<compile_context>
chip_gen: v6e
topology: v6e:2x2x1
jax: 0.10.0
libtpu: 0.0.40
codegen_flags: <defaults>
</compile_context>

<pallas_src>
import jax
import jax.numpy as jnp
from jax.experimental import pallas as pl
from jax.experimental.pallas import tpu as pltpu

_NEG = -3.0e38  # "-inf" stand-in for max-pool margins / masking


def mcm2_forward(x_nchw, p, eps=1e-3):
    """Forward pass of MCM2 (inference-mode BatchNorm + ReLU)."""
    N, Cin, H, W = x_nchw.shape
    HW = H * W
    COUT = 256                                   # 4 branches x 64 channels
    # Flat-index shift margin (>= 2*W+2 for the 5x5 taps), rounded up to a
    # 128-lane multiple so the interior scratch store stays lane-aligned.
    margin = ((2 * W + 2 + 127) // 128) * 128

    # ---------- wrapper-side weight plumbing (tiny, one-off) ----------
    x = x_nchw.reshape(N, Cin, HW)                               # free reshape

    inv = p["gamma"] / jnp.sqrt(p["var"] + eps)                  # BN scale
    shf = p["beta"] - p["mean"] * inv                            # BN shift
    s1, s2, s3, s4 = inv[0:64], inv[64:128], inv[128:192], inv[192:256]
    t1, t2, t3, t4 = shf[0:64], shf[64:128], shf[128:192], shf[192:256]

    # Stacked stem of the three x-fed 1x1 convs.  Branch 1 (rows 0:64) has its
    # BN scale/shift fully folded in; rows 64:192 are the raw 3x3/5x5 stems.
    ws = jnp.concatenate([p["w1"].reshape(64, Cin) * s1[:, None],
                          p["w2a"].reshape(64, Cin),
                          p["w3a"].reshape(64, Cin)], axis=0)    # (192, Cin)
    bs = jnp.concatenate([p["b1"] * s1 + t1,
                          p["b2a"], p["b3a"]]).reshape(192, 1)   # (192, 1)

    # K-stacked (im2col) KxK weights, BN scale folded in.  Column index is
    # (tap = dy*K+dx, in_channel), matching the kernel's col_ref layout.
    w3s = (jnp.transpose(p["w2b"], (0, 2, 3, 1)).reshape(64, 9 * 64)
           * s2[:, None])                                        # (64, 576)
    sh3 = (p["b2b"] * s2 + t2).reshape(64, 1)
    w5s = (jnp.transpose(p["w3b"], (0, 2, 3, 1)).reshape(64, 25 * 64)
           * s3[:, None])                                        # (64, 1600)
    sh5 = (p["b3b"] * s3 + t3).reshape(64, 1)

    # Pool-branch 1x1, BN folded.
    wp = p["w4"].reshape(64, Cin) * s4[:, None]                  # (64, Cin)
    bp = (p["b4"] * s4 + t4).reshape(64, 1)                      # (64, 1)

    def kernel(x_ref, ws_ref, bs_ref, w3_ref, sh3_ref, w5_ref, sh5_ref,
               wp_ref, bp_ref, o_ref, pad_ref, ppad_ref, col_ref):
        # Margin (re)init only -- interiors are fully overwritten every step.
        pad_ref[:, 0:margin] = jnp.zeros((64, margin), jnp.float32)
        pad_ref[:, margin + HW:HW + 2 * margin] = jnp.zeros((64, margin),
                                                            jnp.float32)
        ppad_ref[:, 0:margin] = jnp.full((Cin, margin), _NEG, jnp.float32)
        ppad_ref[:, margin + HW:HW + 2 * margin] = jnp.full((Cin, margin),
                                                            _NEG, jnp.float32)

        # Row-wrap lane masks; they depend only on the horizontal shift sx.
        # Vertical out-of-image shifts read the zero / -inf margins directly.
        w_idx = jax.lax.broadcasted_iota(jnp.int32, (1, HW), 1) % W
        wmask = {sx: (w_idx + sx >= 0) & (w_idx + sx < W)
                 for sx in (-2, -1, 1, 2)}

        x_v = x_ref[...]                                         # (Cin, HW)

        def conv1x1(w, b, v):
            # w: (Cout, Cin)  b: (Cout, 1)  v: (Cin, HW)
            cout, cin = w.shape
            if cin <= 32:     # tiny contraction: VPU broadcast-FMA, skip MXU
                acc = w[:, 0:1] * v[0:1, :] + b
                for c in range(1, cin):
                    acc = acc + w[:, c:c + 1] * v[c:c + 1, :]
                return acc
            return jnp.dot(w, v, preferred_element_type=jnp.float32) + b

        def shifted(ref, s):
            # ref[:, margin+i] holds flat pixel i; static (unaligned) window.
            return ref[:, margin + s: margin + s + HW]

        def im2col(t_val, ksize):
            # Write the ksize*ksize masked shifted taps of t_val (64, HW) into
            # col_ref rows [k*64, (k+1)*64).  Returns the stacked K extent.
            half = ksize // 2
            pad_ref[:, margin:margin + HW] = t_val   # aligned interior store
            for dy in range(ksize):
                sy = dy - half
                for dx in range(ksize):
                    sx = dx - half
                    k = dy * ksize + dx
                    tap = shifted(pad_ref, sy * W + sx)
                    if sx != 0:                      # row-wrap mask only
                        tap = jnp.where(wmask[sx], tap, 0.0)
                    col_ref[k * 64:(k + 1) * 64, :] = tap
            return ksize * ksize * 64

        def maxpool3(v):
            ppad_ref[:, margin:margin + HW] = v
            pooled = v                               # center tap always valid
            for dy in range(3):
                sy = dy - 1
                for dx in range(3):
                    sx = dx - 1
                    if sy == 0 and sx == 0:
                        continue
                    tap = shifted(ppad_ref, sy * W + sx)
                    if sx != 0:
                        tap = jnp.where(wmask[sx], tap, _NEG)
                    pooled = jnp.maximum(pooled, tap)
            return pooled

        def relu(v):
            return jnp.maximum(v, 0.0).astype(o_ref.dtype)

        # Stem: the three x-fed 1x1 convs fused into one (192, Cin) contraction.
        stem = conv1x1(ws_ref[...], bs_ref[...], x_v)            # (192, HW)

        # Branch 1: 1x1 (BN already folded into stem rows 0:64).
        o_ref[0:64, :] = relu(stem[0:64, :])

        # Branch 2: 1x1 -> 3x3 (pad 1): one K=576 MXU contraction.
        kk = im2col(stem[64:128, :], 3)
        y2 = jnp.dot(w3_ref[...], col_ref[0:kk, :],
                     preferred_element_type=jnp.float32) + sh3_ref[...]
        o_ref[64:128, :] = relu(y2)

        # Branch 3: 1x1 -> 5x5 (pad 2): one K=1600 MXU contraction.
        kk = im2col(stem[128:192, :], 5)
        y3 = jnp.dot(w5_ref[...], col_ref[0:kk, :],
                     preferred_element_type=jnp.float32) + sh5_ref[...]
        o_ref[128:192, :] = relu(y3)

        # Branch 4: maxpool(3x3, s1, p1) -> 1x1 (BN folded into wp/bp).
        o_ref[192:256, :] = relu(conv1x1(wp_ref[...], bp_ref[...],
                                         maxpool3(x_v)))

    flops = 2 * N * HW * (192 * Cin + 64 * 576 + 64 * 1600 + 64 * Cin)
    bytes_accessed = 4 * (N * Cin * HW + N * COUT * HW + 192 * Cin + 192
                          + 64 * 576 + 64 + 64 * 1600 + 64 + 64 * Cin + 64)

    out = pl.pallas_call(
        kernel,
        out_shape=jax.ShapeDtypeStruct((N, COUT, HW), jnp.float32),
        grid=(N,),
        in_specs=[
            pl.BlockSpec((None, Cin, HW), lambda n: (n, 0, 0)),  # x (per batch)
            pl.BlockSpec((192, Cin), lambda n: (0, 0)),          # stacked stem W
            pl.BlockSpec((192, 1), lambda n: (0, 0)),            # stacked stem b
            pl.BlockSpec((64, 9 * 64), lambda n: (0, 0)),        # 3x3 K-stacked W
            pl.BlockSpec((64, 1), lambda n: (0, 0)),             # 3x3 shift
            pl.BlockSpec((64, 25 * 64), lambda n: (0, 0)),       # 5x5 K-stacked W
            pl.BlockSpec((64, 1), lambda n: (0, 0)),             # 5x5 shift
            pl.BlockSpec((64, Cin), lambda n: (0, 0)),           # pool 1x1 W
            pl.BlockSpec((64, 1), lambda n: (0, 0)),             # pool 1x1 shift
        ],
        out_specs=pl.BlockSpec((None, COUT, HW), lambda n: (n, 0, 0)),
        scratch_shapes=[
            pltpu.VMEM((64, HW + 2 * margin), jnp.float32),   # shared conv pad
            pltpu.VMEM((Cin, HW + 2 * margin), jnp.float32),  # pool pad (-inf)
            pltpu.VMEM((25 * 64, HW), jnp.float32),           # shared im2col buf
        ],
        compiler_params=pltpu.CompilerParams(
            dimension_semantics=("parallel",)),
        cost_estimate=pl.CostEstimate(flops=flops, transcendentals=0,
                                      bytes_accessed=bytes_accessed),
    )(x, ws, bs, w3s, sh3, w5s, sh5, wp, bp)

    return out.reshape(N, COUT, H, W)


def _mcm2_reference(x, p, eps=1e-3):
    """Pure-JAX reference (eval-mode BN), full f32 precision."""
    prec = jax.lax.Precision.HIGHEST

    def conv1x1(v, w, b):
        return (jnp.einsum("nchw,oc->nohw", v, w[:, :, 0, 0], precision=prec)
                + b.reshape(1, -1, 1, 1))

    def convkxk(v, w, b, pad):
        y = jax.lax.conv_general_dilated(
            v, w, window_strides=(1, 1), padding=[(pad, pad), (pad, pad)],
            dimension_numbers=("NCHW", "OIHW", "NCHW"), precision=prec)
        return y + b.reshape(1, -1, 1, 1)

    br1 = conv1x1(x, p["w1"], p["b1"])
    br2 = convkxk(conv1x1(x, p["w2a"], p["b2a"]), p["w2b"], p["b2b"], 1)
    br3 = convkxk(conv1x1(x, p["w3a"], p["b3a"]), p["w3b"], p["b3b"], 2)
    xp = jax.lax.reduce_window(x, -jnp.inf, jax.lax.max,
                               window_dimensions=(1, 1, 3, 3),
                               window_strides=(1, 1, 1, 1),
                               padding=((0, 0), (0, 0), (1, 1), (1, 1)))
    br4 = conv1x1(xp, p["w4"], p["b4"])
    y = jnp.concatenate([br1, br2, br3, br4], axis=1)
    inv = (p["gamma"] / jnp.sqrt(p["var"] + eps)).reshape(1, -1, 1, 1)
    y = (y - p["mean"].reshape(1, -1, 1, 1)) * inv + p["beta"].reshape(1, -1, 1, 1)
    return jnp.maximum(y, 0.0)


if __name__ == "__main__":
    N, Cin, H, W = 2, 4, 16, 16
    COUT = 256

    key = jax.random.PRNGKey(0)
    keys = jax.random.split(key, 12)

    def conv_init(k, cout, cin, ks):
        bound = 1.0 / float(cin * ks * ks) ** 0.5
        kw, kb = jax.random.split(k)
        w = jax.random.uniform(kw, (cout, cin, ks, ks),
                               minval=-bound, maxval=bound, dtype=jnp.float32)
        b = jax.random.uniform(kb, (cout,),
                               minval=-bound, maxval=bound, dtype=jnp.float32)
        return w, b

    x = jax.random.normal(keys[0], (N, Cin, H, W), dtype=jnp.float32)
    w1, b1 = conv_init(keys[1], 64, Cin, 1)       # Branch1x1
    w2a, b2a = conv_init(keys[2], 64, Cin, 1)     # Branch3x3_1
    w2b, b2b = conv_init(keys[3], 64, 64, 3)      # Branch3x3
    w3a, b3a = conv_init(keys[4], 64, Cin, 1)     # Branch5x5_1
    w3b, b3b = conv_init(keys[5], 64, 64, 5)      # Branch5x5
    w4, b4 = conv_init(keys[6], 64, Cin, 1)       # Branchmax1x1
    gamma = jax.random.uniform(keys[7], (COUT,), minval=0.5, maxval=1.5,
                               dtype=jnp.float32)
    beta = 0.1 * jax.random.normal(keys[8], (COUT,), dtype=jnp.float32)
    rmean = 0.1 * jax.random.normal(keys[9], (COUT,), dtype=jnp.float32)
    rvar = jax.random.uniform(keys[10], (COUT,), minval=0.5, maxval=1.5,
                              dtype=jnp.float32)

    params = dict(w1=w1, b1=b1, w2a=w2a, b2a=b2a, w2b=w2b, b2b=b2b,
                  w3a=w3a, b3a=b3a, w3b=w3b, b3b=b3b, w4=w4, b4=b4,
                  gamma=gamma, beta=beta, mean=rmean, var=rvar)

    y = mcm2_forward(x, params)
    jax.block_until_ready(y)

    ref = _mcm2_reference(x, params)
    assert y.shape == (N, COUT, H, W)
    max_err = jnp.max(jnp.abs(y - ref))
    assert jnp.allclose(y, ref, atol=1e-3, rtol=1e-3), f"max abs err {max_err}"

    print("KERNEL_OK")
</pallas_src>

<mosaic_0001>
module attributes {stable_mosaic.version = 11 : i64} {
  func.func @kernel(%arg0: i32, %arg1: memref<1x4x256xf32, #tpu.memory_space<vmem>>, %arg2: memref<192x4xf32, #tpu.memory_space<vmem>>, %arg3: memref<192x1xf32, #tpu.memory_space<vmem>>, %arg4: memref<64x576xf32, #tpu.memory_space<vmem>>, %arg5: memref<64x1xf32, #tpu.memory_space<vmem>>, %arg6: memref<64x1600xf32, #tpu.memory_space<vmem>>, %arg7: memref<64x1xf32, #tpu.memory_space<vmem>>, %arg8: memref<64x4xf32, #tpu.memory_space<vmem>>, %arg9: memref<64x1xf32, #tpu.memory_space<vmem>>, %arg10: memref<1x256x256xf32, #tpu.memory_space<vmem>>, %arg11: memref<64x512xf32, #tpu.memory_space<vmem>>, %arg12: memref<4x512xf32, #tpu.memory_space<vmem>>, %arg13: memref<1600x256xf32, #tpu.memory_space<vmem>>) attributes {dimension_semantics = [#tpu.dimension_semantics<parallel>], iteration_bounds = array<i64: 2>, scalar_prefetch = 0 : i64, scratch_operands = 3 : i64, tpu.core_type = #tpu.core_type<tc>, window_params = [{transform_indices = @transform_0, window_bounds = array<i64: 1, 4, 256>}, {pipeline_mode = #tpu.pipeline_mode<synchronous>, transform_indices = @transform_1, window_bounds = array<i64: 192, 4>}, {pipeline_mode = #tpu.pipeline_mode<synchronous>, transform_indices = @transform_2, window_bounds = array<i64: 192, 1>}, {pipeline_mode = #tpu.pipeline_mode<synchronous>, transform_indices = @transform_3, window_bounds = array<i64: 64, 576>}, {pipeline_mode = #tpu.pipeline_mode<synchronous>, transform_indices = @transform_4, window_bounds = array<i64: 64, 1>}, {pipeline_mode = #tpu.pipeline_mode<synchronous>, transform_indices = @transform_5, window_bounds = array<i64: 64, 1600>}, {pipeline_mode = #tpu.pipeline_mode<synchronous>, transform_indices = @transform_6, window_bounds = array<i64: 64, 1>}, {pipeline_mode = #tpu.pipeline_mode<synchronous>, transform_indices = @transform_7, window_bounds = array<i64: 64, 4>}, {pipeline_mode = #tpu.pipeline_mode<synchronous>, transform_indices = @transform_8, window_bounds = array<i64: 64, 1>}, {transform_indices = @transform_9, window_bounds = array<i64: 1, 256, 256>}]} {
    %cst = arith.constant 0.000000e+00 : f32
    %0 = vector.broadcast %cst : f32 to vector<64x128xf32>
    %c0 = arith.constant 0 : index
    %c0_0 = arith.constant 0 : index
    %1 = vector.load %arg11[%c0, %c0_0] : memref<64x512xf32, #tpu.memory_space<vmem>>, vector<64x128xf32>
    tpu.vector_store %arg11[%c0, %c0_0], %0 {strides = array<i32>} : memref<64x512xf32, #tpu.memory_space<vmem>>, vector<64x128xf32>,
    %cst_1 = arith.constant 0.000000e+00 : f32
    %2 = vector.broadcast %cst_1 : f32 to vector<64x128xf32>
    %c0_2 = arith.constant 0 : index
    %c384 = arith.constant 384 : index
    %3 = vector.load %arg11[%c0_2, %c384] : memref<64x512xf32, #tpu.memory_space<vmem>>, vector<64x128xf32>
    tpu.vector_store %arg11[%c0_2, %c384], %2 {strides = array<i32>} : memref<64x512xf32, #tpu.memory_space<vmem>>, vector<64x128xf32>,
    %cst_3 = arith.constant -3.000000e+38 : f32
    %4 = vector.broadcast %cst_3 : f32 to vector<4x128xf32>
    %c0_4 = arith.constant 0 : index
    %c0_5 = arith.constant 0 : index
    %5 = vector.load %arg12[%c0_4, %c0_5] : memref<4x512xf32, #tpu.memory_space<vmem>>, vector<4x128xf32>
    tpu.vector_store %arg12[%c0_4, %c0_5], %4 {strides = array<i32>} : memref<4x512xf32, #tpu.memory_space<vmem>>, vector<4x128xf32>,
    %cst_6 = arith.constant -3.000000e+38 : f32
    %6 = vector.broadcast %cst_6 : f32 to vector<4x128xf32>
    %c0_7 = arith.constant 0 : index
    %c384_8 = arith.constant 384 : index
    %7 = vector.load %arg12[%c0_7, %c384_8] : memref<4x512xf32, #tpu.memory_space<vmem>>, vector<4x128xf32>
    tpu.vector_store %arg12[%c0_7, %c384_8], %6 {strides = array<i32>} : memref<4x512xf32, #tpu.memory_space<vmem>>, vector<4x128xf32>,
    %8 = tpu.iota {dimensions = array<i32: 1>} : vector<1x256xi32>
    %c16_i32 = arith.constant 16 : i32
    %c0_i32 = arith.constant 0 : i32
    %9 = arith.cmpi eq, %c16_i32, %c0_i32 : i32
    %c1_i32 = arith.constant 1 : i32
    %10 = arith.select %9, %c1_i32, %c16_i32 : i32
    %11 = vector.broadcast %10 : i32 to vector<1x256xi32>
    %12 = arith.remsi %8, %11 : vector<1x256xi32>
    %c0_i32_9 = arith.constant 0 : i32
    %13 = vector.broadcast %c0_i32_9 : i32 to vector<1x256xi32>
    %14 = arith.cmpi ne, %12, %13 : vector<1x256xi32>
    %c0_i32_10 = arith.constant 0 : i32
    %15 = vector.broadcast %c0_i32_10 : i32 to vector<1x256xi32>
    %16 = arith.cmpi slt, %12, %15 : vector<1x256xi32>
    %c0_i32_11 = arith.constant 0 : i32
    %17 = arith.cmpi slt, %10, %c0_i32_11 : i32
    %18 = vector.broadcast %17 : i1 to vector<1x256xi1>
    %19 = vector.broadcast %18 : vector<1x256xi1> to vector<1x256xi1>
    %20 = arith.xori %16, %19 : vector<1x256xi1>
    %21 = arith.andi %20, %14 : vector<1x256xi1>
    %22 = vector.broadcast %10 : i32 to vector<1x256xi32>
    %23 = arith.addi %12, %22 : vector<1x256xi32>
    %24 = arith.select %21, %23, %12 : vector<1x256xi1>, vector<1x256xi32>
    %c-2_i32 = arith.constant -2 : i32
    %25 = vector.broadcast %c-2_i32 : i32 to vector<1x256xi32>
    %26 = arith.addi %24, %25 : vector<1x256xi32>
    %c0_i32_12 = arith.constant 0 : i32
    %27 = vector.broadcast %c0_i32_12 : i32 to vector<1x256xi32>
    %28 = arith.cmpi sge, %26, %27 : vector<1x256xi32>
    %c-2_i32_13 = arith.constant -2 : i32
    %29 = vector.broadcast %c-2_i32_13 : i32 to vector<1x256xi32>
    %30 = arith.addi %24, %29 : vector<1x256xi32>
    %c16_i32_14 = arith.constant 16 : i32
    %31 = vector.broadcast %c16_i32_14 : i32 to vector<1x256xi32>
    %32 = arith.cmpi slt, %30, %31 : vector<1x256xi32>
    %33 = arith.andi %28, %32 : vector<1x256xi1>
    %c-1_i32 = arith.constant -1 : i32
    %34 = vector.broadcast %c-1_i32 : i32 to vector<1x256xi32>
    %35 = arith.addi %24, %34 : vector<1x256xi32>
    %c0_i32_15 = arith.constant 0 : i32
    %36 = vector.broadcast %c0_i32_15 : i32 to vector<1x256xi32>
    %37 = arith.cmpi sge, %35, %36 : vector<1x256xi32>
    %c-1_i32_16 = arith.constant -1 : i32
    %38 = vector.broadcast %c-1_i32_16 : i32 to vector<1x256xi32>
    %39 = arith.addi %24, %38 : vector<1x256xi32>
    %c16_i32_17 = arith.constant 16 : i32
    %40 = vector.broadcast %c16_i32_17 : i32 to vector<1x256xi32>
    %41 = arith.cmpi slt, %39, %40 : vector<1x256xi32>
    %42 = arith.andi %37, %41 : vector<1x256xi1>
    %c1_i32_18 = arith.constant 1 : i32
    %43 = vector.broadcast %c1_i32_18 : i32 to vector<1x256xi32>
    %44 = arith.addi %24, %43 : vector<1x256xi32>
    %c0_i32_19 = arith.constant 0 : i32
    %45 = vector.broadcast %c0_i32_19 : i32 to vector<1x256xi32>
    %46 = arith.cmpi sge, %44, %45 : vector<1x256xi32>
    %c1_i32_20 = arith.constant 1 : i32
    %47 = vector.broadcast %c1_i32_20 : i32 to vector<1x256xi32>
    %48 = arith.addi %24, %47 : vector<1x256xi32>
    %c16_i32_21 = arith.constant 16 : i32
    %49 = vector.broadcast %c16_i32_21 : i32 to vector<1x256xi32>
    %50 = arith.cmpi slt, %48, %49 : vector<1x256xi32>
    %51 = arith.andi %46, %50 : vector<1x256xi1>
    %c2_i32 = arith.constant 2 : i32
    %52 = vector.broadcast %c2_i32 : i32 to vector<1x256xi32>
    %53 = arith.addi %24, %52 : vector<1x256xi32>
    %c0_i32_22 = arith.constant 0 : i32
    %54 = vector.broadcast %c0_i32_22 : i32 to vector<1x256xi32>
    %55 = arith.cmpi sge, %53, %54 : vector<1x256xi32>
    %c2_i32_23 = arith.constant 2 : i32
    %56 = vector.broadcast %c2_i32_23 : i32 to vector<1x256xi32>
    %57 = arith.addi %24, %56 : vector<1x256xi32>
    %c16_i32_24 = arith.constant 16 : i32
    %58 = vector.broadcast %c16_i32_24 : i32 to vector<1x256xi32>
    %59 = arith.cmpi slt, %57, %58 : vector<1x256xi32>
    %60 = arith.andi %55, %59 : vector<1x256xi1>
    %c0_25 = arith.constant 0 : index
    %c0_26 = arith.constant 0 : index
    %c0_27 = arith.constant 0 : index
    %61 = vector.load %arg1[%c0_25, %c0_26, %c0_27] : memref<1x4x256xf32, #tpu.memory_space<vmem>>, vector<1x4x256xf32>
    %62 = vector.shape_cast %61 : vector<1x4x256xf32> to vector<4x256xf32>
    %c0_28 = arith.constant 0 : index
    %c0_29 = arith.constant 0 : index
    %63 = vector.load %arg2[%c0_28, %c0_29] : memref<192x4xf32, #tpu.memory_space<vmem>>, vector<192x4xf32>
    %c0_30 = arith.constant 0 : index
    %c0_31 = arith.constant 0 : index
    %64 = vector.load %arg3[%c0_30, %c0_31] : memref<192x1xf32, #tpu.memory_space<vmem>>, vector<192x1xf32>
    %65 = vector.extract_strided_slice %63 {offsets = [0, 0], sizes = [192, 1], strides = [1, 1]} : vector<192x4xf32> to vector<192x1xf32>
    %66 = vector.extract_strided_slice %62 {offsets = [0, 0], sizes = [1, 256], strides = [1, 1]} : vector<4x256xf32> to vector<1x256xf32>
    %67 = vector.broadcast %65 : vector<192x1xf32> to vector<192x256xf32>
    %68 = vector.broadcast %66 : vector<1x256xf32> to vector<192x256xf32>
    %69 = arith.mulf %67, %68 : vector<192x256xf32>
    %70 = vector.broadcast %64 : vector<192x1xf32> to vector<192x256xf32>
    %71 = arith.addf %69, %70 : vector<192x256xf32>
    %72 = vector.extract_strided_slice %63 {offsets = [0, 1], sizes = [192, 1], strides = [1, 1]} : vector<192x4xf32> to vector<192x1xf32>
    %73 = vector.extract_strided_slice %62 {offsets = [1, 0], sizes = [1, 256], strides = [1, 1]} : vector<4x256xf32> to vector<1x256xf32>
    %74 = vector.broadcast %72 : vector<192x1xf32> to vector<192x256xf32>
    %75 = vector.broadcast %73 : vector<1x256xf32> to vector<192x256xf32>
    %76 = arith.mulf %74, %75 : vector<192x256xf32>
    %77 = arith.addf %71, %76 : vector<192x256xf32>
    %78 = vector.extract_strided_slice %63 {offsets = [0, 2], sizes = [192, 1], strides = [1, 1]} : vector<192x4xf32> to vector<192x1xf32>
    %79 = vector.extract_strided_slice %62 {offsets = [2, 0], sizes = [1, 256], strides = [1, 1]} : vector<4x256xf32> to vector<1x256xf32>
    %80 = vector.broadcast %78 : vector<192x1xf32> to vector<192x256xf32>
    %81 = vector.broadcast %79 : vector<1x256xf32> to vector<192x256xf32>
    %82 = arith.mulf %80, %81 : vector<192x256xf32>
    %83 = arith.addf %77, %82 : vector<192x256xf32>
    %84 = vector.extract_strided_slice %63 {offsets = [0, 3], sizes = [192, 1], strides = [1, 1]} : vector<192x4xf32> to vector<192x1xf32>
    %85 = vector.extract_strided_slice %62 {offsets = [3, 0], sizes = [1, 256], strides = [1, 1]} : vector<4x256xf32> to vector<1x256xf32>
    %86 = vector.broadcast %84 : vector<192x1xf32> to vector<192x256xf32>
    %87 = vector.broadcast %85 : vector<1x256xf32> to vector<192x256xf32>
    %88 = arith.mulf %86, %87 : vector<192x256xf32>
    %89 = arith.addf %83, %88 : vector<192x256xf32>
    %90 = vector.extract_strided_slice %89 {offsets = [0, 0], sizes = [64, 256], strides = [1, 1]} : vector<192x256xf32> to vector<64x256xf32>
    %cst_32 = arith.constant 0.000000e+00 : f32
    %91 = vector.broadcast %cst_32 : f32 to vector<64x256xf32>
    %92 = arith.maximumf %90, %91 : vector<64x256xf32>
    %c0_33 = arith.constant 0 : index
    %c0_34 = arith.constant 0 : index
    %c0_35 = arith.constant 0 : index
    %93 = vector.load %arg10[%c0_33, %c0_34, %c0_35] : memref<1x256x256xf32, #tpu.memory_space<vmem>>, vector<1x64x256xf32>
    %94 = vector.shape_cast %93 : vector<1x64x256xf32> to vector<64x256xf32>
    %95 = vector.shape_cast %92 : vector<64x256xf32> to vector<1x64x256xf32>
    tpu.vector_store %arg10[%c0_33, %c0_34, %c0_35], %95 {strides = array<i32>} : memref<1x256x256xf32, #tpu.memory_space<vmem>>, vector<1x64x256xf32>,
    %96 = vector.extract_strided_slice %89 {offsets = [64, 0], sizes = [64, 256], strides = [1, 1]} : vector<192x256xf32> to vector<64x256xf32>
    %c0_36 = arith.constant 0 : index
    %c128 = arith.constant 128 : index
    %97 = vector.load %arg11[%c0_36, %c128] : memref<64x512xf32, #tpu.memory_space<vmem>>, vector<64x256xf32>
    tpu.vector_store %arg11[%c0_36, %c128], %96 {strides = array<i32>} : memref<64x512xf32, #tpu.memory_space<vmem>>, vector<64x256xf32>,
    %c0_37 = arith.constant 0 : index
    %c111 = arith.constant 111 : index
    %98 = vector.load %arg11[%c0_37, %c111] : memref<64x512xf32, #tpu.memory_space<vmem>>, vector<64x256xf32>
    %cst_38 = arith.constant 0.000000e+00 : f32
    %99 = vector.shape_cast %42 : vector<1x256xi1> to vector<1x256xi1>
    %100 = vector.broadcast %99 : vector<1x256xi1> to vector<64x256xi1>
    %101 = vector.broadcast %cst_38 : f32 to vector<64x256xf32>
    %102 = arith.select %100, %98, %101 : vector<64x256xi1>, vector<64x256xf32>
    %c0_39 = arith.constant 0 : index
    %c0_40 = arith.constant 0 : index
    %103 = vector.load %arg13[%c0_39, %c0_40] : memref<1600x256xf32, #tpu.memory_space<vmem>>, vector<64x256xf32>
    tpu.vector_store %arg13[%c0_39, %c0_40], %102 {strides = array<i32>} : memref<1600x256xf32, #tpu.memory_space<vmem>>, vector<64x256xf32>,
    %c0_41 = arith.constant 0 : index
    %c112 = arith.constant 112 : index
    %104 = vector.load %arg11[%c0_41, %c112] : memref<64x512xf32, #tpu.memory_space<vmem>>, vector<64x256xf32>
    %c64 = arith.constant 64 : index
    %c0_42 = arith.constant 0 : index
    %105 = vector.load %arg13[%c64, %c0_42] : memref<1600x256xf32, #tpu.memory_space<vmem>>, vector<64x256xf32>
    tpu.vector_store %arg13[%c64, %c0_42], %104 {strides = array<i32>} : memref<1600x256xf32, #tpu.memory_space<vmem>>, vector<64x256xf32>,
    %c0_43 = arith.constant 0 : index
    %c113 = arith.constant 113 : index
    %106 = vector.load %arg11[%c0_43, %c113] : memref<64x512xf32, #tpu.memory_space<vmem>>, vector<64x256xf32>
    %cst_44 = arith.constant 0.000000e+00 : f32
    %107 = vector.shape_cast %51 : vector<1x256xi1> to vector<1x256xi1>
    %108 = vector.broadcast %107 : vector<1x256xi1> to vector<64x256xi1>
    %109 = vector.broadcast %cst_44 : f32 to vector<64x256xf32>
    %110 = arith.select %108, %106, %109 : vector<64x256xi1>, vector<64x256xf32>
    %c128_45 = arith.constant 128 : index
    %c0_46 = arith.constant 0 : index
    %111 = vector.load %arg13[%c128_45, %c0_46] : memref<1600x256xf32, #tpu.memory_space<vmem>>, vector<64x256xf32>
    tpu.vector_store %arg13[%c128_45, %c0_46], %110 {strides = array<i32>} : memref<1600x256xf32, #tpu.memory_space<vmem>>, vector<64x256xf32>,
    %c0_47 = arith.constant 0 : index
    %c127 = arith.constant 127 : index
    %112 = vector.load %arg11[%c0_47, %c127] : memref<64x512xf32, #tpu.memory_space<vmem>>, vector<64x256xf32>
    %cst_48 = arith.constant 0.000000e+00 : f32
    %113 = vector.shape_cast %42 : vector<1x256xi1> to vector<1x256xi1>
    %114 = vector.broadcast %113 : vector<1x256xi1> to vector<64x256xi1>
    %115 = vector.broadcast %cst_48 : f32 to vector<64x256xf32>
    %116 = arith.select %114, %112, %115 : vector<64x256xi1>, vector<64x256xf32>
    %c192 = arith.constant 192 : index
    %c0_49 = arith.constant 0 : index
    %117 = vector.load %arg13[%c192, %c0_49] : memref<1600x256xf32, #tpu.memory_space<vmem>>, vector<64x256xf32>
    tpu.vector_store %arg13[%c192, %c0_49], %116 {strides = array<i32>} : memref<1600x256xf32, #tpu.memory_space<vmem>>, vector<64x256xf32>,
    %c0_50 = arith.constant 0 : index
    %c128_51 = arith.constant 128 : index
    %118 = vector.load %arg11[%c0_50, %c128_51] : memref<64x512xf32, #tpu.memory_space<vmem>>, vector<64x256xf32>
    %c256 = arith.constant 256 : index
    %c0_52 = arith.constant 0 : index
    %119 = vector.load %arg13[%c256, %c0_52] : memref<1600x256xf32, #tpu.memory_space<vmem>>, vector<64x256xf32>
    tpu.vector_store %arg13[%c256, %c0_52], %118 {strides = array<i32>} : memref<1600x256xf32, #tpu.memory_space<vmem>>, vector<64x256xf32>,
    %c0_53 = arith.constant 0 : index
    %c129 = arith.constant 129 : index
    %120 = vector.load %arg11[%c0_53, %c129] : memref<64x512xf32, #tpu.memory_space<vmem>>, vector<64x256xf32>
    %cst_54 = arith.constant 0.000000e+00 : f32
    %121 = vector.shape_cast %51 : vector<1x256xi1> to vector<1x256xi1>
    %122 = vector.broadcast %121 : vector<1x256xi1> to vector<64x256xi1>
    %123 = vector.broadcast %cst_54 : f32 to vector<64x256xf32>
    %124 = arith.select %122, %120, %123 : vector<64x256xi1>, vector<64x256xf32>
    %c320 = arith.constant 320 : index
    %c0_55 = arith.constant 0 : index
    %125 = vector.load %arg13[%c320, %c0_55] : memref<1600x256xf32, #tpu.memory_space<vmem>>, vector<64x256xf32>
    tpu.vector_store %arg13[%c320, %c0_55], %124 {strides = array<i32>} : memref<1600x256xf32, #tpu.memory_space<vmem>>, vector<64x256xf32>,
    %c0_56 = arith.constant 0 : index
    %c143 = arith.constant 143 : index
    %126 = vector.load %arg11[%c0_56, %c143] : memref<64x512xf32, #tpu.memory_space<vmem>>, vector<64x256xf32>
    %cst_57 = arith.constant 0.000000e+00 : f32
    %127 = vector.shape_cast %42 : vector<1x256xi1> to vector<1x256xi1>
    %128 = vector.broadcast %127 : vector<1x256xi1> to vector<64x256xi1>
    %129 = vector.broadcast %cst_57 : f32 to vector<64x256xf32>
    %130 = arith.select %128, %126, %129 : vector<64x256xi1>, vector<64x256xf32>
    %c384_58 = arith.constant 384 : index
    %c0_59 = arith.constant 0 : index
    %131 = vector.load %arg13[%c384_58, %c0_59] : memref<1600x256xf32, #tpu.memory_space<vmem>>, vector<64x256xf32>
    tpu.vector_store %arg13[%c384_58, %c0_59], %130 {strides = array<i32>} : memref<1600x256xf32, #tpu.memory_space<vmem>>, vector<64x256xf32>,
    %c0_60 = arith.constant 0 : index
    %c144 = arith.constant 144 : index
    %132 = vector.load %arg11[%c0_60, %c144] : memref<64x512xf32, #tpu.memory_space<vmem>>, vector<64x256xf32>
    %c448 = arith.constant 448 : index
    %c0_61 = arith.constant 0 : index
    %133 = vector.load %arg13[%c448, %c0_61] : memref<1600x256xf32, #tpu.memory_space<vmem>>, vector<64x256xf32>
    tpu.vector_store %arg13[%c448, %c0_61], %132 {strides = array<i32>} : memref<1600x256xf32, #tpu.memory_space<vmem>>, vector<64x256xf32>,
    %c0_62 = arith.constant 0 : index
    %c145 = arith.constant 145 : index
    %134 = vector.load %arg11[%c0_62, %c145] : memref<64x512xf32, #tpu.memory_space<vmem>>, vector<64x256xf32>
    %cst_63 = arith.constant 0.000000e+00 : f32
    %135 = vector.shape_cast %51 : vector<1x256xi1> to vector<1x256xi1>
    %136 = vector.broadcast %135 : vector<1x256xi1> to vector<64x256xi1>
    %137 = vector.broadcast %cst_63 : f32 to vector<64x256xf32>
    %138 = arith.select %136, %134, %137 : vector<64x256xi1>, vector<64x256xf32>
    %c512 = arith.constant 512 : index
    %c0_64 = arith.constant 0 : index
    %139 = vector.load %arg13[%c512, %c0_64] : memref<1600x256xf32, #tpu.memory_space<vmem>>, vector<64x256xf32>
    tpu.vector_store %arg13[%c512, %c0_64], %138 {strides = array<i32>} : memref<1600x256xf32, #tpu.memory_space<vmem>>, vector<64x256xf32>,
    %c0_65 = arith.constant 0 : index
    %c0_66 = arith.constant 0 : index
    %140 = vector.load %arg4[%c0_65, %c0_66] : memref<64x576xf32, #tpu.memory_space<vmem>>, vector<64x576xf32>
    %c0_67 = arith.constant 0 : index
    %c0_68 = arith.constant 0 : index
    %141 = vector.load %arg13[%c0_67, %c0_68] : memref<1600x256xf32, #tpu.memory_space<vmem>>, vector<576x256xf32>
    %cst_69 = arith.constant dense<0.000000e+00> : vector<64x256xf32>
    %142 = tpu.matmul %140, %141, %cst_69 {dimension_numbers = #tpu.dot_dimension_numbers<[1], [0], [0], [1], [0, 0, 1, 1], [], []>} : vector<64x576xf32>, vector<576x256xf32>, vector<64x256xf32> -> vector<64x256xf32>
    %c0_70 = arith.constant 0 : index
    %c0_71 = arith.constant 0 : index
    %143 = vector.load %arg5[%c0_70, %c0_71] : memref<64x1xf32, #tpu.memory_space<vmem>>, vector<64x1xf32>
    %144 = vector.broadcast %143 : vector<64x1xf32> to vector<64x256xf32>
    %145 = arith.addf %142, %144 : vector<64x256xf32>
    %cst_72 = arith.constant 0.000000e+00 : f32
    %146 = vector.broadcast %cst_72 : f32 to vector<64x256xf32>
    %147 = arith.maximumf %145, %146 : vector<64x256xf32>
    %c0_73 = arith.constant 0 : index
    %c64_74 = arith.constant 64 : index
    %c0_75 = arith.constant 0 : index
    %148 = vector.load %arg10[%c0_73, %c64_74, %c0_75] : memref<1x256x256xf32, #tpu.memory_space<vmem>>, vector<1x64x256xf32>
    %149 = vector.shape_cast %148 : vector<1x64x256xf32> to vector<64x256xf32>
    %150 = vector.shape_cast %147 : vector<64x256xf32> to vector<1x64x256xf32>
    tpu.vector_store %arg10[%c0_73, %c64_74, %c0_75], %150 {strides = array<i32>} : memref<1x256x256xf32, #tpu.memory_space<vmem>>, vector<1x64x256xf32>,
    %151 = vector.extract_strided_slice %89 {offsets = [128, 0], sizes = [64, 256], strides = [1, 1]} : vector<192x256xf32> to vector<64x256xf32>
    %c0_76 = arith.constant 0 : index
    %c128_77 = arith.constant 128 : index
    %152 = vector.load %arg11[%c0_76, %c128_77] : memref<64x512xf32, #tpu.memory_space<vmem>>, vector<64x256xf32>
    tpu.vector_store %arg11[%c0_76, %c128_77], %151 {strides = array<i32>} : memref<64x512xf32, #tpu.memory_space<vmem>>, vector<64x256xf32>,
    %c0_78 = arith.constant 0 : index
    %c94 = arith.constant 94 : index
    %153 = vector.load %arg11[%c0_78, %c94] : memref<64x512xf32, #tpu.memory_space<vmem>>, vector<64x256xf32>
    %cst_79 = arith.constant 0.000000e+00 : f32
    %154 = vector.shape_cast %33 : vector<1x256xi1> to vector<1x256xi1>
    %155 = vector.broadcast %154 : vector<1x256xi1> to vector<64x256xi1>
    %156 = vector.broadcast %cst_79 : f32 to vector<64x256xf32>
    %157 = arith.select %155, %153, %156 : vector<64x256xi1>, vector<64x256xf32>
    %c0_80 = arith.constant 0 : index
    %c0_81 = arith.constant 0 : index
    %158 = vector.load %arg13[%c0_80, %c0_81] : memref<1600x256xf32, #tpu.memory_space<vmem>>, vector<64x256xf32>
    tpu.vector_store %arg13[%c0_80, %c0_81], %157 {strides = array<i32>} : memref<1600x256xf32, #tpu.memory_space<vmem>>, vector<64x256xf32>,
    %c0_82 = arith.constant 0 : index
    %c95 = arith.constant 95 : index
    %159 = vector.load %arg11[%c0_82, %c95] : memref<64x512xf32, #tpu.memory_space<vmem>>, vector<64x256xf32>
    %cst_83 = arith.constant 0.000000e+00 : f32
    %160 = vector.shape_cast %42 : vector<1x256xi1> to vector<1x256xi1>
    %161 = vector.broadcast %160 : vector<1x256xi1> to vector<64x256xi1>
    %162 = vector.broadcast %cst_83 : f32 to vector<64x256xf32>
    %163 = arith.select %161, %159, %162 : vector<64x256xi1>, vector<64x256xf32>
    %c64_84 = arith.constant 64 : index
    %c0_85 = arith.constant 0 : index
    %164 = vector.load %arg13[%c64_84, %c0_85] : memref<1600x256xf32, #tpu.memory_space<vmem>>, vector<64x256xf32>
    tpu.vector_store %arg13[%c64_84, %c0_85], %163 {strides = array<i32>} : memref<1600x256xf32, #tpu.memory_space<vmem>>, vector<64x256xf32>,
    %c0_86 = arith.constant 0 : index
    %c96 = arith.constant 96 : index
    %165 = vector.load %arg11[%c0_86, %c96] : memref<64x512xf32, #tpu.memory_space<vmem>>, vector<64x256xf32>
    %c128_87 = arith.constant 128 : index
    %c0_88 = arith.constant 0 : index
    %166 = vector.load %arg13[%c128_87, %c0_88] : memref<1600x256xf32, #tpu.memory_space<vmem>>, vector<64x256xf32>
    tpu.vector_store %arg13[%c128_87, %c0_88], %165 {strides = array<i32>} : memref<1600x256xf32, #tpu.memory_space<vmem>>, vector<64x256xf32>,
    %c0_89 = arith.constant 0 : index
    %c97 = arith.constant 97 : index
    %167 = vector.load %arg11[%c0_89, %c97] : memref<64x512xf32, #tpu.memory_space<vmem>>, vector<64x256xf32>
    %cst_90 = arith.constant 0.000000e+00 : f32
    %168 = vector.shape_cast %51 : vector<1x256xi1> to vector<1x256xi1>
    %169 = vector.broadcast %168 : vector<1x256xi1> to vector<64x256xi1>
    %170 = vector.broadcast %cst_90 : f32 to vector<64x256xf32>
    %171 = arith.select %169, %167, %170 : vector<64x256xi1>, vector<64x256xf32>
    %c192_91 = arith.constant 192 : index
    %c0_92 = arith.constant 0 : index
    %172 = vector.load %arg13[%c192_91, %c0_92] : memref<1600x256xf32, #tpu.memory_space<vmem>>, vector<64x256xf32>
    tpu.vector_store %arg13[%c192_91, %c0_92], %171 {strides = array<i32>} : memref<1600x256xf32, #tpu.memory_space<vmem>>, vector<64x256xf32>,
    %c0_93 = arith.constant 0 : index
    %c98 = arith.constant 98 : index
    %173 = vector.load %arg11[%c0_93, %c98] : memref<64x512xf32, #tpu.memory_space<vmem>>, vector<64x256xf32>
    %cst_94 = arith.constant 0.000000e+00 : f32
    %174 = vector.shape_cast %60 : vector<1x256xi1> to vector<1x256xi1>
    %175 = vector.broadcast %174 : vector<1x256xi1> to vector<64x256xi1>
    %176 = vector.broadcast %cst_94 : f32 to vector<64x256xf32>
    %177 = arith.select %175, %173, %176 : vector<64x256xi1>, vector<64x256xf32>
    %c256_95 = arith.constant 256 : index
    %c0_96 = arith.constant 0 : index
    %178 = vector.load %arg13[%c256_95, %c0_96] : memref<1600x256xf32, #tpu.memory_space<vmem>>, vector<64x256xf32>
    tpu.vector_store %arg13[%c256_95, %c0_96], %177 {strides = array<i32>} : memref<1600x256xf32, #tpu.memory_space<vmem>>, vector<64x256xf32>,
    %c0_97 = arith.constant 0 : index
    %c110 = arith.constant 110 : index
    %179 = vector.load %arg11[%c0_97, %c110] : memref<64x512xf32, #tpu.memory_space<vmem>>, vector<64x256xf32>
    %cst_98 = arith.constant 0.000000e+00 : f32
    %180 = vector.shape_cast %33 : vector<1x256xi1> to vector<1x256xi1>
    %181 = vector.broadcast %180 : vector<1x256xi1> to vector<64x256xi1>
    %182 = vector.broadcast %cst_98 : f32 to vector<64x256xf32>
    %183 = arith.select %181, %179, %182 : vector<64x256xi1>, vector<64x256xf32>
    %c320_99 = arith.constant 320 : index
    %c0_100 = arith.constant 0 : index
    %184 = vector.load %arg13[%c320_99, %c0_100] : memref<1600x256xf32, #tpu.memory_space<vmem>>, vector<64x256xf32>
    tpu.vector_store %arg13[%c320_99, %c0_100], %183 {strides = array<i32>} : memref<1600x256xf32, #tpu.memory_space<vmem>>, vector<64x256xf32>,
    %c0_101 = arith.constant 0 : index
    %c111_102 = arith.constant 111 : index
    %185 = vector.load %arg11[%c0_101, %c111_102] : memref<64x512xf32, #tpu.memory_space<vmem>>, vector<64x256xf32>
    %cst_103 = arith.constant 0.000000e+00 : f32
    %186 = vector.shape_cast %42 : vector<1x256xi1> to vector<1x256xi1>
    %187 = vector.broadcast %186 : vector<1x256xi1> to vector<64x256xi1>
    %188 = vector.broadcast %cst_103 : f32 to vector<64x256xf32>
    %189 = arith.select %187, %185, %188 : vector<64x256xi1>, vector<64x256xf32>
    %c384_104 = arith.constant 384 : index
    %c0_105 = arith.constant 0 : index
    %190 = vector.load %arg13[%c384_104, %c0_105] : memref<1600x256xf32, #tpu.memory_space<vmem>>, vector<64x256xf32>
    tpu.vector_store %arg13[%c384_104, %c0_105], %189 {strides = array<i32>} : memref<1600x256xf32, #tpu.memory_space<vmem>>, vector<64x256xf32>,
    %c0_106 = arith.constant 0 : index
    %c112_107 = arith.constant 112 : index
    %191 = vector.load %arg11[%c0_106, %c112_107] : memref<64x512xf32, #tpu.memory_space<vmem>>, vector<64x256xf32>
    %c448_108 = arith.constant 448 : index
    %c0_109 = arith.constant 0 : index
    %192 = vector.load %arg13[%c448_108, %c0_109] : memref<1600x256xf32, #tpu.memory_space<vmem>>, vector<64x256xf32>
    tpu.vector_store %arg13[%c448_108, %c0_109], %191 {strides = array<i32>} : memref<1600x256xf32, #tpu.memory_space<vmem>>, vector<64x256xf32>,
    %c0_110 = arith.constant 0 : index
    %c113_111 = arith.constant 113 : index
    %193 = vector.load %arg11[%c0_110, %c113_111] : memref<64x512xf32, #tpu.memory_space<vmem>>, vector<64x256xf32>
    %cst_112 = arith.constant 0.000000e+00 : f32
    %194 = vector.shape_cast %51 : vector<1x256xi1> to vector<1x256xi1>
    %195 = vector.broadcast %194 : vector<1x256xi1> to vector<64x256xi1>
    %196 = vector.broadcast %cst_112 : f32 to vector<64x256xf32>
    %197 = arith.select %195, %193, %196 : vector<64x256xi1>, vector<64x256xf32>
    %c512_113 = arith.constant 512 : index
    %c0_114 = arith.constant 0 : index
    %198 = vector.load %arg13[%c512_113, %c0_114] : memref<1600x256xf32, #tpu.memory_space<vmem>>, vector<64x256xf32>
    tpu.vector_store %arg13[%c512_113, %c0_114], %197 {strides = array<i32>} : memref<1600x256xf32, #tpu.memory_space<vmem>>, vector<64x256xf32>,
    %c0_115 = arith.constant 0 : index
    %c114 = arith.constant 114 : index
    %199 = vector.load %arg11[%c0_115, %c114] : memref<64x512xf32, #tpu.memory_space<vmem>>, vector<64x256xf32>
    %cst_116 = arith.constant 0.000000e+00 : f32
    %200 = vector.shape_cast %60 : vector<1x256xi1> to vector<1x256xi1>
    %201 = vector.broadcast %200 : vector<1x256xi1> to vector<64x256xi1>
    %202 = vector.broadcast %cst_116 : f32 to vector<64x256xf32>
    %203 = arith.select %201, %199, %202 : vector<64x256xi1>, vector<64x256xf32>
    %c576 = arith.constant 576 : index
    %c0_117 = arith.constant 0 : index
    %204 = vector.load %arg13[%c576, %c0_117] : memref<1600x256xf32, #tpu.memory_space<vmem>>, vector<64x256xf32>
    tpu.vector_store %arg13[%c576, %c0_117], %203 {strides = array<i32>} : memref<1600x256xf32, #tpu.memory_space<vmem>>, vector<64x256xf32>,
    %c0_118 = arith.constant 0 : index
    %c126 = arith.constant 126 : index
    %205 = vector.load %arg11[%c0_118, %c126] : memref<64x512xf32, #tpu.memory_space<vmem>>, vector<64x256xf32>
    %cst_119 = arith.constant 0.000000e+00 : f32
    %206 = vector.shape_cast %33 : vector<1x256xi1> to vector<1x256xi1>
    %207 = vector.broadcast %206 : vector<1x256xi1> to vector<64x256xi1>
    %208 = vector.broadcast %cst_119 : f32 to vector<64x256xf32>
    %209 = arith.select %207, %205, %208 : vector<64x256xi1>, vector<64x256xf32>
    %c640 = arith.constant 640 : index
    %c0_120 = arith.constant 0 : index
    %210 = vector.load %arg13[%c640, %c0_120] : memref<1600x256xf32, #tpu.memory_space<vmem>>, vector<64x256xf32>
    tpu.vector_store %arg13[%c640, %c0_120], %209 {strides = array<i32>} : memref<1600x256xf32, #tpu.memory_space<vmem>>, vector<64x256xf32>,
    %c0_121 = arith.constant 0 : index
    %c127_122 = arith.constant 127 : index
    %211 = vector.load %arg11[%c0_121, %c127_122] : memref<64x512xf32, #tpu.memory_space<vmem>>, vector<64x256xf32>
    %cst_123 = arith.constant 0.000000e+00 : f32
    %212 = vector.shape_cast %42 : vector<1x256xi1> to vector<1x256xi1>
    %213 = vector.broadcast %212 : vector<1x256xi1> to vector<64x256xi1>
    %214 = vector.broadcast %cst_123 : f32 to vector<64x256xf32>
    %215 = arith.select %213, %211, %214 : vector<64x256xi1>, vector<64x256xf32>
    %c704 = arith.constant 704 : index
    %c0_124 = arith.constant 0 : index
    %216 = vector.load %arg13[%c704, %c0_124] : memref<1600x256xf32, #tpu.memory_space<vmem>>, vector<64x256xf32>
    tpu.vector_store %arg13[%c704, %c0_124], %215 {strides = array<i32>} : memref<1600x256xf32, #tpu.memory_space<vmem>>, vector<64x256xf32>,
    %c0_125 = arith.constant 0 : index
    %c128_126 = arith.constant 128 : index
    %217 = vector.load %arg11[%c0_125, %c128_126] : memref<64x512xf32, #tpu.memory_space<vmem>>, vector<64x256xf32>
    %c768 = arith.constant 768 : index
    %c0_127 = arith.constant 0 : index
    %218 = vector.load %arg13[%c768, %c0_127] : memref<1600x256xf32, #tpu.memory_space<vmem>>, vector<64x256xf32>
    tpu.vector_store %arg13[%c768, %c0_127], %217 {strides = array<i32>} : memref<1600x256xf32, #tpu.memory_space<vmem>>, vector<64x256xf32>,
    %c0_128 = arith.constant 0 : index
    %c129_129 = arith.constant 129 : index
    %219 = vector.load %arg11[%c0_128, %c129_129] : memref<64x512xf32, #tpu.memory_space<vmem>>, vector<64x256xf32>
    %cst_130 = arith.constant 0.000000e+00 : f32
    %220 = vector.shape_cast %51 : vector<1x256xi1> to vector<1x256xi1>
    %221 = vector.broadcast %220 : vector<1x256xi1> to vector<64x256xi1>
    %222 = vector.broadcast %cst_130 : f32 to vector<64x256xf32>
    %223 = arith.select %221, %219, %222 : vector<64x256xi1>, vector<64x256xf32>
    %c832 = arith.constant 832 : index
    %c0_131 = arith.constant 0 : index
    %224 = vector.load %arg13[%c832, %c0_131] : memref<1600x256xf32, #tpu.memory_space<vmem>>, vector<64x256xf32>
    tpu.vector_store %arg13[%c832, %c0_131], %223 {strides = array<i32>} : memref<1600x256xf32, #tpu.memory_space<vmem>>, vector<64x256xf32>,
    %c0_132 = arith.constant 0 : index
    %c130 = arith.constant 130 : index
    %225 = vector.load %arg11[%c0_132, %c130] : memref<64x512xf32, #tpu.memory_space<vmem>>, vector<64x256xf32>
    %cst_133 = arith.constant 0.000000e+00 : f32
    %226 = vector.shape_cast %60 : vector<1x256xi1> to vector<1x256xi1>
    %227 = vector.broadcast %226 : vector<1x256xi1> to vector<64x256xi1>
    %228 = vector.broadcast %cst_133 : f32 to vector<64x256xf32>
    %229 = arith.select %227, %225, %228 : vector<64x256xi1>, vector<64x256xf32>
    %c896 = arith.constant 896 : index
    %c0_134 = arith.constant 0 : index
    %230 = vector.load %arg13[%c896, %c0_134] : memref<1600x256xf32, #tpu.memory_space<vmem>>, vector<64x256xf32>
    tpu.vector_store %arg13[%c896, %c0_134], %229 {strides = array<i32>} : memref<1600x256xf32, #tpu.memory_space<vmem>>, vector<64x256xf32>,
    %c0_135 = arith.constant 0 : index
    %c142 = arith.constant 142 : index
    %231 = vector.load %arg11[%c0_135, %c142] : memref<64x512xf32, #tpu.memory_space<vmem>>, vector<64x256xf32>
    %cst_136 = arith.constant 0.000000e+00 : f32
    %232 = vector.shape_cast %33 : vector<1x256xi1> to vector<1x256xi1>
    %233 = vector.broadcast %232 : vector<1x256xi1> to vector<64x256xi1>
    %234 = vector.broadcast %cst_136 : f32 to vector<64x256xf32>
    %235 = arith.select %233, %231, %234 : vector<64x256xi1>, vector<64x256xf32>
    %c960 = arith.constant 960 : index
    %c0_137 = arith.constant 0 : index
    %236 = vector.load %arg13[%c960, %c0_137] : memref<1600x256xf32, #tpu.memory_space<vmem>>, vector<64x256xf32>
    tpu.vector_store %arg13[%c960, %c0_137], %235 {strides = array<i32>} : memref<1600x256xf32, #tpu.memory_space<vmem>>, vector<64x256xf32>,
    %c0_138 = arith.constant 0 : index
    %c143_139 = arith.constant 143 : index
    %237 = vector.load %arg11[%c0_138, %c143_139] : memref<64x512xf32, #tpu.memory_space<vmem>>, vector<64x256xf32>
    %cst_140 = arith.constant 0.000000e+00 : f32
    %238 = vector.shape_cast %42 : vector<1x256xi1> to vector<1x256xi1>
    %239 = vector.broadcast %238 : vector<1x256xi1> to vector<64x256xi1>
    %240 = vector.broadcast %cst_140 : f32 to vector<64x256xf32>
    %241 = arith.select %239, %237, %240 : vector<64x256xi1>, vector<64x256xf32>
    %c1024 = arith.constant 1024 : index
    %c0_141 = arith.constant 0 : index
    %242 = vector.load %arg13[%c1024, %c0_141] : memref<1600x256xf32, #tpu.memory_space<vmem>>, vector<64x256xf32>
    tpu.vector_store %arg13[%c1024, %c0_141], %241 {strides = array<i32>} : memref<1600x256xf32, #tpu.memory_space<vmem>>, vector<64x256xf32>,
    %c0_142 = arith.constant 0 : index
    %c144_143 = arith.constant 144 : index
    %243 = vector.load %arg11[%c0_142, %c144_143] : memref<64x512xf32, #tpu.memory_space<vmem>>, vector<64x256xf32>
    %c1088 = arith.constant 1088 : index
    %c0_144 = arith.constant 0 : index
    %244 = vector.load %arg13[%c1088, %c0_144] : memref<1600x256xf32, #tpu.memory_space<vmem>>, vector<64x256xf32>
    tpu.vector_store %arg13[%c1088, %c0_144], %243 {strides = array<i32>} : memref<1600x256xf32, #tpu.memory_space<vmem>>, vector<64x256xf32>,
    %c0_145 = arith.constant 0 : index
    %c145_146 = arith.constant 145 : index
    %245 = vector.load %arg11[%c0_145, %c145_146] : memref<64x512xf32, #tpu.memory_space<vmem>>, vector<64x256xf32>
    %cst_147 = arith.constant 0.000000e+00 : f32
    %246 = vector.shape_cast %51 : vector<1x256xi1> to vector<1x256xi1>
    %247 = vector.broadcast %246 : vector<1x256xi1> to vector<64x256xi1>
    %248 = vector.broadcast %cst_147 : f32 to vector<64x256xf32>
    %249 = arith.select %247, %245, %248 : vector<64x256xi1>, vector<64x256xf32>
    %c1152 = arith.constant 1152 : index
    %c0_148 = arith.constant 0 : index
    %250 = vector.load %arg13[%c1152, %c0_148] : memref<1600x256xf32, #tpu.memory_space<vmem>>, vector<64x256xf32>
    tpu.vector_store %arg13[%c1152, %c0_148], %249 {strides = array<i32>} : memref<1600x256xf32, #tpu.memory_space<vmem>>, vector<64x256xf32>,
    %c0_149 = arith.constant 0 : index
    %c146 = arith.constant 146 : index
    %251 = vector.load %arg11[%c0_149, %c146] : memref<64x512xf32, #tpu.memory_space<vmem>>, vector<64x256xf32>
    %cst_150 = arith.constant 0.000000e+00 : f32
    %252 = vector.shape_cast %60 : vector<1x256xi1> to vector<1x256xi1>
    %253 = vector.broadcast %252 : vector<1x256xi1> to vector<64x256xi1>
    %254 = vector.broadcast %cst_150 : f32 to vector<64x256xf32>
    %255 = arith.select %253, %251, %254 : vector<64x256xi1>, vector<64x256xf32>
    %c1216 = arith.constant 1216 : index
    %c0_151 = arith.constant 0 : index
    %256 = vector.load %arg13[%c1216, %c0_151] : memref<1600x256xf32, #tpu.memory_space<vmem>>, vector<64x256xf32>
    tpu.vector_store %arg13[%c1216, %c0_151], %255 {strides = array<i32>} : memref<1600x256xf32, #tpu.memory_space<vmem>>, vector<64x256xf32>,
    %c0_152 = arith.constant 0 : index
    %c158 = arith.constant 158 : index
    %257 = vector.load %arg11[%c0_152, %c158] : memref<64x512xf32, #tpu.memory_space<vmem>>, vector<64x256xf32>
    %cst_153 = arith.constant 0.000000e+00 : f32
    %258 = vector.shape_cast %33 : vector<1x256xi1> to vector<1x256xi1>
    %259 = vector.broadcast %258 : vector<1x256xi1> to vector<64x256xi1>
    %260 = vector.broadcast %cst_153 : f32 to vector<64x256xf32>
    %261 = arith.select %259, %257, %260 : vector<64x256xi1>, vector<64x256xf32>
    %c1280 = arith.constant 1280 : index
    %c0_154 = arith.constant 0 : index
    %262 = vector.load %arg13[%c1280, %c0_154] : memref<1600x256xf32, #tpu.memory_space<vmem>>, vector<64x256xf32>
    tpu.vector_store %arg13[%c1280, %c0_154], %261 {strides = array<i32>} : memref<1600x256xf32, #tpu.memory_space<vmem>>, vector<64x256xf32>,
    %c0_155 = arith.constant 0 : index
    %c159 = arith.constant 159 : index
    %263 = vector.load %arg11[%c0_155, %c159] : memref<64x512xf32, #tpu.memory_space<vmem>>, vector<64x256xf32>
    %cst_156 = arith.constant 0.000000e+00 : f32
    %264 = vector.shape_cast %42 : vector<1x256xi1> to vector<1x256xi1>
    %265 = vector.broadcast %264 : vector<1x256xi1> to vector<64x256xi1>
    %266 = vector.broadcast %cst_156 : f32 to vector<64x256xf32>
    %267 = arith.select %265, %263, %266 : vector<64x256xi1>, vector<64x256xf32>
    %c1344 = arith.constant 1344 : index
    %c0_157 = arith.constant 0 : index
    %268 = vector.load %arg13[%c1344, %c0_157] : memref<1600x256xf32, #tpu.memory_space<vmem>>, vector<64x256xf32>
    tpu.vector_store %arg13[%c1344, %c0_157], %267 {strides = array<i32>} : memref<1600x256xf32, #tpu.memory_space<vmem>>, vector<64x256xf32>,
    %c0_158 = arith.constant 0 : index
    %c160 = arith.constant 160 : index
    %269 = vector.load %arg11[%c0_158, %c160] : memref<64x512xf32, #tpu.memory_space<vmem>>, vector<64x256xf32>
    %c1408 = arith.constant 1408 : index
    %c0_159 = arith.constant 0 : index
    %270 = vector.load %arg13[%c1408, %c0_159] : memref<1600x256xf32, #tpu.memory_space<vmem>>, vector<64x256xf32>
    tpu.vector_store %arg13[%c1408, %c0_159], %269 {strides = array<i32>} : memref<1600x256xf32, #tpu.memory_space<vmem>>, vector<64x256xf32>,
    %c0_160 = arith.constant 0 : index
    %c161 = arith.constant 161 : index
    %271 = vector.load %arg11[%c0_160, %c161] : memref<64x512xf32, #tpu.memory_space<vmem>>, vector<64x256xf32>
    %cst_161 = arith.constant 0.000000e+00 : f32
    %272 = vector.shape_cast %51 : vector<1x256xi1> to vector<1x256xi1>
    %273 = vector.broadcast %272 : vector<1x256xi1> to vector<64x256xi1>
    %274 = vector.broadcast %cst_161 : f32 to vector<64x256xf32>
    %275 = arith.select %273, %271, %274 : vector<64x256xi1>, vector<64x256xf32>
    %c1472 = arith.constant 1472 : index
    %c0_162 = arith.constant 0 : index
    %276 = vector.load %arg13[%c1472, %c0_162] : memref<1600x256xf32, #tpu.memory_space<vmem>>, vector<64x256xf32>
    tpu.vector_store %arg13[%c1472, %c0_162], %275 {strides = array<i32>} : memref<1600x256xf32, #tpu.memory_space<vmem>>, vector<64x256xf32>,
    %c0_163 = arith.constant 0 : index
    %c162 = arith.constant 162 : index
    %277 = vector.load %arg11[%c0_163, %c162] : memref<64x512xf32, #tpu.memory_space<vmem>>, vector<64x256xf32>
    %cst_164 = arith.constant 0.000000e+00 : f32
    %278 = vector.shape_cast %60 : vector<1x256xi1> to vector<1x256xi1>
    %279 = vector.broadcast %278 : vector<1x256xi1> to vector<64x256xi1>
    %280 = vector.broadcast %cst_164 : f32 to vector<64x256xf32>
    %281 = arith.select %279, %277, %280 : vector<64x256xi1>, vector<64x256xf32>
    %c1536 = arith.constant 1536 : index
    %c0_165 = arith.constant 0 : index
    %282 = vector.load %arg13[%c1536, %c0_165] : memref<1600x256xf32, #tpu.memory_space<vmem>>, vector<64x256xf32>
    tpu.vector_store %arg13[%c1536, %c0_165], %281 {strides = array<i32>} : memref<1600x256xf32, #tpu.memory_space<vmem>>, vector<64x256xf32>,
    %c0_166 = arith.constant 0 : index
    %c0_167 = arith.constant 0 : index
    %283 = vector.load %arg6[%c0_166, %c0_167] : memref<64x1600xf32, #tpu.memory_space<vmem>>, vector<64x1600xf32>
    %c0_168 = arith.constant 0 : index
    %c0_169 = arith.constant 0 : index
    %284 = vector.load %arg13[%c0_168, %c0_169] : memref<1600x256xf32, #tpu.memory_space<vmem>>, vector<1600x256xf32>
    %cst_170 = arith.constant dense<0.000000e+00> : vector<64x256xf32>
    %285 = tpu.matmul %283, %284, %cst_170 {dimension_numbers = #tpu.dot_dimension_numbers<[1], [0], [0], [1], [0, 0, 1, 1], [], []>} : vector<64x1600xf32>, vector<1600x256xf32>, vector<64x256xf32> -> vector<64x256xf32>
    %c0_171 = arith.constant 0 : index
    %c0_172 = arith.constant 0 : index
    %286 = vector.load %arg7[%c0_171, %c0_172] : memref<64x1xf32, #tpu.memory_space<vmem>>, vector<64x1xf32>
    %287 = vector.broadcast %286 : vector<64x1xf32> to vector<64x256xf32>
    %288 = arith.addf %285, %287 : vector<64x256xf32>
    %cst_173 = arith.constant 0.000000e+00 : f32
    %289 = vector.broadcast %cst_173 : f32 to vector<64x256xf32>
    %290 = arith.maximumf %288, %289 : vector<64x256xf32>
    %c0_174 = arith.constant 0 : index
    %c128_175 = arith.constant 128 : index
    %c0_176 = arith.constant 0 : index
    %291 = vector.load %arg10[%c0_174, %c128_175, %c0_176] : memref<1x256x256xf32, #tpu.memory_space<vmem>>, vector<1x64x256xf32>
    %292 = vector.shape_cast %291 : vector<1x64x256xf32> to vector<64x256xf32>
    %293 = vector.shape_cast %290 : vector<64x256xf32> to vector<1x64x256xf32>
    tpu.vector_store %arg10[%c0_174, %c128_175, %c0_176], %293 {strides = array<i32>} : memref<1x256x256xf32, #tpu.memory_space<vmem>>, vector<1x64x256xf32>,
    %c0_177 = arith.constant 0 : index
    %c0_178 = arith.constant 0 : index
    %294 = vector.load %arg8[%c0_177, %c0_178] : memref<64x4xf32, #tpu.memory_space<vmem>>, vector<64x4xf32>
    %c0_179 = arith.constant 0 : index
    %c0_180 = arith.constant 0 : index
    %295 = vector.load %arg9[%c0_179, %c0_180] : memref<64x1xf32, #tpu.memory_space<vmem>>, vector<64x1xf32>
    %c0_181 = arith.constant 0 : index
    %c128_182 = arith.constant 128 : index
    %296 = vector.load %arg12[%c0_181, %c128_182] : memref<4x512xf32, #tpu.memory_space<vmem>>, vector<4x256xf32>
    tpu.vector_store %arg12[%c0_181, %c128_182], %62 {strides = array<i32>} : memref<4x512xf32, #tpu.memory_space<vmem>>, vector<4x256xf32>,
    %c0_183 = arith.constant 0 : index
    %c111_184 = arith.constant 111 : index
    %297 = vector.load %arg12[%c0_183, %c111_184] : memref<4x512xf32, #tpu.memory_space<vmem>>, vector<4x256xf32>
    %cst_185 = arith.constant -3.000000e+38 : f32
    %298 = vector.shape_cast %42 : vector<1x256xi1> to vector<1x256xi1>
    %299 = vector.broadcast %298 : vector<1x256xi1> to vector<4x256xi1>
    %300 = vector.broadcast %cst_185 : f32 to vector<4x256xf32>
    %301 = arith.select %299, %297, %300 : vector<4x256xi1>, vector<4x256xf32>
    %302 = arith.maximumf %62, %301 : vector<4x256xf32>
    %c0_186 = arith.constant 0 : index
    %c112_187 = arith.constant 112 : index
    %303 = vector.load %arg12[%c0_186, %c112_187] : memref<4x512xf32, #tpu.memory_space<vmem>>, vector<4x256xf32>
    %304 = arith.maximumf %302, %303 : vector<4x256xf32>
    %c0_188 = arith.constant 0 : index
    %c113_189 = arith.constant 113 : index
    %305 = vector.load %arg12[%c0_188, %c113_189] : memref<4x512xf32, #tpu.memory_space<vmem>>, vector<4x256xf32>
    %cst_190 = arith.constant -3.000000e+38 : f32
    %306 = vector.shape_cast %51 : vector<1x256xi1> to vector<1x256xi1>
    %307 = vector.broadcast %306 : vector<1x256xi1> to vector<4x256xi1>
    %308 = vector.broadcast %cst_190 : f32 to vector<4x256xf32>
    %309 = arith.select %307, %305, %308 : vector<4x256xi1>, vector<4x256xf32>
    %310 = arith.maximumf %304, %309 : vector<4x256xf32>
    %c0_191 = arith.constant 0 : index
    %c127_192 = arith.constant 127 : index
    %311 = vector.load %arg12[%c0_191, %c127_192] : memref<4x512xf32, #tpu.memory_space<vmem>>, vector<4x256xf32>
    %cst_193 = arith.constant -3.000000e+38 : f32
    %312 = vector.shape_cast %42 : vector<1x256xi1> to vector<1x256xi1>
    %313 = vector.broadcast %312 : vector<1x256xi1> to vector<4x256xi1>
    %314 = vector.broadcast %cst_193 : f32 to vector<4x256xf32>
    %315 = arith.select %313, %311, %314 : vector<4x256xi1>, vector<4x256xf32>
    %316 = arith.maximumf %310, %315 : vector<4x256xf32>
    %c0_194 = arith.constant 0 : index
    %c129_195 = arith.constant 129 : index
    %317 = vector.load %arg12[%c0_194, %c129_195] : memref<4x512xf32, #tpu.memory_space<vmem>>, vector<4x256xf32>
    %cst_196 = arith.constant -3.000000e+38 : f32
    %318 = vector.shape_cast %51 : vector<1x256xi1> to vector<1x256xi1>
    %319 = vector.broadcast %318 : vector<1x256xi1> to vector<4x256xi1>
    %320 = vector.broadcast %cst_196 : f32 to vector<4x256xf32>
    %321 = arith.select %319, %317, %320 : vector<4x256xi1>, vector<4x256xf32>
    %322 = arith.maximumf %316, %321 : vector<4x256xf32>
    %c0_197 = arith.constant 0 : index
    %c143_198 = arith.constant 143 : index
    %323 = vector.load %arg12[%c0_197, %c143_198] : memref<4x512xf32, #tpu.memory_space<vmem>>, vector<4x256xf32>
    %cst_199 = arith.constant -3.000000e+38 : f32
    %324 = vector.shape_cast %42 : vector<1x256xi1> to vector<1x256xi1>
    %325 = vector.broadcast %324 : vector<1x256xi1> to vector<4x256xi1>
    %326 = vector.broadcast %cst_199 : f32 to vector<4x256xf32>
    %327 = arith.select %325, %323, %326 : vector<4x256xi1>, vector<4x256xf32>
    %328 = arith.maximumf %322, %327 : vector<4x256xf32>
    %c0_200 = arith.constant 0 : index
    %c144_201 = arith.constant 144 : index
    %329 = vector.load %arg12[%c0_200, %c144_201] : memref<4x512xf32, #tpu.memory_space<vmem>>, vector<4x256xf32>
    %330 = arith.maximumf %328, %329 : vector<4x256xf32>
    %c0_202 = arith.constant 0 : index
    %c145_203 = arith.constant 145 : index
    %331 = vector.load %arg12[%c0_202, %c145_203] : memref<4x512xf32, #tpu.memory_space<vmem>>, vector<4x256xf32>
    %cst_204 = arith.constant -3.000000e+38 : f32
    %332 = vector.shape_cast %51 : vector<1x256xi1> to vector<1x256xi1>
    %333 = vector.broadcast %332 : vector<1x256xi1> to vector<4x256xi1>
    %334 = vector.broadcast %cst_204 : f32 to vector<4x256xf32>
    %335 = arith.select %333, %331, %334 : vector<4x256xi1>, vector<4x256xf32>
    %336 = arith.maximumf %330, %335 : vector<4x256xf32>
    %337 = vector.extract_strided_slice %294 {offsets = [0, 0], sizes = [64, 1], strides = [1, 1]} : vector<64x4xf32> to vector<64x1xf32>
    %338 = vector.extract_strided_slice %336 {offsets = [0, 0], sizes = [1, 256], strides = [1, 1]} : vector<4x256xf32> to vector<1x256xf32>
    %339 = vector.broadcast %337 : vector<64x1xf32> to vector<64x256xf32>
    %340 = vector.broadcast %338 : vector<1x256xf32> to vector<64x256xf32>
    %341 = arith.mulf %339, %340 : vector<64x256xf32>
    %342 = vector.broadcast %295 : vector<64x1xf32> to vector<64x256xf32>
    %343 = arith.addf %341, %342 : vector<64x256xf32>
    %344 = vector.extract_strided_slice %294 {offsets = [0, 1], sizes = [64, 1], strides = [1, 1]} : vector<64x4xf32> to vector<64x1xf32>
    %345 = vector.extract_strided_slice %336 {offsets = [1, 0], sizes = [1, 256], strides = [1, 1]} : vector<4x256xf32> to vector<1x256xf32>
    %346 = vector.broadcast %344 : vector<64x1xf32> to vector<64x256xf32>
    %347 = vector.broadcast %345 : vector<1x256xf32> to vector<64x256xf32>
    %348 = arith.mulf %346, %347 : vector<64x256xf32>
    %349 = arith.addf %343, %348 : vector<64x256xf32>
    %350 = vector.extract_strided_slice %294 {offsets = [0, 2], sizes = [64, 1], strides = [1, 1]} : vector<64x4xf32> to vector<64x1xf32>
    %351 = vector.extract_strided_slice %336 {offsets = [2, 0], sizes = [1, 256], strides = [1, 1]} : vector<4x256xf32> to vector<1x256xf32>
    %352 = vector.broadcast %350 : vector<64x1xf32> to vector<64x256xf32>
    %353 = vector.broadcast %351 : vector<1x256xf32> to vector<64x256xf32>
    %354 = arith.mulf %352, %353 : vector<64x256xf32>
    %355 = arith.addf %349, %354 : vector<64x256xf32>
    %356 = vector.extract_strided_slice %294 {offsets = [0, 3], sizes = [64, 1], strides = [1, 1]} : vector<64x4xf32> to vector<64x1xf32>
    %357 = vector.extract_strided_slice %336 {offsets = [3, 0], sizes = [1, 256], strides = [1, 1]} : vector<4x256xf32> to vector<1x256xf32>
    %358 = vector.broadcast %356 : vector<64x1xf32> to vector<64x256xf32>
    %359 = vector.broadcast %357 : vector<1x256xf32> to vector<64x256xf32>
    %360 = arith.mulf %358, %359 : vector<64x256xf32>
    %361 = arith.addf %355, %360 : vector<64x256xf32>
    %cst_205 = arith.constant 0.000000e+00 : f32
    %362 = vector.broadcast %cst_205 : f32 to vector<64x256xf32>
    %363 = arith.maximumf %361, %362 : vector<64x256xf32>
    %c0_206 = arith.constant 0 : index
    %c192_207 = arith.constant 192 : index
    %c0_208 = arith.constant 0 : index
    %364 = vector.load %arg10[%c0_206, %c192_207, %c0_208] : memref<1x256x256xf32, #tpu.memory_space<vmem>>, vector<1x64x256xf32>
    %365 = vector.shape_cast %364 : vector<1x64x256xf32> to vector<64x256xf32>
    %366 = vector.shape_cast %363 : vector<64x256xf32> to vector<1x64x256xf32>
    tpu.vector_store %arg10[%c0_206, %c192_207, %c0_208], %366 {strides = array<i32>} : memref<1x256x256xf32, #tpu.memory_space<vmem>>, vector<1x64x256xf32>,
    return
  }
  func.func @transform_0(%arg0: i32) -> (i32, i32, i32) {
    %c0_i32 = arith.constant 0 : i32
    %c0_i32_0 = arith.constant 0 : i32
    %c0_i32_1 = arith.constant 0 : i32
    return %arg0, %c0_i32, %c0_i32_0 : i32, i32, i32
  }
  func.func @transform_1(%arg0: i32) -> (i32, i32) {
    %c0_i32 = arith.constant 0 : i32
    %c0_i32_0 = arith.constant 0 : i32
    %c0_i32_1 = arith.constant 0 : i32
    return %c0_i32, %c0_i32_0 : i32, i32
  }
  func.func @transform_2(%arg0: i32) -> (i32, i32) {
    %c0_i32 = arith.constant 0 : i32
    %c0_i32_0 = arith.constant 0 : i32
    %c0_i32_1 = arith.constant 0 : i32
    return %c0_i32, %c0_i32_0 : i32, i32
  }
  func.func @transform_3(%arg0: i32) -> (i32, i32) {
    %c0_i32 = arith.constant 0 : i32
    %c0_i32_0 = arith.constant 0 : i32
    %c0_i32_1 = arith.constant 0 : i32
    return %c0_i32, %c0_i32_0 : i32, i32
  }
  func.func @transform_4(%arg0: i32) -> (i32, i32) {
    %c0_i32 = arith.constant 0 : i32
    %c0_i32_0 = arith.constant 0 : i32
    %c0_i32_1 = arith.constant 0 : i32
    return %c0_i32, %c0_i32_0 : i32, i32
  }
  func.func @transform_5(%arg0: i32) -> (i32, i32) {
    %c0_i32 = arith.constant 0 : i32
    %c0_i32_0 = arith.constant 0 : i32
    %c0_i32_1 = arith.constant 0 : i32
    return %c0_i32, %c0_i32_0 : i32, i32
  }
  func.func @transform_6(%arg0: i32) -> (i32, i32) {
    %c0_i32 = arith.constant 0 : i32
    %c0_i32_0 = arith.constant 0 : i32
    %c0_i32_1 = arith.constant 0 : i32
    return %c0_i32, %c0_i32_0 : i32, i32
  }
  func.func @transform_7(%arg0: i32) -> (i32, i32) {
    %c0_i32 = arith.constant 0 : i32
    %c0_i32_0 = arith.constant 0 : i32
    %c0_i32_1 = arith.constant 0 : i32
    return %c0_i32, %c0_i32_0 : i32, i32
  }
  func.func @transform_8(%arg0: i32) -> (i32, i32) {
    %c0_i32 = arith.constant 0 : i32
    %c0_i32_0 = arith.constant 0 : i32
    %c0_i32_1 = arith.constant 0 : i32
    return %c0_i32, %c0_i32_0 : i32, i32
  }
  func.func @transform_9(%arg0: i32) -> (i32, i32, i32) {
    %c0_i32 = arith.constant 0 : i32
    %c0_i32_0 = arith.constant 0 : i32
    %c0_i32_1 = arith.constant 0 : i32
    return %arg0, %c0_i32, %c0_i32_0 : i32, i32, i32
  }
}

</mosaic_0001>

<bundles_post_ra>
// kernel: tpu_custom_call.1
= control target key start
LH: loop header
LB: loop body
LE: loop exit
PB: predicated region body
PF: predicated region fallthrough
CT: control target
= control target key end

     0   :  { %14 = vsyncpa [#allocation6], 0  ;;  %s17182_s0 = inlined_call_operand.vmem [shape: f32[2,4,256], index: 0, kind: input, shape index: {}]   ;;  %s17183_s1 = inlined_call_operand.vmem [shape: f32[192,4], index: 1, kind: input, shape index: {}]   ;;  %s17184_s2 = inlined_call_operand.vmem [shape: f32[192,1], index: 2, kind: input, shape index: {}]   ;;  %s17185_s3 = inlined_call_operand.vmem [shape: f32[64,576], index: 3, kind: input, shape index: {}]   ;;  %s17186_s4 = inlined_call_operand.vmem [shape: f32[64,1], index: 4, kind: input, shape index: {}]   ;;  %s17187_s5 = inlined_call_operand.hbm [shape: f32[64,1600], index: 5, kind: input, shape index: {}]   ;;  %s17188_s6 = inlined_call_operand.vmem [shape: f32[64,1], index: 6, kind: input, shape index: {}]   ;;  %s17189_s7 = inlined_call_operand.vmem [shape: f32[64,4], index: 7, kind: input, shape index: {}]   ;;  %s17190_s8 = inlined_call_operand.vmem [shape: f32[64,1], index: 8, kind: input, shape index: {}]   ;;  %s17191_s9 = inlined_call_operand.hbm [shape: f32[2,256,256], index: 9, kind: output, shape index: {}]  }
   0x1   :  { %15 = vsyncpa [#allocation7], 0 }
   0x2   :  { %17 = vsyncpa [#allocation7 + $0x1], 0  ;;  %s10689_s30 = smov 0   ;;  %s10691_s10 = smov 0  }
   0x3   :  { %s10693_s11 = smov 0   ;;  %s10695_s12 = smov 0  }
   0x4 LB: > { %s10710_s13 = sadd.s32 4294967295, %s10602_s12   ;;  %s9323_s14 = sadd.s32 4294967294, %s10602_s12   ;;  %s10602_s12 = sphi %s10695_s12, %s17841_s12   ;;  %s10598_s11 = sphi %s10693_s11, %s17840_s11   ;;  %s10594_s10 = sphi %s10691_s10, %s17839_s10   ;;  %s10590_s30 = sphi %s10689_s30, %s17838_s30  }
   0x5   : > { %s10714_s15 = sadd.s32 1, %s10602_s12   ;;  %s224_s16 = sadd.s32 1, %s10598_s11 }
   0x6   : > { %s221_s17 = ssub.s32 %s10602_s12, %s10714_s15  ;;  %p234_p0 = scmp.ne.s32.totalorder %s10598_s11, %s10594_s10 }
   0x7   : > { %p222_p1 = scmp.eq.s32.totalorder %s221_s17, 0  ;;  %p235_p2 = scmp.eq.s32.totalorder %s10710_s13, 1 }
   0x8   : > { %p240_p3 = scmp.ne.s32.totalorder %s10594_s10, %s10590_s30  ;;  %p241_p4 = scmp.eq.s32.totalorder %s9323_s14, 1 }
   0x9   : > { %s10725_s18 = scalar_select %p222_p1, %s10598_s11, %s224_s16  }
   0xa   : > { %p10727_p5 = por %p235_p2, %p234_p0  ;;  %p10731_p6 = por %p241_p4, %p240_p3 }
   0xb   : > { %p9324_p7 = scmp.ge.s32.totalorder %s10602_s12, 1  ;;  %p248_p8 = scmp.lt.s32.totalorder %s10602_s12, 3 }
   0xc   : > { %s17414_s20 = scalar_select %p10731_p6, 1, 0 }
   0xd   : > { %p9785_p9 = scmp.eq.s32.totalorder %s10710_s13, 0  ;;  %p10738_p10 = pnand %p9324_p7, %p248_p8 }
   0xe   : > { %s10604_s22 = smov [#allocation5]  }
   0xf   : > { %s272_s23 = sshll.u32 %s10604_s22, 4  ;;  %p9777_p11 = pneg %p10738_p10  ;;  %s273_s23 = int_to_ptr.vmem [resolvable:$true] %s272_s23 }
  0x10   : > { %s10523_s24 = scalar_lea.vmem %s273_s23, 13312  ;;  %p10531_p3 = scmp.lt.s32.totalorder %s273_s23, %s273_s23 }
  0x11   : > { %p9778_p12 = pnand %p9785_p9, %p9777_p11  ;;  %p10524_p0 = scmp.ne.s32.totalorder %s273_s23, %s10523_s24 }
  0x12   : > { %p10532_p4 = scmp.lt.s32.totalorder %s10523_s24, %s10523_s24 }
  0x13   : > { %p10514_p13 = pneg %p9778_p12 }
  0x14   : > { %p10533_p6 = por %p10532_p4, %p10531_p3 }
  0x15   : > { %p10526_p1 = pnand %p10524_p0, %p10514_p13 }
  0x17   : > { %p10527_p2 = pneg %p10526_p1 }
  0x19   : > { %p10534_p7 = pnand %p10533_p6, %p10527_p2 }
  0x1b   : > { %10537 = shalt.err (!%p10534_p7)
}
  0x1c   : > { %s10605_s25 = smov 1664   ;;  %s10606_s26 = smov 104  }
  0x1d   : > { %9780 = dma.hbm_to_vmem [thread:$0]  (!%p9778_p12), %s17187_s5, 13312, %s273_s23, [#allocation6], %s10605_s25, %s10605_s25, %s10606_s26  }
  0x1e   : > { %305 = sbr.rel (%p10738_p10) target bundleno = 2041 (0x7f9), region = 56 }
  0x23   : > { %10581 = dma.done.wait (%p9785_p9), [#allocation6], 13312  }
  0x24   : > { %10583 = vsyncadd (%p9785_p9), [#allocation6], 4294953984  ;;  %v17196_v0 = vmov 1   ;;  %v17198_v1 = vmov 0   ;;  %p341_p6 = scmp.lt.s32.totalorder %s10710_s13, 1  ;;  %v10761_v2 = vld [vmem:[%s17183_s1 + $0x10] sm:$0xff] }
  0x25   : > { %9855 = vset.pattern.permute.xlu0 %v17196_v0  ;;  %9854 = vset.pattern.permute.xlu1 %v17198_v1  ;;  %v10766_v3 = vld [vmem:[%s17183_s1] sm:$0xff]  ;;  %v10773_v4 = vld [vmem:[%s17183_s1 + $0x18] sm:$0xff]  ;;  %v10781_v5 = vld [vmem:[%s17183_s1 + $0x28] sm:$0xff]  ;;  %v17194_v18 = vmov 2   ;;  %v17192_v40 = vmov 3   ;;  %s17406_s22 = smov 17  }
  0x26   : > { %484 = vperm.xlu1 %9854, %v10761_v2   ;;  %828 = vperm.xlu0 %9855, %v10766_v3   ;;  %s342_s23 = scalar_select %p341_p6, %s10710_s13, 1  ;;  %v10791_v6 = vld [vmem:[%s17183_s1 + $0x38] sm:$0xff]  ;;  %v10801_v8 = vld [vmem:[%s17183_s1 + $0x48] sm:$0xff]  ;;  %v10870_v20 = vld [vmem:[%s17183_s1 + $0x20] sm:$0xff]  ;;  %vm1766_vm0 = vcmask 130048   ;;  %vm1605_vm3 = vcmask 138240  }
  0x27   : > { %v10808_v9 = vld [vmem:[%s17183_s1 + $0x58] sm:$0xff]  ;;  %v10815_v10 = vld [vmem:[%s17183_s1 + $0x68] sm:$0xff]  ;;  %v10879_v22 = vld [vmem:[%s17183_s1 + $0x30] sm:$0xff]  ;;  %s17402_s27 = smov 15   ;;  %s17400_s28 = smov 1   ;;  %vm2076_vm4 = vcmask 7168  }
  0x28   : > { %s9353_s26 = sshll.u32 %s342_s23, 3  ;;  %v10822_v11 = vld [vmem:[%s17183_s1 + $0x78] sm:$0xff]  ;;  %v10829_v12 = vld [vmem:[%s17183_s1 + $0x88] sm:$0xff]  ;;  %v10888_v24 = vld [vmem:[%s17183_s1 + $0x40] sm:$0xff]  ;;  %s17296_s23 = sand.u32 1, %s10594_s10   ;;  %vm1915_vm7 = vcmask 121856  }
  0x29   : > { %s345_s29 = scalar_lea.vmem %s17182_s0, %s9353_s26  ;;  %v10836_v13 = vld [vmem:[%s17183_s1 + $0x98] sm:$0xff]  ;;  %v10843_v14 = vld [vmem:[%s17183_s1 + $0xa8] sm:$0xff]  ;;  %v10897_v26 = vld [vmem:[%s17183_s1 + $0x50] sm:$0xff]  ;;  %s9329_s24 = sshll.u32 %s17296_s23, 9  ;;  %vm2269_vm8 = vcmask 1039360   ;;  %vm17393_vm9 = vcmask 916480  }
  0x2a   : > { %489 = vperm.xlu1 %9854, %v10773_v4   ;;  %840 = vperm.xlu0 %9855, %v10773_v4   ;;  %v10793_v7 = vld [vmem:[%s345_s29] sm:$0xff]  ;;  %v10850_v15 = vld [vmem:[%s17183_s1 + $0xb8] sm:$0xff]  ;;  %v449_v16 = vld [vmem:[%s17184_s2 + $0x8] sm:$0xff]  ;;  %s11326_s25 = scalar_lea.vmem [#allocation8], %s9329_s24  ;;  %s17404_s26 = smov 16   ;;  %vm17358_vm10 = vcmask 924672  }
  0x2b   : > { %8692 = vst [vmem:[#allocation3 + $0x4] sm:$0xff] %v10793_v7  ;;  %v10860_v17 = vld [vmem:[%s17183_s1 + $0x8] sm:$0xff]  ;;  %v451_v19 = vld [vmem:[%s17184_s2 + $0x18] sm:$0xff]  ;;  %v10906_v28 = vld [vmem:[%s17183_s1 + $0x60] sm:$0xff]  ;;  %s17301_s29 = smov 127   ;;  %s17299_s17 = smov 113  }
  0x2c   : > { %v453_v21 = vld [vmem:[%s17184_s2 + $0x28] sm:$0xff]  ;;  %v455_v23 = vld [vmem:[%s17184_s2 + $0x38] sm:$0xff]  ;;  %v10915_v30 = vld [vmem:[%s17183_s1 + $0x70] sm:$0xff]  ;;  %s17297_s21 = smov 112   ;;  %s17317_s24 = smov 111   ;;  %vm17357_vm11 = vcmask 908288  }
  0x2d   : > { %v457_v25 = vld [vmem:[%s17184_s2 + $0x48] sm:$0xff]  ;;  %v459_v27 = vld [vmem:[%s17184_s2 + $0x58] sm:$0xff]  ;;  %v10924_v32 = vld [vmem:[%s17183_s1 + $0x80] sm:$0xff]  ;;  %s10621_s14 = smov 33   ;;  %vm17334_vm12 = vcmask 523264   ;;  %s10624_s16 = smov 30  }
  0x2e   : > { %499 = vperm.xlu1 %9854, %v10781_v5   ;;  %848 = vperm.xlu0 %9855, %v10781_v5   ;;  %v461_v29 = vld [vmem:[%s17184_s2 + $0x68] sm:$0xff]  ;;  %v463_v31 = vld [vmem:[%s17184_s2 + $0x78] sm:$0xff]  ;;  %v10933_v34 = vld [vmem:[%s17183_s1 + $0x90] sm:$0xff]  ;;  %vm3706_vm13 = vcmask 269312   ;;  %s17652_s23 = smov 127  }
  0x2f   : > { %v465_v33 = vld [vmem:[%s17184_s2 + $0x88] sm:$0xff]  ;;  %v467_v35 = vld [vmem:[%s17184_s2 + $0x98] sm:$0xff]  ;;  %v10942_v36 = vld [vmem:[%s17183_s1 + $0xa0] sm:$0xff] }
  0x30   : > { %v469_v37 = vld [vmem:[%s17184_s2 + $0xa8] sm:$0xff]  ;;  %v10951_v38 = vld [vmem:[%s17183_s1 + $0xb0] sm:$0xff]  ;;  %v471_v39 = vld [vmem:[%s17184_s2 + $0xb8] sm:$0xff] }
  0x32   : > { %509 = vperm.xlu1 %9854, %v10791_v6   ;;  %856 = vperm.xlu0 %9855, %v10791_v6  }
  0x36   : > { %519 = vperm.xlu1 %9854, %v10801_v8   ;;  %864 = vperm.xlu0 %9855, %v10801_v8  }
  0x3a   : > { %529 = vperm.xlu1 %9854, %v10808_v9   ;;  %872 = vperm.xlu0 %9855, %v10808_v9  }
  0x3e   : > { %539 = vperm.xlu1 %9854, %v10815_v10   ;;  %880 = vperm.xlu0 %9855, %v10815_v10  }
  0x42   : > { %549 = vperm.xlu1 %9854, %v10822_v11   ;;  %888 = vperm.xlu0 %9855, %v10822_v11  }
  0x46   : > { %559 = vperm.xlu1 %9854, %v10829_v12   ;;  %896 = vperm.xlu0 %9855, %v10829_v12  }
  0x4a   : > { %569 = vperm.xlu1 %9854, %v10836_v13   ;;  %904 = vperm.xlu0 %9855, %v10836_v13  }
  0x4e   : > { %579 = vperm.xlu1 %9854, %v10843_v14   ;;  %912 = vperm.xlu0 %9855, %v10843_v14  }
  0x52   : > { %589 = vperm.xlu1 %9854, %v10850_v15   ;;  %920 = vperm.xlu0 %9855, %v10850_v15  }
  0x56   : > { %666 = vperm.xlu1 %9854, %v449_v16   ;;  %9858 = vset.pattern.permute.xlu0 %v17194_v18 }
  0x57   : > { %1042 = vperm.xlu0 %9858, %v10860_v17  }
  0x5a   : > { %676 = vperm.xlu1 %9854, %v451_v19  }
  0x5b   : > { %1054 = vperm.xlu0 %9858, %v10870_v20  }
  0x5e   : > { %686 = vperm.xlu1 %9854, %v453_v21  }
  0x5f   : > { %1062 = vperm.xlu0 %9858, %v10879_v22  }
  0x62   : > { %696 = vperm.xlu1 %9854, %v455_v23   ;;  %v448_v23 = vld [vmem:[%s17184_s2] sm:$0xff] }
  0x63   : > { %1070 = vperm.xlu0 %9858, %v10888_v24  }
  0x66   : > { %706 = vperm.xlu1 %9854, %v457_v25  }
  0x67   : > { %1078 = vperm.xlu0 %9858, %v10897_v26  }
  0x6a   : > { %716 = vperm.xlu1 %9854, %v459_v27  }
  0x6b   : > { %1086 = vperm.xlu0 %9858, %v10906_v28  }
  0x6e   : > { %726 = vperm.xlu1 %9854, %v461_v29  }
  0x6f   : > { %1094 = vperm.xlu0 %9858, %v10915_v30  }
  0x72   : > { %736 = vperm.xlu1 %9854, %v463_v31  }
  0x73   : > { %1102 = vperm.xlu0 %9858, %v10924_v32  }
  0x76   : > { %746 = vperm.xlu1 %9854, %v465_v33  }
  0x77   : > { %1110 = vperm.xlu0 %9858, %v10933_v34  }
  0x7a   : > { %756 = vperm.xlu1 %9854, %v467_v35  }
  0x7b   : > { %1118 = vperm.xlu0 %9858, %v10942_v36  }
  0x7e   : > { %766 = vperm.xlu1 %9854, %v469_v37  }
  0x7f   : > { %1126 = vperm.xlu0 %9858, %v10951_v38  }
  0x82   : > { %776 = vperm.xlu1 %9854, %v471_v39   ;;  %v456_v39 = vld [vmem:[%s17184_s2 + $0x40] sm:$0xff] }
  0x83   : > { %9859 = vset.pattern.permute.xlu0 %v17192_v40 }
  0x84   : > { %1248 = vperm.xlu0 %9859, %v10766_v3  }
  0x86   : > { %9856 = vset.pattern.permute.xlu1 %v17196_v0 }
  0x87   : > { %832 = vperm.xlu1 %9856, %v10860_v17  }
  0x88   : > { %1260 = vperm.xlu0 %9859, %v10773_v4  }
  0x8b   : > { %836 = vperm.xlu1 %9856, %v10761_v2  }
  0x8c   : > { %1268 = vperm.xlu0 %9859, %v10781_v5  }
  0x8f   : > { %844 = vperm.xlu1 %9856, %v10870_v20  }
  0x90   : > { %1276 = vperm.xlu0 %9859, %v10791_v6  }
  0x93   : > { %852 = vperm.xlu1 %9856, %v10879_v22  }
  0x94   : > { %1284 = vperm.xlu0 %9859, %v10801_v8  }
  0x97   : > { %860 = vperm.xlu1 %9856, %v10888_v24  }
  0x98   : > { %1292 = vperm.xlu0 %9859, %v10808_v9  }
  0x9b   : > { %868 = vperm.xlu1 %9856, %v10897_v26  }
  0x9c   : > { %1300 = vperm.xlu0 %9859, %v10815_v10  }
  0x9f   : > { %876 = vperm.xlu1 %9856, %v10906_v28  }
  0xa0   : > { %1308 = vperm.xlu0 %9859, %v10822_v11  }
  0xa1   : > { %v10974_v41 = vpop.permute.xlu1 %484  ;;  %v10976_v42 = vpop.permute.xlu0 %828 }
  0xa3   : > { %884 = vperm.xlu1 %9856, %v10915_v30  }
  0xa4   : > { %1316 = vperm.xlu0 %9859, %v10829_v12  }
  0xa5   : > { %v10980_v43 = vpop.permute.xlu1 %489  ;;  %v10982_v44 = vpop.permute.xlu0 %840 }
  0xa7   : > { %892 = vperm.xlu1 %9856, %v10924_v32  }
  0xa8   : > { %1324 = vperm.xlu0 %9859, %v10836_v13  }
  0xa9   : > { %v10986_v45 = vpop.permute.xlu1 %499  ;;  %v10988_v46 = vpop.permute.xlu0 %848 }
  0xab   : > { %900 = vperm.xlu1 %9856, %v10933_v34  }
  0xac   : > { %1332 = vperm.xlu0 %9859, %v10843_v14  }
  0xad   : > { %v10992_v47 = vpop.permute.xlu1 %509  ;;  %v10994_v48 = vpop.permute.xlu0 %856 }
  0xaf   : > { %908 = vperm.xlu1 %9856, %v10942_v36  }
  0xb0   : > { %1340 = vperm.xlu0 %9859, %v10850_v15  }
  0xb1   : > { %v10998_v49 = vpop.permute.xlu1 %519  ;;  %v11000_v50 = vpop.permute.xlu0 %864 }
  0xb3   : > { %916 = vperm.xlu1 %9856, %v10951_v38  }
  0xb4   : > { %9861 = vset.pattern.permute.xlu0 %v17198_v1 }
  0xb5   : > { %v11004_v51 = vpop.permute.xlu1 %529  ;;  %474 = vperm.xlu0 %9861, %v10766_v3   ;;  %v11007_v52 = vpop.permute.xlu0 %872 }
  0xb7   : > { %9857 = vset.pattern.permute.xlu1 %v17194_v18 }
  0xb8   : > { %1038 = vperm.xlu1 %9857, %v10766_v3  }
  0xb9   : > { %v11011_v53 = vpop.permute.xlu1 %539  ;;  %479 = vperm.xlu0 %9861, %v10860_v17   ;;  %v11014_v54 = vpop.permute.xlu0 %880 }
  0xba   : > { %17416 = vst [vmem:[#allocation11_spill] sm:$0xff] %v11011_v53  ;;  %17417 = vst [vmem:[#allocation12_spill] sm:$0xff] %v11014_v54 }
  0xbc   : > { %1046 = vperm.xlu1 %9857, %v10761_v2  }
  0xbd   : > { %v11017_v55 = vpop.permute.xlu1 %549  ;;  %494 = vperm.xlu0 %9861, %v10870_v20   ;;  %v11020_v56 = vpop.permute.xlu0 %888 }
  0xbe   : > { %17418 = vst [vmem:[#allocation13_spill] sm:$0xff] %v11017_v55  ;;  %17419 = vst [vmem:[#allocation14_spill] sm:$0xff] %v11020_v56 }
  0xc0   : > { %1050 = vperm.xlu1 %9857, %v10773_v4  }
  0xc1   : > { %v11023_v57 = vpop.permute.xlu1 %559  ;;  %504 = vperm.xlu0 %9861, %v10879_v22   ;;  %v11026_v58 = vpop.permute.xlu0 %896 }
  0xc2   : > { %17420 = vst [vmem:[#allocation15_spill] sm:$0xff] %v11023_v57  ;;  %17421 = vst [vmem:[#allocation16_spill] sm:$0xff] %v11026_v58 }
  0xc4   : > { %1058 = vperm.xlu1 %9857, %v10781_v5  }
  0xc5   : > { %v11029_v59 = vpop.permute.xlu1 %569  ;;  %514 = vperm.xlu0 %9861, %v10888_v24   ;;  %v11032_v60 = vpop.permute.xlu0 %904 }
  0xc6   : > { %17422 = vst [vmem:[#allocation17_spill] sm:$0xff] %v11029_v59  ;;  %17423 = vst [vmem:[#allocation18_spill] sm:$0xff] %v11032_v60 }
  0xc8   : > { %1066 = vperm.xlu1 %9857, %v10791_v6  }
  0xc9   : > { %v11035_v61 = vpop.permute.xlu1 %579  ;;  %524 = vperm.xlu0 %9861, %v10897_v26   ;;  %v11038_v62 = vpop.permute.xlu0 %912 }
  0xca   : > { %17424 = vst [vmem:[#allocation19_spill] sm:$0xff] %v11035_v61  ;;  %17425 = vst [vmem:[#allocation20_spill] sm:$0xff] %v11038_v62 }
  0xcc   : > { %1074 = vperm.xlu1 %9857, %v10801_v8  }
  0xcd   : > { %v11041_v63 = vpop.permute.xlu1 %589  ;;  %534 = vperm.xlu0 %9861, %v10906_v28   ;;  %v11044_v3 = vpop.permute.xlu0 %920 }
  0xce   : > { %17426 = vst [vmem:[#allocation21_spill] sm:$0xff] %v11041_v63  ;;  %17427 = vst [vmem:[#allocation22_spill] sm:$0xff] %v11044_v3  ;;  %v17209_v63 = vmov 0.0  }
  0xd0   : > { %1082 = vperm.xlu1 %9857, %v10808_v9  }
  0xd1   : > { %v11047_v4 = vpop.permute.xlu1 %666  ;;  %544 = vperm.xlu0 %9861, %v10915_v30  }
  0xd2   : > { %v11050_v5 = vpop.permute.xlu0 %1042 }
  0xd4   : > { %1090 = vperm.xlu1 %9857, %v10815_v10  }
  0xd5   : > { %v11053_v6 = vpop.permute.xlu1 %676  ;;  %554 = vperm.xlu0 %9861, %v10924_v32  }
  0xd6   : > { %v11056_v8 = vpop.permute.xlu0 %1054 }
  0xd8   : > { %1098 = vperm.xlu1 %9857, %v10822_v11  }
  0xd9   : > { %v11059_v16 = vpop.permute.xlu1 %686  ;;  %564 = vperm.xlu0 %9861, %v10933_v34  }
  0xda   : > { %v11062_v9 = vpop.permute.xlu0 %1062 }
  0xdc   : > { %1106 = vperm.xlu1 %9857, %v10829_v12  }
  0xdd   : > { %v11065_v19 = vpop.permute.xlu1 %696  ;;  %574 = vperm.xlu0 %9861, %v10942_v36  }
  0xde   : > { %v11068_v10 = vpop.permute.xlu0 %1070 }
  0xe0   : > { %1114 = vperm.xlu1 %9857, %v10836_v13   ;;  %v450_v13 = vld [vmem:[%s17184_s2 + $0x10] sm:$0xff] }
  0xe1   : > { %v11071_v21 = vpop.permute.xlu1 %706  ;;  %584 = vperm.xlu0 %9861, %v10951_v38  }
  0xe2   : > { %v11074_v11 = vpop.permute.xlu0 %1078 }
  0xe3   : > { %17428 = vst [vmem:[#allocation23_spill] sm:$0xff] %v11074_v11 }
  0xe4   : > { %1122 = vperm.xlu1 %9857, %v10843_v14   ;;  %v452_v14 = vld [vmem:[%s17184_s2 + $0x20] sm:$0xff] }
  0xe5   : > { %v11080_v12 = vpop.permute.xlu1 %716  ;;  %661 = vperm.xlu0 %9861, %v448_v23  }
  0xe6   : > { %v11082_v25 = vpop.permute.xlu0 %1086 }
  0xe7   : > { %17429 = vst [vmem:[#allocation24_spill] sm:$0xff] %v11082_v25 }
  0xe8   : > { %1130 = vperm.xlu1 %9857, %v10850_v15   ;;  %v454_v15 = vld [vmem:[%s17184_s2 + $0x30] sm:$0xff] }
  0xe9   : > { %v11088_v27 = vpop.permute.xlu1 %726  ;;  %671 = vperm.xlu0 %9861, %v450_v13   ;;  %v458_v13 = vld [vmem:[%s17184_s2 + $0x50] sm:$0xff] }
  0xea   : > { %17430 = vst [vmem:[#allocation25_spill] sm:$0xff] %v11088_v27  ;;  %v11090_v29 = vpop.permute.xlu0 %1094 }
  0xeb   : > { %17431 = vst [vmem:[#allocation26_spill] sm:$0xff] %v11090_v29 }
  0xec   : > { %9860 = vset.pattern.permute.xlu1 %v17192_v40 }
  0xed   : > { %v11096_v31 = vpop.permute.xlu1 %736  ;;  %1252 = vperm.xlu1 %9860, %v10860_v17   ;;  %681 = vperm.xlu0 %9861, %v452_v14  }
  0xee   : > { %17432 = vst [vmem:[#allocation27_spill] sm:$0xff] %v11096_v31  ;;  %v11099_v33 = vpop.permute.xlu0 %1102 }
  0xef   : > { %17433 = vst [vmem:[#allocation28_spill] sm:$0xff] %v11099_v33 }
  0xf1   : > { %v11104_v35 = vpop.permute.xlu1 %746  ;;  %1256 = vperm.xlu1 %9860, %v10761_v2   ;;  %691 = vperm.xlu0 %9861, %v454_v15   ;;  %v460_v15 = vld [vmem:[%s17184_s2 + $0x60] sm:$0xff] }
  0xf2   : > { %17434 = vst [vmem:[#allocation29_spill] sm:$0xff] %v11104_v35  ;;  %v11107_v37 = vpop.permute.xlu0 %1110 }
  0xf3   : > { %17435 = vst [vmem:[#allocation30_spill] sm:$0xff] %v11107_v37 }
  0xf5   : > { %v11112_v23 = vpop.permute.xlu1 %756  ;;  %1264 = vperm.xlu1 %9860, %v10870_v20   ;;  %701 = vperm.xlu0 %9861, %v456_v39   ;;  %v462_v20 = vld [vmem:[%s17184_s2 + $0x70] sm:$0xff] }
  0xf6   : > { %17436 = vst [vmem:[#allocation31_spill] sm:$0xff] %v11112_v23  ;;  %v11115_v17 = vpop.permute.xlu0 %1118 }
  0xf7   : > { %17437 = vst [vmem:[#allocation32_spill] sm:$0xff] %v11115_v17 }
  0xf9   : > { %v11120_v14 = vpop.permute.xlu1 %766  ;;  %1272 = vperm.xlu1 %9860, %v10879_v22   ;;  %711 = vperm.xlu0 %9861, %v458_v13   ;;  %v464_v13 = vld [vmem:[%s17184_s2 + $0x80] sm:$0xff] }
  0xfa   : > { %17438 = vst [vmem:[#allocation33_spill] sm:$0xff] %v11120_v14  ;;  %v11123_v2 = vpop.permute.xlu0 %1126 }
  0xfb   : > { %17439 = vst [vmem:[#allocation34_spill] sm:$0xff] %v11123_v2 }
  0xfd   : > { %v11128_v40 = vpop.permute.xlu1 %776  ;;  %1280 = vperm.xlu1 %9860, %v10888_v24   ;;  %721 = vperm.xlu0 %9861, %v460_v15   ;;  %v466_v15 = vld [vmem:[%s17184_s2 + $0x90] sm:$0xff] }
  0xfe   : > { %17440 = vst [vmem:[#allocation35_spill] sm:$0xff] %v11128_v40 }
  0xff   : > { %v11134_v39 = vpop.permute.xlu0 %1248 }
 0x101   : > { %1288 = vperm.xlu1 %9860, %v10897_v26   ;;  %731 = vperm.xlu0 %9861, %v462_v20   ;;  %v468_v20 = vld [vmem:[%s17184_s2 + $0xa0] sm:$0xff] }
 0x102   : > { %v11137_v22 = vpop.permute.xlu1 %832 }
 0x103   : > { %v11142_v18 = vpop.permute.xlu0 %1260 }
 0x105   : > { %1296 = vperm.xlu1 %9860, %v10906_v28   ;;  %741 = vperm.xlu0 %9861, %v464_v13   ;;  %v470_v13 = vld [vmem:[%s17184_s2 + $0xb0] sm:$0xff] }
 0x106   : > { %v11145_v24 = vpop.permute.xlu1 %836 }
 0x107   : > { %v11150_v0 = vpop.permute.xlu0 %1268 }
 0x109   : > { %1304 = vperm.xlu1 %9860, %v10915_v30   ;;  %751 = vperm.xlu0 %9861, %v466_v15  }
 0x10a   : > { %v11153_v26 = vpop.permute.xlu1 %844 }
 0x10b   : > { %v11158_v1 = vpop.permute.xlu0 %1276 }
 0x10d   : > { %1312 = vperm.xlu1 %9860, %v10924_v32   ;;  %761 = vperm.xlu0 %9861, %v468_v20  }
 0x10e   : > { %v11161_v28 = vpop.permute.xlu1 %852 }
 0x10f   : > { %v11166_v2 = vpop.permute.xlu0 %1284 }
 0x111   : > { %1320 = vperm.xlu1 %9860, %v10933_v34   ;;  %771 = vperm.xlu0 %9861, %v470_v13   ;;  %v17446_v13 = vmov 0  }
 0x112   : > { %v11169_v30 = vpop.permute.xlu1 %860 }
 0x113   : > { %v11171_v15 = vpop.permute.xlu0 %1292 }
 0x114   : > { %17441 = vst [vmem:[#allocation36_spill] sm:$0xff] %v11171_v15 }
 0x115   : > { %1328 = vperm.xlu1 %9860, %v10942_v36  }
 0x116   : > { %v11174_v3 = vpop.permute.xlu1 %868 }
 0x117   : > { %v11176_v32 = vpop.permute.xlu0 %1300 }
 0x118   : > { %17442 = vst [vmem:[#allocation37_spill] sm:$0xff] %v11176_v32 }
 0x119   : > { %1336 = vperm.xlu1 %9860, %v10951_v38   ;;  %v17215_v38 = vlaneseq }
 0x11a   : > { %v11179_v20 = vpop.permute.xlu1 %876 }
 0x11b   : > { %17443 = vst [vmem:[#allocation38_spill] sm:$0xff] %v11179_v20  ;;  %v11181_v40 = vpop.permute.xlu0 %1308  ;;  %v11199_v37 = vshrl.u32 %v17215_v38, 7 }
 0x11c   : > { %17444 = vst [vmem:[#allocation39_spill] sm:$0xff] %v11181_v40 }
 0x11d   : > { %9863 = vrot.lane.b32.xlu1 %v17209_v63, %s17406_s22  ;;  %17452 = vst [vmem:[#allocation46_spill] sm:$0xff] %v11199_v37  ;;  %v17224_v23 = vsub.s32 4, %v11199_v37  ;;  %v11228_v35 = vsub.s32 2, %v11199_v37  ;;  %v11232_v33 = vsub.s32 3, %v11199_v37 }
 0x11e   : > { %v11185_v34 = vpop.permute.xlu1 %884  ;;  %10022 = vset.pattern.permute.xlu1 %v17446_v13  ;;  %v11206_v13 = vsub.s32 0, %v11199_v37 }
 0x11f   : > { %17445 = vst [vmem:[#allocation40_spill] sm:$0xff] %v11185_v34  ;;  %v11188_v36 = vpop.permute.xlu0 %1316  ;;  %17458 = vst [vmem:[#allocation52_spill] sm:$0xff] %v11228_v35  ;;  %v1136_v29 = vrot.slane %v10793_v7, %v11228_v35 }
 0x120   : > { %17447 = vst [vmem:[#allocation41_spill] sm:$0xff] %v11188_v36  ;;  %17455 = vst [vmem:[#allocation49_spill] sm:$0xff] %v11206_v13  ;;  %v11210_v36 = vsub.s32 1, %v11199_v37  ;;  %v596_v38 = vrot.slane %v10793_v7, %v11206_v13 }
 0x121   : > { %17459 = vst [vmem:[#allocation53_spill] sm:$0xff] %v11232_v33  ;;  %v11276_v55 = vrot.slane %v1136_v29, %v11228_v35 }
 0x122   : > { %v11190_v17 = vpop.permute.xlu1 %892  ;;  %17456 = vst [vmem:[#allocation50_spill] sm:$0xff] %v11210_v36  ;;  %v11238_v58 = vrot.slane %v596_v38, %v11206_v13 }
 0x123   : > { %17448 = vst [vmem:[#allocation42_spill] sm:$0xff] %v11190_v17  ;;  %v11192_v14 = vpop.permute.xlu0 %1324  ;;  %v17464_v17 = vsub.s32 6, %v11199_v37  ;;  %17466 = vst [vmem:[#allocation58_spill] sm:$0xff] %v11276_v55 }
 0x124   : > { %17449 = vst [vmem:[#allocation43_spill] sm:$0xff] %v11192_v14  ;;  %v17228_v14 = vsub.s32 5, %v11199_v37  ;;  %17460 = vst [vmem:[#allocation54_spill] sm:$0xff] %v11238_v58  ;;  %v617_v38 = vmul.f32 %v11238_v58, %v10980_v43  ;;  %v621_v34 = vmul.f32 %v11238_v58, %v10986_v45 }
 0x125   : > { %v1140_v56 = vrot.slane %v10793_v7, %v17464_v17 }
 0x126   : > { %v11194_v62 = vpop.permute.xlu1 %900  ;;  %v930_v59 = vrot.slane %v10793_v7, %v17228_v14  ;;  %v785_v32 = vadd.f32 %v11053_v6, %v617_v38 }
 0x127   : > { %17450 = vst [vmem:[#allocation44_spill] sm:$0xff] %v11194_v62  ;;  %v11196_v61 = vpop.permute.xlu0 %1332 }
 0x128   : > { %17451 = vst [vmem:[#allocation45_spill] sm:$0xff] %v11196_v61  ;;  %v600_v61 = vrot.slane %v10793_v7, %v17224_v23 }
 0x12a   : > { %v11201_v60 = vpop.permute.xlu1 %908  ;;  %v11241_v57 = vrot.slane %v600_v61, %v11206_v13  ;;  %v17465_v13 = vsub.s32 7, %v11199_v37  ;;  %v11279_v37 = vrot.slane %v1140_v56, %v11228_v35 }
 0x12b   : > { %17453 = vst [vmem:[#allocation47_spill] sm:$0xff] %v11201_v60  ;;  %v11203_v63 = vpop.permute.xlu0 %1340  ;;  %v926_v60 = vrot.slane %v10793_v7, %v11210_v36 }
 0x12c   : > { %17454 = vst [vmem:[#allocation48_spill] sm:$0xff] %v11203_v63  ;;  %17461 = vst [vmem:[#allocation55_spill] sm:$0xff] %v11241_v57  ;;  %v618_v61 = vmul.f32 %v11241_v57, %v10980_v43  ;;  %v622_v43 = vmul.f32 %v11241_v57, %v10986_v45  ;;  %v789_v45 = vadd.f32 %v11059_v16, %v621_v34 }
 0x12d   : > { %v11246_v14 = vrot.slane %v926_v60, %v11210_v36  ;;  %v1346_v60 = vrot.slane %v10793_v7, %v11232_v33  ;;  %17467 = vst [vmem:[#allocation59_spill] sm:$0xff] %v11279_v37  ;;  %v625_v34 = vmul.f32 %v11238_v58, %v10992_v47 }
 0x12e   : > { %v11213_v62 = vpop.permute.xlu1 %916  ;;  %v786_v17 = vadd.f32 %v11053_v6, %v618_v61  ;;  %v790_v29 = vadd.f32 %v11059_v16, %v622_v43  ;;  %v626_v16 = vmul.f32 %v11241_v57, %v10992_v47 }
 0x12f   : > { %17457 = vst [vmem:[#allocation51_spill] sm:$0xff] %v11213_v62  ;;  %17462 = vst [vmem:[#allocation56_spill] sm:$0xff] %v11246_v14  ;;  %v11249_v62 = vrot.slane %v930_v59, %v11210_v36  ;;  %v1350_v59 = vrot.slane %v10793_v7, %v17465_v13  ;;  %v947_v7 = vmul.f32 %v11246_v14, %v10982_v44 }
 0x130   : > { %v11220_v63 = vpop.permute.xlu0 %474  ;;  %v11286_v13 = vrot.slane %v1346_v60, %v11232_v33  ;;  %v951_v60 = vmul.f32 %v11246_v14, %v10988_v46 }
 0x131   : > { %17463 = vst [vmem:[#allocation57_spill] sm:$0xff] %v11249_v62  ;;  %v948_v6 = vmul.f32 %v11249_v62, %v10982_v44  ;;  %v11289_v38 = vrot.slane %v1350_v59, %v11232_v33  ;;  %v995_v61 = vadd.f32 %v947_v7, %v785_v32  ;;  %v952_v59 = vmul.f32 %v11249_v62, %v10988_v46 }
 0x132   : > { %17468 = vst [vmem:[#allocation60_spill] sm:$0xff] %v11286_v13  ;;  %v1367_v32 = vmul.f32 %v11286_v13, %v11142_v18  ;;  %v793_v46 = vadd.f32 %v11065_v19, %v625_v34  ;;  %v794_v33 = vadd.f32 %v11065_v19, %v626_v16 }
 0x133   : > { %v11235_v23 = vpop.permute.xlu1 %1038  ;;  %17469 = vst [vmem:[#allocation61_spill] sm:$0xff] %v11289_v38  ;;  %v996_v35 = vadd.f32 %v948_v6, %v786_v17  ;;  %v1368_v17 = vmul.f32 %v11289_v38, %v11142_v18  ;;  %v999_v6 = vadd.f32 %v951_v60, %v789_v45  ;;  %v955_v18 = vmul.f32 %v11246_v14, %v10994_v48 }
 0x134   : > { %v11243_v40 = vpop.permute.xlu0 %479  ;;  %v1372_v19 = vmul.f32 %v11289_v38, %v11150_v0 }
 0x135   : > { %v1003_v60 = vadd.f32 %v955_v18, %v793_v46 }
 0x137   : > { %v11265_v36 = vpop.permute.xlu1 %1046 }
 0x138   : > { %v11269_v31 = vpop.permute.xlu0 %494 }
 0x13b   : > { %v1051_v56 = vpop.permute.xlu1 %1050 }
 0x13c   : > { %v1157_v25 = vmul.f32 %v11276_v55, %v1051_v56  ;;  %v1158_v27 = vmul.f32 %v11279_v37, %v1051_v56  ;;  %v11296_v44 = vpop.permute.xlu0 %504  ;;  %v1000_v56 = vadd.f32 %v952_v59, %v790_v29 }
 0x13e   : > { %v1205_v43 = vadd.f32 %v1157_v25, %v995_v61  ;;  %v1206_v7 = vadd.f32 %v1158_v27, %v996_v35  ;;  %v956_v25 = vmul.f32 %v11249_v62, %v10994_v48  ;;  %v1371_v27 = vmul.f32 %v11286_v13, %v11150_v0 }
 0x13f   : > { %v1059_v54 = vpop.permute.xlu1 %1058 }
 0x140   : > { %v1415_v20 = vadd.f32 %v1367_v32, %v1205_v43  ;;  %v1416_v53 = vadd.f32 %v1368_v17, %v1206_v7  ;;  %v1161_v47 = vmul.f32 %v11276_v55, %v1059_v54  ;;  %v1162_v15 = vmul.f32 %v11279_v37, %v1059_v54  ;;  %v11316_v11 = vpop.permute.xlu0 %514 }
 0x141   : > { %v1004_v54 = vadd.f32 %v956_v25, %v794_v33  ;;  %v1375_v33 = vmul.f32 %v11286_v13, %v11158_v1 }
 0x142   : > { %v1463_v35 = vmax.f32 %v1415_v20, 0.0  ;;  %v1464_v45 = vmax.f32 %v1416_v53, 0.0  ;;  %v1209_v29 = vadd.f32 %v1161_v47, %v999_v6  ;;  %v1210_v61 = vadd.f32 %v1162_v15, %v1000_v56 }
 0x143   : > { %v1067_v59 = vpop.permute.xlu1 %1066  ;;  %v1376_v15 = vmul.f32 %v11289_v38, %v11158_v1 }
 0x144   : > { %1479 = vst [vmem:[%s11326_s25 + $0x30] sm:$0xff] %v1463_v35  ;;  %1480 = vst [vmem:[%s11326_s25 + $0x38] sm:$0xff] %v1464_v45  ;;  %v1419_v48 = vadd.f32 %v1371_v27, %v1209_v29  ;;  %v1420_v34 = vadd.f32 %v1372_v19, %v1210_v61  ;;  %v1165_v16 = vmul.f32 %v11276_v55, %v1067_v59  ;;  %v11332_v53 = vpop.permute.xlu0 %524 }
 0x145   : > { %v1166_v0 = vmul.f32 %v11279_v37, %v1067_v59  ;;  %v614_v59 = vmul.f32 %v11241_v57, %v11243_v40 }
 0x146   : > { %v1467_v20 = vmax.f32 %v1419_v48, 0.0  ;;  %v1468_v32 = vmax.f32 %v1420_v34, 0.0  ;;  %v1213_v17 = vadd.f32 %v1165_v16, %v1003_v60  ;;  %v615_v34 = vmul.f32 %v11238_v58, %v10974_v41 }
 0x147   : > { %v1214_v43 = vadd.f32 %v1166_v0, %v1004_v54  ;;  %v11338_v7 = vpop.permute.xlu1 %1074  ;;  %v613_v54 = vmul.f32 %v11238_v58, %v11243_v40  ;;  %v616_v16 = vmul.f32 %v11241_v57, %v10974_v41  ;;  %v941_v0 = vmul.f32 %v11246_v14, %v10976_v42 }
 0x148   : > { %1483 = vst [vmem:[%s11326_s25 + $0x50] sm:$0xff] %v1467_v20  ;;  %1484 = vst [vmem:[%s11326_s25 + $0x58] sm:$0xff] %v1468_v32  ;;  %v1423_v6 = vadd.f32 %v1375_v33, %v1213_v17  ;;  %v11342_v46 = vpop.permute.xlu0 %534  ;;  %v942_v33 = vmul.f32 %v11249_v62, %v10976_v42  ;;  %v11384_v40 = vmul.f32 %v11241_v57, %v10998_v49 }
 0x149   : > { %v1424_v56 = vadd.f32 %v1376_v15, %v1214_v43  ;;  %v11380_v15 = vmul.f32 %v11238_v58, %v10998_v49  ;;  %v11388_v20 = vmul.f32 %v11246_v14, %v11000_v50  ;;  %v611_v41 = vmul.f32 %v11238_v58, %v11220_v63 }
 0x14a   : > { %v1471_v47 = vmax.f32 %v1423_v6, 0.0  ;;  %v612_v32 = vmul.f32 %v11241_v57, %v11220_v63  ;;  %v1153_v42 = vmul.f32 %v11276_v55, %v11050_v5  ;;  %v1154_v43 = vmul.f32 %v11279_v37, %v11050_v5 }
 0x14b   : > { %v1472_v18 = vmax.f32 %v1424_v56, 0.0  ;;  %v11344_v25 = vpop.permute.xlu1 %1082  ;;  %v781_v49 = vadd.f32 %v11047_v4, %v613_v54  ;;  %v782_v6 = vadd.f32 %v11047_v4, %v614_v59  ;;  %v11408_v63 = vmul.f32 %v11279_v37, %v11056_v8 }
 0x14c   : > { %1487 = vst [vmem:[%s11326_s25 + $0x70] sm:$0xff] %v1471_v47  ;;  %v11348_v27 = vpop.permute.xlu0 %544  ;;  %v11404_v47 = vmul.f32 %v11276_v55, %v11056_v8  ;;  %v11416_v5 = vmul.f32 %v11279_v37, %v11062_v9  ;;  %v943_v4 = vmul.f32 %v11246_v14, %v11137_v22  ;;  %v944_v54 = vmul.f32 %v11249_v62, %v11137_v22 }
 0x14d   : > { %1488 = vst [vmem:[%s11326_s25 + $0x78] sm:$0xff] %v1472_v18  ;;  %v1151_v8 = vmul.f32 %v11276_v55, %v11235_v23  ;;  %v1152_v59 = vmul.f32 %v11279_v37, %v11235_v23  ;;  %v945_v23 = vmul.f32 %v11246_v14, %v11145_v24 }
 0x14f   : > { %v11350_v1 = vpop.permute.xlu1 %1090 }
 0x150   : > { %17470 = vst [vmem:[#allocation62_spill] sm:$0xff] %v11350_v1  ;;  %v11352_v19 = vpop.permute.xlu0 %554 }
 0x151   : > { %17471 = vst [vmem:[#allocation63_spill] sm:$0xff] %v11352_v19 }
 0x153   : > { %v11354_v35 = vpop.permute.xlu1 %1098 }
 0x154   : > { %17472 = vst [vmem:[#allocation64_spill] sm:$0xff] %v11354_v35  ;;  %v11356_v45 = vpop.permute.xlu0 %564 }
 0x155   : > { %17473 = vst [vmem:[#allocation65_spill] sm:$0xff] %v11356_v45  ;;  %v992_v45 = vadd.f32 %v944_v54, %v782_v6 }
 0x157   : > { %v11358_v29 = vpop.permute.xlu1 %1106 }
 0x158   : > { %17474 = vst [vmem:[#allocation66_spill] sm:$0xff] %v11358_v29  ;;  %v11360_v61 = vpop.permute.xlu0 %574 }
 0x159   : > { %17475 = vst [vmem:[#allocation67_spill] sm:$0xff] %v11360_v61  ;;  %v1362_v61 = vmul.f32 %v11289_v38, %v11134_v39 }
 0x15b   : > { %v11362_v60 = vpop.permute.xlu1 %1114 }
 0x15c   : > { %17476 = vst [vmem:[#allocation68_spill] sm:$0xff] %v11362_v60  ;;  %v11368_v48 = vpop.permute.xlu0 %584  ;;  %v991_v60 = vadd.f32 %v943_v4, %v781_v49  ;;  %v620_v49 = vmul.f32 %v11241_v57, %v11269_v31  ;;  %v1202_v4 = vadd.f32 %v1154_v43, %v992_v45  ;;  %v624_v45 = vmul.f32 %v11241_v57, %v11296_v44 }
 0x15d   : > { %17477 = vst [vmem:[#allocation69_spill] sm:$0xff] %v11368_v48 }
 0x15f   : > { %v11394_v17 = vpop.permute.xlu1 %1122 }
 0x160   : > { %17478 = vst [vmem:[#allocation70_spill] sm:$0xff] %v11394_v17  ;;  %v662_v56 = vpop.permute.xlu0 %661  ;;  %v11412_v17 = vmul.f32 %v11276_v55, %v11062_v9  ;;  %v1361_v9 = vmul.f32 %v11286_v13, %v11134_v39  ;;  %v619_v39 = vmul.f32 %v11238_v58, %v11269_v31  ;;  %v1156_v31 = vmul.f32 %v11279_v37, %v11265_v36 }
 0x161   : > { %v779_v18 = vadd.f32 %v662_v56, %v611_v41  ;;  %v780_v48 = vadd.f32 %v662_v56, %v612_v32 }
 0x163   : > { %v989_v41 = vadd.f32 %v941_v0, %v779_v18  ;;  %v990_v32 = vadd.f32 %v942_v33, %v780_v48  ;;  %v11426_v56 = vpop.permute.xlu1 %1130  ;;  %v946_v48 = vmul.f32 %v11249_v62, %v11145_v24  ;;  %v949_v0 = vmul.f32 %v11246_v14, %v11153_v26 }
 0x164   : > { %17479 = vst [vmem:[#allocation71_spill] sm:$0xff] %v11426_v56  ;;  %v672_v29 = vpop.permute.xlu0 %671  ;;  %v950_v33 = vmul.f32 %v11249_v62, %v11153_v26  ;;  %v1201_v24 = vadd.f32 %v1153_v42, %v991_v60 }
 0x165   : > { %v1199_v22 = vadd.f32 %v1151_v8, %v989_v41  ;;  %v1200_v19 = vadd.f32 %v1152_v59, %v990_v32  ;;  %v783_v35 = vadd.f32 %v672_v29, %v615_v34  ;;  %v784_v1 = vadd.f32 %v672_v29, %v616_v16 }
 0x166   : > { %v1155_v32 = vmul.f32 %v11276_v55, %v11265_v36 }
 0x167   : > { %v1409_v34 = vadd.f32 %v1361_v9, %v1199_v22  ;;  %v1410_v29 = vadd.f32 %v1362_v61, %v1200_v19  ;;  %v993_v16 = vadd.f32 %v945_v23, %v783_v35  ;;  %v994_v6 = vadd.f32 %v946_v48, %v784_v1 }
 0x168   : > { %v1253_v18 = vpop.permute.xlu1 %1252  ;;  %v682_v54 = vpop.permute.xlu0 %681  ;;  %v623_v1 = vmul.f32 %v11238_v58, %v11296_v44  ;;  %v953_v44 = vmul.f32 %v11246_v14, %v11161_v28 }
 0x169   : > { %v1457_v8 = vmax.f32 %v1409_v34, 0.0  ;;  %v1458_v59 = vmax.f32 %v1410_v29, 0.0  ;;  %v1363_v26 = vmul.f32 %v11286_v13, %v1253_v18  ;;  %v1364_v41 = vmul.f32 %v11289_v38, %v1253_v18 }
 0x16a   : > { %v787_v19 = vadd.f32 %v682_v54, %v619_v39  ;;  %v788_v35 = vadd.f32 %v682_v54, %v620_v49  ;;  %v1203_v22 = vadd.f32 %v1155_v32, %v993_v16  ;;  %v1204_v23 = vadd.f32 %v1156_v31, %v994_v6 }
 0x16b   : > { %1473 = vst [vmem:[%s11326_s25] sm:$0xff] %v1457_v8  ;;  %1474 = vst [vmem:[%s11326_s25 + $0x8] sm:$0xff] %v1458_v59  ;;  %v1411_v61 = vadd.f32 %v1363_v26, %v1201_v24  ;;  %v1412_v60 = vadd.f32 %v1364_v41, %v1202_v4  ;;  %v954_v29 = vmul.f32 %v11249_v62, %v11161_v28 }
 0x16c   : > { %v997_v42 = vadd.f32 %v949_v0, %v787_v19  ;;  %v998_v43 = vadd.f32 %v950_v33, %v788_v35  ;;  %v1257_v9 = vpop.permute.xlu1 %1256  ;;  %v692_v36 = vpop.permute.xlu0 %691  ;;  %v627_v33 = vmul.f32 %v11238_v58, %v11316_v11  ;;  %v628_v16 = vmul.f32 %v11241_v57, %v11316_v11 }
 0x16d   : > { %v1459_v48 = vmax.f32 %v1411_v61, 0.0  ;;  %v1460_v39 = vmax.f32 %v1412_v60, 0.0  ;;  %v1365_v49 = vmul.f32 %v11286_v13, %v1257_v9  ;;  %v1366_v34 = vmul.f32 %v11289_v38, %v1257_v9 }
 0x16e   : > { %v791_v0 = vadd.f32 %v692_v36, %v623_v1  ;;  %v792_v18 = vadd.f32 %v692_v36, %v624_v45  ;;  %v1207_v59 = vadd.f32 %v11404_v47, %v997_v42  ;;  %v1208_v28 = vadd.f32 %v11408_v63, %v998_v43 }
 0x16f   : > { %1475 = vst [vmem:[%s11326_s25 + $0x10] sm:$0xff] %v1459_v48  ;;  %1476 = vst [vmem:[%s11326_s25 + $0x18] sm:$0xff] %v1460_v39  ;;  %v1413_v6 = vadd.f32 %v1365_v49, %v1203_v22  ;;  %v1414_v24 = vadd.f32 %v1366_v34, %v1204_v23  ;;  %v957_v19 = vmul.f32 %v11246_v14, %v11169_v30 }
 0x170   : > { %v1001_v4 = vadd.f32 %v953_v44, %v791_v0  ;;  %v1002_v54 = vadd.f32 %v954_v29, %v792_v18  ;;  %v1265_v8 = vpop.permute.xlu1 %1264  ;;  %v702_v26 = vpop.permute.xlu0 %701  ;;  %v958_v35 = vmul.f32 %v11249_v62, %v11169_v30  ;;  %v960_v47 = vmul.f32 %v11249_v62, %v11000_v50 }
 0x171   : > { %v1461_v41 = vmax.f32 %v1413_v6, 0.0  ;;  %v1462_v32 = vmax.f32 %v1414_v24, 0.0  ;;  %v1369_v31 = vmul.f32 %v11286_v13, %v1265_v8  ;;  %v1370_v11 = vmul.f32 %v11289_v38, %v1265_v8 }
 0x172   : > { %v795_v1 = vadd.f32 %v702_v26, %v627_v33  ;;  %v796_v45 = vadd.f32 %v702_v26, %v628_v16  ;;  %v798_v63 = vadd.f32 %v11071_v21, %v11384_v40  ;;  %v1211_v22 = vadd.f32 %v11412_v17, %v1001_v4 }
 0x173   : > { %1477 = vst [vmem:[%s11326_s25 + $0x20] sm:$0xff] %v1461_v41  ;;  %1478 = vst [vmem:[%s11326_s25 + $0x28] sm:$0xff] %v1462_v32  ;;  %v1417_v61 = vadd.f32 %v1369_v31, %v1207_v59  ;;  %v1418_v60 = vadd.f32 %v1370_v11, %v1208_v28  ;;  %v1212_v30 = vadd.f32 %v11416_v5, %v1002_v54 }
 0x174   : > { %v1005_v42 = vadd.f32 %v957_v19, %v795_v1  ;;  %v1006_v43 = vadd.f32 %v958_v35, %v796_v45  ;;  %v1273_v9 = vpop.permute.xlu1 %1272  ;;  %v712_v40 = vpop.permute.xlu0 %711  ;;  %v1167_v39 = vmul.f32 %v11276_v55, %v11068_v10  ;;  %v1168_v49 = vmul.f32 %v11279_v37, %v11068_v10 }
 0x175   : > { %v1465_v23 = vmax.f32 %v1417_v61, 0.0  ;;  %v1466_v36 = vmax.f32 %v1418_v60, 0.0  ;;  %v1373_v50 = vmul.f32 %v11286_v13, %v1273_v9  ;;  %v1374_v48 = vmul.f32 %v11289_v38, %v1273_v9 }
 0x176   : > { %v797_v34 = vadd.f32 %v11071_v21, %v11380_v15  ;;  %v631_v17 = vmul.f32 %v11238_v58, %v11332_v53  ;;  %v1008_v5 = vadd.f32 %v960_v47, %v798_v63  ;;  %v1170_v44 = vmul.f32 %v11279_v37, %v11338_v7 }
 0x177   : > { %1481 = vst [vmem:[%s11326_s25 + $0x40] sm:$0xff] %v1465_v23  ;;  %1482 = vst [vmem:[%s11326_s25 + $0x48] sm:$0xff] %v1466_v36  ;;  %v1421_v29 = vadd.f32 %v1373_v50, %v1211_v22  ;;  %v1422_v0 = vadd.f32 %v1374_v48, %v1212_v30  ;;  %v1169_v18 = vmul.f32 %v11276_v55, %v11338_v7 }
 0x178   : > { %v799_v10 = vadd.f32 %v712_v40, %v631_v17  ;;  %v1281_v33 = vpop.permute.xlu1 %1280  ;;  %v1215_v16 = vadd.f32 %v1167_v39, %v1005_v42  ;;  %v1216_v21 = vadd.f32 %v1168_v49, %v1006_v43  ;;  %v633_v54 = vmul.f32 %v11238_v58, %v11004_v51  ;;  %v722_v36 = vpop.permute.xlu0 %721 }
 0x179   : > { %v1469_v15 = vmax.f32 %v1421_v29, 0.0  ;;  %v1470_v6 = vmax.f32 %v1422_v0, 0.0  ;;  %v1377_v24 = vmul.f32 %v11286_v13, %v1281_v33  ;;  %v1378_v4 = vmul.f32 %v11289_v38, %v1281_v33 }
 0x17a   : > { %v1007_v8 = vadd.f32 %v11388_v20, %v797_v34  ;;  %v961_v59 = vmul.f32 %v11246_v14, %v11174_v3  ;;  %v1218_v28 = vadd.f32 %v1170_v44, %v1008_v5  ;;  %v632_v41 = vmul.f32 %v11241_v57, %v11332_v53  ;;  %v17480_v53 = vld [vmem:[#allocation23_spill] sm:$0xff]  ;;  %v17481_v34 = vld [vmem:[#allocation36_spill] sm:$0xff] }
 0x17b   : > { %1485 = vst [vmem:[%s11326_s25 + $0x60] sm:$0xff] %v1469_v15  ;;  %1486 = vst [vmem:[%s11326_s25 + $0x68] sm:$0xff] %v1470_v6  ;;  %v11509_v7 = vadd.f32 %v1377_v24, %v1215_v16  ;;  %v11511_v26 = vadd.f32 %v1378_v4, %v1216_v21  ;;  %v801_v11 = vadd.f32 %v11080_v12, %v633_v54  ;;  %v17482_v0 = vmov 0.0   ;;  %v17485_v4 = vld [vmem:[#allocation12_spill] sm:$0xff] }
 0x17c   : > { %v1217_v32 = vadd.f32 %v1169_v18, %v1007_v8  ;;  %v1289_v31 = vpop.permute.xlu1 %1288  ;;  %v1380_v20 = vmul.f32 %v11289_v38, %v11166_v2  ;;  %v1009_v19 = vadd.f32 %v961_v59, %v799_v10  ;;  %v963_v35 = vmul.f32 %v11246_v14, %v11007_v52  ;;  %v17483_v18 = vld [vmem:[#allocation11_spill] sm:$0xff]  ;;  %v17484_v10 = vld [vmem:[#allocation38_spill] sm:$0xff]  ;;  %v17486_v8 = vld [vmem:[#allocation25_spill] sm:$0xff] }
 0x17d   : > { %1561 = vrot.lane.b32.xlu1 %v11511_v26, %s17406_s22  ;;  %v1379_v1 = vmul.f32 %v11286_v13, %v11166_v2  ;;  %v800_v45 = vadd.f32 %v712_v40, %v632_v41  ;;  %1559 = vrot.lane.b32.xlu0 %v11509_v7, %s17406_s22  ;;  %v1171_v47 = vmul.f32 %v11276_v55, %v17480_v53 }
 0x17e   : > { %v11528_v63 = vadd.f32 %v1380_v20, %v1218_v28  ;;  %v1173_v61 = vmul.f32 %v11276_v55, %v11344_v25  ;;  %v1381_v60 = vmul.f32 %v11286_v13, %v1289_v31  ;;  %v634_v42 = vmul.f32 %v11241_v57, %v11004_v51  ;;  %v732_v20 = vpop.permute.xlu0 %731 }
 0x17f   : > { %v962_v2 = vmul.f32 %v11249_v62, %v11174_v3  ;;  %v11537_v43 = vadd.f32 %v1379_v1, %v1217_v32  ;;  %v1011_v9 = vadd.f32 %v963_v35, %v801_v11  ;;  %v1219_v22 = vadd.f32 %v1171_v47, %v1009_v19  ;;  %v17487_v19 = vld [vmem:[#allocation24_spill] sm:$0xff] }
 0x180   : > { %v802_v30 = vadd.f32 %v11080_v12, %v634_v42  ;;  %v964_v51 = vmul.f32 %v11249_v62, %v11007_v52  ;;  %v636_v3 = vmul.f32 %v11241_v57, %v11342_v46  ;;  %v1172_v40 = vmul.f32 %v11279_v37, %v17480_v53  ;;  %v1297_v24 = vpop.permute.xlu1 %1296 }
 0x181   : > { %1567 = vrot.lane.b32.xlu1 %v11528_v63, %s17406_s22  ;;  %v1010_v23 = vadd.f32 %v962_v2, %v800_v45  ;;  %1565 = vrot.lane.b32.xlu0 %v11537_v43, %s17406_s22  ;;  %v1221_v50 = vadd.f32 %v1173_v61, %v1011_v9  ;;  %v11548_v48 = vadd.f32 %v1381_v60, %v1219_v22  ;;  %v17488_v45 = vld [vmem:[#allocation62_spill] sm:$0xff] }
 0x182   : > { %v635_v12 = vmul.f32 %v11238_v58, %v11342_v46  ;;  %v1174_v39 = vmul.f32 %v11279_v37, %v11344_v25  ;;  %v1382_v49 = vmul.f32 %v11289_v38, %v1289_v31  ;;  %v1383_v52 = vmul.f32 %v11286_v13, %v17481_v34 }
 0x183   : > { %v804_v17 = vadd.f32 %v722_v36, %v636_v3  ;;  %v1012_v5 = vadd.f32 %v964_v51, %v802_v30  ;;  %v1220_v29 = vadd.f32 %v1172_v40, %v1010_v23  ;;  %v638_v46 = vmul.f32 %v11241_v57, %v17483_v18  ;;  %v17489_v51 = vld [vmem:[#allocation13_spill] sm:$0xff] }
 0x184   : > { %v803_v44 = vadd.f32 %v722_v36, %v635_v12  ;;  %v966_v25 = vmul.f32 %v11249_v62, %v17484_v10  ;;  %v11567_v33 = vadd.f32 %v1383_v52, %v1221_v50  ;;  %v637_v16 = vmul.f32 %v11238_v58, %v17483_v18  ;;  %v17490_v50 = vld [vmem:[#allocation40_spill] sm:$0xff] }
 0x185   : > { %1571 = vrot.lane.b32.xlu1 %v11548_v48, %s17406_s22  ;;  %9868 = vrot.lane.b32.xlu0 %v17482_v0, %s17406_s22  ;;  %v965_v21 = vmul.f32 %v11246_v14, %v17484_v10  ;;  %v1222_v15 = vadd.f32 %v1174_v39, %v1012_v5  ;;  %v11573_v6 = vadd.f32 %v1382_v49, %v1220_v29  ;;  %v17491_v5 = vld [vmem:[#allocation27_spill] sm:$0xff]  ;;  %v17492_v29 = vld [vmem:[#allocation37_spill] sm:$0xff]  ;;  %v17493_v10 = vld [vmem:[#allocation14_spill] sm:$0xff] }
 0x186   : > { %v967_v54 = vmul.f32 %v11246_v14, %v17485_v4  ;;  %v806_v59 = vadd.f32 %v17486_v8, %v638_v46  ;;  %v1014_v28 = vadd.f32 %v966_v25, %v804_v17  ;;  %v968_v41 = vmul.f32 %v11249_v62, %v17485_v4  ;;  %v1305_v17 = vpop.permute.xlu1 %1304  ;;  %v17495_v4 = vld [vmem:[#allocation64_spill] sm:$0xff] }
 0x187   : > { %v805_v32 = vadd.f32 %v17486_v8, %v637_v16  ;;  %v1384_v31 = vmul.f32 %v11289_v38, %v17481_v34  ;;  %v1013_v11 = vadd.f32 %v965_v21, %v803_v44  ;;  %v1176_v35 = vmul.f32 %v11279_v37, %v17487_v19  ;;  %v17494_v21 = vld [vmem:[#allocation26_spill] sm:$0xff] }
 0x188   : > { %v639_v1 = vmul.f32 %v11238_v58, %v11348_v27  ;;  %v1178_v53 = vmul.f32 %v11279_v37, %v17488_v45  ;;  %v1386_v47 = vmul.f32 %v11289_v38, %v1297_v24  ;;  %v1175_v61 = vmul.f32 %v11276_v55, %v17487_v19 }
 0x189   : > { %1577 = vrot.lane.b32.xlu1 %v11567_v33, %s17406_s22  ;;  %1573 = vrot.lane.b32.xlu0 %v11573_v6, %s17406_s22  ;;  %v11596_v60 = vadd.f32 %v1384_v31, %v1222_v15  ;;  %v1177_v42 = vmul.f32 %v11276_v55, %v17488_v45  ;;  %v1385_v2 = vmul.f32 %v11286_v13, %v1297_v24 }
 0x18a   : > { %v1016_v9 = vadd.f32 %v968_v41, %v806_v59  ;;  %v807_v22 = vadd.f32 %v732_v20, %v639_v1  ;;  %v1224_v30 = vadd.f32 %v1176_v35, %v1014_v28  ;;  %v1015_v23 = vadd.f32 %v967_v54, %v805_v32 }
 0x18b   : > { %v1223_v36 = vadd.f32 %v1175_v61, %v1013_v11  ;;  %v641_v3 = vmul.f32 %v11238_v58, %v17489_v51  ;;  %v969_v40 = vmul.f32 %v11246_v14, %v17490_v50  ;;  %v640_v49 = vmul.f32 %v11241_v57, %v11348_v27  ;;  %v17497_v61 = vld [vmem:[#allocation39_spill] sm:$0xff] }
 0x18c   : > { %v1226_v12 = vadd.f32 %v1178_v53, %v1016_v9  ;;  %v11609_v39 = vadd.f32 %v1386_v47, %v1224_v30  ;;  %v1225_v34 = vadd.f32 %v1177_v42, %v1015_v23  ;;  %v1388_v18 = vmul.f32 %v11289_v38, %v17492_v29 }
 0x18d   : > { %9873 = vrot.lane.b32.xlu1 %v17482_v0, %s17406_s22  ;;  %1579 = vrot.lane.b32.xlu0 %v11596_v60, %s17406_s22  ;;  %v11613_v52 = vadd.f32 %v1385_v2, %v1223_v36  ;;  %v809_v44 = vadd.f32 %v17491_v5, %v641_v3  ;;  %v1017_v46 = vadd.f32 %v969_v40, %v807_v22  ;;  %v11723_v3 = vpop.permute.xlu1 %1312  ;;  %v11733_v40 = vpop.permute.xlu0 %741 }
 0x18e   : > { %v971_v25 = vmul.f32 %v11246_v14, %v17493_v10  ;;  %v1387_v16 = vmul.f32 %v11286_v13, %v17492_v29  ;;  %v808_v27 = vadd.f32 %v732_v20, %v640_v49  ;;  %v1179_v15 = vmul.f32 %v11276_v55, %v17494_v21  ;;  %17500 = vst [vmem:[#allocation38_spill] sm:$0xff] %v11723_v3 }
 0x18f   : > { %v11628_v24 = vadd.f32 %v1388_v18, %v1226_v12  ;;  %v1181_v54 = vmul.f32 %v11276_v55, %v17495_v4  ;;  %v1389_v8 = vmul.f32 %v11286_v13, %v1305_v17  ;;  %v642_v59 = vmul.f32 %v11241_v57, %v17489_v51  ;;  %17502 = vst [vmem:[#allocation25_spill] sm:$0xff] %v11733_v40 }
 0x190   : > { %v970_v28 = vmul.f32 %v11249_v62, %v17490_v50  ;;  %v11637_v41 = vadd.f32 %v1387_v16, %v1225_v34  ;;  %v1019_v32 = vadd.f32 %v971_v25, %v809_v44  ;;  %v1227_v31 = vadd.f32 %v1179_v15, %v1017_v46 }
 0x191   : > { %1585 = vrot.lane.b32.xlu1 %v11609_v39, %s17406_s22  ;;  %1583 = vrot.lane.b32.xlu0 %v11613_v52, %s17406_s22  ;;  %v810_v11 = vadd.f32 %v17491_v5, %v642_v59  ;;  %v972_v1 = vmul.f32 %v11249_v62, %v17493_v10  ;;  %v1180_v45 = vmul.f32 %v11279_v37, %v17494_v21  ;;  %v11729_v50 = vpop.permute.xlu1 %1320  ;;  %v11743_v49 = vpop.permute.xlu0 %751 }
 0x192   : > { %v1018_v20 = vadd.f32 %v970_v28, %v808_v27  ;;  %v1229_v19 = vadd.f32 %v1181_v54, %v1019_v32  ;;  %v11644_v35 = vadd.f32 %v1389_v8, %v1227_v31  ;;  %v1182_v53 = vmul.f32 %v11279_v37, %v17495_v4  ;;  %17501 = vst [vmem:[#allocation12_spill] sm:$0xff] %v11729_v50 }
 0x193   : > { %v1390_v47 = vmul.f32 %v11289_v38, %v1305_v17  ;;  %v1391_v42 = vmul.f32 %v11286_v13, %v17497_v61  ;;  %v1020_v2 = vadd.f32 %v972_v1, %v810_v11  ;;  %v1392_v36 = vmul.f32 %v11289_v38, %v17497_v61  ;;  %17504 = vst [vmem:[#allocation62_spill] sm:$0xff] %v11743_v49 }
 0x194   : > { %17496 = vst [vmem:[#allocation23_spill] sm:$0xff] %v11644_v35  ;;  %v1228_v9 = vadd.f32 %v1180_v45, %v1018_v20  ;;  %v17508_v37 = vlaneseq }
 0x195   : > { %1591 = vrot.lane.b32.xlu1 %v11628_v24, %s17406_s22  ;;  %1589 = vrot.lane.b32.xlu0 %v11637_v41, %s17406_s22  ;;  %v11659_v22 = vadd.f32 %v1391_v42, %v1229_v19  ;;  %v1230_v30 = vadd.f32 %v1182_v53, %v1020_v2  ;;  %v11741_v12 = vpop.permute.xlu1 %1328  ;;  %v11753_v17 = vpop.permute.xlu0 %761 }
 0x196   : > { %v11661_v23 = vadd.f32 %v1390_v47, %v1228_v9  ;;  %17503 = vst [vmem:[#allocation24_spill] sm:$0xff] %v11741_v12  ;;  %17506 = vst [vmem:[#allocation40_spill] sm:$0xff] %v11753_v17  ;;  %v2802_v12 = vld [vmem:[%s17185_s3 + $0x8] sm:$0xff]  ;;  %v365_v55 = vand.u32 127, %v17508_v37 }
 0x197   : > { %17498 = vst [vmem:[#allocation36_spill] sm:$0xff] %v11659_v22  ;;  %v11669_v51 = vadd.f32 %v1392_v36, %v1230_v30  ;;  %3122 = vmatprep.mubr.f32.mxu0 %v2802_v12 }
 0x198   : > { %17499 = vst [vmem:[#allocation11_spill] sm:$0xff] %v11661_v23 }
 0x199   : > { %1595 = vrot.lane.b32.xlu1 %v11644_v35, %s17406_s22  ;;  %9878 = vrot.lane.b32.xlu0 %v17482_v0, %s17406_s22  ;;  %v11749_v34 = vpop.permute.xlu1 %1336  ;;  %v11763_v44 = vpop.permute.xlu0 %771 }
 0x19a   : > { %17505 = vst [vmem:[#allocation13_spill] sm:$0xff] %v11749_v34  ;;  %17507 = vst [vmem:[#allocation27_spill] sm:$0xff] %v11763_v44 }
 0x19d   : > { %1601 = vrot.lane.b32.xlu1 %v11659_v22, %s17406_s22  ;;  %1597 = vrot.lane.b32.xlu0 %v11661_v23, %s17406_s22  ;;  %v11759_v5 = vpop.permute.xlu1 %9863 }
 0x1a1   : > { %9883 = vrot.lane.b32.xlu1 %v17482_v0, %s17404_s26  ;;  %1603 = vrot.lane.b32.xlu0 %v11669_v51, %s17406_s22 }
 0x1a5   : > { %1722 = vrot.lane.b32.xlu1 %v11511_v26, %s17404_s26  ;;  %1720 = vrot.lane.b32.xlu0 %v11509_v7, %s17404_s26 }
 0x1a9   : > { %1728 = vrot.lane.b32.xlu1 %v11528_v63, %s17404_s26  ;;  %1726 = vrot.lane.b32.xlu0 %v11537_v43, %s17404_s26 }
 0x1ad   : > { %1732 = vrot.lane.b32.xlu1 %v11548_v48, %s17404_s26  ;;  %9888 = vrot.lane.b32.xlu0 %v17482_v0, %s17404_s26 }
 0x1b1   : > { %1738 = vrot.lane.b32.xlu1 %v11567_v33, %s17404_s26  ;;  %1734 = vrot.lane.b32.xlu0 %v11573_v6, %s17404_s26 }
 0x1b5   : > { %9893 = vrot.lane.b32.xlu1 %v17482_v0, %s17404_s26  ;;  %1740 = vrot.lane.b32.xlu0 %v11596_v60, %s17404_s26 }
 0x1b9   : > { %1746 = vrot.lane.b32.xlu1 %v11609_v39, %s17404_s26  ;;  %1744 = vrot.lane.b32.xlu0 %v11613_v52, %s17404_s26 }
 0x1bd   : > { %1752 = vrot.lane.b32.xlu1 %v11628_v24, %s17404_s26  ;;  %1750 = vrot.lane.b32.xlu0 %v11637_v41, %s17404_s26 }
 0x1c1   : > { %1756 = vrot.lane.b32.xlu1 %v11644_v35, %s17404_s26  ;;  %9898 = vrot.lane.b32.xlu0 %v17482_v0, %s17404_s26 }
 0x1c5   : > { %1762 = vrot.lane.b32.xlu1 %v11659_v22, %s17404_s26  ;;  %1758 = vrot.lane.b32.xlu0 %v11661_v23, %s17404_s26 }
 0x1c9   : > { %9903 = vrot.lane.b32.xlu1 %v17482_v0, %s17402_s27  ;;  %1764 = vrot.lane.b32.xlu0 %v11669_v51, %s17404_s26 }
 0x1cd   : > { %1871 = vrot.lane.b32.xlu1 %v11511_v26, %s17402_s27  ;;  %1869 = vrot.lane.b32.xlu0 %v11509_v7, %s17402_s27 }
 0x1d1   : > { %1877 = vrot.lane.b32.xlu1 %v11528_v63, %s17402_s27  ;;  %1875 = vrot.lane.b32.xlu0 %v11537_v43, %s17402_s27 }
 0x1d5   : > { %1881 = vrot.lane.b32.xlu1 %v11548_v48, %s17402_s27  ;;  %9908 = vrot.lane.b32.xlu0 %v17482_v0, %s17402_s27 }
 0x1d9   : > { %1887 = vrot.lane.b32.xlu1 %v11567_v33, %s17402_s27  ;;  %1883 = vrot.lane.b32.xlu0 %v11573_v6, %s17402_s27 }
 0x1dd   : > { %9913 = vrot.lane.b32.xlu1 %v17482_v0, %s17402_s27  ;;  %1889 = vrot.lane.b32.xlu0 %v11596_v60, %s17402_s27 }
 0x1e1   : > { %1895 = vrot.lane.b32.xlu1 %v11609_v39, %s17402_s27  ;;  %1893 = vrot.lane.b32.xlu0 %v11613_v52, %s17402_s27 }
 0x1e5   : > { %1901 = vrot.lane.b32.xlu1 %v11628_v24, %s17402_s27  ;;  %1899 = vrot.lane.b32.xlu0 %v11637_v41, %s17402_s27 }
 0x1e9   : > { %1905 = vrot.lane.b32.xlu1 %v11644_v35, %s17402_s27  ;;  %9918 = vrot.lane.b32.xlu0 %v17482_v0, %s17402_s27 }
 0x1ed   : > { %1911 = vrot.lane.b32.xlu1 %v11659_v22, %s17402_s27  ;;  %1907 = vrot.lane.b32.xlu0 %v11661_v23, %s17402_s27 }
 0x1ef   : > { %v11769_v29 = vpop.permute.xlu1 %1561  ;;  %v11771_v18 = vpop.permute.xlu0 %1559 }
 0x1f1   : > { %9923 = vrot.lane.b32.xlu1 %v17482_v0, %s17400_s28  ;;  %1913 = vrot.lane.b32.xlu0 %v11669_v51, %s17402_s27 }
 0x1f3   : > { %v11777_v46 = vpop.permute.xlu1 %1567  ;;  %v11779_v10 = vpop.permute.xlu0 %1565 }
 0x1f5   : > { %2032 = vrot.lane.b32.xlu1 %v11511_v26, %s17400_s28  ;;  %2030 = vrot.lane.b32.xlu0 %v11509_v7, %s17400_s28 }
 0x1f7   : > { %v11785_v25 = vpop.permute.xlu1 %1571  ;;  %v11787_v16 = vpop.permute.xlu0 %9868 }
 0x1f9   : > { %2038 = vrot.lane.b32.xlu1 %v11528_v63, %s17400_s28  ;;  %2036 = vrot.lane.b32.xlu0 %v11537_v43, %s17400_s28 }
 0x1fb   : > { %v11793_v27 = vpop.permute.xlu1 %1577  ;;  %v11795_v21 = vpop.permute.xlu0 %1573 }
 0x1fd   : > { %2042 = vrot.lane.b32.xlu1 %v11548_v48, %s17400_s28  ;;  %9928 = vrot.lane.b32.xlu0 %v17482_v0, %s17400_s28 }
 0x1ff   : > { %v11801_v15 = vpop.permute.xlu1 %9873  ;;  %v11803_v4 = vpop.permute.xlu0 %1579 }
 0x201   : > { %2048 = vrot.lane.b32.xlu1 %v11567_v33, %s17400_s28  ;;  %2044 = vrot.lane.b32.xlu0 %v11573_v6, %s17400_s28 }
 0x203   : > { %v11809_v54 = vpop.permute.xlu1 %1585  ;;  %v11811_v8 = vpop.permute.xlu0 %1583 }
 0x205   : > { %9933 = vrot.lane.b32.xlu1 %v17482_v0, %s17400_s28  ;;  %2050 = vrot.lane.b32.xlu0 %v11596_v60, %s17400_s28 }
 0x207   : > { %v11817_v59 = vpop.permute.xlu1 %1591  ;;  %v11819_v28 = vpop.permute.xlu0 %1589 }
 0x209   : > { %2056 = vrot.lane.b32.xlu1 %v11609_v39, %s17400_s28  ;;  %2054 = vrot.lane.b32.xlu0 %v11613_v52, %s17400_s28 }
 0x20b   : > { %v11825_v32 = vpop.permute.xlu1 %1595  ;;  %v11827_v31 = vpop.permute.xlu0 %9878 }
 0x20d   : > { %2062 = vrot.lane.b32.xlu1 %v11628_v24, %s17400_s28  ;;  %2060 = vrot.lane.b32.xlu0 %v11637_v41, %s17400_s28 }
 0x20f   : > { %v11833_v11 = vpop.permute.xlu1 %1601  ;;  %v11835_v20 = vpop.permute.xlu0 %1597 }
 0x211   : > { %2066 = vrot.lane.b32.xlu1 %v11644_v35, %s17400_s28  ;;  %9938 = vrot.lane.b32.xlu0 %v17482_v0, %s17400_s28 }
 0x213   : > { %v11841_v19 = vpop.permute.xlu1 %9883  ;;  %v11843_v1 = vpop.permute.xlu0 %1603 }
 0x215   : > { %2072 = vrot.lane.b32.xlu1 %v11659_v22, %s17400_s28  ;;  %2068 = vrot.lane.b32.xlu0 %v11661_v23, %s17400_s28 }
 0x217   : > { %v11849_v45 = vpop.permute.xlu1 %1722  ;;  %v11851_v53 = vpop.permute.xlu0 %1720 }
 0x219   : > { %2221 = vrot.lane.b32.xlu1 %v11509_v7, %s17301_s29  ;;  %2074 = vrot.lane.b32.xlu0 %v11669_v51, %s17400_s28 }
 0x21b   : > { %v11857_v47 = vpop.permute.xlu1 %1728  ;;  %v11859_v61 = vpop.permute.xlu0 %1726 }
 0x21d   : > { %9943 = vrot.lane.b32.xlu1 %v17482_v0, %s17301_s29  ;;  %2223 = vrot.lane.b32.xlu0 %v11511_v26, %s17301_s29 }
 0x21f   : > { %v11865_v42 = vpop.permute.xlu1 %1732  ;;  %v11867_v2 = vpop.permute.xlu0 %9888 }
 0x221   : > { %2229 = vrot.lane.b32.xlu1 %v11528_v63, %s17301_s29  ;;  %2227 = vrot.lane.b32.xlu0 %v11537_v43, %s17301_s29 }
 0x223   : > { %v11873_v9 = vpop.permute.xlu1 %1738  ;;  %v11875_v30 = vpop.permute.xlu0 %1734 }
 0x225   : > { %2235 = vrot.lane.b32.xlu1 %v11573_v6, %s17301_s29  ;;  %2233 = vrot.lane.b32.xlu0 %v11548_v48, %s17301_s29 }
 0x227   : > { %v9894_v36 = vpop.permute.xlu1 %9893  ;;  %v1741_v34 = vpop.permute.xlu0 %1740 }
 0x229   : > { %2239 = vrot.lane.b32.xlu1 %v11567_v33, %s17301_s29  ;;  %9948 = vrot.lane.b32.xlu0 %v17482_v0, %s17301_s29 }
 0x22b   : > { %v1747_v56 = vpop.permute.xlu1 %1746  ;;  %v1745_v44 = vpop.permute.xlu0 %1744 }
 0x22d   : > { %2245 = vrot.lane.b32.xlu1 %v11613_v52, %s17301_s29  ;;  %2241 = vrot.lane.b32.xlu0 %v11596_v60, %s17301_s29 }
 0x22f   : > { %v1753_v17 = vpop.permute.xlu1 %1752  ;;  %v1751_v50 = vpop.permute.xlu0 %1750 }
 0x231   : > { %9953 = vrot.lane.b32.xlu1 %v17482_v0, %s17301_s29  ;;  %2247 = vrot.lane.b32.xlu0 %v11609_v39, %s17301_s29 }
 0x233   : > { %v1757_v49 = vpop.permute.xlu1 %1756  ;;  %v9899_v38 = vpop.permute.xlu0 %9898 }
 0x234   : > { %v9901_v3 = vunpack.i.h.bf16 %v9899_v38  ;;  %v9900_v14 = vunpack.i.l.bf16 %v9899_v38  ;;  %v9896_v38 = vunpack.i.h.bf16 %v9894_v36 }
 0x235   : > { %2253 = vrot.lane.b32.xlu1 %v11628_v24, %s17301_s29  ;;  %2251 = vrot.lane.b32.xlu0 %v11637_v41, %s17301_s29 }
 0x237   : > { %v1763_v12 = vpop.permute.xlu1 %1762  ;;  %v1759_v13 = vpop.permute.xlu0 %1758 }
 0x238   : > { %v1781_v58 = vsel %vm1766_vm0, %v9901_v3, %v1763_v12  ;;  %v1780_v37 = vsel %vm1766_vm0, %v1757_v49, %v1759_v13  ;;  %v9891_v3 = vunpack.i.h.bf16 %v11867_v2  ;;  %v1777_v13 = vsel %vm1766_vm0, %v9896_v38, %v1751_v50 }
 0x239   : > { %2259 = vrot.lane.b32.xlu1 %v11661_v23, %s17301_s29  ;;  %2257 = vrot.lane.b32.xlu0 %v11644_v35, %s17301_s29  ;;  %v366_v23 = vadd.s32 128, %v365_v55  ;;  %v1770_v38 = vsel %vm1766_vm0, %v11859_v61, %v11857_v47  ;;  %v1768_v47 = vsel %vm1766_vm0, %v11851_v53, %v11849_v45  ;;  %v1619_v45 = vsel %vm1605_vm3, %v11825_v32, %v11835_v20 }
 0x23a   : > { %v9871_v20 = vunpack.i.h.bf16 %v11787_v16 }
 0x23b   : > { %v11905_v62 = vpop.permute.xlu1 %9903  ;;  %v1765_v40 = vpop.permute.xlu0 %1764 }
 0x23c   : > { %17509 = vst [vmem:[#allocation37_spill] sm:$0xff] %v11905_v62  ;;  %v1782_v57 = vsel %vm1766_vm0, %v1763_v12, %v1765_v40  ;;  %v11926_v40 = vand.u32 15, %v366_v23  ;;  %v1774_v23 = vsel %vm1766_vm0, %v11873_v9, %v1741_v34  ;;  %v9886_v34 = vunpack.i.h.bf16 %v11841_v19 }
 0x23d   : > { %2263 = vrot.lane.b32.xlu1 %v11659_v22, %s17301_s29  ;;  %9958 = vrot.lane.b32.xlu0 %v17482_v0, %s17301_s29  ;;  %v1779_v22 = vsel %vm1766_vm0, %v9900_v14, %v1757_v49  ;;  %v11931_v49 = vand.u32 15, %v365_v55  ;;  %v1773_v55 = vsel %vm1766_vm0, %v9891_v3, %v11873_v9 }
 0x23e   : > { %3058 = vmatprep.subr.mxu0 %v1782_v57  ;;  %v1778_v57 = vsel %vm1766_vm0, %v1751_v50, %v1753_v17  ;;  %17510 = vst [vmem:[#allocation14_spill] sm:$0xff] %v11926_v40  ;;  %v9890_v17 = vunpack.i.l.bf16 %v11867_v2  ;;  %v1769_v3 = vsel %vm1766_vm0, %v9886_v34, %v11859_v61 }
 0x23f   : > { %3059 = vmatpush1.msra.mxu0 %v1781_v58  ;;  %v11913_v35 = vpop.permute.xlu1 %1871  ;;  %v11916_v62 = vpop.permute.xlu0 %1869  ;;  %v9895_v58 = vunpack.i.l.bf16 %v9894_v36  ;;  %17511 = vst [vmem:[#allocation26_spill] sm:$0xff] %v11931_v49  ;;  %v11954_v2 = vadd.s32 4294967295, %v11931_v49 }
 0x240   : > { %3060 = vmatprep.subr.mxu0 %v1780_v37  ;;  %v1771_v9 = vsel %vm1766_vm0, %v9890_v17, %v11865_v42 }
 0x241   : > { %3061 = vmatpush1.msra.mxu0 %v1779_v22  ;;  %2382 = vrot.lane.b32.xlu1 %v11509_v7, %s17299_s17  ;;  %v1776_v22 = vsel %vm1766_vm0, %v1745_v44, %v1747_v56  ;;  %v1775_v36 = vsel %vm1766_vm0, %v9895_v58, %v1745_v44  ;;  %v11946_v56 = vadd.s32 4294967295, %v11926_v40  ;;  %v1772_v44 = vsel %vm1766_vm0, %v11865_v42, %v11875_v30 }
 0x242   : > { %2265 = vrot.lane.b32.xlu0 %v11669_v51, %s17301_s29  ;;  %3062 = vmatprep.subr.mxu0 %v1778_v57  ;;  %17513 = vst [vmem:[#allocation39_spill] sm:$0xff] %v11954_v2  ;;  %v9881_v30 = vunpack.i.h.bf16 %v11827_v31  ;;  %v9885_v57 = vunpack.i.l.bf16 %v11841_v19  ;;  %vm401_vm2 = vcmp.ge.s32.totalorder %v11954_v2, 0  ;;  %v9880_v19 = vunpack.i.l.bf16 %v11827_v31  ;;  %s10622_s29 = smov 32  }
 0x243   : > { %3063 = vmatpush1.msra.mxu0 %v1777_v13  ;;  %v11928_v14 = vpop.permute.xlu1 %1877  ;;  %v11934_v12 = vpop.permute.xlu0 %1875  ;;  %17512 = vst [vmem:[#allocation64_spill] sm:$0xff] %v11946_v56  ;;  %vm402_vm1 = vcmp.ge.s32.totalorder %v11946_v56, 0  ;;  %v1621_v13 = vsel %vm1605_vm3, %v11833_v11, %v11843_v1 }
 0x244   : > { %3064 = vmatprep.subr.mxu0 %v1776_v22  ;;  %v1767_v61 = vsel %vm1766_vm0, %v9885_v57, %v11851_v53  ;;  %v1620_v31 = vsel %vm1605_vm3, %v9881_v30, %v11833_v11  ;;  %v9876_v53 = vunpack.i.h.bf16 %v11801_v15  ;;  %v1618_v17 = vsel %vm1605_vm3, %v9880_v19, %v11825_v32  ;;  %v17514_v57 = vld [vmem:[#allocation11_spill] sm:$0xff]  ;;  %v17516_v19 = vld [vmem:[#allocation36_spill] sm:$0xff] }
 0x245   : > { %3065 = vmatpush1.msra.mxu0 %v1775_v36  ;;  %9963 = vrot.lane.b32.xlu1 %v17482_v0, %s17299_s17  ;;  %v1617_v11 = vsel %vm1605_vm3, %v11819_v28, %v11817_v59  ;;  %v9875_v36 = vunpack.i.l.bf16 %v11801_v15  ;;  %v1615_v59 = vsel %vm1605_vm3, %v11811_v8, %v11809_v54  ;;  %v9870_v15 = vunpack.i.l.bf16 %v11787_v16 }
 0x246   : > { %2384 = vrot.lane.b32.xlu0 %v11511_v26, %s17299_s17  ;;  %3066 = vmatprep.subr.mxu0 %v1774_v23  ;;  %v1616_v32 = vsel %vm1605_vm3, %v9876_v53, %v11819_v28  ;;  %v1613_v28 = vsel %vm1605_vm3, %v11793_v27, %v11803_v4  ;;  %v1612_v16 = vsel %vm1605_vm3, %v9871_v20, %v11793_v27 }
 0x247   : > { %3067 = vmatpush1.msra.mxu0 %v1773_v55  ;;  %v11948_v50 = vpop.permute.xlu1 %1881  ;;  %v11957_v37 = vpop.permute.xlu0 %9908  ;;  %v1611_v54 = vsel %vm1605_vm3, %v11785_v25, %v11795_v21  ;;  %v1609_v27 = vsel %vm1605_vm3, %v11779_v10, %v11777_v46  ;;  %v9865_v21 = vunpack.i.l.bf16 %v11759_v5  ;;  %v1607_v46 = vsel %vm1605_vm3, %v11771_v18, %v11769_v29 }
 0x248   : > { %3068 = vmatprep.subr.mxu0 %v1772_v44  ;;  %v1614_v44 = vsel %vm1605_vm3, %v9875_v36, %v11811_v8  ;;  %v9866_v8 = vunpack.i.h.bf16 %v11759_v5 }
 0x249   : > { %3069 = vmatpush1.msra.mxu0 %v1771_v9  ;;  %2390 = vrot.lane.b32.xlu1 %v11528_v63, %s17299_s17  ;;  %v1610_v9 = vsel %vm1605_vm3, %v9870_v15, %v11785_v25  ;;  %v1606_v5 = vsel %vm1605_vm3, %v9865_v21, %v11771_v18 }
 0x24a   : > { %2388 = vrot.lane.b32.xlu0 %v11537_v43, %s17299_s17  ;;  %3070 = vmatprep.subr.mxu0 %v1770_v38  ;;  %v1608_v25 = vsel %vm1605_vm3, %v9866_v8, %v11779_v10 }
 0x24b   : > { %3071 = vmatpush1.msra.mxu0 %v1769_v3  ;;  %v11973_v42 = vpop.permute.xlu1 %1887  ;;  %v11980_v58 = vpop.permute.xlu0 %1883  ;;  %v17515_v3 = vld [vmem:[#allocation23_spill] sm:$0xff] }
 0x24c   : > { %3072 = vmatprep.subr.mxu0 %v1768_v47 }
 0x24d   : > { %3073 = vmatpush1.msra.mxu0 %v1767_v61  ;;  %2396 = vrot.lane.b32.xlu1 %v11573_v6, %s17299_s17 }
 0x24e   : > { %2394 = vrot.lane.b32.xlu0 %v11548_v48, %s17299_s17  ;;  %9355 = vmatprep.subr.msk.mxu0 %vm402_vm1, %v1621_v13 }
 0x24f   : > { %9356 = vmatpush1.msk.msra.mxu0 %vm401_vm2, %v1620_v31  ;;  %v12000_v1 = vpop.permute.xlu1 %9913  ;;  %v12003_v22 = vpop.permute.xlu0 %1889 }
 0x250   : > { %9357 = vmatprep.subr.msk.mxu0 %vm402_vm1, %v1619_v45 }
 0x251   : > { %9358 = vmatpush1.msk.msra.mxu0 %vm401_vm2, %v1618_v17  ;;  %2400 = vrot.lane.b32.xlu1 %v11567_v33, %s17299_s17 }
 0x252   : > { %9968 = vrot.lane.b32.xlu0 %v17482_v0, %s17299_s17  ;;  %9359 = vmatprep.subr.msk.mxu0 %vm402_vm1, %v1617_v11 }
 0x253   : > { %9360 = vmatpush1.msk.msra.mxu0 %vm401_vm2, %v1616_v32  ;;  %v12026_v23 = vpop.permute.xlu1 %1895  ;;  %v12032_v55 = vpop.permute.xlu0 %1893 }
 0x254   : > { %9361 = vmatprep.subr.msk.mxu0 %vm402_vm1, %v1615_v59 }
 0x255   : > { %9362 = vmatpush1.msk.msra.mxu0 %vm401_vm2, %v1614_v44  ;;  %2406 = vrot.lane.b32.xlu1 %v11613_v52, %s17299_s17 }
 0x256   : > { %2402 = vrot.lane.b32.xlu0 %v11596_v60, %s17299_s17  ;;  %9363 = vmatprep.subr.msk.mxu0 %vm402_vm1, %v1613_v28 }
 0x257   : > { %9364 = vmatpush1.msk.msra.mxu0 %vm401_vm2, %v1612_v16  ;;  %v12056_v4 = vpop.permute.xlu1 %1901  ;;  %v12059_v34 = vpop.permute.xlu0 %1899 }
 0x258   : > { %9365 = vmatprep.subr.msk.mxu0 %vm402_vm1, %v1611_v54 }
 0x259   : > { %9366 = vmatpush1.msk.msra.mxu0 %vm401_vm2, %v1610_v9  ;;  %9973 = vrot.lane.b32.xlu1 %v17482_v0, %s17299_s17 }
 0x25a   : > { %2408 = vrot.lane.b32.xlu0 %v11609_v39, %s17299_s17  ;;  %9367 = vmatprep.subr.msk.mxu0 %vm402_vm1, %v1609_v27 }
 0x25b   : > { %9368 = vmatpush1.msk.msra.mxu0 %vm401_vm2, %v1608_v25  ;;  %v12081_v38 = vpop.permute.xlu1 %1905  ;;  %v12086_v30 = vpop.permute.xlu0 %9918 }
 0x25c   : > { %9369 = vmatprep.subr.msk.mxu0 %vm402_vm1, %v1607_v46 }
 0x25d   : > { %9370 = vmatpush1.msk.msra.mxu0 %vm401_vm2, %v1606_v5  ;;  %2414 = vrot.lane.b32.xlu1 %v11628_v24, %s17299_s17 }
 0x25e   : > { %2412 = vrot.lane.b32.xlu0 %v11637_v41, %s17299_s17 }
 0x25f   : > { %v12098_v10 = vpop.permute.xlu1 %1911  ;;  %v12100_v29 = vpop.permute.xlu0 %1907 }
 0x261   : > { %2420 = vrot.lane.b32.xlu1 %v17514_v57, %s17299_s17 }
 0x262   : > { %2418 = vrot.lane.b32.xlu0 %v17515_v3, %s17299_s17 }
 0x263   : > { %v12106_v18 = vpop.permute.xlu1 %9923  ;;  %v12108_v47 = vpop.permute.xlu0 %1913 }
 0x265   : > { %2424 = vrot.lane.b32.xlu1 %v17516_v19, %s17299_s17 }
 0x266   : > { %9978 = vrot.lane.b32.xlu0 %v17482_v0, %s17299_s17 }
 0x267   : > { %v12114_v61 = vpop.permute.xlu1 %2032  ;;  %v12116_v13 = vpop.permute.xlu0 %2030 }
 0x269   : > { %2543 = vrot.lane.b32.xlu1 %v11509_v7, %s17297_s21 }
 0x26a   : > { %2426 = vrot.lane.b32.xlu0 %v11669_v51, %s17299_s17  ;;  %s10620_s17 = smov 34  }
 0x26b   : > { %v12122_v31 = vpop.permute.xlu1 %2038  ;;  %v12124_v45 = vpop.permute.xlu0 %2036 }
 0x26d   : > { %9983 = vrot.lane.b32.xlu1 %v17482_v0, %s17297_s21 }
 0x26e   : > { %2545 = vrot.lane.b32.xlu0 %v11511_v26, %s17297_s21 }
 0x26f   : > { %v12130_v53 = vpop.permute.xlu1 %2042  ;;  %v12132_v17 = vpop.permute.xlu0 %9928 }
 0x271   : > { %2551 = vrot.lane.b32.xlu1 %v11528_v63, %s17297_s21 }
 0x272   : > { %2549 = vrot.lane.b32.xlu0 %v11537_v43, %s17297_s21 }
 0x273   : > { %v12138_v11 = vpop.permute.xlu1 %2048  ;;  %v12140_v20 = vpop.permute.xlu0 %2044 }
 0x275   : > { %2557 = vrot.lane.b32.xlu1 %v11573_v6, %s17297_s21 }
 0x276   : > { %2555 = vrot.lane.b32.xlu0 %v11548_v48, %s17297_s21 }
 0x277   : > { %v9934_v36 = vpop.permute.xlu1 %9933  ;;  %v2051_v32 = vpop.permute.xlu0 %2050 }
 0x279   : > { %2561 = vrot.lane.b32.xlu1 %v11567_v33, %s17297_s21 }
 0x27a   : > { %9988 = vrot.lane.b32.xlu0 %v17482_v0, %s17297_s21 }
 0x27b   : > { %v2057_v59 = vpop.permute.xlu1 %2056  ;;  %v2055_v15 = vpop.permute.xlu0 %2054 }
 0x27d   : > { %2567 = vrot.lane.b32.xlu1 %v11613_v52, %s17297_s21 }
 0x27e   : > { %2563 = vrot.lane.b32.xlu0 %v11596_v60, %s17297_s21 }
 0x27f   : > { %v2063_v44 = vpop.permute.xlu1 %2062  ;;  %v2061_v28 = vpop.permute.xlu0 %2060 }
 0x281   : > { %9993 = vrot.lane.b32.xlu1 %v17482_v0, %s17297_s21 }
 0x282   : > { %2569 = vrot.lane.b32.xlu0 %v11609_v39, %s17297_s21 }
 0x283   : > { %v2067_v16 = vpop.permute.xlu1 %2066  ;;  %v9939_v54 = vpop.permute.xlu0 %9938 }
 0x284   : > { %v9941_v27 = vunpack.i.h.bf16 %v9939_v54  ;;  %v9940_v25 = vunpack.i.l.bf16 %v9939_v54 }
 0x285   : > { %2575 = vrot.lane.b32.xlu1 %v11628_v24, %s17297_s21 }
 0x286   : > { %2573 = vrot.lane.b32.xlu0 %v11637_v41, %s17297_s21 }
 0x287   : > { %v2073_v8 = vpop.permute.xlu1 %2072  ;;  %v2069_v9 = vpop.permute.xlu0 %2068 }
 0x289   : > { %2581 = vrot.lane.b32.xlu1 %v17514_v57, %s17297_s21  ;;  %v2091_v57 = vsel %vm2076_vm4, %v9941_v27, %v2073_v8 }
 0x28a   : > { %2579 = vrot.lane.b32.xlu0 %v17515_v3, %s17297_s21  ;;  %v2090_v3 = vsel %vm2076_vm4, %v2067_v16, %v2069_v9  ;;  %v9935_v9 = vunpack.i.l.bf16 %v9934_v36 }
 0x28b   : > { %v12166_v21 = vpop.permute.xlu1 %2221  ;;  %v2075_v46 = vpop.permute.xlu0 %2074 }
 0x28c   : > { %17517 = vst [vmem:[#allocation72_spill] sm:$0xff] %v12166_v21  ;;  %v2092_v5 = vsel %vm2076_vm4, %v2073_v8, %v2075_v46  ;;  %v9936_v21 = vunpack.i.h.bf16 %v9934_v36  ;;  %v2088_v8 = vsel %vm2076_vm4, %v2061_v28, %v2063_v44  ;;  %v9930_v44 = vunpack.i.l.bf16 %v12132_v17 }
 0x28d   : > { %2585 = vrot.lane.b32.xlu1 %v17516_v19, %s17297_s21  ;;  %9371 = vmatprep.subr.msk.mxu0 %vm402_vm1, %v2092_v5  ;;  %v2089_v19 = vsel %vm2076_vm4, %v9940_v25, %v2067_v16  ;;  %v2086_v16 = vsel %vm2076_vm4, %v2055_v15, %v2057_v59  ;;  %v2085_v36 = vsel %vm2076_vm4, %v9935_v9, %v2055_v15  ;;  %v12221_v59 = vadd.s32 1, %v11926_v40  ;;  %v17545_v40 = vld [vmem:[#allocation62_spill] sm:$0xff] }
 0x28e   : > { %9998 = vrot.lane.b32.xlu0 %v17482_v0, %s17297_s21  ;;  %9372 = vmatpush2.msk.msra.mxu0 %vm401_vm2, %v2091_v57  ;;  %v9931_v57 = vunpack.i.h.bf16 %v12132_v17  ;;  %v2084_v25 = vsel %vm2076_vm4, %v12138_v11, %v2051_v32  ;;  %v2082_v32 = vsel %vm2076_vm4, %v12130_v53, %v12140_v20  ;;  %v2080_v20 = vsel %vm2076_vm4, %v12124_v45, %v12122_v31 }
 0x28f   : > { %v12179_v54 = vpop.permute.xlu1 %9943  ;;  %v12181_v46 = vpop.permute.xlu0 %2223  ;;  %9373 = vmatprep.subr.msk.mxu0 %vm402_vm1, %v2090_v3  ;;  %v2087_v3 = vsel %vm2076_vm4, %v9936_v21, %v2061_v28  ;;  %17518 = vst [vmem:[#allocation73_spill] sm:$0xff] %v12221_v59  ;;  %v12231_v28 = vadd.s32 1, %v11931_v49  ;;  %v9926_v21 = vunpack.i.h.bf16 %v12106_v18  ;;  %vm412_vm5 = vcmp.lt.s32.totalorder %v12221_v59, 16 }
 0x290   : > { %9374 = vmatpush2.msk.msra.mxu0 %vm401_vm2, %v2089_v19  ;;  %v2083_v17 = vsel %vm2076_vm4, %v9931_v57, %v12138_v11  ;;  %v2081_v11 = vsel %vm2076_vm4, %v9930_v44, %v12130_v53  ;;  %v9925_v57 = vunpack.i.l.bf16 %v12106_v18  ;;  %v2078_v18 = vsel %vm2076_vm4, %v12116_v13, %v12114_v61 }
 0x291   : > { %2688 = vrot.lane.b32.xlu1 %v11509_v7, %s17317_s24  ;;  %9375 = vmatprep.subr.msk.mxu0 %vm402_vm1, %v2088_v8  ;;  %17519 = vst [vmem:[#allocation74_spill] sm:$0xff] %v12231_v28  ;;  %v9921_v8 = vunpack.i.h.bf16 %v12086_v30  ;;  %v2079_v53 = vsel %vm2076_vm4, %v9926_v21, %v12124_v45  ;;  %vm411_vm6 = vcmp.lt.s32.totalorder %v12231_v28, 16  ;;  %v9920_v31 = vunpack.i.l.bf16 %v12086_v30 }
 0x292   : > { %2587 = vrot.lane.b32.xlu0 %v11669_v51, %s17297_s21  ;;  %9376 = vmatpush2.msk.msra.mxu0 %vm401_vm2, %v2087_v3  ;;  %v2077_v45 = vsel %vm2076_vm4, %v9925_v57, %v12116_v13  ;;  %v1929_v61 = vsel %vm1915_vm7, %v12081_v38, %v12100_v29  ;;  %v9916_v13 = vunpack.i.h.bf16 %v12000_v1  ;;  %v9911_v29 = vunpack.i.h.bf16 %v11957_v37  ;;  %s10628_s21 = smov 126  }
 0x293   : > { %v12199_v19 = vpop.permute.xlu1 %2229  ;;  %v12203_v27 = vpop.permute.xlu0 %2227  ;;  %9377 = vmatprep.subr.msk.mxu0 %vm402_vm1, %v2086_v16  ;;  %v1931_v16 = vsel %vm1915_vm7, %v12098_v10, %v12108_v47  ;;  %v1930_v30 = vsel %vm1915_vm7, %v9921_v8, %v12098_v10  ;;  %v1927_v10 = vsel %vm1915_vm7, %v12059_v34, %v12056_v4  ;;  %v1925_v4 = vsel %vm1915_vm7, %v12032_v55, %v12026_v23 }
 0x294   : > { %9378 = vmatpush2.msk.msra.mxu0 %vm401_vm2, %v2085_v36  ;;  %v1928_v36 = vsel %vm1915_vm7, %v9920_v31, %v12081_v38  ;;  %v1926_v38 = vsel %vm1915_vm7, %v9916_v13, %v12059_v34  ;;  %v1923_v34 = vsel %vm1915_vm7, %v11973_v42, %v12003_v22  ;;  %v1922_v23 = vsel %vm1915_vm7, %v9911_v29, %v11973_v42  ;;  %v17521_v13 = vld [vmem:[#allocation11_spill] sm:$0xff] }
 0x295   : > { %10003 = vrot.lane.b32.xlu1 %v17482_v0, %s17317_s24  ;;  %9379 = vmatprep.subr.msk.mxu0 %vm402_vm1, %v2084_v25  ;;  %v9915_v25 = vunpack.i.l.bf16 %v12000_v1  ;;  %v9910_v1 = vunpack.i.l.bf16 %v11957_v37  ;;  %v2804_v37 = vld [vmem:[%s17185_s3 + $0x18] sm:$0xff]  ;;  %v1921_v22 = vsel %vm1915_vm7, %v11948_v50, %v11980_v58  ;;  %v1919_v58 = vsel %vm1915_vm7, %v11934_v12, %v11928_v14  ;;  %v2801_v14 = vld [vmem:[%s17185_s3] sm:$0xff]  ;;  %v2811_v29 = vld [vmem:[%s17185_s3 + $0x50] sm:$0xff] }
 0x296   : > { %2690 = vrot.lane.b32.xlu0 %v11511_v26, %s17317_s24  ;;  %9380 = vmatpush2.msk.msra.mxu0 %vm401_vm2, %v2083_v17 }
 0x297   : > { %v12228_v15 = vpop.permute.xlu1 %2235  ;;  %v12234_v5 = vpop.permute.xlu0 %2233  ;;  %9381 = vmatprep.subr.msk.mxu0 %vm402_vm1, %v2082_v32  ;;  %v1924_v21 = vsel %vm1915_vm7, %v9915_v25, %v12032_v55  ;;  %3235 = vmatprep.mubr.f32.mxu1 %v2804_v37  ;;  %v1920_v42 = vsel %vm1915_vm7, %v9910_v1, %v11948_v50  ;;  %v17524_v1 = vld [vmem:[#allocation36_spill] sm:$0xff]  ;;  %v2985_v37 = vld [vmem:[%s17186_s4] sm:$0xff] }
 0x298   : > { %9382 = vmatpush2.msk.msra.mxu0 %vm401_vm2, %v2081_v11  ;;  %v17520_v11 = vld [vmem:[#allocation37_spill] sm:$0xff] }
 0x299   : > { %2696 = vrot.lane.b32.xlu1 %v11528_v63, %s17317_s24  ;;  %9383 = vmatprep.subr.msk.mxu0 %vm402_vm1, %v2080_v20  ;;  %v9906_v20 = vunpack.i.h.bf16 %v17520_v11  ;;  %v9905_v57 = vunpack.i.l.bf16 %v17520_v11 }
 0x29a   : > { %2694 = vrot.lane.b32.xlu0 %v11537_v43, %s17317_s24  ;;  %9384 = vmatpush2.msk.msra.mxu0 %vm401_vm2, %v2079_v53 }
 0x29b   : > { %v12258_v9 = vpop.permute.xlu1 %2239  ;;  %v12265_v3 = vpop.permute.xlu0 %9948  ;;  %9385 = vmatprep.subr.msk.mxu0 %vm402_vm1, %v2078_v18  ;;  %v1918_v50 = vsel %vm1915_vm7, %v9906_v20, %v11934_v12  ;;  %v1917_v18 = vsel %vm1915_vm7, %v11916_v62, %v11913_v35  ;;  %v2807_v12 = vld [vmem:[%s17185_s3 + $0x30] sm:$0xff] }
 0x29c   : > { %9386 = vmatpush2.msk.msra.mxu0 %vm401_vm2, %v2077_v45  ;;  %v1916_v45 = vsel %vm1915_vm7, %v9905_v57, %v11916_v62  ;;  %v2806_v62 = vld [vmem:[%s17185_s3 + $0x28] sm:$0xff] }
 0x29d   : > { %2702 = vrot.lane.b32.xlu1 %v11573_v6, %s17317_s24  ;;  %9387 = vmatprep.subr.msk.mxu0 %vm412_vm5, %v1931_v16 }
 0x29e   : > { %2700 = vrot.lane.b32.xlu0 %v11548_v48, %s17317_s24  ;;  %9388 = vmatpush2.msk.msra.mxu0 %vm411_vm6, %v1930_v30  ;;  %v2812_v30 = vld [vmem:[%s17185_s3 + $0x58] sm:$0xff] }
 0x29f   : > { %v12289_v47 = vpop.permute.xlu1 %2245  ;;  %v12292_v44 = vpop.permute.xlu0 %2241  ;;  %9389 = vmatprep.subr.msk.mxu0 %vm412_vm5, %v1929_v61 }
 0x2a0   : > { %9390 = vmatpush2.msk.msra.mxu0 %vm411_vm6, %v1928_v36  ;;  %v17522_v36 = vld [vmem:[#allocation23_spill] sm:$0xff] }
 0x2a1   : > { %2706 = vrot.lane.b32.xlu1 %v11567_v33, %s17317_s24  ;;  %9391 = vmatprep.subr.msk.mxu0 %vm412_vm5, %v1927_v10 }
 0x2a2   : > { %10008 = vrot.lane.b32.xlu0 %v17482_v0, %s17317_s24  ;;  %9392 = vmatpush2.msk.msra.mxu0 %vm411_vm6, %v1926_v38 }
 0x2a3   : > { %v12315_v17 = vpop.permute.xlu1 %9953  ;;  %v12321_v32 = vpop.permute.xlu0 %2247  ;;  %9393 = vmatprep.subr.msk.mxu0 %vm412_vm5, %v1925_v4  ;;  %v2817_v4 = vld [vmem:[%s17185_s3 + $0x80] sm:$0xff] }
 0x2a4   : > { %9394 = vmatpush2.msk.msra.mxu0 %vm411_vm6, %v1924_v21  ;;  %v9955_v11 = vunpack.i.l.bf16 %v12315_v17 }
 0x2a5   : > { %2712 = vrot.lane.b32.xlu1 %v11613_v52, %s17317_s24  ;;  %9395 = vmatprep.subr.msk.mxu0 %vm412_vm5, %v1923_v34 }
 0x2a6   : > { %2708 = vrot.lane.b32.xlu0 %v11596_v60, %s17317_s24  ;;  %9396 = vmatpush2.msk.msra.mxu0 %vm411_vm6, %v1922_v23 }
 0x2a7   : > { %v12348_v55 = vpop.permute.xlu1 %2253  ;;  %v12351_v8 = vpop.permute.xlu0 %2251  ;;  %9397 = vmatprep.subr.msk.mxu0 %vm412_vm5, %v1921_v22  ;;  %v9956_v22 = vunpack.i.h.bf16 %v12315_v17  ;;  %v2822_v17 = vld [vmem:[%s17185_s3 + $0xa8] sm:$0xff] }
 0x2a8   : > { %9398 = vmatpush2.msk.msra.mxu0 %vm411_vm6, %v1920_v42 }
 0x2a9   : > { %10013 = vrot.lane.b32.xlu1 %v17482_v0, %s17317_s24  ;;  %9399 = vmatprep.subr.msk.mxu0 %vm412_vm5, %v1919_v58  ;;  %v2816_v58 = vld [vmem:[%s17185_s3 + $0x78] sm:$0xff] }
 0x2aa   : > { %2714 = vrot.lane.b32.xlu0 %v11609_v39, %s17317_s24  ;;  %9400 = vmatpush2.msk.msra.mxu0 %vm411_vm6, %v1918_v50  ;;  %v9951_v50 = vunpack.i.h.bf16 %v12265_v3 }
 0x2ab   : > { %v2260_v53 = vpop.permute.xlu1 %2259  ;;  %v2258_v31 = vpop.permute.xlu0 %2257  ;;  %9401 = vmatprep.subr.msk.mxu0 %vm412_vm5, %v1917_v18  ;;  %v2281_v18 = vsel %vm2269_vm8, %v12348_v55, %v9956_v22  ;;  %v9946_v22 = vunpack.i.h.bf16 %v12179_v54 }
 0x2ac   : > { %9402 = vmatpush2.msk.msra.mxu0 %vm411_vm6, %v1916_v45  ;;  %v2282_v57 = vsel %vm2269_vm8, %v2258_v31, %v2260_v53  ;;  %v2986_v45 = vld [vmem:[%s17186_s4 + $0x8] sm:$0xff] }
 0x2ad   : > { %2720 = vrot.lane.b32.xlu1 %v11628_v24, %s17317_s24  ;;  %3123 = vmatmul.mubr.f32.vlgmr.msra.gmra.mxu0 %v2801_v14  ;;  %v2280_v14 = vsel %vm2269_vm8, %v12351_v8, %v12348_v55  ;;  %v2279_v55 = vsel %vm2269_vm8, %v12321_v32, %v9955_v11  ;;  %v2821_v8 = vld [vmem:[%s17185_s3 + $0xa0] sm:$0xff]  ;;  %v9945_v11 = vunpack.i.l.bf16 %v12179_v54  ;;  %v2274_v54 = vsel %vm2269_vm8, %v12234_v5, %v12228_v15  ;;  %v2990_v5 = vld [vmem:[%s17186_s4 + $0x28] sm:$0xff] }
 0x2ae   : > { %2718 = vrot.lane.b32.xlu0 %v11637_v41, %s17317_s24  ;;  %3128 = vmatprep.mubr.f32.mxu0 %v2807_v12  ;;  %v9950_v12 = vunpack.i.l.bf16 %v12265_v3  ;;  %v2278_v3 = vsel %vm2269_vm8, %v12289_v47, %v12321_v32  ;;  %v17527_v47 = vld [vmem:[#allocation63_spill] sm:$0xff] }
 0x2af   : > { %v2264_v35 = vpop.permute.xlu1 %2263  ;;  %v9959_v16 = vpop.permute.xlu0 %9958 }
 0x2b0   : > { %v9961_v61 = vunpack.i.h.bf16 %v9959_v16  ;;  %v9960_v25 = vunpack.i.l.bf16 %v9959_v16  ;;  %v2277_v16 = vsel %vm2269_vm8, %v12292_v44, %v9951_v50  ;;  %v2832_v50 = vld [vmem:[%s17185_s3 + $0xf8] sm:$0xff] }
 0x2b1   : > { %2726 = vrot.lane.b32.xlu1 %v17521_v13, %s17317_s24  ;;  %3129 = vmatmul.mubr.f32.gmra.mxu0 %v2806_v62  ;;  %v2827_v62 = vld [vmem:[%s17185_s3 + $0xd0] sm:$0xff] }
 0x2b2   : > { %2724 = vrot.lane.b32.xlu0 %v17522_v36, %s17317_s24  ;;  %3134 = vmatprep.mubr.f32.mxu0 %v2812_v30  ;;  %v2283_v42 = vsel %vm2269_vm8, %v2260_v53, %v9960_v25  ;;  %v2987_v53 = vld [vmem:[%s17186_s4 + $0x10] sm:$0xff]  ;;  %v2988_v30 = vld [vmem:[%s17186_s4 + $0x18] sm:$0xff] }
 0x2b3   : > { %v12402_v10 = vpop.permute.xlu1 %2382 }
 0x2b4   : > { %17523 = vst [vmem:[#allocation37_spill] sm:$0xff] %v12402_v10  ;;  %v2266_v38 = vpop.permute.xlu0 %2265  ;;  %v17578_v10 = vld [vmem:[#allocation13_spill] sm:$0xff] }
 0x2b5   : > { %2730 = vrot.lane.b32.xlu1 %v17524_v1, %s17317_s24  ;;  %v2285_v21 = vsel %vm2269_vm8, %v2266_v38, %v9961_v61  ;;  %v2284_v34 = vsel %vm2269_vm8, %v2264_v35, %v2266_v38  ;;  %3135 = vmatmul.mubr.f32.gmra.mxu0 %v2811_v29  ;;  %v17525_v61 = vld [vmem:[#allocation15_spill] sm:$0xff]  ;;  %v17526_v29 = vld [vmem:[#allocation54_spill] sm:$0xff]  ;;  %v2276_v38 = vsel %vm2269_vm8, %v12258_v9, %v12292_v44 }
 0x2b6   : > { %10018 = vrot.lane.b32.xlu0 %v17482_v0, %s17317_s24  ;;  %9403 = vmatprep.subr.msk.mxu1 %vm412_vm5, %v2285_v21  ;;  %v645_v25 = vmul.f32 %v17526_v29, %v17525_v61  ;;  %v643_v32 = vmul.f32 %v17526_v29, %v17527_v47  ;;  %v2989_v21 = vld [vmem:[%s17186_s4 + $0x20] sm:$0xff]  ;;  %v2275_v9 = vsel %vm2269_vm8, %v12228_v15, %v9950_v12  ;;  %v2826_v44 = vld [vmem:[%s17185_s3 + $0xc8] sm:$0xff] }
 0x2b7   : > { %v12421_v23 = vpop.permute.xlu1 %9963  ;;  %3140 = vmatprep.mubr.f32.mxu0 %v2817_v4  ;;  %9404 = vmatpush1.msk.msra.mxu1 %vm411_vm6, %v2284_v34  ;;  %v17528_v34 = vld [vmem:[#allocation55_spill] sm:$0xff]  ;;  %v2273_v15 = vsel %vm2269_vm8, %v12199_v19, %v9946_v22  ;;  %v17532_v12 = vld [vmem:[#allocation57_spill] sm:$0xff] }
 0x2b8   : > { %v12427_v20 = vpop.permute.xlu0 %2384  ;;  %9405 = vmatprep.subr.msk.mxu1 %vm412_vm5, %v2283_v42 }
 0x2b9   : > { %2995 = vperm.xlu1 %10022, %v2985_v37   ;;  %9406 = vmatpush1.msk.msra.mxu1 %vm411_vm6, %v2282_v57  ;;  %v644_v37 = vmul.f32 %v17528_v34, %v17527_v47  ;;  %v17529_v57 = vld [vmem:[#allocation25_spill] sm:$0xff]  ;;  %v17535_v47 = vld [vmem:[#allocation58_spill] sm:$0xff] }
 0x2ba   : > { %2732 = vrot.lane.b32.xlu0 %v11669_v51, %s17317_s24  ;;  %3141 = vmatmul.mubr.f32.gmra.mxu0 %v2816_v58  ;;  %v646_v58 = vmul.f32 %v17528_v34, %v17525_v61  ;;  %v17534_v61 = vld [vmem:[#allocation28_spill] sm:$0xff]  ;;  %s10626_s24 = smov 14  }
 0x2bb   : > { %9407 = vmatprep.subr.msk.mxu1 %vm412_vm5, %v2281_v18  ;;  %v12454_v31 = vpop.permute.xlu1 %2390  ;;  %3146 = vmatprep.mubr.f32.mxu0 %v2822_v17  ;;  %v811_v17 = vadd.f32 %v17529_v57, %v643_v32  ;;  %v17530_v18 = vld [vmem:[#allocation16_spill] sm:$0xff]  ;;  %v1183_v32 = vmul.f32 %v17535_v47, %v17534_v61 }
 0x2bc   : > { %9408 = vmatpush1.msk.msra.mxu1 %vm411_vm6, %v2280_v14  ;;  %v12462_v35 = vpop.permute.xlu0 %2388 }
 0x2bd   : > { %9409 = vmatprep.subr.msk.mxu1 %vm412_vm5, %v2279_v55  ;;  %3005 = vperm.xlu1 %10022, %v2987_v53   ;;  %v17531_v53 = vld [vmem:[#allocation56_spill] sm:$0xff]  ;;  %v976_v55 = vmul.f32 %v17532_v12, %v17530_v18 }
 0x2be   : > { %9410 = vmatpush1.msk.msra.mxu1 %vm411_vm6, %v2278_v3  ;;  %3000 = vperm.xlu0 %9861, %v2986_v45   ;;  %v975_v14 = vmul.f32 %v17531_v53, %v17530_v18  ;;  %v812_v45 = vadd.f32 %v17529_v57, %v644_v37  ;;  %v17536_v37 = vld [vmem:[#allocation29_spill] sm:$0xff] }
 0x2bf   : > { %3147 = vmatmul.mubr.f32.gmra.mxu0 %v2821_v8  ;;  %9411 = vmatprep.subr.msk.mxu1 %vm412_vm5, %v2277_v16  ;;  %v12493_v4 = vpop.permute.xlu1 %2396  ;;  %v17533_v8 = vld [vmem:[#allocation42_spill] sm:$0xff]  ;;  %v813_v22 = vadd.f32 %v17536_v37, %v645_v25  ;;  %v2992_v25 = vld [vmem:[%s17186_s4 + $0x38] sm:$0xff] }
 0x2c0   : > { %9412 = vmatpush1.msk.msra.mxu1 %vm411_vm6, %v2276_v38  ;;  %v12504_v42 = vpop.permute.xlu0 %2394  ;;  %3152 = vmatprep.mubr.f32.mxu0 %v2827_v62  ;;  %v973_v3 = vmul.f32 %v17531_v53, %v17533_v8  ;;  %v2272_v62 = vsel %vm2269_vm8, %v12203_v27, %v12199_v19  ;;  %v974_v38 = vmul.f32 %v17532_v12, %v17533_v8  ;;  %v17541_v8 = vld [vmem:[#allocation60_spill] sm:$0xff] }
 0x2c1   : > { %9413 = vmatprep.subr.msk.mxu1 %vm412_vm5, %v2275_v9  ;;  %3010 = vperm.xlu1 %10022, %v2988_v30   ;;  %v2991_v30 = vld [vmem:[%s17186_s4 + $0x30] sm:$0xff]  ;;  %v2271_v27 = vsel %vm2269_vm8, %v12181_v46, %v9945_v11  ;;  %v2837_v11 = vld [vmem:[%s17185_s3 + $0x120] sm:$0xff] }
 0x2c2   : > { %9414 = vmatpush1.msk.msra.mxu1 %vm411_vm6, %v2274_v54  ;;  %3015 = vperm.xlu0 %9861, %v2989_v21   ;;  %v2831_v21 = vld [vmem:[%s17185_s3 + $0xf0] sm:$0xff]  ;;  %v1021_v9 = vadd.f32 %v973_v3, %v811_v17  ;;  %v814_v54 = vadd.f32 %v17536_v37, %v646_v58 }
 0x2c3   : > { %3153 = vmatmul.mubr.f32.gmra.mxu0 %v2826_v44  ;;  %9415 = vmatprep.subr.msk.mxu1 %vm412_vm5, %v2273_v15  ;;  %v12541_v16 = vpop.permute.xlu1 %2400  ;;  %v17537_v44 = vld [vmem:[#allocation72_spill] sm:$0xff]  ;;  %v17538_v17 = vld [vmem:[#allocation59_spill] sm:$0xff] }
 0x2c4   : > { %9416 = vmatpush1.msk.msra.mxu1 %vm411_vm6, %v2272_v62  ;;  %v12552_v19 = vpop.permute.xlu0 %9968  ;;  %3158 = vmatprep.mubr.f32.mxu0 %v2832_v50  ;;  %v2270_v57 = vsel %vm2269_vm8, %v17537_v44, %v12181_v46  ;;  %v1022_v50 = vadd.f32 %v974_v38, %v812_v45  ;;  %v1184_v18 = vmul.f32 %v17538_v17, %v17534_v61  ;;  %v17539_v46 = vld [vmem:[#allocation66_spill] sm:$0xff]  ;;  %v17542_v45 = vld [vmem:[#allocation65_spill] sm:$0xff] }
 0x2c5   : > { %9417 = vmatprep.subr.msk.mxu1 %vm412_vm5, %v2271_v27  ;;  %3020 = vperm.xlu1 %10022, %v2990_v5   ;;  %v1185_v15 = vmul.f32 %v17535_v47, %v17539_v46  ;;  %v17540_v5 = vld [vmem:[#allocation38_spill] sm:$0xff]  ;;  %v647_v62 = vmul.f32 %v17526_v29, %v17542_v45  ;;  %v17543_v38 = vld [vmem:[#allocation61_spill] sm:$0xff]  ;;  %v1023_v44 = vadd.f32 %v975_v14, %v813_v22  ;;  %v17547_v14 = vld [vmem:[#allocation44_spill] sm:$0xff] }
 0x2c6   : > { %9418 = vmatpush1.msk.msra.mxu1 %vm411_vm6, %v2270_v57  ;;  %3025 = vperm.xlu0 %9861, %v2991_v30   ;;  %v1393_v3 = vmul.f32 %v17541_v8, %v17540_v5  ;;  %v1186_v30 = vmul.f32 %v17538_v17, %v17539_v46  ;;  %v1394_v61 = vmul.f32 %v17543_v38, %v17540_v5 }
 0x2c7   : > { %3159 = vmatmul.mubr.f32.gmra.mxu0 %v2831_v21  ;;  %3187 = vmatprep.subr.mxu1 %v11669_v51  ;;  %v12581_v58 = vpop.permute.xlu1 %2406  ;;  %v2836_v51 = vld [vmem:[%s17185_s3 + $0x118] sm:$0xff]  ;;  %v17544_v21 = vld [vmem:[#allocation17_spill] sm:$0xff]  ;;  %v1231_v57 = vadd.f32 %v1183_v32, %v1021_v9  ;;  %v1024_v46 = vadd.f32 %v976_v55, %v814_v54  ;;  %v815_v5 = vadd.f32 %v17545_v40, %v647_v62  ;;  %v17552_v62 = vld [vmem:[#allocation30_spill] sm:$0xff] }
 0x2c8   : > { %3188 = vmatpush1.msra.mxu1 %v17524_v1  ;;  %v12590_v27 = vpop.permute.xlu0 %2402  ;;  %3164 = vmatprep.mubr.f32.mxu0 %v2837_v11  ;;  %v649_v37 = vmul.f32 %v17526_v29, %v17544_v21  ;;  %v1232_v49 = vadd.f32 %v1184_v18, %v1022_v50  ;;  %v648_v1 = vmul.f32 %v17528_v34, %v17542_v45  ;;  %v17549_v9 = vld [vmem:[#allocation41_spill] sm:$0xff] }
 0x2c9   : > { %3189 = vmatprep.subr.mxu1 %v17521_v13  ;;  %3030 = vperm.xlu1 %10022, %v2992_v25   ;;  %v1233_v11 = vadd.f32 %v1185_v15, %v1023_v44  ;;  %v12604_v28 = vadd.f32 %v1393_v3, %v1231_v57  ;;  %v977_v55 = vmul.f32 %v17531_v53, %v17547_v14 }
 0x2ca   : > { %3190 = vmatpush1.msra.mxu1 %v17522_v36  ;;  %10024 = vrot.lane.b32.xlu0 %v17482_v0, %s10620_s17  ;;  %v1234_v32 = vadd.f32 %v1186_v30, %v1024_v46  ;;  %v12611_v36 = vadd.f32 %v1394_v61, %v1232_v49  ;;  %v1395_v54 = vmul.f32 %v17541_v8, %v17549_v9  ;;  %v17553_v61 = vld [vmem:[#allocation68_spill] sm:$0xff] }
 0x2cb   : > { %17546 = vst [vmem:[#allocation11_spill] sm:$0xff] %v12604_v28  ;;  %3165 = vmatmul.mubr.f32.gmra.mxu0 %v2836_v51  ;;  %3191 = vmatprep.subr.mxu1 %v11628_v24  ;;  %v12607_v13 = vpop.permute.xlu1 %9973  ;;  %v816_v50 = vadd.f32 %v17545_v40, %v648_v1  ;;  %v17550_v24 = vld [vmem:[#allocation31_spill] sm:$0xff]  ;;  %v1396_v49 = vmul.f32 %v17543_v38, %v17549_v9  ;;  %v17551_v40 = vld [vmem:[#allocation18_spill] sm:$0xff] }
 0x2cc   : > { %17548 = vst [vmem:[#allocation23_spill] sm:$0xff] %v12611_v36  ;;  %3192 = vmatpush1.msra.mxu1 %v11637_v41  ;;  %v12614_v22 = vpop.permute.xlu0 %2408  ;;  %3348 = vmatprep.mubr.f32.mxu0 %v17482_v0  ;;  %v817_v25 = vadd.f32 %v17550_v24, %v649_v37  ;;  %v1025_v41 = vadd.f32 %v977_v55, %v815_v5 }
 0x2cd   : > { %3193 = vmatprep.subr.mxu1 %v11609_v39  ;;  %3499 = vrot.lane.b32.xlu1 %v12604_v28, %s10620_s17  ;;  %v650_v18 = vmul.f32 %v17528_v34, %v17544_v21  ;;  %v979_v39 = vmul.f32 %v17531_v53, %v17551_v40  ;;  %v978_v15 = vmul.f32 %v17532_v12, %v17547_v14  ;;  %v17554_v21 = vld [vmem:[#allocation12_spill] sm:$0xff] }
 0x2ce   : > { %3194 = vmatpush1.msra.mxu1 %v11613_v52  ;;  %3501 = vrot.lane.b32.xlu0 %v12611_v36, %s10620_s17  ;;  %v12635_v3 = vadd.f32 %v1395_v54, %v1233_v11  ;;  %v1187_v52 = vmul.f32 %v17535_v47, %v17552_v62  ;;  %v12642_v30 = vadd.f32 %v1396_v49, %v1234_v32  ;;  %v17555_v11 = vld [vmem:[#allocation67_spill] sm:$0xff] }
 0x2cf   : > { %3195 = vmatprep.subr.mxu1 %v11596_v60  ;;  %v12638_v45 = vpop.permute.xlu1 %2414  ;;  %v1189_v51 = vmul.f32 %v17535_v47, %v17553_v61  ;;  %v1397_v37 = vmul.f32 %v17541_v8, %v17554_v21  ;;  %v818_v57 = vadd.f32 %v17550_v24, %v650_v18  ;;  %v1026_v60 = vadd.f32 %v978_v15, %v816_v50  ;;  %v17560_v15 = vld [vmem:[#allocation47_spill] sm:$0xff] }
 0x2d0   : > { %3196 = vmatpush1.msra.mxu1 %v11567_v33  ;;  %v12649_v44 = vpop.permute.xlu0 %2412  ;;  %v980_v46 = vmul.f32 %v17532_v12, %v17551_v40  ;;  %v1027_v5 = vadd.f32 %v979_v39, %v817_v25  ;;  %v1235_v1 = vadd.f32 %v1187_v52, %v1025_v41  ;;  %v1188_v33 = vmul.f32 %v17538_v17, %v17552_v62  ;;  %v17557_v25 = vld [vmem:[#allocation40_spill] sm:$0xff] }
 0x2d1   : > { %3197 = vmatprep.subr.mxu1 %v11573_v6  ;;  %3505 = vrot.lane.b32.xlu1 %v12635_v3, %s10620_s17  ;;  %v651_v14 = vmul.f32 %v17526_v29, %v17555_v11  ;;  %v1190_v6 = vmul.f32 %v17538_v17, %v17553_v61  ;;  %v1398_v55 = vmul.f32 %v17543_v38, %v17554_v21 }
 0x2d2   : > { %3198 = vmatpush1.msra.mxu1 %v11548_v48  ;;  %3507 = vrot.lane.b32.xlu0 %v12642_v30, %s10620_s17  ;;  %v652_v48 = vmul.f32 %v17528_v34, %v17555_v11  ;;  %v1237_v9 = vadd.f32 %v1189_v51, %v1027_v5  ;;  %v12673_v54 = vadd.f32 %v1397_v37, %v1235_v1 }
 0x2d3   : > { %3199 = vmatprep.subr.mxu1 %v11528_v63  ;;  %v12669_v32 = vpop.permute.xlu1 %2420  ;;  %v1028_v24 = vadd.f32 %v980_v46, %v818_v57  ;;  %v819_v49 = vadd.f32 %v17557_v25, %v651_v14  ;;  %v1236_v41 = vadd.f32 %v1188_v33, %v1026_v60  ;;  %v17558_v63 = vld [vmem:[#allocation43_spill] sm:$0xff]  ;;  %v981_v62 = vmul.f32 %v17531_v53, %v17560_v15  ;;  %v17563_v57 = vld [vmem:[#allocation20_spill] sm:$0xff]  ;;  %v17564_v46 = vld [vmem:[#allocation33_spill] sm:$0xff] }
 0x2d4   : > { %17556 = vst [vmem:[#allocation36_spill] sm:$0xff] %v12673_v54  ;;  %3200 = vmatpush1.msra.mxu1 %v11537_v43  ;;  %v12676_v50 = vpop.permute.xlu0 %2418  ;;  %v1399_v18 = vmul.f32 %v17541_v8, %v17558_v63  ;;  %v820_v40 = vadd.f32 %v17557_v25, %v652_v48  ;;  %v17559_v43 = vld [vmem:[#allocation19_spill] sm:$0xff]  ;;  %v983_v60 = vmul.f32 %v17531_v53, %v17563_v57 }
 0x2d5   : > { %3201 = vmatprep.subr.mxu1 %v11511_v26  ;;  %10029 = vrot.lane.b32.xlu1 %v17482_v0, %s10620_s17  ;;  %v653_v39 = vmul.f32 %v17526_v29, %v17559_v43  ;;  %v1238_v26 = vadd.f32 %v1190_v6, %v1028_v24  ;;  %v12692_v52 = vadd.f32 %v1398_v55, %v1236_v41  ;;  %v17565_v55 = vld [vmem:[#allocation32_spill] sm:$0xff]  ;;  %v17567_v24 = vld [vmem:[#allocation70_spill] sm:$0xff] }
 0x2d6   : > { %3202 = vmatpush1.msra.mxu1 %v11509_v7  ;;  %3511 = vrot.lane.b32.xlu0 %v12673_v54, %s10620_s17  ;;  %v654_v51 = vmul.f32 %v17528_v34, %v17559_v43  ;;  %v982_v7 = vmul.f32 %v17532_v12, %v17560_v15  ;;  %v12700_v21 = vadd.f32 %v1399_v18, %v1237_v9 }
 0x2d7   : > { %17561 = vst [vmem:[#allocation15_spill] sm:$0xff] %v12692_v52  ;;  %v12694_v61 = vpop.permute.xlu1 %2424  ;;  %v821_v5 = vadd.f32 %v17564_v46, %v653_v39  ;;  %v1400_v1 = vmul.f32 %v17543_v38, %v17558_v63  ;;  %v1029_v33 = vadd.f32 %v981_v62, %v819_v49  ;;  %v984_v11 = vmul.f32 %v17532_v12, %v17563_v57  ;;  %v17568_v49 = vld [vmem:[#allocation24_spill] sm:$0xff]  ;;  %v17570_v57 = vld [vmem:[#allocation27_spill] sm:$0xff] }
 0x2d8   : > { %17562 = vst [vmem:[#allocation54_spill] sm:$0xff] %v12700_v21  ;;  %v12702_v37 = vpop.permute.xlu0 %9978  ;;  %v822_v14 = vadd.f32 %v17564_v46, %v654_v51  ;;  %v1030_v6 = vadd.f32 %v982_v7, %v820_v40  ;;  %v1191_v48 = vmul.f32 %v17535_v47, %v17565_v55  ;;  %v1193_v25 = vmul.f32 %v17535_v47, %v17567_v24  ;;  %v17569_v40 = vld [vmem:[#allocation69_spill] sm:$0xff] }
 0x2d9   : > { %3513 = vrot.lane.b32.xlu1 %v12692_v52, %s10620_s17  ;;  %v12718_v9 = vadd.f32 %v1400_v1, %v1238_v26  ;;  %v1401_v41 = vmul.f32 %v17541_v8, %v17568_v49  ;;  %v1192_v18 = vmul.f32 %v17538_v17, %v17565_v55  ;;  %v655_v43 = vmul.f32 %v17526_v29, %v17569_v40 }
 0x2da   : > { %3517 = vrot.lane.b32.xlu0 %v12700_v21, %s10620_s17  ;;  %v1194_v39 = vmul.f32 %v17538_v17, %v17567_v24  ;;  %v1402_v15 = vmul.f32 %v17543_v38, %v17568_v49  ;;  %v1031_v26 = vadd.f32 %v983_v60, %v821_v5  ;;  %v1239_v51 = vadd.f32 %v1191_v48, %v1029_v33  ;;  %v17571_v60 = vld [vmem:[#allocation21_spill] sm:$0xff]  ;;  %v17572_v33 = vld [vmem:[#allocation51_spill] sm:$0xff] }
 0x2db   : > { %17566 = vst [vmem:[#allocation63_spill] sm:$0xff] %v12718_v9  ;;  %v12724_v63 = vpop.permute.xlu1 %2543  ;;  %v1032_v7 = vadd.f32 %v984_v11, %v822_v14  ;;  %v823_v46 = vadd.f32 %v17570_v57, %v655_v43  ;;  %v1240_v1 = vadd.f32 %v1192_v18, %v1030_v6  ;;  %v656_v55 = vmul.f32 %v17528_v34, %v17569_v40  ;;  %v17573_v18 = vld [vmem:[#allocation45_spill] sm:$0xff] }
 0x2dc   : > { %v12734_v62 = vpop.permute.xlu0 %2426  ;;  %v1241_v24 = vadd.f32 %v1193_v25, %v1031_v26  ;;  %v12743_v59 = vadd.f32 %v1401_v41, %v1239_v51  ;;  %v657_v5 = vmul.f32 %v17526_v29, %v17571_v60  ;;  %v985_v11 = vmul.f32 %v17531_v53, %v17572_v33  ;;  %v17574_v41 = vld [vmem:[#allocation35_spill] sm:$0xff] }
 0x2dd   : > { %3519 = vrot.lane.b32.xlu1 %v12718_v9, %s10620_s17  ;;  %v1242_v14 = vadd.f32 %v1194_v39, %v1032_v7  ;;  %v12751_v48 = vadd.f32 %v1402_v15, %v1240_v1  ;;  %v1403_v43 = vmul.f32 %v17541_v8, %v17573_v18  ;;  %v824_v25 = vadd.f32 %v17570_v57, %v656_v55  ;;  %v17575_v15 = vld [vmem:[#allocation22_spill] sm:$0xff] }
 0x2de   : > { %10034 = vrot.lane.b32.xlu0 %v17482_v0, %s10620_s17  ;;  %v825_v40 = vadd.f32 %v17574_v41, %v657_v5  ;;  %v1404_v29 = vmul.f32 %v17543_v38, %v17573_v18  ;;  %v1033_v26 = vadd.f32 %v985_v11, %v823_v46  ;;  %v658_v39 = vmul.f32 %v17528_v34, %v17571_v60  ;;  %v17576_v55 = vld [vmem:[#allocation34_spill] sm:$0xff]  ;;  %v17577_v11 = vld [vmem:[#allocation71_spill] sm:$0xff] }
 0x2df   : > { %v12745_v49 = vpop.permute.xlu1 %9983  ;;  %v987_v51 = vmul.f32 %v17531_v53, %v17575_v15  ;;  %v986_v7 = vmul.f32 %v17532_v12, %v17572_v33  ;;  %v12771_v57 = vadd.f32 %v1403_v43, %v1241_v24  ;;  %v1195_v5 = vmul.f32 %v17535_v47, %v17576_v55 }
 0x2e0   : > { %v12753_v6 = vpop.permute.xlu0 %2545  ;;  %v12777_v46 = vadd.f32 %v1404_v29, %v1242_v14  ;;  %v1197_v18 = vmul.f32 %v17535_v47, %v17577_v11  ;;  %v1405_v34 = vmul.f32 %v17541_v8, %v17578_v10  ;;  %v826_v53 = vadd.f32 %v17574_v41, %v658_v39 }
 0x2e1   : > { %3523 = vrot.lane.b32.xlu1 %v12743_v59, %s10620_s17  ;;  %v1034_v33 = vadd.f32 %v986_v7, %v824_v25  ;;  %v1035_v24 = vadd.f32 %v987_v51, %v825_v40  ;;  %v1243_v43 = vadd.f32 %v1195_v5, %v1033_v26  ;;  %v988_v14 = vmul.f32 %v17532_v12, %v17575_v15  ;;  %v17579_v12 = vld [vmem:[#allocation48_spill] sm:$0xff] }
 0x2e2   : > { %3525 = vrot.lane.b32.xlu0 %v12751_v48, %s10620_s17  ;;  %v1196_v47 = vmul.f32 %v17538_v17, %v17576_v55  ;;  %v1198_v29 = vmul.f32 %v17538_v17, %v17577_v11  ;;  %v1406_v25 = vmul.f32 %v17543_v38, %v17578_v10  ;;  %v1407_v15 = vmul.f32 %v17541_v8, %v17579_v12 }
 0x2e3   : > { %v12773_v1 = vpop.permute.xlu1 %2551  ;;  %v1245_v39 = vadd.f32 %v1197_v18, %v1035_v24  ;;  %v12800_v40 = vadd.f32 %v1405_v34, %v1243_v43  ;;  %v1036_v51 = vadd.f32 %v988_v14, %v826_v53  ;;  %v1408_v18 = vmul.f32 %v17543_v38, %v17579_v12 }
 0x2e4   : > { %v12783_v60 = vpop.permute.xlu0 %2549  ;;  %v1244_v7 = vadd.f32 %v1196_v47, %v1034_v33 }
 0x2e5   : > { %3529 = vrot.lane.b32.xlu1 %v12771_v57, %s10620_s17  ;;  %v1246_v17 = vadd.f32 %v1198_v29, %v1036_v51  ;;  %v12814_v5 = vadd.f32 %v1407_v15, %v1245_v39 }
 0x2e6   : > { %3531 = vrot.lane.b32.xlu0 %v12777_v46, %s10620_s17  ;;  %v12810_v10 = vadd.f32 %v1406_v25, %v1244_v7 }
 0x2e7   : > { %v12798_v41 = vpop.permute.xlu1 %2557  ;;  %17581 = vst [vmem:[#allocation25_spill] sm:$0xff] %v12814_v5  ;;  %v12824_v8 = vadd.f32 %v1408_v18, %v1246_v17 }
 0x2e8   : > { %v12802_v26 = vpop.permute.xlu0 %2555  ;;  %17580 = vst [vmem:[#allocation55_spill] sm:$0xff] %v12810_v10 }
 0x2e9   : > { %10039 = vrot.lane.b32.xlu1 %v17482_v0, %s10620_s17  ;;  %17582 = vst [vmem:[#allocation16_spill] sm:$0xff] %v12824_v8 }
 0x2ea   : > { %3535 = vrot.lane.b32.xlu0 %v12800_v40, %s10620_s17 }
 0x2eb   : > { %v12812_v55 = vpop.permute.xlu1 %2561 }
 0x2ec   : > { %v12816_v11 = vpop.permute.xlu0 %9988 }
 0x2ed   : > { %3537 = vrot.lane.b32.xlu1 %v12810_v10, %s10620_s17 }
 0x2ee   : > { %3541 = vrot.lane.b32.xlu0 %v12814_v5, %s10620_s17 }
 0x2ef   : > { %v2568_v34 = vpop.permute.xlu1 %2567 }
 0x2f0   : > { %v2564_v53 = vpop.permute.xlu0 %2563 }
 0x2f1   : > { %3543 = vrot.lane.b32.xlu1 %v12824_v8, %s10620_s17  ;;  %s10629_s17 = smov 114  }
 0x2f2   : > { %10044 = vrot.lane.b32.xlu0 %v17482_v0, %s10621_s14 }
 0x2f3   : > { %v9994_v33 = vpop.permute.xlu1 %9993 }
 0x2f4   : > { %v2570_v24 = vpop.permute.xlu0 %2569  ;;  %v9996_v18 = vunpack.i.h.bf16 %v9994_v33 }
 0x2f5   : > { %3660 = vrot.lane.b32.xlu1 %v12604_v28, %s10621_s14 }
 0x2f6   : > { %3662 = vrot.lane.b32.xlu0 %v12611_v36, %s10621_s14 }
 0x2f7   : > { %v2576_v38 = vpop.permute.xlu1 %2575 }
 0x2f8   : > { %v2574_v43 = vpop.permute.xlu0 %2573 }
 0x2f9   : > { %3666 = vrot.lane.b32.xlu1 %v12635_v3, %s10621_s14 }
 0x2fa   : > { %3668 = vrot.lane.b32.xlu0 %v12642_v30, %s10621_s14 }
 0x2fb   : > { %v2582_v14 = vpop.permute.xlu1 %2581 }
 0x2fc   : > { %v2580_v47 = vpop.permute.xlu0 %2579 }
 0x2fd   : > { %10049 = vrot.lane.b32.xlu1 %v17482_v0, %s10621_s14 }
 0x2fe   : > { %3672 = vrot.lane.b32.xlu0 %v12673_v54, %s10621_s14 }
 0x2ff   : > { %v2586_v29 = vpop.permute.xlu1 %2585 }
 0x300   : > { %v9999_v25 = vpop.permute.xlu0 %9998 }
 0x301   : > { %v10001_v39 = vunpack.i.h.bf16 %v9999_v25  ;;  %3674 = vrot.lane.b32.xlu1 %v12692_v52, %s10621_s14  ;;  %v10000_v51 = vunpack.i.l.bf16 %v9999_v25  ;;  %v9995_v52 = vunpack.i.l.bf16 %v9994_v33  ;;  %v2602_v33 = vsel %vm17393_vm9, %v2574_v43, %v2576_v38 }
 0x302   : > { %3678 = vrot.lane.b32.xlu0 %v12700_v21, %s10621_s14 }
 0x303   : > { %v12846_v7 = vpop.permute.xlu1 %2688  ;;  %v2605_v25 = vsel %vm17393_vm9, %v2582_v14, %v10000_v51  ;;  %v9990_v51 = vunpack.i.l.bf16 %v12816_v11 }
 0x304   : > { %17583 = vst [vmem:[#allocation56_spill] sm:$0xff] %v12846_v7  ;;  %v2588_v12 = vpop.permute.xlu0 %2587 }
 0x305   : > { %3680 = vrot.lane.b32.xlu1 %v12718_v9, %s10621_s14  ;;  %v2607_v15 = vsel %vm17393_vm9, %v2588_v12, %v10001_v39  ;;  %v2606_v17 = vsel %vm17393_vm9, %v2586_v29, %v2588_v12  ;;  %v2604_v9 = vsel %vm17393_vm9, %v2580_v47, %v2582_v14  ;;  %v9991_v39 = vunpack.i.h.bf16 %v12816_v11 }
 0x306   : > { %10054 = vrot.lane.b32.xlu0 %v17482_v0, %s10621_s14  ;;  %3203 = vmatprep.subr.mxu1 %v2607_v15  ;;  %v2603_v29 = vsel %vm17393_vm9, %v2576_v38, %v9996_v18  ;;  %v2601_v14 = vsel %vm17393_vm9, %v2570_v24, %v9995_v52  ;;  %v2598_v11 = vsel %vm17393_vm9, %v12812_v55, %v2564_v53  ;;  %v9986_v52 = vunpack.i.h.bf16 %v12745_v49 }
 0x307   : > { %3204 = vmatpush2.msra.mxu1 %v2606_v17  ;;  %v12854_v21 = vpop.permute.xlu1 %10003  ;;  %v2599_v15 = vsel %vm17393_vm9, %v2564_v53, %v9991_v39  ;;  %v9985_v38 = vunpack.i.l.bf16 %v12745_v49  ;;  %v2596_v17 = vsel %vm17393_vm9, %v12802_v26, %v12798_v41  ;;  %v9981_v18 = vunpack.i.h.bf16 %v12702_v37 }
 0x308   : > { %v12857_v7 = vpop.permute.xlu0 %2690  ;;  %3205 = vmatprep.subr.mxu1 %v2605_v25  ;;  %v2595_v49 = vsel %vm17393_vm9, %v12773_v1, %v9986_v52  ;;  %v2594_v55 = vsel %vm17393_vm9, %v12783_v60, %v12773_v1  ;;  %v9980_v53 = vunpack.i.l.bf16 %v12702_v37  ;;  %v2592_v39 = vsel %vm17393_vm9, %v12724_v63, %v12753_v6 }
 0x309   : > { %3206 = vmatpush2.msra.mxu1 %v2604_v9  ;;  %3684 = vrot.lane.b32.xlu1 %v12743_v59, %s10621_s14  ;;  %v2600_v9 = vsel %vm17393_vm9, %v2568_v34, %v2570_v24  ;;  %v2597_v34 = vsel %vm17393_vm9, %v12798_v41, %v9990_v51  ;;  %v2593_v26 = vsel %vm17393_vm9, %v12753_v6, %v9985_v38  ;;  %v9976_v60 = vunpack.i.h.bf16 %v12607_v13 }
 0x30a   : > { %3686 = vrot.lane.b32.xlu0 %v12751_v48, %s10621_s14  ;;  %3207 = vmatprep.subr.mxu1 %v2603_v29  ;;  %v2446_v37 = vsel %vm17358_vm10, %v12734_v62, %v9981_v18  ;;  %v2445_v1 = vsel %vm17358_vm10, %v12694_v61, %v12734_v62  ;;  %v9975_v63 = vunpack.i.l.bf16 %v12607_v13  ;;  %v2444_v29 = vsel %vm17358_vm10, %v12669_v32, %v9980_v53  ;;  %v17585_v53 = vld [vmem:[#allocation15_spill] sm:$0xff] }
 0x30b   : > { %3208 = vmatpush2.msra.mxu1 %v2602_v33  ;;  %v12868_v12 = vpop.permute.xlu1 %2696  ;;  %v2443_v33 = vsel %vm17358_vm10, %v12676_v50, %v12669_v32  ;;  %v9971_v61 = vunpack.i.h.bf16 %v12552_v19  ;;  %v2442_v13 = vsel %vm17358_vm10, %v12638_v45, %v9976_v60  ;;  %v2441_v32 = vsel %vm17358_vm10, %v12649_v44, %v12638_v45 }
 0x30c   : > { %v12871_v47 = vpop.permute.xlu0 %2694  ;;  %3209 = vmatprep.subr.mxu1 %v2601_v14  ;;  %v9970_v50 = vunpack.i.l.bf16 %v12552_v19  ;;  %v2440_v14 = vsel %vm17358_vm10, %v12614_v22, %v9975_v63  ;;  %v2439_v45 = vsel %vm17358_vm10, %v12581_v58, %v12614_v22  ;;  %v2437_v44 = vsel %vm17358_vm10, %v12541_v16, %v12590_v27  ;;  %v2819_v63 = vld [vmem:[%s17185_s3 + $0x90] sm:$0xff] }
 0x30d   : > { %3210 = vmatpush2.msra.mxu1 %v2600_v9  ;;  %3690 = vrot.lane.b32.xlu1 %v12771_v57, %s10621_s14  ;;  %v2438_v19 = vsel %vm17358_vm10, %v12590_v27, %v9971_v61  ;;  %v9966_v58 = vunpack.i.h.bf16 %v12421_v23  ;;  %v9965_v22 = vunpack.i.l.bf16 %v12421_v23  ;;  %v2433_v16 = vsel %vm17358_vm10, %v12462_v35, %v12454_v31 }
 0x30e   : > { %3692 = vrot.lane.b32.xlu0 %v12777_v46, %s10621_s14  ;;  %3211 = vmatprep.subr.mxu1 %v2599_v15  ;;  %v2436_v15 = vsel %vm17358_vm10, %v12493_v4, %v9970_v50 }
 0x30f   : > { %3212 = vmatpush2.msra.mxu1 %v2598_v11  ;;  %v12883_v43 = vpop.permute.xlu1 %2702  ;;  %v2435_v11 = vsel %vm17358_vm10, %v12504_v42, %v12493_v4  ;;  %v2434_v23 = vsel %vm17358_vm10, %v12454_v31, %v9966_v58  ;;  %v2432_v4 = vsel %vm17358_vm10, %v12427_v20, %v9965_v22  ;;  %v2803_v42 = vld [vmem:[%s17185_s3 + $0x10] sm:$0xff]  ;;  %v17584_v31 = vld [vmem:[#allocation37_spill] sm:$0xff] }
 0x310   : > { %v12887_v24 = vpop.permute.xlu0 %2700  ;;  %3213 = vmatprep.subr.mxu1 %v2597_v34  ;;  %v2431_v35 = vsel %vm17358_vm10, %v17584_v31, %v12427_v20  ;;  %v2809_v34 = vld [vmem:[%s17185_s3 + $0x40] sm:$0xff]  ;;  %v2808_v20 = vld [vmem:[%s17185_s3 + $0x38] sm:$0xff]  ;;  %vm4177_vm10 = vcmask 244736  }
 0x311   : > { %3214 = vmatpush2.msra.mxu1 %v2596_v17  ;;  %10059 = vrot.lane.b32.xlu1 %v17482_v0, %s10621_s14 }
 0x312   : > { %3696 = vrot.lane.b32.xlu0 %v12800_v40, %s10621_s14  ;;  %3215 = vmatprep.subr.mxu1 %v2595_v49  ;;  %v2814_v49 = vld [vmem:[%s17185_s3 + $0x68] sm:$0xff] }
 0x313   : > { %3216 = vmatpush2.msra.mxu1 %v2594_v55  ;;  %v12903_v41 = vpop.permute.xlu1 %2706 }
 0x314   : > { %v12907_v25 = vpop.permute.xlu0 %10008  ;;  %3217 = vmatprep.subr.mxu1 %v2593_v26  ;;  %v17586_v26 = vld [vmem:[#allocation54_spill] sm:$0xff] }
 0x315   : > { %3218 = vmatpush2.msra.mxu1 %v2592_v39  ;;  %3698 = vrot.lane.b32.xlu1 %v12810_v10, %s10621_s14  ;;  %v2813_v39 = vld [vmem:[%s17185_s3 + $0x60] sm:$0xff]  ;;  %v10011_v58 = vunpack.i.h.bf16 %v12907_v25 }
 0x316   : > { %3702 = vrot.lane.b32.xlu0 %v12814_v5, %s10621_s14  ;;  %9419 = vmatprep.subr.msk.mxu1 %vm402_vm1, %v2446_v37 }
 0x317   : > { %9420 = vmatpush2.msk.msra.mxu1 %vm401_vm2, %v2445_v1  ;;  %v12927_v6 = vpop.permute.xlu1 %2712 }
 0x318   : > { %v12934_v51 = vpop.permute.xlu0 %2708  ;;  %9421 = vmatprep.subr.msk.mxu1 %vm402_vm1, %v2444_v29 }
 0x319   : > { %9422 = vmatpush2.msk.msra.mxu1 %vm401_vm2, %v2443_v33  ;;  %3704 = vrot.lane.b32.xlu1 %v12824_v8, %s10621_s14  ;;  %v17587_v33 = vld [vmem:[#allocation63_spill] sm:$0xff]  ;;  %s10623_s14 = smov 31  }
 0x31a   : > { %10064 = vrot.lane.b32.xlu0 %v17482_v0, %s10622_s29  ;;  %9423 = vmatprep.subr.msk.mxu1 %vm402_vm1, %v2442_v13 }
 0x31b   : > { %9424 = vmatpush2.msk.msra.mxu1 %vm401_vm2, %v2441_v32  ;;  %v12955_v62 = vpop.permute.xlu1 %10013 }
 0x31c   : > { %v12959_v9 = vpop.permute.xlu0 %2714  ;;  %9425 = vmatprep.subr.msk.mxu1 %vm402_vm1, %v2440_v14  ;;  %v10016_v32 = vunpack.i.h.bf16 %v12955_v62  ;;  %v10015_v50 = vunpack.i.l.bf16 %v12955_v62  ;;  %v2824_v62 = vld [vmem:[%s17185_s3 + $0xb8] sm:$0xff] }
 0x31d   : > { %9426 = vmatpush2.msk.msra.mxu1 %vm401_vm2, %v2439_v45  ;;  %3821 = vrot.lane.b32.xlu1 %v12604_v28, %s10622_s29 }
 0x31e   : > { %3823 = vrot.lane.b32.xlu0 %v12611_v36, %s10622_s29  ;;  %9427 = vmatprep.subr.msk.mxu1 %vm402_vm1, %v2438_v19  ;;  %v2818_v19 = vld [vmem:[%s17185_s3 + $0x88] sm:$0xff] }
 0x31f   : > { %9428 = vmatpush2.msk.msra.mxu1 %vm401_vm2, %v2437_v44  ;;  %v2721_v52 = vpop.permute.xlu1 %2720 }
 0x320   : > { %v2719_v38 = vpop.permute.xlu0 %2718  ;;  %9429 = vmatprep.subr.msk.mxu1 %vm402_vm1, %v2436_v15  ;;  %v2748_v22 = vsel %vm17357_vm11, %v2721_v52, %v10016_v32  ;;  %v2820_v32 = vld [vmem:[%s17185_s3 + $0x98] sm:$0xff] }
 0x321   : > { %9430 = vmatpush2.msk.msra.mxu1 %vm401_vm2, %v2435_v11  ;;  %3827 = vrot.lane.b32.xlu1 %v12635_v3, %s10622_s29  ;;  %v2747_v15 = vsel %vm17357_vm11, %v2719_v38, %v2721_v52  ;;  %v10010_v11 = vunpack.i.l.bf16 %v12907_v25  ;;  %v2745_v52 = vsel %vm17357_vm11, %v12927_v6, %v12959_v9  ;;  %v2829_v25 = vld [vmem:[%s17185_s3 + $0xe0] sm:$0xff]  ;;  %v2744_v38 = vsel %vm17357_vm11, %v12934_v51, %v10011_v58  ;;  %v2830_v58 = vld [vmem:[%s17185_s3 + $0xe8] sm:$0xff] }
 0x322   : > { %3829 = vrot.lane.b32.xlu0 %v12642_v30, %s10622_s29  ;;  %9431 = vmatprep.subr.msk.mxu1 %vm402_vm1, %v2434_v23  ;;  %v2746_v23 = vsel %vm17357_vm11, %v12959_v9, %v10015_v50  ;;  %v2743_v6 = vsel %vm17357_vm11, %v12903_v41, %v12934_v51  ;;  %v10006_v9 = vunpack.i.h.bf16 %v12854_v21  ;;  %v2828_v41 = vld [vmem:[%s17185_s3 + $0xd8] sm:$0xff]  ;;  %v2741_v51 = vsel %vm17357_vm11, %v12887_v24, %v12883_v43 }
 0x323   : > { %9432 = vmatpush2.msk.msra.mxu1 %vm401_vm2, %v2433_v16  ;;  %v2727_v17 = vpop.permute.xlu1 %2726  ;;  %v2739_v24 = vsel %vm17357_vm11, %v12871_v47, %v12868_v12  ;;  %v17594_v47 = vld [vmem:[#allocation56_spill] sm:$0xff] }
 0x324   : > { %v2725_v27 = vpop.permute.xlu0 %2724  ;;  %9433 = vmatprep.subr.msk.mxu1 %vm402_vm1, %v2432_v4  ;;  %v2823_v4 = vld [vmem:[%s17185_s3 + $0xb0] sm:$0xff] }
 0x325   : > { %9434 = vmatpush2.msk.msra.mxu1 %vm401_vm2, %v2431_v35  ;;  %10069 = vrot.lane.b32.xlu1 %v17482_v0, %s10622_s29  ;;  %v2749_v44 = vsel %vm17357_vm11, %v2725_v27, %v2727_v17  ;;  %v2742_v27 = vsel %vm17357_vm11, %v12883_v43, %v10010_v11  ;;  %v2834_v35 = vld [vmem:[%s17185_s3 + $0x108] sm:$0xff]  ;;  %v2740_v43 = vsel %vm17357_vm11, %v12868_v12, %v10006_v9  ;;  %v2805_v12 = vld [vmem:[%s17185_s3 + $0x20] sm:$0xff]  ;;  %v2835_v11 = vld [vmem:[%s17185_s3 + $0x110] sm:$0xff] }
 0x326   : > { %3833 = vrot.lane.b32.xlu0 %v12673_v54, %s10622_s29  ;;  %3236 = vmatmul.mubr.f32.vlgmr.msra.gmra.mxu1 %v2803_v42  ;;  %v10005_v42 = vunpack.i.l.bf16 %v12854_v21 }
 0x327   : > { %3241 = vmatprep.mubr.f32.mxu1 %v2809_v34  ;;  %v2731_v37 = vpop.permute.xlu1 %2730 }
 0x328   : > { %v10019_v18 = vpop.permute.xlu0 %10018  ;;  %v2738_v34 = vsel %vm17357_vm11, %v12857_v7, %v10005_v42 }
 0x329   : > { %v10021_v55 = vunpack.i.h.bf16 %v10019_v18  ;;  %3835 = vrot.lane.b32.xlu1 %v17585_v53, %s10622_s29  ;;  %v10020_v1 = vunpack.i.l.bf16 %v10019_v18  ;;  %v2737_v18 = vsel %vm17357_vm11, %v17594_v47, %v12857_v7 }
 0x32a   : > { %3839 = vrot.lane.b32.xlu0 %v17586_v26, %s10622_s29  ;;  %3242 = vmatmul.mubr.f32.gmra.mxu1 %v2808_v20  ;;  %v2833_v20 = vld [vmem:[%s17185_s3 + $0x100] sm:$0xff] }
 0x32b   : > { %3247 = vmatprep.mubr.f32.mxu1 %v2814_v49  ;;  %v2750_v45 = vsel %vm17357_vm11, %v2727_v17, %v10020_v1 }
 0x32c   : > { %v2733_v60 = vpop.permute.xlu0 %2732 }
 0x32d   : > { %v2751_v29 = vsel %vm17357_vm11, %v2731_v37, %v2733_v60  ;;  %3841 = vrot.lane.b32.xlu1 %v17587_v33, %s10622_s29  ;;  %v2752_v61 = vsel %vm17357_vm11, %v2733_v60, %v10021_v55  ;;  %v2839_v55 = vld [vmem:[%s17185_s3 + $0x130] sm:$0xff]  ;;  %v2810_v37 = vld [vmem:[%s17185_s3 + $0x48] sm:$0xff] }
 0x32e   : > { %10074 = vrot.lane.b32.xlu0 %v17482_v0, %s10622_s29  ;;  %3248 = vmatmul.mubr.f32.gmra.mxu1 %v2813_v39  ;;  %v2838_v39 = vld [vmem:[%s17185_s3 + $0x128] sm:$0xff] }
 0x32f   : > { %9435 = vmatprep.subr.msk.mxu0 %vm412_vm5, %v2752_v61  ;;  %3253 = vmatprep.mubr.f32.mxu1 %v2819_v63  ;;  %v2815_v63 = vld [vmem:[%s17185_s3 + $0x70] sm:$0xff] }
 0x330   : > { %9436 = vmatpush1.msk.msra.mxu0 %vm411_vm6, %v2751_v29 }
 0x331   : > { %9437 = vmatprep.subr.msk.mxu0 %vm412_vm5, %v2750_v45  ;;  %3845 = vrot.lane.b32.xlu1 %v12743_v59, %s10622_s29 }
 0x332   : > { %9438 = vmatpush1.msk.msra.mxu0 %vm411_vm6, %v2749_v44  ;;  %3847 = vrot.lane.b32.xlu0 %v12751_v48, %s10622_s29 }
 0x333   : > { %3254 = vmatmul.mubr.f32.gmra.mxu1 %v2818_v19  ;;  %9439 = vmatprep.subr.msk.mxu0 %vm412_vm5, %v2748_v22  ;;  %v2825_v19 = vld [vmem:[%s17185_s3 + $0xc0] sm:$0xff] }
 0x334   : > { %9440 = vmatpush1.msk.msra.mxu0 %vm411_vm6, %v2747_v15  ;;  %v13078_v16 = vpop.permute.xlu1 %2995  ;;  %3259 = vmatprep.mubr.f32.mxu1 %v2824_v62 }
 0x335   : > { %17590 = vst [vmem:[#allocation57_spill] sm:$0xff] %v13078_v16  ;;  %9441 = vmatprep.subr.msk.mxu0 %vm412_vm5, %v2746_v23  ;;  %3851 = vrot.lane.b32.xlu1 %v12771_v57, %s10622_s29 }
 0x336   : > { %9442 = vmatpush1.msk.msra.mxu0 %vm411_vm6, %v2745_v52  ;;  %3853 = vrot.lane.b32.xlu0 %v12777_v46, %s10622_s29  ;;  %v2840_v52 = vld [vmem:[%s17185_s3 + $0x138] sm:$0xff] }
 0x337   : > { %3260 = vmatmul.mubr.f32.gmra.mxu1 %v2823_v4  ;;  %9443 = vmatprep.subr.msk.mxu0 %vm412_vm5, %v2744_v38 }
 0x338   : > { %9444 = vmatpush1.msk.msra.mxu0 %vm411_vm6, %v2743_v6  ;;  %v13110_v31 = vpop.permute.xlu1 %3005  ;;  %3265 = vmatprep.mubr.f32.mxu1 %v2829_v25 }
 0x339   : > { %17591 = vst [vmem:[#allocation42_spill] sm:$0xff] %v13110_v31  ;;  %9445 = vmatprep.subr.msk.mxu0 %vm412_vm5, %v2742_v27  ;;  %v13120_v21 = vpop.permute.xlu0 %3000  ;;  %10079 = vrot.lane.b32.xlu1 %v17482_v0, %s10622_s29 }
 0x33a   : > { %17592 = vst [vmem:[#allocation28_spill] sm:$0xff] %v13120_v21  ;;  %9446 = vmatpush1.msk.msra.mxu0 %vm411_vm6, %v2741_v51  ;;  %3857 = vrot.lane.b32.xlu0 %v12800_v40, %s10622_s29 }
 0x33b   : > { %3266 = vmatmul.mubr.f32.gmra.mxu1 %v2828_v41  ;;  %9447 = vmatprep.subr.msk.mxu0 %vm412_vm5, %v2740_v43 }
 0x33c   : > { %9448 = vmatpush1.msk.msra.mxu0 %vm411_vm6, %v2739_v24  ;;  %v13142_v17 = vpop.permute.xlu1 %3010  ;;  %3271 = vmatprep.mubr.f32.mxu1 %v2834_v35 }
 0x33d   : > { %17593 = vst [vmem:[#allocation58_spill] sm:$0xff] %v13142_v17  ;;  %9449 = vmatprep.subr.msk.mxu0 %vm412_vm5, %v2738_v34  ;;  %v13155_v49 = vpop.permute.xlu0 %3015  ;;  %3859 = vrot.lane.b32.xlu1 %v12810_v10, %s10622_s29 }
 0x33e   : > { %17595 = vst [vmem:[#allocation29_spill] sm:$0xff] %v13155_v49  ;;  %9450 = vmatpush1.msk.msra.mxu0 %vm411_vm6, %v2737_v18  ;;  %3863 = vrot.lane.b32.xlu0 %v12814_v5, %s10622_s29 }
 0x33f   : > { %3272 = vmatmul.mubr.f32.gmra.mxu1 %v2833_v20  ;;  %9332 = vmatmul.mubr.msk.f32.vlgmr.msra.gmra.mxu0 %vm17334_vm12, %v2805_v12 }
 0x340   : > { %v13167_v7 = vpop.permute.xlu1 %3020  ;;  %3277 = vmatprep.mubr.f32.mxu1 %v2839_v55  ;;  %3354 = vmatprep.mubr.f32.mxu0 %v17482_v0 }
 0x341   : > { %17596 = vst [vmem:[#allocation72_spill] sm:$0xff] %v13167_v7  ;;  %v13176_v1 = vpop.permute.xlu0 %3025  ;;  %3865 = vrot.lane.b32.xlu1 %v12824_v8, %s10622_s29  ;;  %s10627_s29 = smov 2  }
 0x342   : > { %17597 = vst [vmem:[#allocation59_spill] sm:$0xff] %v13176_v1  ;;  %10084 = vrot.lane.b32.xlu0 %v17482_v0, %s10623_s14 }
 0x343   : > { %3278 = vmatmul.mubr.f32.gmra.mxu1 %v2838_v39  ;;  %9333 = vmatmul.mubr.msk.f32.gmra.mxu0 %vm17334_vm12, %v2810_v37 }
 0x344   : > { %v13183_v60 = vpop.permute.xlu1 %3030  ;;  %3360 = vmatprep.mubr.f32.mxu0 %v17482_v0 }
 0x345   : > { %17598 = vst [vmem:[#allocation66_spill] sm:$0xff] %v13183_v60  ;;  %v13189_v29 = vpop.permute.xlu0 %10024  ;;  %3966 = vrot.lane.b32.xlu1 %v12604_v28, %s10623_s14 }
 0x346   : > { %3968 = vrot.lane.b32.xlu0 %v12611_v36, %s10623_s14 }
 0x347   : > { %9334 = vmatmul.mubr.msk.f32.gmra.mxu0 %vm17334_vm12, %v2815_v63 }
 0x348   : > { %v13196_v61 = vpop.permute.xlu1 %3499  ;;  %3366 = vmatprep.mubr.f32.mxu0 %v17482_v0 }
 0x349   : > { %v13202_v50 = vpop.permute.xlu0 %3501  ;;  %3972 = vrot.lane.b32.xlu1 %v12635_v3, %s10623_s14 }
 0x34a   : > { %3974 = vrot.lane.b32.xlu0 %v12642_v30, %s10623_s14 }
 0x34b   : > { %9335 = vmatmul.mubr.msk.f32.gmra.mxu0 %vm17334_vm12, %v2820_v32 }
 0x34c   : > { %v13209_v45 = vpop.permute.xlu1 %3505  ;;  %3372 = vmatprep.mubr.f32.mxu0 %v17482_v0 }
 0x34d   : > { %v13215_v44 = vpop.permute.xlu0 %3507  ;;  %10089 = vrot.lane.b32.xlu1 %v17482_v0, %s10623_s14 }
 0x34e   : > { %3978 = vrot.lane.b32.xlu0 %v12673_v54, %s10623_s14 }
 0x34f   : > { %9336 = vmatmul.mubr.msk.f32.gmra.mxu0 %vm17334_vm12, %v2825_v19 }
 0x350   : > { %v13222_v62 = vpop.permute.xlu1 %10029  ;;  %3378 = vmatprep.mubr.f32.mxu0 %v17482_v0 }
 0x351   : > { %v13228_v22 = vpop.permute.xlu0 %3511  ;;  %3980 = vrot.lane.b32.xlu1 %v17585_v53, %s10623_s14 }
 0x352   : > { %3984 = vrot.lane.b32.xlu0 %v17586_v26, %s10623_s14 }
 0x353   : > { %9337 = vmatmul.mubr.msk.f32.gmra.mxu0 %vm17334_vm12, %v2830_v58 }
 0x354   : > { %v13235_v15 = vpop.permute.xlu1 %3513  ;;  %3384 = vmatprep.mubr.f32.mxu0 %v17482_v0 }
 0x355   : > { %v13241_v23 = vpop.permute.xlu0 %3517  ;;  %3986 = vrot.lane.b32.xlu1 %v17587_v33, %s10623_s14 }
 0x356   : > { %10094 = vrot.lane.b32.xlu0 %v17482_v0, %s10623_s14 }
 0x357   : > { %9338 = vmatmul.mubr.msk.f32.gmra.mxu0 %vm17334_vm12, %v2835_v11 }
 0x358   : > { %v13248_v4 = vpop.permute.xlu1 %3519  ;;  %3390 = vmatprep.mubr.f32.mxu0 %v17482_v0 }
 0x359   : > { %v13254_v25 = vpop.permute.xlu0 %10034  ;;  %3990 = vrot.lane.b32.xlu1 %v12743_v59, %s10623_s14 }
 0x35a   : > { %3992 = vrot.lane.b32.xlu0 %v12751_v48, %s10623_s14 }
 0x35b   : > { %9339 = vmatmul.mubr.msk.f32.gmra.mxu0 %vm17334_vm12, %v2840_v52  ;;  %vm3545_vm12 = vcmask 277504  }
 0x35c   : > { %v13261_v38 = vpop.permute.xlu1 %3523 }
 0x35d   : > { %v13263_v6 = vpop.permute.xlu0 %3525  ;;  %3996 = vrot.lane.b32.xlu1 %v12771_v57, %s10623_s14 }
 0x35e   : > { %3998 = vrot.lane.b32.xlu0 %v12777_v46, %s10623_s14 }
 0x360   : > { %v13269_v9 = vpop.permute.xlu1 %3529 }
 0x361   : > { %v13271_v42 = vpop.permute.xlu0 %3531  ;;  %10099 = vrot.lane.b32.xlu1 %v17482_v0, %s10623_s14 }
 0x362   : > { %4002 = vrot.lane.b32.xlu0 %v12800_v40, %s10623_s14 }
 0x364   : > { %v13277_v27 = vpop.permute.xlu1 %10039 }
 0x365   : > { %v13279_v41 = vpop.permute.xlu0 %3535  ;;  %4004 = vrot.lane.b32.xlu1 %v12810_v10, %s10623_s14 }
 0x366   : > { %4008 = vrot.lane.b32.xlu0 %v12814_v5, %s10623_s14 }
 0x368   : > { %v13285_v51 = vpop.permute.xlu1 %3537 }
 0x369   : > { %v13287_v35 = vpop.permute.xlu0 %3541  ;;  %4010 = vrot.lane.b32.xlu1 %v12824_v8, %s10623_s14  ;;  %s10625_s14 = smov 18  }
 0x36a   : > { %10104 = vrot.lane.b32.xlu0 %v17482_v0, %s10624_s16 }
 0x36c   : > { %v13293_v43 = vpop.permute.xlu1 %3543 }
 0x36d   : > { %v13295_v24 = vpop.permute.xlu0 %10044  ;;  %4131 = vrot.lane.b32.xlu1 %v12604_v28, %s10624_s16 }
 0x36e   : > { %4133 = vrot.lane.b32.xlu0 %v12611_v36, %s10624_s16 }
 0x370   : > { %v13301_v34 = vpop.permute.xlu1 %3660 }
 0x371   : > { %v13303_v20 = vpop.permute.xlu0 %3662  ;;  %4137 = vrot.lane.b32.xlu1 %v12635_v3, %s10624_s16 }
 0x372   : > { %4139 = vrot.lane.b32.xlu0 %v12642_v30, %s10624_s16 }
 0x374   : > { %v13309_v12 = vpop.permute.xlu1 %3666 }
 0x375   : > { %v13311_v47 = vpop.permute.xlu0 %3668  ;;  %10109 = vrot.lane.b32.xlu1 %v17482_v0, %s10624_s16 }
 0x376   : > { %4143 = vrot.lane.b32.xlu0 %v12673_v54, %s10624_s16 }
 0x378   : > { %v13317_v18 = vpop.permute.xlu1 %10049 }
 0x379   : > { %v13319_v55 = vpop.permute.xlu0 %3672  ;;  %4145 = vrot.lane.b32.xlu1 %v17585_v53, %s10624_s16 }
 0x37a   : > { %4149 = vrot.lane.b32.xlu0 %v17586_v26, %s10624_s16 }
 0x37c   : > { %v13325_v39 = vpop.permute.xlu1 %3674 }
 0x37d   : > { %v3679_v37 = vpop.permute.xlu0 %3678  ;;  %4151 = vrot.lane.b32.xlu1 %v17587_v33, %s10624_s16 }
 0x37e   : > { %10114 = vrot.lane.b32.xlu0 %v17482_v0, %s10624_s16 }
 0x380   : > { %v3681_v63 = vpop.permute.xlu1 %3680 }
 0x381   : > { %v10055_v32 = vpop.permute.xlu0 %10054  ;;  %4155 = vrot.lane.b32.xlu1 %v12743_v59, %s10624_s16 }
 0x382   : > { %4157 = vrot.lane.b32.xlu0 %v12751_v48, %s10624_s16 }
 0x384   : > { %v3685_v19 = vpop.permute.xlu1 %3684 }
 0x385   : > { %v3687_v58 = vpop.permute.xlu0 %3686  ;;  %4161 = vrot.lane.b32.xlu1 %v12771_v57, %s10624_s16 }
 0x386   : > { %4163 = vrot.lane.b32.xlu0 %v12777_v46, %s10624_s16 }
 0x388   : > { %v3691_v11 = vpop.permute.xlu1 %3690 }
 0x389   : > { %v3693_v52 = vpop.permute.xlu0 %3692  ;;  %10119 = vrot.lane.b32.xlu1 %v17482_v0, %s10624_s16 }
 0x38a   : > { %4167 = vrot.lane.b32.xlu0 %v12800_v40, %s10624_s16 }
 0x38c   : > { %v10060_v60 = vpop.permute.xlu1 %10059 }
 0x38d   : > { %v3697_v1 = vpop.permute.xlu0 %3696  ;;  %4169 = vrot.lane.b32.xlu1 %v12810_v10, %s10624_s16  ;;  %v10062_v17 = vunpack.i.h.bf16 %v10060_v60  ;;  %v10061_v31 = vunpack.i.l.bf16 %v10060_v60  ;;  %v10057_v60 = vunpack.i.h.bf16 %v10055_v32 }
 0x38e   : > { %4173 = vrot.lane.b32.xlu0 %v12814_v5, %s10624_s16 }
 0x390   : > { %v3699_v7 = vpop.permute.xlu1 %3698 }
 0x391   : > { %v3703_v49 = vpop.permute.xlu0 %3702  ;;  %4175 = vrot.lane.b32.xlu1 %v12824_v8, %s10624_s16  ;;  %v3720_v8 = vsel %vm3706_vm13, %v3697_v1, %v3699_v7  ;;  %s17661_s16 = smov 113  }
 0x392   : > { %10124 = vrot.lane.b32.xlu0 %v17482_v0, %s10625_s14  ;;  %v3721_v13 = vsel %vm3706_vm13, %v10062_v17, %v3703_v49  ;;  %v3718_v17 = vsel %vm3706_vm13, %v3691_v11, %v3693_v52  ;;  %v3712_v52 = vsel %vm3706_vm13, %v13319_v55, %v13325_v39 }
 0x394   : > { %v3705_v21 = vpop.permute.xlu1 %3704 }
 0x395   : > { %v3722_v16 = vsel %vm3706_vm13, %v3703_v49, %v3705_v21  ;;  %v13352_v14 = vpop.permute.xlu0 %10064  ;;  %4292 = vrot.lane.b32.xlu1 %v12604_v28, %s10625_s14  ;;  %v10056_v21 = vunpack.i.l.bf16 %v10055_v32 }
 0x396   : > { %17599 = vst [vmem:[#allocation38_spill] sm:$0xff] %v13352_v14  ;;  %4294 = vrot.lane.b32.xlu0 %v12611_v36, %s10625_s14  ;;  %9451 = vmatprep.subr.msk.mxu1 %vm402_vm1, %v3722_v16  ;;  %v3719_v14 = vsel %vm3706_vm13, %v10061_v31, %v3697_v1  ;;  %v10052_v16 = vunpack.i.h.bf16 %v13317_v18  ;;  %v10051_v31 = vunpack.i.l.bf16 %v13317_v18  ;;  %v3714_v1 = vsel %vm3706_vm13, %v3679_v37, %v3681_v63  ;;  %v17602_v18 = vld [vmem:[#allocation26_spill] sm:$0xff] }
 0x397   : > { %9452 = vmatpush1.msk.msra.mxu1 %vm401_vm2, %v3721_v13  ;;  %v3717_v13 = vsel %vm3706_vm13, %v10057_v60, %v3691_v11  ;;  %v3715_v7 = vsel %vm3706_vm13, %v10056_v21, %v3685_v19  ;;  %v17604_v63 = vld [vmem:[#allocation14_spill] sm:$0xff]  ;;  %v10046_v60 = vunpack.i.l.bf16 %v13295_v24 }
 0x398   : > { %v13365_v5 = vpop.permute.xlu1 %3821  ;;  %9453 = vmatprep.subr.msk.mxu1 %vm402_vm1, %v3720_v8  ;;  %v3716_v8 = vsel %vm3706_vm13, %v3685_v19, %v3687_v58  ;;  %v3713_v58 = vsel %vm3706_vm13, %v10052_v16, %v3679_v37  ;;  %v13404_v19 = vadd.s32 4294967294, %v17602_v18  ;;  %v13407_v11 = vadd.s32 4294967294, %v17604_v63 }
 0x399   : > { %17600 = vst [vmem:[#allocation60_spill] sm:$0xff] %v13365_v5  ;;  %v13370_v49 = vpop.permute.xlu0 %3823  ;;  %4298 = vrot.lane.b32.xlu1 %v12635_v3, %s10625_s14  ;;  %9454 = vmatpush1.msk.msra.mxu1 %vm401_vm2, %v3719_v14  ;;  %v10047_v37 = vunpack.i.h.bf16 %v13295_v24  ;;  %v3711_v21 = vsel %vm3706_vm13, %v10051_v31, %v13319_v55  ;;  %v10041_v55 = vunpack.i.l.bf16 %v13277_v27 }
 0x39a   : > { %17601 = vst [vmem:[#allocation65_spill] sm:$0xff] %v13370_v49  ;;  %4300 = vrot.lane.b32.xlu0 %v12642_v30, %s10625_s14  ;;  %9455 = vmatprep.subr.msk.mxu1 %vm402_vm1, %v3718_v17  ;;  %17603 = vst [vmem:[#allocation61_spill] sm:$0xff] %v13404_v19  ;;  %vm393_vm14 = vcmp.ge.s32.totalorder %v13404_v19, 0  ;;  %vm394_vm15 = vcmp.ge.s32.totalorder %v13407_v11, 0 }
 0x39b   : > { %9456 = vmatpush1.msk.msra.mxu1 %vm401_vm2, %v3717_v13  ;;  %17605 = vst [vmem:[#allocation17_spill] sm:$0xff] %v13407_v11  ;;  %v3710_v13 = vsel %vm3706_vm13, %v13309_v12, %v13311_v47  ;;  %v3709_v24 = vsel %vm3706_vm13, %v10047_v37, %v13309_v12  ;;  %v3708_v47 = vsel %vm3706_vm13, %v13301_v34, %v13303_v20  ;;  %v10042_v12 = vunpack.i.h.bf16 %v13277_v27 }
 0x39c   : > { %v13387_v14 = vpop.permute.xlu1 %3827  ;;  %9457 = vmatprep.subr.msk.mxu1 %vm402_vm1, %v3716_v8  ;;  %v3707_v8 = vsel %vm3706_vm13, %v10046_v60, %v13301_v34  ;;  %v3561_v20 = vsel %vm3545_vm12, %v13287_v35, %v13293_v43  ;;  %v3559_v43 = vsel %vm3545_vm12, %v13279_v41, %v13285_v51  ;;  %v10037_v34 = vunpack.i.h.bf16 %v13254_v25 }
 0x39d   : > { %v13392_v32 = vpop.permute.xlu0 %3829  ;;  %10129 = vrot.lane.b32.xlu1 %v17482_v0, %s10625_s14  ;;  %9458 = vmatpush1.msk.msra.mxu1 %vm401_vm2, %v3715_v7  ;;  %v3560_v27 = vsel %vm3545_vm12, %v10042_v12, %v13287_v35  ;;  %v10036_v7 = vunpack.i.l.bf16 %v13254_v25  ;;  %v3558_v35 = vsel %vm3545_vm12, %v10041_v55, %v13279_v41  ;;  %v10032_v41 = vunpack.i.h.bf16 %v13222_v62 }
 0x39e   : > { %4304 = vrot.lane.b32.xlu0 %v12673_v54, %s10625_s14  ;;  %9459 = vmatprep.subr.msk.mxu1 %vm402_vm1, %v3714_v1  ;;  %v3556_v25 = vsel %vm3545_vm12, %v10037_v34, %v13269_v9  ;;  %v3553_v60 = vsel %vm3545_vm12, %v13241_v23, %v13248_v4  ;;  %v3551_v4 = vsel %vm3545_vm12, %v13228_v22, %v13235_v15  ;;  %vm3867_vm13 = vcmask 261120  }
 0x39f   : > { %9460 = vmatpush1.msk.msra.mxu1 %vm401_vm2, %v3713_v58  ;;  %v3557_v58 = vsel %vm3545_vm12, %v13269_v9, %v13271_v42  ;;  %v3555_v42 = vsel %vm3545_vm12, %v13261_v38, %v13263_v6  ;;  %v3554_v9 = vsel %vm3545_vm12, %v10036_v7, %v13261_v38  ;;  %v10027_v38 = vunpack.i.h.bf16 %v13189_v29 }
 0x3a0   : > { %v13418_v17 = vpop.permute.xlu1 %10069  ;;  %9461 = vmatprep.subr.msk.mxu1 %vm402_vm1, %v3712_v52  ;;  %v10031_v52 = vunpack.i.l.bf16 %v13222_v62  ;;  %v3552_v62 = vsel %vm3545_vm12, %v10032_v41, %v13241_v23 }
 0x3a1   : > { %v13425_v39 = vpop.permute.xlu0 %3833  ;;  %4306 = vrot.lane.b32.xlu1 %v17585_v53, %s10625_s14  ;;  %9462 = vmatpush1.msk.msra.mxu1 %vm401_vm2, %v3711_v21  ;;  %v10026_v21 = vunpack.i.l.bf16 %v13189_v29  ;;  %v3548_v29 = vsel %vm3545_vm12, %v10027_v38, %v13209_v45 }
 0x3a2   : > { %4310 = vrot.lane.b32.xlu0 %v17586_v26, %s10625_s14  ;;  %9463 = vmatprep.subr.msk.mxu1 %vm402_vm1, %v3710_v13  ;;  %v3550_v23 = vsel %vm3545_vm12, %v10031_v52, %v13228_v22 }
 0x3a3   : > { %9464 = vmatpush1.msk.msra.mxu1 %vm401_vm2, %v3709_v24  ;;  %v3549_v24 = vsel %vm3545_vm12, %v13209_v45, %v13215_v44  ;;  %v3547_v44 = vsel %vm3545_vm12, %v13196_v61, %v13202_v50  ;;  %v3546_v22 = vsel %vm3545_vm12, %v10026_v21, %v13196_v61  ;;  %v17606_v50 = vld [vmem:[#allocation25_spill] sm:$0xff]  ;;  %v17607_v61 = vld [vmem:[#allocation16_spill] sm:$0xff]  ;;  %vm4012_vm12 = vcmask 252928  }
 0x3a4   : > { %v13448_v16 = vpop.permute.xlu1 %3835  ;;  %9465 = vmatprep.subr.msk.mxu1 %vm402_vm1, %v3708_v47 }
 0x3a5   : > { %v13455_v31 = vpop.permute.xlu0 %3839  ;;  %4312 = vrot.lane.b32.xlu1 %v17587_v33, %s10625_s14  ;;  %9466 = vmatpush1.msk.msra.mxu1 %vm401_vm2, %v3707_v8 }
 0x3a6   : > { %10134 = vrot.lane.b32.xlu0 %v17482_v0, %s10625_s14  ;;  %9467 = vmatprep.subr.msk.mxu1 %vm394_vm15, %v3561_v20 }
 0x3a7   : > { %9468 = vmatpush1.msk.msra.mxu1 %vm393_vm14, %v3560_v27  ;;  %v13586_v27 = vpop.f32.mrf.mxu0 }
 0x3a8   : > { %v13476_v1 = vpop.permute.xlu1 %3841  ;;  %9469 = vmatprep.subr.msk.mxu1 %vm394_vm15, %v3559_v43 }
 0x3a9   : > { %v13483_v51 = vpop.permute.xlu0 %10074  ;;  %4316 = vrot.lane.b32.xlu1 %v12743_v59, %s10625_s14  ;;  %9470 = vmatpush1.msk.msra.mxu1 %vm393_vm14, %v3558_v35  ;;  %v13596_v7 = vpop.f32.mrf.mxu0 }
 0x3aa   : > { %4318 = vrot.lane.b32.xlu0 %v12751_v48, %s10625_s14  ;;  %9471 = vmatprep.subr.msk.mxu1 %vm394_vm15, %v3557_v58 }
 0x3ab   : > { %9472 = vmatpush1.msk.msra.mxu1 %vm393_vm14, %v3556_v25  ;;  %v13606_v25 = vpop.f32.mrf.mxu0 }
 0x3ac   : > { %v13504_v37 = vpop.permute.xlu1 %3845  ;;  %9473 = vmatprep.subr.msk.mxu1 %vm394_vm15, %v3555_v42 }
 0x3ad   : > { %v13511_v6 = vpop.permute.xlu0 %3847  ;;  %4322 = vrot.lane.b32.xlu1 %v12771_v57, %s10625_s14  ;;  %9474 = vmatpush1.msk.msra.mxu1 %vm393_vm14, %v3554_v9  ;;  %v13616_v52 = vpop.f32.mrf.mxu0 }
 0x3ae   : > { %4324 = vrot.lane.b32.xlu0 %v12777_v46, %s10625_s14  ;;  %9475 = vmatprep.subr.msk.mxu1 %vm394_vm15, %v3553_v60 }
 0x3af   : > { %9476 = vmatpush1.msk.msra.mxu1 %vm393_vm14, %v3552_v62  ;;  %v13626_v62 = vpop.f32.mrf.mxu0 }
 0x3b0   : > { %v13532_v13 = vpop.permute.xlu1 %3851  ;;  %9477 = vmatprep.subr.msk.mxu1 %vm394_vm15, %v3551_v4  ;;  %17608 = vst [vmem:[#allocation62_spill] sm:$0xff] %v13626_v62 }
 0x3b1   : > { %v13539_v15 = vpop.permute.xlu0 %3853  ;;  %10139 = vrot.lane.b32.xlu1 %v17482_v0, %s10625_s14  ;;  %9478 = vmatpush1.msk.msra.mxu1 %vm393_vm14, %v3550_v23  ;;  %v13634_v21 = vpop.f32.mrf.mxu0 }
 0x3b2   : > { %4328 = vrot.lane.b32.xlu0 %v12800_v40, %s10625_s14  ;;  %9479 = vmatprep.subr.msk.mxu1 %vm394_vm15, %v3549_v24  ;;  %17609 = vst [vmem:[#allocation44_spill] sm:$0xff] %v13634_v21 }
 0x3b3   : > { %9480 = vmatpush1.msk.msra.mxu1 %vm393_vm14, %v3548_v29  ;;  %v13640_v29 = vpop.f32.mrf.mxu0 }
 0x3b4   : > { %v13558_v47 = vpop.permute.xlu1 %10079  ;;  %9481 = vmatprep.subr.msk.mxu1 %vm394_vm15, %v3547_v44  ;;  %17610 = vst [vmem:[#allocation41_spill] sm:$0xff] %v13640_v29 }
 0x3b5   : > { %v13562_v45 = vpop.permute.xlu0 %3857  ;;  %4330 = vrot.lane.b32.xlu1 %v12810_v10, %s10625_s14  ;;  %9482 = vmatpush1.msk.msra.mxu1 %vm393_vm14, %v3546_v22  ;;  %v13646_v2 = vpop.f32.mrf.mxu0 }
 0x3b6   : > { %4334 = vrot.lane.b32.xlu0 %v17606_v50, %s10625_s14  ;;  %17611 = vst [vmem:[#allocation31_spill] sm:$0xff] %v13646_v2 }
 0x3b7   : > { %v13652_v18 = vpop.f32.mrf.mxu0 }
 0x3b8   : > { %v13570_v12 = vpop.permute.xlu1 %3859  ;;  %17612 = vst [vmem:[#allocation18_spill] sm:$0xff] %v13652_v18 }
 0x3b9   : > { %v13572_v55 = vpop.permute.xlu0 %3863  ;;  %4336 = vrot.lane.b32.xlu1 %v17607_v61, %s10625_s14  ;;  %v13658_v29 = vpop.f32.mrf.mxu0  ;;  %s17667_s14 = smov 112  }
 0x3ba   : > { %10144 = vrot.lane.b32.xlu0 %v17482_v0, %s17406_s22  ;;  %17613 = vst [vmem:[#allocation30_spill] sm:$0xff] %v13658_v29 }
 0x3bb   : > { %v13672_v29 = vpop.f32.mrf.mxu0 }
 0x3bc   : > { %v13578_v8 = vpop.permute.xlu1 %3865 }
 0x3bd   : > { %v13580_v20 = vpop.permute.xlu0 %10084  ;;  %4453 = vrot.lane.b32.xlu1 %v12604_v28, %s17406_s22 }
 0x3be   : > { %4455 = vrot.lane.b32.xlu0 %v12611_v36, %s17406_s22 }
 0x3c0   : > { %v13588_v43 = vpop.permute.xlu1 %3966 }
 0x3c1   : > { %v13590_v34 = vpop.permute.xlu0 %3968  ;;  %4459 = vrot.lane.b32.xlu1 %v12635_v3, %s17406_s22 }
 0x3c2   : > { %4461 = vrot.lane.b32.xlu0 %v12642_v30, %s17406_s22 }
 0x3c4   : > { %v13598_v35 = vpop.permute.xlu1 %3972 }
 0x3c5   : > { %v13600_v58 = vpop.permute.xlu0 %3974  ;;  %10149 = vrot.lane.b32.xlu1 %v17482_v0, %s17406_s22 }
 0x3c6   : > { %4465 = vrot.lane.b32.xlu0 %v12673_v54, %s17406_s22 }
 0x3c8   : > { %v13608_v42 = vpop.permute.xlu1 %10089 }
 0x3c9   : > { %v13610_v41 = vpop.permute.xlu0 %3978  ;;  %4467 = vrot.lane.b32.xlu1 %v17585_v53, %s17406_s22 }
 0x3ca   : > { %4471 = vrot.lane.b32.xlu0 %v17586_v26, %s17406_s22 }
 0x3cc   : > { %v13618_v9 = vpop.permute.xlu1 %3980 }
 0x3cd   : > { %v13620_v60 = vpop.permute.xlu0 %3984  ;;  %4473 = vrot.lane.b32.xlu1 %v17587_v33, %s17406_s22 }
 0x3ce   : > { %10154 = vrot.lane.b32.xlu0 %v17482_v0, %s17406_s22 }
 0x3d0   : > { %v13628_v4 = vpop.permute.xlu1 %3986 }
 0x3d1   : > { %v10095_v38 = vpop.permute.xlu0 %10094  ;;  %4477 = vrot.lane.b32.xlu1 %v12743_v59, %s17406_s22 }
 0x3d2   : > { %4479 = vrot.lane.b32.xlu0 %v12751_v48, %s17406_s22  ;;  %v10096_v62 = vunpack.i.l.bf16 %v10095_v38 }
 0x3d4   : > { %v3991_v23 = vpop.permute.xlu1 %3990 }
 0x3d5   : > { %v3993_v24 = vpop.permute.xlu0 %3992  ;;  %4483 = vrot.lane.b32.xlu1 %v12771_v57, %s17406_s22 }
 0x3d6   : > { %4485 = vrot.lane.b32.xlu0 %v12777_v46, %s17406_s22 }
 0x3d8   : > { %v3997_v44 = vpop.permute.xlu1 %3996 }
 0x3d9   : > { %v3999_v22 = vpop.permute.xlu0 %3998  ;;  %10159 = vrot.lane.b32.xlu1 %v17482_v0, %s17406_s22 }
 0x3da   : > { %4489 = vrot.lane.b32.xlu0 %v12800_v40, %s17406_s22 }
 0x3dc   : > { %v10100_v56 = vpop.permute.xlu1 %10099 }
 0x3dd   : > { %v4003_v63 = vpop.permute.xlu0 %4002  ;;  %4491 = vrot.lane.b32.xlu1 %v12810_v10, %s17406_s22  ;;  %v10102_v2 = vunpack.i.h.bf16 %v10100_v56  ;;  %v10101_v21 = vunpack.i.l.bf16 %v10100_v56 }
 0x3de   : > { %4495 = vrot.lane.b32.xlu0 %v17606_v50, %s17406_s22 }
 0x3e0   : > { %v4005_v19 = vpop.permute.xlu1 %4004 }
 0x3e1   : > { %v4009_v11 = vpop.permute.xlu0 %4008  ;;  %4497 = vrot.lane.b32.xlu1 %v17607_v61, %s17406_s22  ;;  %v4026_v56 = vsel %vm4012_vm12, %v4003_v63, %v4005_v19 }
 0x3e2   : > { %10164 = vrot.lane.b32.xlu0 %v17482_v0, %s17404_s26  ;;  %v4027_v18 = vsel %vm4012_vm12, %v10102_v2, %v4009_v11 }
 0x3e4   : > { %v4011_v5 = vpop.permute.xlu1 %4010 }
 0x3e5   : > { %v4028_v10 = vsel %vm4012_vm12, %v4009_v11, %v4011_v5  ;;  %v13661_v49 = vpop.permute.xlu0 %10104  ;;  %4613 = vrot.lane.b32.xlu1 %v12604_v28, %s17404_s26  ;;  %v4025_v28 = vsel %vm4012_vm12, %v10101_v21, %v4003_v63  ;;  %v13698_v63 = vpop.f32.mrf.mxu0  ;;  %v10092_v21 = vunpack.i.h.bf16 %v13608_v42 }
 0x3e6   : > { %17614 = vst [vmem:[#allocation68_spill] sm:$0xff] %v13661_v49  ;;  %4615 = vrot.lane.b32.xlu0 %v12611_v36, %s17404_s26  ;;  %v13668_v61 = vpop.f32.mrf.mxu1  ;;  %9483 = vmatprep.subr.msk.mxu1 %vm412_vm5, %v4028_v10  ;;  %v10097_v49 = vunpack.i.h.bf16 %v10095_v38  ;;  %v4024_v10 = vsel %vm4012_vm12, %v3997_v44, %v3999_v22  ;;  %v4022_v38 = vsel %vm4012_vm12, %v3991_v23, %v3993_v24 }
 0x3e7   : > { %9484 = vmatpush2.msk.msra.mxu1 %vm411_vm6, %v4027_v18  ;;  %v4020_v24 = vsel %vm4012_vm12, %v13620_v60, %v13628_v4  ;;  %v4018_v4 = vsel %vm4012_vm12, %v13610_v41, %v13618_v9  ;;  %v4016_v9 = vsel %vm4012_vm12, %v13598_v35, %v13600_v58  ;;  %v4014_v58 = vsel %vm4012_vm12, %v13588_v43, %v13590_v34 }
 0x3e8   : > { %v13678_v2 = vpop.f32.mrf.mxu1  ;;  %v13680_v11 = vpop.permute.xlu1 %4131  ;;  %9485 = vmatprep.subr.msk.mxu1 %vm412_vm5, %v4026_v56  ;;  %v4023_v18 = vsel %vm4012_vm12, %v10097_v49, %v3997_v44  ;;  %v4021_v49 = vsel %vm4012_vm12, %v10096_v62, %v3991_v23 }
 0x3e9   : > { %v13685_v36 = vpop.permute.xlu0 %4133  ;;  %4619 = vrot.lane.b32.xlu1 %v12635_v3, %s17404_s26  ;;  %9486 = vmatpush2.msk.msra.mxu1 %vm411_vm6, %v4025_v28  ;;  %v10091_v28 = vunpack.i.l.bf16 %v13608_v42  ;;  %v4019_v42 = vsel %vm4012_vm12, %v10092_v21, %v13620_v60  ;;  %v13734_v23 = vpop.f32.mrf.mxu0  ;;  %v10086_v60 = vunpack.i.l.bf16 %v13580_v20 }
 0x3ea   : > { %4621 = vrot.lane.b32.xlu0 %v12642_v30, %s17404_s26  ;;  %v13694_v19 = vpop.f32.mrf.mxu1  ;;  %9487 = vmatprep.subr.msk.mxu1 %vm412_vm5, %v4024_v10  ;;  %v10087_v10 = vunpack.i.h.bf16 %v13580_v20 }
 0x3eb   : > { %9488 = vmatpush2.msk.msra.mxu1 %vm411_vm6, %v4023_v18  ;;  %v4017_v18 = vsel %vm4012_vm12, %v10091_v28, %v13610_v41  ;;  %v13766_v41 = vpop.f32.mrf.mxu0  ;;  %v10082_v28 = vunpack.i.h.bf16 %v13558_v47 }
 0x3ec   : > { %v13706_v44 = vpop.f32.mrf.mxu1  ;;  %v13708_v22 = vpop.permute.xlu1 %4137  ;;  %9489 = vmatprep.subr.msk.mxu1 %vm412_vm5, %v4022_v38  ;;  %v4015_v20 = vsel %vm4012_vm12, %v10087_v10, %v13598_v35  ;;  %v4013_v35 = vsel %vm4012_vm12, %v10086_v60, %v13588_v43  ;;  %v3881_v10 = vsel %vm3867_vm13, %v13562_v45, %v13570_v12  ;;  %v3879_v12 = vsel %vm3867_vm13, %v13532_v13, %v13539_v15 }
 0x3ed   : > { %v13715_v56 = vpop.permute.xlu0 %4139  ;;  %10169 = vrot.lane.b32.xlu1 %v17482_v0, %s17404_s26  ;;  %9490 = vmatpush2.msk.msra.mxu1 %vm411_vm6, %v4021_v49  ;;  %v3882_v43 = vsel %vm3867_vm13, %v10082_v28, %v13572_v55  ;;  %v13794_v60 = vpop.f32.mrf.mxu0  ;;  %v17617_v28 = vld [vmem:[#allocation57_spill] sm:$0xff]  ;;  %v10071_v15 = vunpack.i.l.bf16 %v13418_v17  ;;  %vm4338_vm12 = vcmask 146432  }
 0x3ee   : > { %4625 = vrot.lane.b32.xlu0 %v12673_v54, %s17404_s26  ;;  %v13725_v62 = vpop.f32.mrf.mxu1  ;;  %9491 = vmatprep.subr.msk.mxu1 %vm412_vm5, %v4020_v24  ;;  %v10081_v24 = vunpack.i.l.bf16 %v13558_v47  ;;  %v3883_v47 = vsel %vm3867_vm13, %v13572_v55, %v13578_v8 }
 0x3ef   : > { %9492 = vmatpush2.msk.msra.mxu1 %vm411_vm6, %v4019_v42 }
 0x3f0   : > { %v13740_v38 = vpop.permute.xlu1 %10109  ;;  %9493 = vmatprep.subr.msk.mxu1 %vm412_vm5, %v4018_v4  ;;  %v13747_v21 = vpop.f32.mrf.mxu1  ;;  %v3880_v8 = vsel %vm3867_vm13, %v10081_v24, %v13562_v45  ;;  %v3877_v45 = vsel %vm3867_vm13, %v13504_v37, %v13511_v6  ;;  %v3125_v24 = vadd.f32 %v13586_v27, %v17617_v28  ;;  %v3875_v6 = vsel %vm3867_vm13, %v13455_v31, %v13476_v1 }
 0x3f1   : > { %v13749_v49 = vpop.permute.xlu0 %4143  ;;  %4627 = vrot.lane.b32.xlu1 %v17585_v53, %s17404_s26  ;;  %9494 = vmatpush2.msk.msra.mxu1 %vm411_vm6, %v4017_v18  ;;  %v10077_v18 = vunpack.i.h.bf16 %v13483_v51  ;;  %v3873_v1 = vsel %vm3867_vm13, %v13425_v39, %v13448_v16  ;;  %v3871_v16 = vsel %vm3867_vm13, %v13387_v14, %v13392_v32  ;;  %v17622_v32 = vld [vmem:[#allocation65_spill] sm:$0xff] }
 0x3f2   : > { %4631 = vrot.lane.b32.xlu0 %v17586_v26, %s17404_s26  ;;  %9495 = vmatprep.subr.msk.mxu1 %vm412_vm5, %v4016_v9  ;;  %v10076_v9 = vunpack.i.l.bf16 %v13483_v51  ;;  %v3238_v27 = vadd.f32 %v13668_v61, %v3125_v24 }
 0x3f3   : > { %9496 = vmatpush2.msk.msra.mxu1 %vm411_vm6, %v4015_v20  ;;  %v13776_v4 = vpop.f32.mrf.mxu1  ;;  %v3878_v51 = vsel %vm3867_vm13, %v10077_v18, %v13532_v13 }
 0x3f4   : > { %v13772_v42 = vpop.permute.xlu1 %4145  ;;  %9497 = vmatprep.subr.msk.mxu1 %vm412_vm5, %v4014_v58  ;;  %v3876_v13 = vsel %vm3867_vm13, %v10076_v9, %v13504_v37  ;;  %v17618_v9 = vld [vmem:[#allocation28_spill] sm:$0xff] }
 0x3f5   : > { %v13778_v34 = vpop.permute.xlu0 %4149  ;;  %4633 = vrot.lane.b32.xlu1 %v17587_v33, %s17404_s26  ;;  %9498 = vmatpush2.msk.msra.mxu1 %vm411_vm6, %v4013_v35  ;;  %v13802_v58 = vpop.f32.mrf.mxu1 }
 0x3f6   : > { %10174 = vrot.lane.b32.xlu0 %v17482_v0, %s17404_s26  ;;  %7901 = vmatprep.subr.mxu1 %v3883_v47  ;;  %v13820_v35 = vpop.f32.mrf.mxu0  ;;  %v10072_v47 = vunpack.i.h.bf16 %v13418_v17  ;;  %v3127_v17 = vadd.f32 %v13596_v7, %v17617_v28 }
 0x3f7   : > { %7902 = vmatpush2.msra.mxu1 %v3882_v43 }
 0x3f8   : > { %v13798_v20 = vpop.permute.xlu1 %4151  ;;  %7903 = vmatprep.subr.mxu1 %v3881_v10  ;;  %v13828_v10 = vpop.f32.mrf.mxu1  ;;  %v3874_v37 = vsel %vm3867_vm13, %v10072_v47, %v13455_v31  ;;  %v3240_v7 = vadd.f32 %v13678_v2, %v3127_v17  ;;  %v3872_v31 = vsel %vm3867_vm13, %v10071_v15, %v13425_v39  ;;  %v17620_v15 = vld [vmem:[#allocation42_spill] sm:$0xff] }
 0x3f9   : > { %v13804_v55 = vpop.permute.xlu0 %10114  ;;  %4637 = vrot.lane.b32.xlu1 %v12743_v59, %s17404_s26  ;;  %7904 = vmatpush2.msra.mxu1 %v3880_v8  ;;  %v3131_v8 = vadd.f32 %v13606_v25, %v17618_v9  ;;  %v3133_v25 = vadd.f32 %v13616_v52, %v17618_v9 }
 0x3fa   : > { %4639 = vrot.lane.b32.xlu0 %v12751_v48, %s17404_s26  ;;  %7905 = vmatprep.subr.mxu1 %v3879_v12  ;;  %v17619_v12 = vld [vmem:[#allocation38_spill] sm:$0xff]  ;;  %v13858_v47 = vpop.f32.mrf.mxu1 }
 0x3fb   : > { %7906 = vmatpush2.msra.mxu1 %v3878_v51  ;;  %v10067_v51 = vunpack.i.h.bf16 %v17619_v12  ;;  %v10066_v61 = vunpack.i.l.bf16 %v17619_v12  ;;  %v3244_v2 = vadd.f32 %v13694_v19, %v3131_v8  ;;  %v17623_v12 = vld [vmem:[#allocation60_spill] sm:$0xff]  ;;  %v3246_v8 = vadd.f32 %v13706_v44, %v3133_v25 }
 0x3fc   : > { %v13824_v43 = vpop.permute.xlu1 %4155  ;;  %7907 = vmatprep.subr.mxu1 %v3877_v45  ;;  %v3869_v19 = vsel %vm3867_vm13, %v17623_v12, %v17622_v32 }
 0x3fd   : > { %v13830_v18 = vpop.permute.xlu0 %4157  ;;  %4643 = vrot.lane.b32.xlu1 %v12771_v57, %s17404_s26  ;;  %7908 = vmatpush2.msra.mxu1 %v3876_v13  ;;  %v3870_v52 = vsel %vm3867_vm13, %v10067_v51, %v13387_v14  ;;  %v3868_v14 = vsel %vm3867_vm13, %v10066_v61, %v17623_v12  ;;  %v17624_v51 = vld [vmem:[#allocation44_spill] sm:$0xff] }
 0x3fe   : > { %4645 = vrot.lane.b32.xlu0 %v12777_v46, %s17404_s26  ;;  %7909 = vmatprep.subr.mxu1 %v3875_v6 }
 0x3ff   : > { %v3350_v45 = vpop.f32.mrf.mxu0  ;;  %7910 = vmatpush2.msra.mxu1 %v3874_v37 }
 0x400   : > { %v3351_v28 = vadd.f32 %v3350_v45, %v3238_v27  ;;  %v13852_v24 = vpop.permute.xlu1 %4161  ;;  %7911 = vmatprep.subr.mxu1 %v3873_v1  ;;  %v17621_v27 = vld [vmem:[#allocation62_spill] sm:$0xff] }
 0x401   : > { %v3352_v13 = vpop.f32.mrf.mxu0  ;;  %10179 = vrot.lane.b32.xlu1 %v17482_v0, %s17404_s26  ;;  %7912 = vmatpush2.msra.mxu1 %v3872_v31  ;;  %v13866_v39 = vpop.permute.xlu0 %4163  ;;  %v3137_v37 = vadd.f32 %v17621_v27, %v17620_v15 }
 0x402   : > { %v3397_v6 = vmax.f32 %v3351_v28, 0.0  ;;  %v3353_v17 = vadd.f32 %v3352_v13, %v3240_v7  ;;  %4649 = vrot.lane.b32.xlu0 %v12800_v40, %s17404_s26  ;;  %7913 = vmatprep.subr.mxu1 %v3871_v16  ;;  %v3139_v28 = vadd.f32 %v17624_v51, %v17620_v15  ;;  %v3267_v31 = vpop.f32.mrf.mxu1  ;;  %v17625_v16 = vld [vmem:[#allocation55_spill] sm:$0xff]  ;;  %v17628_v15 = vld [vmem:[#allocation41_spill] sm:$0xff] }
 0x403   : > { %v3356_v9 = vpop.f32.mrf.mxu0  ;;  %7914 = vmatpush2.msra.mxu1 %v3870_v52  ;;  %v3250_v44 = vadd.f32 %v13725_v62, %v3137_v37  ;;  %v17627_v52 = vld [vmem:[#allocation58_spill] sm:$0xff] }
 0x404   : > { %3413 = vst [vmem:[%s11326_s25 + $0x80] sm:$0xff] %v3397_v6  ;;  %v3398_v45 = vmax.f32 %v3353_v17, 0.0  ;;  %v3357_v1 = vadd.f32 %v3356_v9, %v3244_v2  ;;  %v13879_v7 = vpop.permute.xlu1 %10119  ;;  %7915 = vmatprep.subr.mxu1 %v3869_v19  ;;  %v17626_v17 = vld [vmem:[#allocation25_spill] sm:$0xff]  ;;  %v3143_v27 = vadd.f32 %v17628_v15, %v17627_v52  ;;  %v3252_v9 = vadd.f32 %v13747_v21, %v3139_v28  ;;  %v3269_v37 = vpop.f32.mrf.mxu1 }
 0x405   : > { %v3358_v13 = vpop.f32.mrf.mxu0  ;;  %4651 = vrot.lane.b32.xlu1 %v17625_v16, %s17404_s26  ;;  %7916 = vmatpush2.msra.mxu1 %v3868_v14  ;;  %v13889_v6 = vpop.permute.xlu0 %4167 }
 0x406   : > { %3414 = vst [vmem:[%s11326_s25 + $0x88] sm:$0xff] %v3398_v45  ;;  %v3399_v25 = vmax.f32 %v3357_v1, 0.0  ;;  %v3359_v2 = vadd.f32 %v3358_v13, %v3246_v8  ;;  %4655 = vrot.lane.b32.xlu0 %v17626_v17, %s17404_s26  ;;  %v17629_v8 = vld [vmem:[#allocation16_spill] sm:$0xff]  ;;  %v17630_v45 = vld [vmem:[#allocation31_spill] sm:$0xff]  ;;  %v3256_v14 = vadd.f32 %v13776_v4, %v3143_v27  ;;  %v3273_v27 = vpop.f32.mrf.mxu1 }
 0x407   : > { %v3362_v61 = vpop.f32.mrf.mxu0  ;;  %v3145_v1 = vadd.f32 %v17630_v45, %v17627_v52 }
 0x408   : > { %3415 = vst [vmem:[%s11326_s25 + $0x90] sm:$0xff] %v3399_v25  ;;  %v3400_v32 = vmax.f32 %v3359_v2, 0.0  ;;  %v3363_v12 = vadd.f32 %v3362_v61, %v3250_v44  ;;  %v13897_v62 = vpop.permute.xlu1 %4169  ;;  %v17631_v44 = vld [vmem:[#allocation29_spill] sm:$0xff]  ;;  %v17632_v25 = vld [vmem:[#allocation18_spill] sm:$0xff] }
 0x409   : > { %v3364_v19 = vpop.f32.mrf.mxu0  ;;  %4657 = vrot.lane.b32.xlu1 %v17629_v8, %s17404_s26  ;;  %v13905_v28 = vpop.permute.xlu0 %4173  ;;  %v3149_v2 = vadd.f32 %v17632_v25, %v17631_v44  ;;  %v3258_v61 = vadd.f32 %v13802_v58, %v3145_v1  ;;  %s17715_s26 = smov 17  }
 0x40a   : > { %3416 = vst [vmem:[%s11326_s25 + $0x98] sm:$0xff] %v3400_v32  ;;  %v3401_v51 = vmax.f32 %v3363_v12, 0.0  ;;  %v3365_v21 = vadd.f32 %v3364_v19, %v3252_v9  ;;  %10184 = vrot.lane.b32.xlu0 %v17482_v0, %s17402_s27  ;;  %v17633_v9 = vld [vmem:[#allocation11_spill] sm:$0xff]  ;;  %v17634_v12 = vld [vmem:[#allocation30_spill] sm:$0xff] }
 0x40b   : > { %v3368_v13 = vpop.f32.mrf.mxu0  ;;  %v3151_v19 = vadd.f32 %v17634_v12, %v17631_v44  ;;  %v3262_v45 = vadd.f32 %v13828_v10, %v3149_v2  ;;  %v3275_v2 = vpop.f32.mrf.mxu1 }
 0x40c   : > { %3417 = vst [vmem:[%s11326_s25 + $0xa0] sm:$0xff] %v3401_v51  ;;  %v3402_v15 = vmax.f32 %v3365_v21, 0.0  ;;  %v3369_v52 = vadd.f32 %v3368_v13, %v3256_v14  ;;  %v13913_v4 = vpop.permute.xlu1 %4175  ;;  %v17635_v14 = vld [vmem:[#allocation23_spill] sm:$0xff]  ;;  %v17636_v21 = vld [vmem:[#allocation72_spill] sm:$0xff] }
 0x40d   : > { %v3370_v32 = vpop.f32.mrf.mxu0  ;;  %4757 = vrot.lane.b32.xlu1 %v17633_v9, %s17402_s27  ;;  %v13921_v1 = vpop.permute.xlu0 %10124  ;;  %v3155_v13 = vadd.f32 %v13672_v29, %v17636_v21  ;;  %v3264_v5 = vadd.f32 %v13858_v47, %v3151_v19  ;;  %v17637_v19 = vld [vmem:[#allocation59_spill] sm:$0xff] }
 0x40e   : > { %3418 = vst [vmem:[%s11326_s25 + $0xa8] sm:$0xff] %v3402_v15  ;;  %v3403_v25 = vmax.f32 %v3369_v52, 0.0  ;;  %v3371_v58 = vadd.f32 %v3370_v32, %v3258_v61  ;;  %4759 = vrot.lane.b32.xlu0 %v17635_v14, %s17402_s27  ;;  %v3157_v61 = vadd.f32 %v13698_v63, %v17636_v21 }
 0x40f   : > { %v3374_v51 = vpop.f32.mrf.mxu0  ;;  %v3268_v52 = vadd.f32 %v3267_v31, %v3155_v13 }
 0x410   : > { %3419 = vst [vmem:[%s11326_s25 + $0xb0] sm:$0xff] %v3403_v25  ;;  %v3404_v50 = vmax.f32 %v3371_v58, 0.0  ;;  %v3375_v44 = vadd.f32 %v3374_v51, %v3262_v45  ;;  %v13929_v10 = vpop.permute.xlu1 %4292  ;;  %v3161_v45 = vadd.f32 %v13734_v23, %v17637_v19  ;;  %v3270_v25 = vadd.f32 %v3269_v37, %v3157_v61 }
 0x411   : > { %v3376_v15 = vpop.f32.mrf.mxu0  ;;  %4763 = vrot.lane.b32.xlu1 %v12635_v3, %s17402_s27  ;;  %v13936_v47 = vpop.permute.xlu0 %4294 }
 0x412   : > { %3420 = vst [vmem:[%s11326_s25 + $0xb8] sm:$0xff] %v3404_v50  ;;  %v3405_v32 = vmax.f32 %v3375_v44, 0.0  ;;  %v3377_v29 = vadd.f32 %v3376_v15, %v3264_v5  ;;  %4765 = vrot.lane.b32.xlu0 %v12642_v30, %s17402_s27  ;;  %v3279_v50 = vpop.f32.mrf.mxu1  ;;  %v3163_v5 = vadd.f32 %v13766_v41, %v17637_v19  ;;  %v3274_v21 = vadd.f32 %v3273_v27, %v3161_v45  ;;  %v17638_v15 = vld [vmem:[#allocation66_spill] sm:$0xff] }
 0x413   : > { %v3380_v12 = vpop.f32.mrf.mxu0  ;;  %v3167_v61 = vadd.f32 %v13794_v60, %v17638_v15  ;;  %v3169_v27 = vadd.f32 %v13820_v35, %v17638_v15 }
 0x414   : > { %3421 = vst [vmem:[%s11326_s25 + $0xc0] sm:$0xff] %v3405_v32  ;;  %v3406_v58 = vmax.f32 %v3377_v29, 0.0  ;;  %v3381_v51 = vadd.f32 %v3380_v12, %v3268_v52  ;;  %v13943_v63 = vpop.permute.xlu1 %4298  ;;  %v3276_v52 = vadd.f32 %v3275_v2, %v3163_v5  ;;  %v3281_v12 = vpop.f32.mrf.mxu1 }
 0x415   : > { %v3382_v31 = vpop.f32.mrf.mxu0  ;;  %10189 = vrot.lane.b32.xlu1 %v17482_v0, %s17402_s27  ;;  %v13950_v37 = vpop.permute.xlu0 %4300  ;;  %v3280_v45 = vadd.f32 %v3279_v50, %v3167_v61 }
 0x416   : > { %3422 = vst [vmem:[%s11326_s25 + $0xc8] sm:$0xff] %v3406_v58  ;;  %v3407_v13 = vmax.f32 %v3381_v51, 0.0  ;;  %v3383_v23 = vadd.f32 %v3382_v31, %v3270_v25  ;;  %4769 = vrot.lane.b32.xlu0 %v12673_v54, %s17402_s27  ;;  %v3282_v51 = vadd.f32 %v3281_v12, %v3169_v27 }
 0x417   : > { %v3386_v44 = vpop.f32.mrf.mxu0 }
 0x418   : > { %3423 = vst [vmem:[%s11326_s25 + $0xd0] sm:$0xff] %v3407_v13  ;;  %v3408_v32 = vmax.f32 %v3383_v23, 0.0  ;;  %v3387_v29 = vadd.f32 %v3386_v44, %v3274_v21  ;;  %v13957_v41 = vpop.permute.xlu1 %10129 }
 0x419   : > { %v3388_v19 = vpop.f32.mrf.mxu0  ;;  %4771 = vrot.lane.b32.xlu1 %v17585_v53, %s17402_s27  ;;  %v13964_v2 = vpop.permute.xlu0 %4304 }
 0x41a   : > { %3424 = vst [vmem:[%s11326_s25 + $0xd8] sm:$0xff] %v3408_v32  ;;  %v3409_v25 = vmax.f32 %v3387_v29, 0.0  ;;  %v3389_v60 = vadd.f32 %v3388_v19, %v3276_v52  ;;  %4775 = vrot.lane.b32.xlu0 %v17586_v26, %s17402_s27 }
 0x41b   : > { %v3392_v58 = vpop.f32.mrf.mxu0 }
 0x41c   : > { %3425 = vst [vmem:[%s11326_s25 + $0xe0] sm:$0xff] %v3409_v25  ;;  %v3410_v35 = vmax.f32 %v3389_v60, 0.0  ;;  %v3393_v31 = vadd.f32 %v3392_v58, %v3280_v45  ;;  %v13969_v5 = vpop.permute.xlu1 %4306 }
 0x41d   : > { %v3394_v21 = vpop.f32.mrf.mxu0  ;;  %4777 = vrot.lane.b32.xlu1 %v17587_v33, %s17402_s27  ;;  %v4311_v23 = vpop.permute.xlu0 %4310 }
 0x41e   : > { %3426 = vst [vmem:[%s11326_s25 + $0xe8] sm:$0xff] %v3410_v35  ;;  %v3411_v50 = vmax.f32 %v3393_v31, 0.0  ;;  %v3395_v13 = vadd.f32 %v3394_v21, %v3282_v51  ;;  %10194 = vrot.lane.b32.xlu0 %v17482_v0, %s17402_s27 }
 0x420   : > { %3427 = vst [vmem:[%s11326_s25 + $0xf0] sm:$0xff] %v3411_v50  ;;  %v3412_v44 = vmax.f32 %v3395_v13, 0.0  ;;  %v4313_v15 = vpop.permute.xlu1 %4312 }
 0x421   : > { %4781 = vrot.lane.b32.xlu1 %v12743_v59, %s17402_s27  ;;  %v10135_v61 = vpop.permute.xlu0 %10134 }
 0x422   : > { %3428 = vst [vmem:[%s11326_s25 + $0xf8] sm:$0xff] %v3412_v44  ;;  %4783 = vrot.lane.b32.xlu0 %v12751_v48, %s17402_s27 }
 0x424   : > { %v4317_v52 = vpop.permute.xlu1 %4316 }
 0x425   : > { %4787 = vrot.lane.b32.xlu1 %v12771_v57, %s17402_s27  ;;  %v4319_v32 = vpop.permute.xlu0 %4318 }
 0x426   : > { %4789 = vrot.lane.b32.xlu0 %v12777_v46, %s17402_s27 }
 0x428   : > { %v4323_v29 = vpop.permute.xlu1 %4322 }
 0x429   : > { %10199 = vrot.lane.b32.xlu1 %v17482_v0, %s17402_s27  ;;  %v4325_v27 = vpop.permute.xlu0 %4324 }
 0x42a   : > { %4793 = vrot.lane.b32.xlu0 %v12800_v40, %s17402_s27 }
 0x42c   : > { %v10140_v12 = vpop.permute.xlu1 %10139 }
 0x42d   : > { %4795 = vrot.lane.b32.xlu1 %v17625_v16, %s17402_s27  ;;  %v4329_v19 = vpop.permute.xlu0 %4328  ;;  %v10142_v60 = vunpack.i.h.bf16 %v10140_v12  ;;  %v10141_v58 = vunpack.i.l.bf16 %v10140_v12  ;;  %v10137_v12 = vunpack.i.h.bf16 %v10135_v61 }
 0x42e   : > { %4799 = vrot.lane.b32.xlu0 %v17626_v17, %s17402_s27 }
 0x430   : > { %v4331_v45 = vpop.permute.xlu1 %4330 }
 0x431   : > { %4801 = vrot.lane.b32.xlu1 %v17629_v8, %s17402_s27  ;;  %v4335_v25 = vpop.permute.xlu0 %4334  ;;  %v4352_v13 = vsel %vm4338_vm12, %v4329_v19, %v4331_v45  ;;  %v4351_v8 = vsel %vm4338_vm12, %v10141_v58, %v4329_v19  ;;  %v4349_v45 = vsel %vm4338_vm12, %v10137_v12, %v4323_v29  ;;  %v10131_v19 = vunpack.i.l.bf16 %v13957_v41 }
 0x432   : > { %10204 = vrot.lane.b32.xlu0 %v17482_v0, %s10626_s24  ;;  %v4353_v31 = vsel %vm4338_vm12, %v10142_v60, %v4335_v25  ;;  %v4346_v58 = vsel %vm4338_vm12, %v4311_v23, %v4313_v15  ;;  %v17643_v15 = vld [vmem:[#allocation14_spill] sm:$0xff]  ;;  %v10126_v12 = vunpack.i.l.bf16 %v13921_v1 }
 0x434   : > { %v4337_v51 = vpop.permute.xlu1 %4336 }
 0x435   : > { %v4354_v35 = vsel %vm4338_vm12, %v4335_v25, %v4337_v51  ;;  %4917 = vrot.lane.b32.xlu1 %v17633_v9, %s10626_s24  ;;  %v14002_v21 = vpop.permute.xlu0 %10144  ;;  %v10136_v51 = vunpack.i.l.bf16 %v10135_v61  ;;  %v4350_v25 = vsel %vm4338_vm12, %v4323_v29, %v4325_v27  ;;  %v4348_v61 = vsel %vm4338_vm12, %v4317_v52, %v4319_v32 }
 0x436   : > { %4919 = vrot.lane.b32.xlu0 %v17635_v14, %s10626_s24  ;;  %9499 = vmatprep.subr.msk.mxu0 %vm394_vm15, %v4354_v35  ;;  %v10132_v27 = vunpack.i.h.bf16 %v13957_v41  ;;  %v17641_v41 = vld [vmem:[#allocation26_spill] sm:$0xff] }
 0x437   : > { %9500 = vmatpush1.msk.msra.mxu0 %vm393_vm14, %v4353_v31  ;;  %v14054_v31 = vadd.s32 2, %v17643_v15 }
 0x438   : > { %v14012_v9 = vpop.permute.xlu1 %4453  ;;  %9501 = vmatprep.subr.msk.mxu0 %vm394_vm15, %v4352_v13  ;;  %v4345_v32 = vsel %vm4338_vm12, %v10132_v27, %v4311_v23  ;;  %v4344_v13 = vsel %vm4338_vm12, %v13964_v2, %v13969_v5  ;;  %v10127_v23 = vunpack.i.h.bf16 %v13921_v1 }
 0x439   : > { %4923 = vrot.lane.b32.xlu1 %v12635_v3, %s10626_s24  ;;  %9502 = vmatpush1.msk.msra.mxu0 %vm393_vm14, %v4351_v8  ;;  %v14022_v60 = vpop.permute.xlu0 %4455  ;;  %v4347_v8 = vsel %vm4338_vm12, %v10136_v51, %v4317_v52  ;;  %v14051_v52 = vadd.s32 2, %v17641_v41  ;;  %17644 = vst [vmem:[#allocation67_spill] sm:$0xff] %v14054_v31  ;;  %v4343_v51 = vsel %vm4338_vm12, %v10131_v19, %v13964_v2  ;;  %vm420_vm11 = vcmp.lt.s32.totalorder %v14054_v31, 16 }
 0x43a   : > { %4925 = vrot.lane.b32.xlu0 %v12642_v30, %s10626_s24  ;;  %9503 = vmatprep.subr.msk.mxu0 %vm394_vm15, %v4350_v25  ;;  %v4341_v1 = vsel %vm4338_vm12, %v10127_v23, %v13943_v63  ;;  %v10121_v2 = vunpack.i.l.bf16 %v13879_v7  ;;  %v10111_v41 = vunpack.i.l.bf16 %v13740_v38 }
 0x43b   : > { %9504 = vmatpush1.msk.msra.mxu0 %vm393_vm14, %v4349_v45  ;;  %17642 = vst [vmem:[#allocation12_spill] sm:$0xff] %v14051_v52  ;;  %v4342_v45 = vsel %vm4338_vm12, %v13943_v63, %v13950_v37  ;;  %vm419_vm13 = vcmp.lt.s32.totalorder %v14051_v52, 16  ;;  %v4340_v37 = vsel %vm4338_vm12, %v13929_v10, %v13936_v47  ;;  %v10122_v63 = vunpack.i.h.bf16 %v13879_v7 }
 0x43c   : > { %v14034_v29 = vpop.permute.xlu1 %4459  ;;  %9505 = vmatprep.subr.msk.mxu0 %vm394_vm15, %v4348_v61  ;;  %v4339_v61 = vsel %vm4338_vm12, %v10126_v12, %v13929_v10  ;;  %v4193_v47 = vsel %vm4177_vm10, %v13905_v28, %v13913_v4  ;;  %v4191_v4 = vsel %vm4177_vm10, %v13889_v6, %v13897_v62  ;;  %v10117_v10 = vunpack.i.h.bf16 %v13804_v55 }
 0x43d   : > { %10209 = vrot.lane.b32.xlu1 %v17482_v0, %s10626_s24  ;;  %9506 = vmatpush1.msk.msra.mxu0 %vm393_vm14, %v4347_v8  ;;  %v14044_v35 = vpop.permute.xlu0 %4461  ;;  %v4192_v7 = vsel %vm4177_vm10, %v10122_v63, %v13905_v28  ;;  %v10116_v8 = vunpack.i.l.bf16 %v13804_v55  ;;  %v4190_v28 = vsel %vm4177_vm10, %v10121_v2, %v13889_v6  ;;  %v10112_v6 = vunpack.i.h.bf16 %v13740_v38  ;;  %v7277_v63 = vld [vmem:[#allocation5] sm:$0xff] }
 0x43e   : > { %4929 = vrot.lane.b32.xlu0 %v12673_v54, %s10626_s24  ;;  %9507 = vmatprep.subr.msk.mxu0 %vm394_vm15, %v4346_v58  ;;  %v4188_v55 = vsel %vm4177_vm10, %v10117_v10, %v13852_v24  ;;  %vm5124_vm12 = vcmask 15360  }
 0x43f   : > { %9508 = vmatpush1.msk.msra.mxu0 %vm393_vm14, %v4345_v32  ;;  %v4189_v32 = vsel %vm4177_vm10, %v13852_v24, %v13866_v39  ;;  %v4187_v39 = vsel %vm4177_vm10, %v13824_v43, %v13830_v18  ;;  %v4186_v24 = vsel %vm4177_vm10, %v10116_v8, %v13824_v43  ;;  %v4184_v38 = vsel %vm4177_vm10, %v10112_v6, %v13778_v34  ;;  %v17645_v43 = vld [vmem:[#allocation68_spill] sm:$0xff] }
 0x440   : > { %v14065_v25 = vpop.permute.xlu1 %10149  ;;  %9509 = vmatprep.subr.msk.mxu0 %vm394_vm15, %v4344_v13  ;;  %v4185_v13 = vsel %vm4177_vm10, %v13778_v34, %v13798_v20  ;;  %v4183_v20 = vsel %vm4177_vm10, %v13749_v49, %v13772_v42  ;;  %v10107_v23 = vunpack.i.h.bf16 %v17645_v43  ;;  %v10106_v12 = vunpack.i.l.bf16 %v17645_v43 }
 0x441   : > { %4931 = vrot.lane.b32.xlu1 %v17585_v53, %s10626_s24  ;;  %9510 = vmatpush1.msk.msra.mxu0 %vm393_vm14, %v4343_v51  ;;  %v14078_v5 = vpop.permute.xlu0 %4465  ;;  %v4182_v34 = vsel %vm4177_vm10, %v10111_v41, %v13749_v49 }
 0x442   : > { %4935 = vrot.lane.b32.xlu0 %v17586_v26, %s10626_s24  ;;  %9511 = vmatprep.subr.msk.mxu0 %vm394_vm15, %v4342_v45  ;;  %v4181_v45 = vsel %vm4177_vm10, %v13708_v22, %v13715_v56  ;;  %v4180_v42 = vsel %vm4177_vm10, %v10107_v23, %v13708_v22  ;;  %v4179_v56 = vsel %vm4177_vm10, %v13680_v11, %v13685_v36  ;;  %v7278_v36 = vld [vmem:[#allocation5 + $0x8] sm:$0xff] }
 0x443   : > { %9512 = vmatpush1.msk.msra.mxu0 %vm393_vm14, %v4341_v1  ;;  %v4178_v49 = vsel %vm4177_vm10, %v10106_v12, %v13680_v11  ;;  %7917 = vmatprep.mubr.f32.mxu1 %v7278_v36  ;;  %v17646_v11 = vld [vmem:[#allocation16_spill] sm:$0xff]  ;;  %vm4963_vm10 = vcmask 113664  }
 0x444   : > { %v14095_v27 = vpop.permute.xlu1 %4467  ;;  %9513 = vmatprep.subr.msk.mxu0 %vm394_vm15, %v4340_v37  ;;  %7918 = vmatmul.mubr.f32.vlgmr.msra.gmra.mxu1 %v7277_v63 }
 0x445   : > { %4937 = vrot.lane.b32.xlu1 %v17587_v33, %s10626_s24  ;;  %9514 = vmatpush1.msk.msra.mxu0 %vm393_vm14, %v4339_v61  ;;  %v14108_v19 = vpop.permute.xlu0 %4471 }
 0x446   : > { %10214 = vrot.lane.b32.xlu0 %v17482_v0, %s10626_s24  ;;  %9515 = vmatprep.subr.msk.mxu0 %vm420_vm11, %v4193_v47 }
 0x447   : > { %9516 = vmatpush1.msk.msra.mxu0 %vm419_vm13, %v4192_v7  ;;  %v17647_v7 = vld [vmem:[#allocation11_spill] sm:$0xff] }
 0x448   : > { %v14123_v58 = vpop.permute.xlu1 %4473  ;;  %9517 = vmatprep.subr.msk.mxu0 %vm420_vm11, %v4191_v4 }
 0x449   : > { %4941 = vrot.lane.b32.xlu1 %v12743_v59, %s10626_s24  ;;  %9518 = vmatpush1.msk.msra.mxu0 %vm419_vm13, %v4190_v28  ;;  %v14136_v62 = vpop.permute.xlu0 %10154 }
 0x44a   : > { %4943 = vrot.lane.b32.xlu0 %v12751_v48, %s10626_s24  ;;  %9519 = vmatprep.subr.msk.mxu0 %vm420_vm11, %v4189_v32 }
 0x44b   : > { %9520 = vmatpush1.msk.msra.mxu0 %vm419_vm13, %v4188_v55 }
 0x44c   : > { %v14151_v15 = vpop.permute.xlu1 %4477  ;;  %9521 = vmatprep.subr.msk.mxu0 %vm420_vm11, %v4187_v39 }
 0x44d   : > { %4947 = vrot.lane.b32.xlu1 %v12771_v57, %s10626_s24  ;;  %9522 = vmatpush1.msk.msra.mxu0 %vm419_vm13, %v4186_v24  ;;  %v14164_v18 = vpop.permute.xlu0 %4479 }
 0x44e   : > { %4949 = vrot.lane.b32.xlu0 %v12777_v46, %s10626_s24  ;;  %9523 = vmatprep.subr.msk.mxu0 %vm420_vm11, %v4185_v13 }
 0x44f   : > { %9524 = vmatpush1.msk.msra.mxu0 %vm419_vm13, %v4184_v38 }
 0x450   : > { %v14179_v51 = vpop.permute.xlu1 %4483  ;;  %9525 = vmatprep.subr.msk.mxu0 %vm420_vm11, %v4183_v20 }
 0x451   : > { %10219 = vrot.lane.b32.xlu1 %v17482_v0, %s10626_s24  ;;  %9526 = vmatpush1.msk.msra.mxu0 %vm419_vm13, %v4182_v34  ;;  %v14192_v1 = vpop.permute.xlu0 %4485 }
 0x452   : > { %4953 = vrot.lane.b32.xlu0 %v12800_v40, %s10626_s24  ;;  %9527 = vmatprep.subr.msk.mxu0 %vm420_vm11, %v4181_v45 }
 0x453   : > { %9528 = vmatpush1.msk.msra.mxu0 %vm419_vm13, %v4180_v42 }
 0x454   : > { %v14205_v37 = vpop.permute.xlu1 %10159  ;;  %9529 = vmatprep.subr.msk.mxu0 %vm420_vm11, %v4179_v56 }
 0x455   : > { %4955 = vrot.lane.b32.xlu1 %v17625_v16, %s10626_s24  ;;  %9530 = vmatpush1.msk.msra.mxu0 %vm419_vm13, %v4178_v49  ;;  %v14213_v22 = vpop.permute.xlu0 %4489 }
 0x456   : > { %4959 = vrot.lane.b32.xlu0 %v17626_v17, %s10626_s24 }
 0x458   : > { %v14217_v2 = vpop.permute.xlu1 %4491 }
 0x459   : > { %4961 = vrot.lane.b32.xlu1 %v17646_v11, %s10626_s24  ;;  %v14221_v61 = vpop.permute.xlu0 %4495  ;;  %s17672_s24 = smov 111  }
 0x45a   : > { %10224 = vrot.lane.b32.xlu0 %v17482_v0, %s10627_s29 }
 0x45c   : > { %v14225_v47 = vpop.permute.xlu1 %4497 }
 0x45d   : > { %5078 = vrot.lane.b32.xlu1 %v17647_v7, %s10627_s29  ;;  %v14229_v4 = vpop.permute.xlu0 %10164 }
 0x45e   : > { %5080 = vrot.lane.b32.xlu0 %v17635_v14, %s10627_s29 }
 0x460   : > { %v14233_v10 = vpop.permute.xlu1 %4613 }
 0x461   : > { %5084 = vrot.lane.b32.xlu1 %v12635_v3, %s10627_s29  ;;  %v14237_v8 = vpop.permute.xlu0 %4615 }
 0x462   : > { %5086 = vrot.lane.b32.xlu0 %v12642_v30, %s10627_s29 }
 0x464   : > { %v14241_v28 = vpop.permute.xlu1 %4619 }
 0x465   : > { %10229 = vrot.lane.b32.xlu1 %v17482_v0, %s10627_s29  ;;  %v14245_v32 = vpop.permute.xlu0 %4621 }
 0x466   : > { %5090 = vrot.lane.b32.xlu0 %v12673_v54, %s10627_s29 }
 0x468   : > { %v14249_v55 = vpop.permute.xlu1 %10169 }
 0x469   : > { %5092 = vrot.lane.b32.xlu1 %v17585_v53, %s10627_s29  ;;  %v14253_v39 = vpop.permute.xlu0 %4625 }
 0x46a   : > { %5096 = vrot.lane.b32.xlu0 %v17586_v26, %s10627_s29 }
 0x46c   : > { %v14257_v6 = vpop.permute.xlu1 %4627 }
 0x46d   : > { %5098 = vrot.lane.b32.xlu1 %v17587_v33, %s10627_s29  ;;  %v4632_v41 = vpop.permute.xlu0 %4631 }
 0x46e   : > { %10234 = vrot.lane.b32.xlu0 %v17482_v0, %s10627_s29 }
 0x470   : > { %v4634_v24 = vpop.permute.xlu1 %4633 }
 0x471   : > { %5102 = vrot.lane.b32.xlu1 %v12743_v59, %s10627_s29  ;;  %v10175_v13 = vpop.permute.xlu0 %10174 }
 0x472   : > { %5104 = vrot.lane.b32.xlu0 %v12751_v48, %s10627_s29  ;;  %v10177_v31 = vunpack.i.h.bf16 %v10175_v13 }
 0x474   : > { %v4638_v38 = vpop.permute.xlu1 %4637 }
 0x475   : > { %5108 = vrot.lane.b32.xlu1 %v12771_v57, %s10627_s29  ;;  %v4640_v20 = vpop.permute.xlu0 %4639 }
 0x476   : > { %5110 = vrot.lane.b32.xlu0 %v12777_v46, %s10627_s29 }
 0x478   : > { %v4644_v43 = vpop.permute.xlu1 %4643 }
 0x479   : > { %10239 = vrot.lane.b32.xlu1 %v17482_v0, %s10627_s29  ;;  %v4646_v23 = vpop.permute.xlu0 %4645 }
 0x47a   : > { %5114 = vrot.lane.b32.xlu0 %v12800_v40, %s10627_s29 }
 0x47c   : > { %v10180_v12 = vpop.permute.xlu1 %10179 }
 0x47d   : > { %5116 = vrot.lane.b32.xlu1 %v17625_v16, %s10627_s29  ;;  %v4650_v34 = vpop.permute.xlu0 %4649  ;;  %v10182_v56 = vunpack.i.h.bf16 %v10180_v12  ;;  %v10181_v49 = vunpack.i.l.bf16 %v10180_v12 }
 0x47e   : > { %5120 = vrot.lane.b32.xlu0 %v17626_v17, %s10627_s29 }
 0x480   : > { %v4652_v45 = vpop.permute.xlu1 %4651 }
 0x481   : > { %5122 = vrot.lane.b32.xlu1 %v17646_v11, %s10627_s29  ;;  %v4656_v42 = vpop.permute.xlu0 %4655  ;;  %v4672_v52 = vsel %vm1766_vm0, %v4650_v34, %v4652_v45  ;;  %v10176_v11 = vunpack.i.l.bf16 %v10175_v13  ;;  %v4668_v13 = vsel %vm1766_vm0, %v4638_v38, %v4640_v20  ;;  %s10630_s29 = smov 110  }
 0x482   : > { %10244 = vrot.lane.b32.xlu0 %v17482_v0, %s17400_s28  ;;  %v4673_v50 = vsel %vm1766_vm0, %v10182_v56, %v4656_v42  ;;  %v10161_v56 = vunpack.i.l.bf16 %v14205_v37 }
 0x484   : > { %v4658_v36 = vpop.permute.xlu1 %4657 }
 0x485   : > { %5239 = vrot.lane.b32.xlu1 %v17647_v7, %s17400_s28  ;;  %v4674_v63 = vsel %vm1766_vm0, %v4656_v42, %v4658_v36  ;;  %v14286_v44 = vpop.permute.xlu0 %10184  ;;  %v4671_v7 = vsel %vm1766_vm0, %v10181_v49, %v4650_v34  ;;  %v4670_v36 = vsel %vm1766_vm0, %v4644_v43, %v4646_v23  ;;  %v10171_v34 = vunpack.i.l.bf16 %v14249_v55 }
 0x486   : > { %17648 = vst [vmem:[#allocation40_spill] sm:$0xff] %v14286_v44  ;;  %5241 = vrot.lane.b32.xlu0 %v17635_v14, %s17400_s28  ;;  %7998 = vmatprep.subr.mxu0 %v4674_v63  ;;  %v4666_v23 = vsel %vm1766_vm0, %v4632_v41, %v4634_v24  ;;  %v4514_v63 = vsel %vm1605_vm3, %v14221_v61, %v14225_v47 }
 0x487   : > { %7999 = vmatpush2.msra.mxu0 %v4673_v50  ;;  %v4669_v50 = vsel %vm1766_vm0, %v10177_v31, %v4644_v43  ;;  %v4663_v24 = vsel %vm1766_vm0, %v10171_v34, %v14253_v39  ;;  %v10151_v34 = vunpack.i.l.bf16 %v14065_v25 }
 0x488   : > { %v14292_v12 = vpop.permute.xlu1 %4757  ;;  %8000 = vmatprep.subr.mxu0 %v4672_v52  ;;  %v10172_v52 = vunpack.i.h.bf16 %v14249_v55  ;;  %v4664_v55 = vsel %vm1766_vm0, %v14253_v39, %v14257_v6  ;;  %v4660_v39 = vsel %vm1766_vm0, %v14233_v10, %v14237_v8  ;;  %v10162_v6 = vunpack.i.h.bf16 %v14205_v37 }
 0x489   : > { %5245 = vrot.lane.b32.xlu1 %v12635_v3, %s17400_s28  ;;  %8001 = vmatpush2.msra.mxu0 %v4671_v7  ;;  %v14298_v44 = vpop.permute.xlu0 %4759  ;;  %v4667_v7 = vsel %vm1766_vm0, %v10176_v11, %v4638_v38  ;;  %v10167_v11 = vunpack.i.h.bf16 %v14229_v4  ;;  %v10166_v38 = vunpack.i.l.bf16 %v14229_v4 }
 0x48a   : > { %5247 = vrot.lane.b32.xlu0 %v12642_v30, %s17400_s28  ;;  %8002 = vmatprep.subr.mxu0 %v4670_v36  ;;  %v4665_v31 = vsel %vm1766_vm0, %v10172_v52, %v4632_v41  ;;  %v4662_v41 = vsel %vm1766_vm0, %v14241_v28, %v14245_v32  ;;  %v4513_v8 = vsel %vm1605_vm3, %v10162_v6, %v14221_v61  ;;  %v10157_v36 = vunpack.i.h.bf16 %v14136_v62 }
 0x48b   : > { %8003 = vmatpush2.msra.mxu0 %v4669_v50  ;;  %v4661_v4 = vsel %vm1766_vm0, %v10167_v11, %v14241_v28  ;;  %v4659_v32 = vsel %vm1766_vm0, %v10166_v38, %v14233_v10  ;;  %v4512_v10 = vsel %vm1605_vm3, %v14213_v22, %v14217_v2  ;;  %v10156_v50 = vunpack.i.l.bf16 %v14136_v62 }
 0x48c   : > { %v14306_v45 = vpop.permute.xlu1 %4763  ;;  %8004 = vmatprep.subr.mxu0 %v4668_v13  ;;  %v4511_v61 = vsel %vm1605_vm3, %v10161_v56, %v14213_v22  ;;  %v4510_v52 = vsel %vm1605_vm3, %v14179_v51, %v14192_v1  ;;  %v4509_v62 = vsel %vm1605_vm3, %v10157_v36, %v14179_v51  ;;  %v4508_v1 = vsel %vm1605_vm3, %v14151_v15, %v14164_v18 }
 0x48d   : > { %10249 = vrot.lane.b32.xlu1 %v17482_v0, %s17400_s28  ;;  %8005 = vmatpush2.msra.mxu0 %v4667_v7  ;;  %v14312_v42 = vpop.permute.xlu0 %4765  ;;  %v10152_v22 = vunpack.i.h.bf16 %v14065_v25  ;;  %v4507_v51 = vsel %vm1605_vm3, %v10156_v50, %v14151_v15  ;;  %v10147_v15 = vunpack.i.h.bf16 %v14002_v21  ;;  %v4502_v11 = vsel %vm1605_vm3, %v14034_v29, %v14044_v35 }
 0x48e   : > { %5251 = vrot.lane.b32.xlu0 %v12673_v54, %s17400_s28  ;;  %8006 = vmatprep.subr.mxu0 %v4666_v23  ;;  %v4506_v23 = vsel %vm1605_vm3, %v14108_v19, %v14123_v58  ;;  %v4504_v58 = vsel %vm1605_vm3, %v14078_v5, %v14095_v27  ;;  %v4500_v35 = vsel %vm1605_vm3, %v14012_v9, %v14022_v60 }
 0x48f   : > { %8007 = vmatpush2.msra.mxu0 %v4665_v31  ;;  %v4505_v25 = vsel %vm1605_vm3, %v10152_v22, %v14108_v19  ;;  %v10146_v31 = vunpack.i.l.bf16 %v14002_v21  ;;  %v4503_v19 = vsel %vm1605_vm3, %v10151_v34, %v14078_v5  ;;  %v4501_v21 = vsel %vm1605_vm3, %v10147_v15, %v14034_v29 }
 0x490   : > { %v14322_v20 = vpop.permute.xlu1 %10189  ;;  %8008 = vmatprep.subr.mxu0 %v4664_v55 }
 0x491   : > { %5253 = vrot.lane.b32.xlu1 %v17585_v53, %s17400_s28  ;;  %8009 = vmatpush2.msra.mxu0 %v4663_v24  ;;  %v14331_v43 = vpop.permute.xlu0 %4769  ;;  %v4499_v5 = vsel %vm1605_vm3, %v10146_v31, %v14012_v9  ;;  %v17651_v9 = vld [vmem:[#allocation16_spill] sm:$0xff] }
 0x492   : > { %5257 = vrot.lane.b32.xlu0 %v17586_v26, %s17400_s28  ;;  %8010 = vmatprep.subr.mxu0 %v4662_v41  ;;  %v17653_v41 = vld [vmem:[#allocation11_spill] sm:$0xff] }
 0x493   : > { %8011 = vmatpush2.msra.mxu0 %v4661_v4 }
 0x494   : > { %v14342_v49 = vpop.permute.xlu1 %4771  ;;  %8012 = vmatprep.subr.mxu0 %v4660_v39 }
 0x495   : > { %5259 = vrot.lane.b32.xlu1 %v17587_v33, %s17400_s28  ;;  %8013 = vmatpush2.msra.mxu0 %v4659_v32  ;;  %v14353_v28 = vpop.permute.xlu0 %4775 }
 0x496   : > { %10254 = vrot.lane.b32.xlu0 %v17482_v0, %s17400_s28  ;;  %9531 = vmatprep.subr.msk.mxu0 %vm402_vm1, %v4514_v63 }
 0x497   : > { %9532 = vmatpush2.msk.msra.mxu0 %vm401_vm2, %v4513_v8 }
 0x498   : > { %v14368_v13 = vpop.permute.xlu1 %4777  ;;  %9533 = vmatprep.subr.msk.mxu0 %vm402_vm1, %v4512_v10 }
 0x499   : > { %5263 = vrot.lane.b32.xlu1 %v12743_v59, %s17400_s28  ;;  %9534 = vmatpush2.msk.msra.mxu0 %vm401_vm2, %v4511_v61  ;;  %v14381_v2 = vpop.permute.xlu0 %10194 }
 0x49a   : > { %5265 = vrot.lane.b32.xlu0 %v12751_v48, %s17400_s28  ;;  %9535 = vmatprep.subr.msk.mxu0 %vm402_vm1, %v4510_v52 }
 0x49b   : > { %9536 = vmatpush2.msk.msra.mxu0 %vm401_vm2, %v4509_v62 }
 0x49c   : > { %v14396_v7 = vpop.permute.xlu1 %4781  ;;  %9537 = vmatprep.subr.msk.mxu0 %vm402_vm1, %v4508_v1 }
 0x49d   : > { %5269 = vrot.lane.b32.xlu1 %v12771_v57, %s17400_s28  ;;  %9538 = vmatpush2.msk.msra.mxu0 %vm401_vm2, %v4507_v51  ;;  %v14409_v18 = vpop.permute.xlu0 %4783 }
 0x49e   : > { %5271 = vrot.lane.b32.xlu0 %v12777_v46, %s17400_s28  ;;  %9539 = vmatprep.subr.msk.mxu0 %vm402_vm1, %v4506_v23 }
 0x49f   : > { %9540 = vmatpush2.msk.msra.mxu0 %vm401_vm2, %v4505_v25  ;;  %v7280_v25 = vld [vmem:[#allocation5 + $0x18] sm:$0xff] }
 0x4a0   : > { %v14424_v55 = vpop.permute.xlu1 %4787  ;;  %9541 = vmatprep.subr.msk.mxu0 %vm402_vm1, %v4504_v58  ;;  %v7279_v58 = vld [vmem:[#allocation5 + $0x10] sm:$0xff]  ;;  %8030 = vmatprep.mubr.f32.mxu0 %v7280_v25 }
 0x4a1   : > { %10259 = vrot.lane.b32.xlu1 %v17482_v0, %s17400_s28  ;;  %9542 = vmatpush2.msk.msra.mxu0 %vm401_vm2, %v4503_v19  ;;  %v14437_v27 = vpop.permute.xlu0 %4789 }
 0x4a2   : > { %5275 = vrot.lane.b32.xlu0 %v12800_v40, %s17400_s28  ;;  %9543 = vmatprep.subr.msk.mxu0 %vm402_vm1, %v4502_v11 }
 0x4a3   : > { %9544 = vmatpush2.msk.msra.mxu0 %vm401_vm2, %v4501_v21 }
 0x4a4   : > { %v14450_v38 = vpop.permute.xlu1 %10199  ;;  %9545 = vmatprep.subr.msk.mxu0 %vm402_vm1, %v4500_v35 }
 0x4a5   : > { %5277 = vrot.lane.b32.xlu1 %v17625_v16, %s17400_s28  ;;  %9546 = vmatpush2.msk.msra.mxu0 %vm401_vm2, %v4499_v5  ;;  %v14458_v29 = vpop.permute.xlu0 %4793 }
 0x4a6   : > { %5281 = vrot.lane.b32.xlu0 %v17626_v17, %s17400_s28  ;;  %8031 = vmatmul.mubr.f32.vlgmr.msra.gmra.mxu0 %v7279_v58 }
 0x4a8   : > { %v14462_v60 = vpop.permute.xlu1 %4795 }
 0x4a9   : > { %5283 = vrot.lane.b32.xlu1 %v17651_v9, %s17400_s28  ;;  %v14466_v24 = vpop.permute.xlu0 %4799 }
 0x4aa   : > { %5429 = vrot.lane.b32.xlu0 %v17653_v41, %s17652_s23 }
 0x4ac   : > { %v14470_v4 = vpop.permute.xlu1 %4801 }
 0x4ad   : > { %5431 = vrot.lane.b32.xlu1 %v17635_v14, %s17652_s23  ;;  %v14474_v39 = vpop.permute.xlu0 %10204 }
 0x4ae   : > { %10264 = vrot.lane.b32.xlu0 %v17482_v0, %s17652_s23 }
 0x4b0   : > { %v14478_v6 = vpop.permute.xlu1 %4917 }
 0x4b1   : > { %5435 = vrot.lane.b32.xlu1 %v12635_v3, %s17652_s23  ;;  %v14482_v56 = vpop.permute.xlu0 %4919 }
 0x4b2   : > { %5437 = vrot.lane.b32.xlu0 %v12642_v30, %s17652_s23 }
 0x4b4   : > { %v14486_v32 = vpop.permute.xlu1 %4923 }
 0x4b5   : > { %5441 = vrot.lane.b32.xlu1 %v12673_v54, %s17652_s23  ;;  %v14490_v63 = vpop.permute.xlu0 %4925 }
 0x4b6   : > { %5443 = vrot.lane.b32.xlu0 %v17585_v53, %s17652_s23 }
 0x4b8   : > { %v14494_v8 = vpop.permute.xlu1 %10209 }
 0x4b9   : > { %10269 = vrot.lane.b32.xlu1 %v17482_v0, %s17652_s23  ;;  %v14498_v10 = vpop.permute.xlu0 %4929 }
 0x4ba   : > { %5447 = vrot.lane.b32.xlu0 %v17586_v26, %s17652_s23 }
 0x4bc   : > { %v14502_v36 = vpop.permute.xlu1 %4931 }
 0x4bd   : > { %5449 = vrot.lane.b32.xlu1 %v17587_v33, %s17652_s23  ;;  %v4936_v50 = vpop.permute.xlu0 %4935 }
 0x4be   : > { %5453 = vrot.lane.b32.xlu0 %v12743_v59, %s17652_s23 }
 0x4c0   : > { %v4938_v61 = vpop.permute.xlu1 %4937 }
 0x4c1   : > { %5455 = vrot.lane.b32.xlu1 %v12751_v48, %s17652_s23  ;;  %v10215_v52 = vpop.permute.xlu0 %10214 }
 0x4c2   : > { %10274 = vrot.lane.b32.xlu0 %v17482_v0, %s17652_s23 }
 0x4c4   : > { %v4942_v62 = vpop.permute.xlu1 %4941 }
 0x4c5   : > { %5459 = vrot.lane.b32.xlu1 %v12771_v57, %s17652_s23  ;;  %v4944_v1 = vpop.permute.xlu0 %4943 }
 0x4c6   : > { %5461 = vrot.lane.b32.xlu0 %v12777_v46, %s17652_s23 }
 0x4c8   : > { %v4948_v22 = vpop.permute.xlu1 %4947 }
 0x4c9   : > { %5465 = vrot.lane.b32.xlu1 %v12800_v40, %s17652_s23  ;;  %v4950_v34 = vpop.permute.xlu0 %4949 }
 0x4ca   : > { %5467 = vrot.lane.b32.xlu0 %v17625_v16, %s17652_s23 }
 0x4cc   : > { %v10220_v51 = vpop.permute.xlu1 %10219 }
 0x4cd   : > { %10279 = vrot.lane.b32.xlu1 %v17482_v0, %s17652_s23  ;;  %v4954_v23 = vpop.permute.xlu0 %4953  ;;  %v10222_v19 = vunpack.i.h.bf16 %v10220_v51  ;;  %v10221_v11 = vunpack.i.l.bf16 %v10220_v51  ;;  %v10217_v51 = vunpack.i.h.bf16 %v10215_v52 }
 0x4ce   : > { %5471 = vrot.lane.b32.xlu0 %v17626_v17, %s17652_s23 }
 0x4d0   : > { %v4956_v15 = vpop.permute.xlu1 %4955 }
 0x4d1   : > { %5473 = vrot.lane.b32.xlu1 %v17651_v9, %s17652_s23  ;;  %v4960_v31 = vpop.permute.xlu0 %4959  ;;  %v4977_v47 = vsel %vm4963_vm10, %v4954_v23, %v4956_v15  ;;  %v4974_v15 = vsel %vm4963_vm10, %v10217_v51, %v4948_v22  ;;  %v10201_v51 = vunpack.i.l.bf16 %v14450_v38 }
 0x4d2   : > { %5589 = vrot.lane.b32.xlu0 %v17653_v41, %s10628_s21  ;;  %v4978_v5 = vsel %vm4963_vm10, %v10222_v19, %v4960_v31  ;;  %v4976_v41 = vsel %vm4963_vm10, %v10221_v11, %v4954_v23  ;;  %v4971_v23 = vsel %vm4963_vm10, %v4936_v50, %v4938_v61  ;;  %v10207_v61 = vunpack.i.h.bf16 %v14474_v39 }
 0x4d4   : > { %v4962_v21 = vpop.permute.xlu1 %4961 }
 0x4d5   : > { %v4979_v35 = vsel %vm4963_vm10, %v4960_v31, %v4962_v21  ;;  %5591 = vrot.lane.b32.xlu1 %v17635_v14, %s10628_s21  ;;  %v14532_v25 = vpop.permute.xlu0 %10224  ;;  %v10216_v21 = vunpack.i.l.bf16 %v10215_v52  ;;  %v4975_v31 = vsel %vm4963_vm10, %v4948_v22, %v4950_v34  ;;  %v10212_v52 = vunpack.i.h.bf16 %v14494_v8 }
 0x4d6   : > { %10284 = vrot.lane.b32.xlu0 %v17482_v0, %s10628_s21  ;;  %9547 = vmatprep.subr.msk.mxu1 %vm420_vm11, %v4979_v35  ;;  %v10211_v34 = vunpack.i.l.bf16 %v14494_v8  ;;  %v4969_v8 = vsel %vm4963_vm10, %v14498_v10, %v14502_v36 }
 0x4d7   : > { %9548 = vmatpush1.msk.msra.mxu1 %vm419_vm13, %v4978_v5  ;;  %v4967_v5 = vsel %vm4963_vm10, %v14486_v32, %v14490_v63  ;;  %v4965_v63 = vsel %vm4963_vm10, %v14478_v6, %v14482_v56 }
 0x4d8   : > { %v14542_v14 = vpop.permute.xlu1 %5078  ;;  %9549 = vmatprep.subr.msk.mxu1 %vm420_vm11, %v4977_v47  ;;  %v4973_v47 = vsel %vm4963_vm10, %v4942_v62, %v4944_v1  ;;  %v4970_v1 = vsel %vm4963_vm10, %v10212_v52, %v4936_v50  ;;  %v4968_v50 = vsel %vm4963_vm10, %v10211_v34, %v14498_v10  ;;  %v10202_v10 = vunpack.i.h.bf16 %v14450_v38 }
 0x4d9   : > { %5595 = vrot.lane.b32.xlu1 %v12635_v3, %s10628_s21  ;;  %9550 = vmatpush1.msk.msra.mxu1 %vm419_vm13, %v4976_v41  ;;  %v14552_v19 = vpop.permute.xlu0 %5080  ;;  %v4972_v41 = vsel %vm4963_vm10, %v10216_v21, %v4942_v62  ;;  %v10206_v62 = vunpack.i.l.bf16 %v14474_v39  ;;  %v4966_v39 = vsel %vm4963_vm10, %v10207_v61, %v14486_v32  ;;  %v10196_v52 = vunpack.i.l.bf16 %v14381_v2 }
 0x4da   : > { %5597 = vrot.lane.b32.xlu0 %v12642_v30, %s10628_s21  ;;  %9551 = vmatprep.subr.msk.mxu1 %vm420_vm11, %v4975_v31  ;;  %v4818_v31 = vsel %vm1915_vm7, %v14466_v24, %v14470_v4  ;;  %v4817_v38 = vsel %vm1915_vm7, %v10202_v10, %v14466_v24  ;;  %v4816_v4 = vsel %vm1915_vm7, %v14458_v29, %v14462_v60  ;;  %v17659_v10 = vld [vmem:[#allocation11_spill] sm:$0xff] }
 0x4db   : > { %9552 = vmatpush1.msk.msra.mxu1 %vm419_vm13, %v4974_v15  ;;  %v4964_v32 = vsel %vm4963_vm10, %v10206_v62, %v14478_v6  ;;  %v4815_v24 = vsel %vm1915_vm7, %v10201_v51, %v14458_v29  ;;  %v10192_v29 = vunpack.i.h.bf16 %v14322_v20  ;;  %vm5798_vm10 = vcmask 932864  }
 0x4dc   : > { %v14564_v22 = vpop.permute.xlu1 %5084  ;;  %9553 = vmatprep.subr.msk.mxu1 %vm420_vm11, %v4973_v47  ;;  %v10197_v47 = vunpack.i.h.bf16 %v14381_v2 }
 0x4dd   : > { %5601 = vrot.lane.b32.xlu1 %v12673_v54, %s10628_s21  ;;  %9554 = vmatpush1.msk.msra.mxu1 %vm419_vm13, %v4972_v41  ;;  %v14574_v11 = vpop.permute.xlu0 %5086  ;;  %v4814_v41 = vsel %vm1915_vm7, %v14424_v55, %v14437_v27  ;;  %v4812_v27 = vsel %vm1915_vm7, %v14396_v7, %v14409_v18 }
 0x4de   : > { %5603 = vrot.lane.b32.xlu0 %v17585_v53, %s10628_s21  ;;  %9555 = vmatprep.subr.msk.mxu1 %vm420_vm11, %v4971_v23  ;;  %v4813_v2 = vsel %vm1915_vm7, %v10197_v47, %v14424_v55  ;;  %v10191_v23 = vunpack.i.l.bf16 %v14322_v20  ;;  %v4811_v55 = vsel %vm1915_vm7, %v10196_v52, %v14396_v7  ;;  %v4809_v20 = vsel %vm1915_vm7, %v10192_v29, %v14353_v28  ;;  %v17658_v7 = vld [vmem:[#allocation40_spill] sm:$0xff] }
 0x4df   : > { %9556 = vmatpush1.msk.msra.mxu1 %vm419_vm13, %v4970_v1  ;;  %v10187_v61 = vunpack.i.h.bf16 %v17658_v7  ;;  %v10186_v62 = vunpack.i.l.bf16 %v17658_v7 }
 0x4e0   : > { %v14589_v35 = vpop.permute.xlu1 %10229  ;;  %9557 = vmatprep.subr.msk.mxu1 %vm420_vm11, %v4969_v8  ;;  %v4810_v8 = vsel %vm1915_vm7, %v14353_v28, %v14368_v13  ;;  %v4808_v13 = vsel %vm1915_vm7, %v14331_v43, %v14342_v49  ;;  %v4807_v28 = vsel %vm1915_vm7, %v10191_v23, %v14331_v43 }
 0x4e1   : > { %10289 = vrot.lane.b32.xlu1 %v17482_v0, %s10628_s21  ;;  %9558 = vmatpush1.msk.msra.mxu1 %vm419_vm13, %v4968_v50  ;;  %v14602_v36 = vpop.permute.xlu0 %5090  ;;  %v4805_v49 = vsel %vm1915_vm7, %v10187_v61, %v14306_v45  ;;  %v4803_v43 = vsel %vm1915_vm7, %v10186_v62, %v14292_v12 }
 0x4e2   : > { %5607 = vrot.lane.b32.xlu0 %v17586_v26, %s10628_s21  ;;  %9559 = vmatprep.subr.msk.mxu1 %vm420_vm11, %v4967_v5  ;;  %v4806_v5 = vsel %vm1915_vm7, %v14306_v45, %v14312_v42  ;;  %v4804_v42 = vsel %vm1915_vm7, %v14292_v12, %v14298_v44 }
 0x4e3   : > { %9560 = vmatpush1.msk.msra.mxu1 %vm419_vm13, %v4966_v39 }
 0x4e4   : > { %v14617_v21 = vpop.permute.xlu1 %5092  ;;  %9561 = vmatprep.subr.msk.mxu1 %vm420_vm11, %v4965_v63 }
 0x4e5   : > { %5609 = vrot.lane.b32.xlu1 %v17587_v33, %s10628_s21  ;;  %9562 = vmatpush1.msk.msra.mxu1 %vm419_vm13, %v4964_v32  ;;  %v14630_v56 = vpop.permute.xlu0 %5096  ;;  %v17660_v32 = vld [vmem:[#allocation23_spill] sm:$0xff] }
 0x4e6   : > { %5613 = vrot.lane.b32.xlu0 %v12743_v59, %s10628_s21  ;;  %9563 = vmatprep.subr.msk.mxu1 %vm412_vm5, %v4818_v31 }
 0x4e7   : > { %9564 = vmatpush1.msk.msra.mxu1 %vm411_vm6, %v4817_v38 }
 0x4e8   : > { %v14645_v34 = vpop.permute.xlu1 %5098  ;;  %9565 = vmatprep.subr.msk.mxu1 %vm412_vm5, %v4816_v4 }
 0x4e9   : > { %5615 = vrot.lane.b32.xlu1 %v12751_v48, %s10628_s21  ;;  %9566 = vmatpush1.msk.msra.mxu1 %vm411_vm6, %v4815_v24  ;;  %v14658_v60 = vpop.permute.xlu0 %10234 }
 0x4ea   : > { %10294 = vrot.lane.b32.xlu0 %v17482_v0, %s10628_s21  ;;  %9567 = vmatprep.subr.msk.mxu1 %vm412_vm5, %v4814_v41 }
 0x4eb   : > { %9568 = vmatpush1.msk.msra.mxu1 %vm411_vm6, %v4813_v2 }
 0x4ec   : > { %v14673_v1 = vpop.permute.xlu1 %5102  ;;  %9569 = vmatprep.subr.msk.mxu1 %vm412_vm5, %v4812_v27 }
 0x4ed   : > { %5619 = vrot.lane.b32.xlu1 %v12771_v57, %s10628_s21  ;;  %9570 = vmatpush1.msk.msra.mxu1 %vm411_vm6, %v4811_v55  ;;  %v14686_v18 = vpop.permute.xlu0 %5104 }
 0x4ee   : > { %5621 = vrot.lane.b32.xlu0 %v12777_v46, %s10628_s21  ;;  %9571 = vmatprep.subr.msk.mxu1 %vm412_vm5, %v4810_v8 }
 0x4ef   : > { %9572 = vmatpush1.msk.msra.mxu1 %vm411_vm6, %v4809_v20 }
 0x4f0   : > { %v14701_v50 = vpop.permute.xlu1 %5108  ;;  %9573 = vmatprep.subr.msk.mxu1 %vm412_vm5, %v4808_v13 }
 0x4f1   : > { %5625 = vrot.lane.b32.xlu1 %v12800_v40, %s10628_s21  ;;  %9574 = vmatpush1.msk.msra.mxu1 %vm411_vm6, %v4807_v28  ;;  %v14714_v39 = vpop.permute.xlu0 %5110 }
 0x4f2   : > { %5627 = vrot.lane.b32.xlu0 %v17625_v16, %s10628_s21  ;;  %9575 = vmatprep.subr.msk.mxu1 %vm412_vm5, %v4806_v5 }
 0x4f3   : > { %9576 = vmatpush1.msk.msra.mxu1 %vm411_vm6, %v4805_v49 }
 0x4f4   : > { %v14727_v63 = vpop.permute.xlu1 %10239  ;;  %9577 = vmatprep.subr.msk.mxu1 %vm412_vm5, %v4804_v42 }
 0x4f5   : > { %10299 = vrot.lane.b32.xlu1 %v17482_v0, %s10628_s21  ;;  %9578 = vmatpush1.msk.msra.mxu1 %vm411_vm6, %v4803_v43  ;;  %v14735_v45 = vpop.permute.xlu0 %5114 }
 0x4f6   : > { %5631 = vrot.lane.b32.xlu0 %v17626_v17, %s10628_s21 }
 0x4f8   : > { %v14739_v44 = vpop.permute.xlu1 %5116 }
 0x4f9   : > { %5633 = vrot.lane.b32.xlu1 %v17651_v9, %s10628_s21  ;;  %v14743_v12 = vpop.permute.xlu0 %5120  ;;  %s10631_s21 = smov 98  }
 0x4fa   : > { %5750 = vrot.lane.b32.xlu0 %v17659_v10, %s10629_s17 }
 0x4fc   : > { %v14747_v51 = vpop.permute.xlu1 %5122 }
 0x4fd   : > { %5752 = vrot.lane.b32.xlu1 %v17660_v32, %s10629_s17  ;;  %v14751_v31 = vpop.permute.xlu0 %10244 }
 0x4fe   : > { %10304 = vrot.lane.b32.xlu0 %v17482_v0, %s10629_s17 }
 0x500   : > { %v14755_v38 = vpop.permute.xlu1 %5239 }
 0x501   : > { %5756 = vrot.lane.b32.xlu1 %v12635_v3, %s10629_s17  ;;  %v14759_v4 = vpop.permute.xlu0 %5241 }
 0x502   : > { %5758 = vrot.lane.b32.xlu0 %v12642_v30, %s10629_s17 }
 0x504   : > { %v14763_v47 = vpop.permute.xlu1 %5245 }
 0x505   : > { %5762 = vrot.lane.b32.xlu1 %v12673_v54, %s10629_s17  ;;  %v14767_v52 = vpop.permute.xlu0 %5247 }
 0x506   : > { %5764 = vrot.lane.b32.xlu0 %v17585_v53, %s10629_s17 }
 0x508   : > { %v14771_v24 = vpop.permute.xlu1 %10249 }
 0x509   : > { %10309 = vrot.lane.b32.xlu1 %v17482_v0, %s10629_s17  ;;  %v14775_v41 = vpop.permute.xlu0 %5251 }
 0x50a   : > { %5768 = vrot.lane.b32.xlu0 %v17586_v26, %s10629_s17 }
 0x50c   : > { %v5254_v2 = vpop.permute.xlu1 %5253 }
 0x50d   : > { %5770 = vrot.lane.b32.xlu1 %v17587_v33, %s10629_s17  ;;  %v5258_v27 = vpop.permute.xlu0 %5257 }
 0x50e   : > { %5774 = vrot.lane.b32.xlu0 %v12743_v59, %s10629_s17 }
 0x510   : > { %v5260_v29 = vpop.permute.xlu1 %5259 }
 0x511   : > { %5776 = vrot.lane.b32.xlu1 %v12751_v48, %s10629_s17  ;;  %v10255_v23 = vpop.permute.xlu0 %10254 }
 0x512   : > { %10314 = vrot.lane.b32.xlu0 %v17482_v0, %s10629_s17 }
 0x514   : > { %v5264_v55 = vpop.permute.xlu1 %5263 }
 0x515   : > { %5780 = vrot.lane.b32.xlu1 %v12771_v57, %s10629_s17  ;;  %v5266_v8 = vpop.permute.xlu0 %5265 }
 0x516   : > { %5782 = vrot.lane.b32.xlu0 %v12777_v46, %s10629_s17 }
 0x518   : > { %v5270_v20 = vpop.permute.xlu1 %5269 }
 0x519   : > { %5786 = vrot.lane.b32.xlu1 %v12800_v40, %s10629_s17  ;;  %v5272_v13 = vpop.permute.xlu0 %5271 }
 0x51a   : > { %5788 = vrot.lane.b32.xlu0 %v17625_v16, %s10629_s17 }
 0x51c   : > { %v10260_v7 = vpop.permute.xlu1 %10259 }
 0x51d   : > { %10319 = vrot.lane.b32.xlu1 %v17482_v0, %s10629_s17  ;;  %v5276_v61 = vpop.permute.xlu0 %5275  ;;  %v10262_v5 = vunpack.i.h.bf16 %v10260_v7  ;;  %v10261_v49 = vunpack.i.l.bf16 %v10260_v7  ;;  %v10257_v7 = vunpack.i.h.bf16 %v10255_v23 }
 0x51e   : > { %5792 = vrot.lane.b32.xlu0 %v17626_v17, %s10629_s17 }
 0x520   : > { %v5278_v62 = vpop.permute.xlu1 %5277 }
 0x521   : > { %5794 = vrot.lane.b32.xlu1 %v17651_v9, %s10629_s17  ;;  %v5282_v28 = vpop.permute.xlu0 %5281  ;;  %v5298_v6 = vsel %vm2076_vm4, %v5276_v61, %v5278_v62  ;;  %v5297_v9 = vsel %vm2076_vm4, %v10261_v49, %v5276_v61  ;;  %v5295_v62 = vsel %vm2076_vm4, %v10257_v7, %v5270_v20  ;;  %v5292_v61 = vsel %vm2076_vm4, %v5258_v27, %v5260_v29  ;;  %s10632_s17 = smov 97  }
 0x522   : > { %5911 = vrot.lane.b32.xlu0 %v17659_v10, %s17661_s16  ;;  %v5299_v37 = vsel %vm2076_vm4, %v10262_v5, %v5282_v28  ;;  %v10247_v29 = vunpack.i.h.bf16 %v14751_v31 }
 0x524   : > { %v5284_v42 = vpop.permute.xlu1 %5283 }
 0x525   : > { %v5300_v43 = vsel %vm2076_vm4, %v5282_v28, %v5284_v42  ;;  %5913 = vrot.lane.b32.xlu1 %v17660_v32, %s17661_s16  ;;  %v14807_v58 = vpop.permute.xlu0 %5429  ;;  %v10256_v42 = vunpack.i.l.bf16 %v10255_v23  ;;  %v5296_v28 = vsel %vm2076_vm4, %v5270_v20, %v5272_v13  ;;  %v10252_v23 = vunpack.i.h.bf16 %v14771_v24 }
 0x526   : > { %10324 = vrot.lane.b32.xlu0 %v17482_v0, %s17661_s16  ;;  %9579 = vmatprep.subr.msk.mxu1 %vm402_vm1, %v5300_v43  ;;  %v10251_v13 = vunpack.i.l.bf16 %v14771_v24  ;;  %v5290_v24 = vsel %vm2076_vm4, %v14775_v41, %v5254_v2  ;;  %v5288_v43 = vsel %vm2076_vm4, %v14763_v47, %v14767_v52  ;;  %v5286_v52 = vsel %vm2076_vm4, %v14755_v38, %v14759_v4 }
 0x527   : > { %9580 = vmatpush2.msk.msra.mxu1 %vm401_vm2, %v5299_v37  ;;  %v5140_v4 = vsel %vm5124_vm12, %v14743_v12, %v14747_v51  ;;  %v5138_v51 = vsel %vm5124_vm12, %v14735_v45, %v14739_v44 }
 0x528   : > { %v14817_v32 = vpop.permute.xlu1 %5431  ;;  %9581 = vmatprep.subr.msk.mxu1 %vm402_vm1, %v5298_v6  ;;  %v5294_v6 = vsel %vm2076_vm4, %v5264_v55, %v5266_v8  ;;  %v5291_v8 = vsel %vm2076_vm4, %v10252_v23, %v5258_v27  ;;  %v5289_v27 = vsel %vm2076_vm4, %v10251_v13, %v14775_v41  ;;  %v10242_v41 = vunpack.i.h.bf16 %v14727_v63 }
 0x529   : > { %5917 = vrot.lane.b32.xlu1 %v12635_v3, %s17661_s16  ;;  %9582 = vmatpush2.msk.msra.mxu1 %vm401_vm2, %v5297_v9  ;;  %v14827_v37 = vpop.permute.xlu0 %10264  ;;  %v5293_v9 = vsel %vm2076_vm4, %v10256_v42, %v5264_v55  ;;  %v10246_v55 = vunpack.i.l.bf16 %v14751_v31  ;;  %v5287_v31 = vsel %vm2076_vm4, %v10247_v29, %v14763_v47  ;;  %v10241_v47 = vunpack.i.l.bf16 %v14727_v63 }
 0x52a   : > { %5919 = vrot.lane.b32.xlu0 %v12642_v30, %s17661_s16  ;;  %9583 = vmatprep.subr.msk.mxu1 %vm402_vm1, %v5296_v28  ;;  %v5139_v63 = vsel %vm5124_vm12, %v10242_v41, %v14743_v12  ;;  %v10236_v23 = vunpack.i.l.bf16 %v14658_v60  ;;  %v10226_v29 = vunpack.i.l.bf16 %v14532_v25 }
 0x52b   : > { %9584 = vmatpush2.msk.msra.mxu1 %vm401_vm2, %v5295_v62  ;;  %v5285_v7 = vsel %vm2076_vm4, %v10246_v55, %v14755_v38  ;;  %v5137_v12 = vsel %vm5124_vm12, %v10241_v47, %v14735_v45  ;;  %v10232_v45 = vunpack.i.h.bf16 %v14589_v35 }
 0x52c   : > { %v14839_v20 = vpop.permute.xlu1 %5435  ;;  %9585 = vmatprep.subr.msk.mxu1 %vm402_vm1, %v5294_v6  ;;  %v10237_v6 = vunpack.i.h.bf16 %v14658_v60 }
 0x52d   : > { %5923 = vrot.lane.b32.xlu1 %v12673_v54, %s17661_s16  ;;  %9586 = vmatpush2.msk.msra.mxu1 %vm401_vm2, %v5293_v9  ;;  %v14849_v5 = vpop.permute.xlu0 %5437  ;;  %v5136_v9 = vsel %vm5124_vm12, %v14701_v50, %v14714_v39  ;;  %v5134_v39 = vsel %vm5124_vm12, %v14673_v1, %v14686_v18 }
 0x52e   : > { %5925 = vrot.lane.b32.xlu0 %v17585_v53, %s17661_s16  ;;  %9587 = vmatprep.subr.msk.mxu1 %vm402_vm1, %v5292_v61  ;;  %v5135_v60 = vsel %vm5124_vm12, %v10237_v6, %v14701_v50  ;;  %v10231_v61 = vunpack.i.l.bf16 %v14589_v35  ;;  %v5133_v50 = vsel %vm5124_vm12, %v10236_v23, %v14673_v1  ;;  %v5131_v35 = vsel %vm5124_vm12, %v10232_v45, %v14630_v56 }
 0x52f   : > { %9588 = vmatpush2.msk.msra.mxu1 %vm401_vm2, %v5291_v8  ;;  %v10227_v1 = vunpack.i.h.bf16 %v14532_v25 }
 0x530   : > { %v14863_v49 = vpop.permute.xlu1 %5441  ;;  %9589 = vmatprep.subr.msk.mxu1 %vm402_vm1, %v5290_v24  ;;  %v5132_v24 = vsel %vm5124_vm12, %v14630_v56, %v14645_v34  ;;  %v5130_v34 = vsel %vm5124_vm12, %v14602_v36, %v14617_v21  ;;  %v5129_v56 = vsel %vm5124_vm12, %v10231_v61, %v14602_v36  ;;  %v5125_v36 = vsel %vm5124_vm12, %v10226_v29, %v14542_v14 }
 0x531   : > { %10329 = vrot.lane.b32.xlu1 %v17482_v0, %s17661_s16  ;;  %9590 = vmatpush2.msk.msra.mxu1 %vm401_vm2, %v5289_v27  ;;  %v14876_v2 = vpop.permute.xlu0 %5443  ;;  %v5128_v27 = vsel %vm5124_vm12, %v14564_v22, %v14574_v11  ;;  %v5127_v25 = vsel %vm5124_vm12, %v10227_v1, %v14564_v22  ;;  %v5126_v11 = vsel %vm5124_vm12, %v14542_v14, %v14552_v19  ;;  %v17668_v14 = vld [vmem:[#allocation11_spill] sm:$0xff]  ;;  %vm5637_vm12 = vcmask 1031168  }
 0x532   : > { %5929 = vrot.lane.b32.xlu0 %v17586_v26, %s17661_s16  ;;  %9591 = vmatprep.subr.msk.mxu1 %vm402_vm1, %v5288_v43 }
 0x533   : > { %9592 = vmatpush2.msk.msra.mxu1 %vm401_vm2, %v5287_v31  ;;  %v17666_v31 = vld [vmem:[#allocation16_spill] sm:$0xff] }
 0x534   : > { %v14891_v42 = vpop.permute.xlu1 %10269  ;;  %9593 = vmatprep.subr.msk.mxu1 %vm402_vm1, %v5286_v52 }
 0x535   : > { %5931 = vrot.lane.b32.xlu1 %v17587_v33, %s17661_s16  ;;  %9594 = vmatpush2.msk.msra.mxu1 %vm401_vm2, %v5285_v7  ;;  %v14904_v28 = vpop.permute.xlu0 %5447  ;;  %v10272_v1 = vunpack.i.h.bf16 %v14891_v42  ;;  %v10271_v29 = vunpack.i.l.bf16 %v14891_v42 }
 0x536   : > { %5935 = vrot.lane.b32.xlu0 %v12743_v59, %s17661_s16  ;;  %9595 = vmatprep.subr.msk.mxu1 %vm394_vm15, %v5140_v4 }
 0x537   : > { %9596 = vmatpush2.msk.msra.mxu1 %vm393_vm14, %v5139_v63 }
 0x538   : > { %v14919_v13 = vpop.permute.xlu1 %5449  ;;  %9597 = vmatprep.subr.msk.mxu1 %vm394_vm15, %v5138_v51  ;;  %v17669_v51 = vld [vmem:[#allocation23_spill] sm:$0xff] }
 0x539   : > { %5937 = vrot.lane.b32.xlu1 %v12751_v48, %s17661_s16  ;;  %9598 = vmatpush2.msk.msra.mxu1 %vm393_vm14, %v5137_v12  ;;  %v14932_v44 = vpop.permute.xlu0 %5453  ;;  %v5484_v42 = vsel %vm2269_vm8, %v14919_v13, %v10272_v1  ;;  %v7368_v1 = vld [vmem:[#allocation5 + $0x2d8] sm:$0xff] }
 0x53a   : > { %10334 = vrot.lane.b32.xlu0 %v17482_v0, %s17661_s16  ;;  %9599 = vmatprep.subr.msk.mxu1 %vm394_vm15, %v5136_v9 }
 0x53b   : > { %9600 = vmatpush2.msk.msra.mxu1 %vm393_vm14, %v5135_v60 }
 0x53c   : > { %v14947_v8 = vpop.permute.xlu1 %5455  ;;  %9601 = vmatprep.subr.msk.mxu1 %vm394_vm15, %v5134_v39 }
 0x53d   : > { %5941 = vrot.lane.b32.xlu1 %v12771_v57, %s17661_s16  ;;  %9602 = vmatpush2.msk.msra.mxu1 %vm393_vm14, %v5133_v50  ;;  %v10275_v18 = vpop.permute.xlu0 %10274 }
 0x53e   : > { %5943 = vrot.lane.b32.xlu0 %v12777_v46, %s17661_s16  ;;  %9603 = vmatprep.subr.msk.mxu1 %vm394_vm15, %v5132_v24  ;;  %v10277_v4 = vunpack.i.h.bf16 %v10275_v18  ;;  %v10276_v9 = vunpack.i.l.bf16 %v10275_v18  ;;  %v7291_v18 = vld [vmem:[#allocation5 + $0x70] sm:$0xff] }
 0x53f   : > { %9604 = vmatpush2.msk.msra.mxu1 %vm393_vm14, %v5131_v35  ;;  %7923 = vmatprep.mubr.f32.mxu1 %v7291_v18  ;;  %v7369_v18 = vld [vmem:[#allocation5 + $0x2e0] sm:$0xff] }
 0x540   : > { %v5460_v55 = vpop.permute.xlu1 %5459  ;;  %9605 = vmatprep.subr.msk.mxu1 %vm394_vm15, %v5130_v34  ;;  %v7290_v34 = vld [vmem:[#allocation5 + $0x68] sm:$0xff] }
 0x541   : > { %5947 = vrot.lane.b32.xlu1 %v12800_v40, %s17661_s16  ;;  %9606 = vmatpush2.msk.msra.mxu1 %vm393_vm14, %v5129_v56  ;;  %v5462_v21 = vpop.permute.xlu0 %5461  ;;  %v5486_v56 = vsel %vm2269_vm8, %v14947_v8, %v10276_v9 }
 0x542   : > { %5949 = vrot.lane.b32.xlu0 %v17625_v16, %s17661_s16  ;;  %9607 = vmatprep.subr.msk.mxu1 %vm394_vm15, %v5128_v27  ;;  %v5488_v50 = vsel %vm2269_vm8, %v5462_v21, %v10277_v4  ;;  %v5487_v24 = vsel %vm2269_vm8, %v5460_v55, %v5462_v21  ;;  %v5485_v55 = vsel %vm2269_vm8, %v14932_v44, %v14947_v8  ;;  %v7304_v21 = vld [vmem:[#allocation5 + $0xd8] sm:$0xff]  ;;  %v7343_v4 = vld [vmem:[#allocation5 + $0x210] sm:$0xff] }
 0x543   : > { %9608 = vmatpush2.msk.msra.mxu1 %vm393_vm14, %v5127_v25  ;;  %v10267_v25 = vunpack.i.h.bf16 %v14827_v37  ;;  %v5483_v44 = vsel %vm2269_vm8, %v14904_v28, %v14919_v13  ;;  %v5481_v28 = vsel %vm2269_vm8, %v14863_v49, %v14876_v2 }
 0x544   : > { %v5466_v43 = vpop.permute.xlu1 %5465  ;;  %9609 = vmatprep.subr.msk.mxu1 %vm394_vm15, %v5126_v11  ;;  %7924 = vmatmul.mubr.f32.gmra.mxu1 %v7290_v34  ;;  %v7303_v11 = vld [vmem:[#allocation5 + $0xd0] sm:$0xff] }
 0x545   : > { %10339 = vrot.lane.b32.xlu1 %v17482_v0, %s17661_s16  ;;  %9610 = vmatpush2.msk.msra.mxu1 %vm393_vm14, %v5125_v36  ;;  %v5468_v22 = vpop.permute.xlu0 %5467  ;;  %v10266_v36 = vunpack.i.l.bf16 %v14827_v37  ;;  %v5480_v37 = vsel %vm2269_vm8, %v14849_v5, %v10267_v25  ;;  %v7281_v25 = vld [vmem:[#allocation5 + $0x20] sm:$0xff] }
 0x546   : > { %5953 = vrot.lane.b32.xlu0 %v17626_v17, %s17661_s16  ;;  %v5489_v45 = vsel %vm2269_vm8, %v5466_v43, %v5468_v22  ;;  %v5482_v43 = vsel %vm2269_vm8, %v14876_v2, %v10271_v29  ;;  %7929 = vmatprep.mubr.f32.mxu1 %v7304_v21  ;;  %v7317_v2 = vld [vmem:[#allocation5 + $0x140] sm:$0xff] }
 0x548   : > { %v10280_v19 = vpop.permute.xlu1 %10279  ;;  %7930 = vmatmul.mubr.f32.gmra.mxu1 %v7303_v11 }
 0x549   : > { %5955 = vrot.lane.b32.xlu1 %v17666_v31, %s17661_s16  ;;  %v5472_v52 = vpop.permute.xlu0 %5471  ;;  %v10282_v41 = vunpack.i.h.bf16 %v10280_v19  ;;  %v10281_v47 = vunpack.i.l.bf16 %v10280_v19  ;;  %v7316_v19 = vld [vmem:[#allocation5 + $0x138] sm:$0xff]  ;;  %7935 = vmatprep.mubr.f32.mxu1 %v7317_v2 }
 0x54a   : > { %6071 = vrot.lane.b32.xlu0 %v17668_v14, %s17667_s14 }
 0x54b   : > { %v5490_v39 = vsel %vm2269_vm8, %v5468_v22, %v10281_v47  ;;  %v5479_v22 = vsel %vm2269_vm8, %v14839_v20, %v14849_v5  ;;  %v5477_v20 = vsel %vm2269_vm8, %v14807_v58, %v14817_v32  ;;  %v7330_v58 = vld [vmem:[#allocation5 + $0x1a8] sm:$0xff]  ;;  %v7329_v47 = vld [vmem:[#allocation5 + $0x1a0] sm:$0xff] }
 0x54c   : > { %v5474_v7 = vpop.permute.xlu1 %5473  ;;  %7936 = vmatmul.mubr.f32.gmra.mxu1 %v7316_v19 }
 0x54d   : > { %v5491_v63 = vsel %vm2269_vm8, %v5472_v52, %v5474_v7  ;;  %6073 = vrot.lane.b32.xlu1 %v17669_v51, %s17667_s14  ;;  %v5492_v6 = vsel %vm2269_vm8, %v5474_v7, %v10282_v41  ;;  %v15011_v23 = vpop.permute.xlu0 %5589  ;;  %v5478_v52 = vsel %vm2269_vm8, %v14817_v32, %v10266_v36  ;;  %7941 = vmatprep.mubr.f32.mxu1 %v7330_v58 }
 0x54e   : > { %10344 = vrot.lane.b32.xlu0 %v17482_v0, %s17667_s14  ;;  %9611 = vmatprep.subr.msk.mxu0 %vm412_vm5, %v5492_v6  ;;  %v7342_v6 = vld [vmem:[#allocation5 + $0x208] sm:$0xff] }
 0x54f   : > { %9612 = vmatpush1.msk.msra.mxu0 %vm411_vm6, %v5491_v63 }
 0x550   : > { %v15021_v61 = vpop.permute.xlu1 %5591  ;;  %9613 = vmatprep.subr.msk.mxu0 %vm412_vm5, %v5490_v39  ;;  %7942 = vmatmul.mubr.f32.gmra.mxu1 %v7329_v47  ;;  %v7356_v39 = vld [vmem:[#allocation5 + $0x278] sm:$0xff] }
 0x551   : > { %6077 = vrot.lane.b32.xlu1 %v12635_v3, %s17667_s14  ;;  %9614 = vmatpush1.msk.msra.mxu0 %vm411_vm6, %v5489_v45  ;;  %v15031_v35 = vpop.permute.xlu0 %10284 }
 0x552   : > { %6079 = vrot.lane.b32.xlu0 %v12642_v30, %s17667_s14  ;;  %9615 = vmatprep.subr.msk.mxu0 %vm412_vm5, %v5488_v50  ;;  %v7355_v50 = vld [vmem:[#allocation5 + $0x270] sm:$0xff] }
 0x553   : > { %9616 = vmatpush1.msk.msra.mxu0 %vm411_vm6, %v5487_v24  ;;  %7947 = vmatprep.mubr.f32.mxu1 %v7343_v4 }
 0x554   : > { %v15046_v27 = vpop.permute.xlu1 %5595  ;;  %9617 = vmatprep.subr.msk.mxu0 %vm412_vm5, %v5486_v56  ;;  %7948 = vmatmul.mubr.f32.gmra.mxu1 %v7342_v6  ;;  %v7282_v56 = vld [vmem:[#allocation5 + $0x28] sm:$0xff] }
 0x555   : > { %6083 = vrot.lane.b32.xlu1 %v12673_v54, %s17667_s14  ;;  %9618 = vmatpush1.msk.msra.mxu0 %vm411_vm6, %v5485_v55  ;;  %v15060_v8 = vpop.permute.xlu0 %5597 }
 0x556   : > { %6085 = vrot.lane.b32.xlu0 %v17585_v53, %s17667_s14  ;;  %9619 = vmatprep.subr.msk.mxu0 %vm412_vm5, %v5484_v42 }
 0x557   : > { %9620 = vmatpush1.msk.msra.mxu0 %vm411_vm6, %v5483_v44  ;;  %7953 = vmatprep.mubr.f32.mxu1 %v7356_v39 }
 0x558   : > { %v15074_v13 = vpop.permute.xlu1 %5601  ;;  %9621 = vmatprep.subr.msk.mxu0 %vm412_vm5, %v5482_v43  ;;  %7954 = vmatmul.mubr.f32.gmra.mxu1 %v7355_v50 }
 0x559   : > { %10349 = vrot.lane.b32.xlu1 %v17482_v0, %s17667_s14  ;;  %9622 = vmatpush1.msk.msra.mxu0 %vm411_vm6, %v5481_v28  ;;  %v15087_v49 = vpop.permute.xlu0 %5603 }
 0x55a   : > { %6089 = vrot.lane.b32.xlu0 %v17586_v26, %s17667_s14  ;;  %9623 = vmatprep.subr.msk.mxu0 %vm412_vm5, %v5480_v37 }
 0x55b   : > { %9624 = vmatpush1.msk.msra.mxu0 %vm411_vm6, %v5479_v22  ;;  %7959 = vmatprep.mubr.f32.mxu1 %v7369_v18 }
 0x55c   : > { %v15100_v5 = vpop.permute.xlu1 %10289  ;;  %9625 = vmatprep.subr.msk.mxu0 %vm412_vm5, %v5478_v52  ;;  %7960 = vmatmul.mubr.f32.gmra.mxu1 %v7368_v1 }
 0x55d   : > { %6091 = vrot.lane.b32.xlu1 %v17587_v33, %s17667_s14  ;;  %9626 = vmatpush1.msk.msra.mxu0 %vm411_vm6, %v5477_v20  ;;  %v15108_v41 = vpop.permute.xlu0 %5607 }
 0x55e   : > { %6095 = vrot.lane.b32.xlu0 %v12743_v59, %s17667_s14  ;;  %8208 = vmatprep.subr.mxu0 %v17666_v31 }
 0x55f   : > { %8209 = vmatpush1.msra.mxu0 %v17626_v17  ;;  %8143 = vmatprep.mubr.f32.mxu1 %v7282_v56 }
 0x560   : > { %v15114_v32 = vpop.permute.xlu1 %5609  ;;  %8210 = vmatprep.subr.mxu0 %v17625_v16  ;;  %8144 = vmatmul.mubr.f32.vlgmr.msra.gmra.mxu1 %v7281_v25 }
 0x561   : > { %6097 = vrot.lane.b32.xlu1 %v12751_v48, %s17667_s14  ;;  %8211 = vmatpush1.msra.mxu0 %v12800_v40  ;;  %v15120_v7 = vpop.permute.xlu0 %5613 }
 0x562   : > { %10354 = vrot.lane.b32.xlu0 %v17482_v0, %s17667_s14  ;;  %8212 = vmatprep.subr.mxu0 %v12777_v46 }
 0x563   : > { %8213 = vmatpush1.msra.mxu0 %v12771_v57 }
 0x564   : > { %v15126_v63 = vpop.permute.xlu1 %5615  ;;  %8214 = vmatprep.subr.mxu0 %v12751_v48 }
 0x565   : > { %6101 = vrot.lane.b32.xlu1 %v12771_v57, %s17667_s14  ;;  %8215 = vmatpush1.msra.mxu0 %v12743_v59  ;;  %v15132_v9 = vpop.permute.xlu0 %10294 }
 0x566   : > { %6103 = vrot.lane.b32.xlu0 %v12777_v46, %s17667_s14  ;;  %8216 = vmatprep.subr.mxu0 %v17587_v33 }
 0x567   : > { %8217 = vmatpush1.msra.mxu0 %v17586_v26 }
 0x568   : > { %v15138_v45 = vpop.permute.xlu1 %5619  ;;  %8218 = vmatprep.subr.mxu0 %v17585_v53 }
 0x569   : > { %6107 = vrot.lane.b32.xlu1 %v12800_v40, %s17667_s14  ;;  %8219 = vmatpush1.msra.mxu0 %v12673_v54  ;;  %v15144_v24 = vpop.permute.xlu0 %5621 }
 0x56a   : > { %6109 = vrot.lane.b32.xlu0 %v17625_v16, %s17667_s14  ;;  %8220 = vmatprep.subr.mxu0 %v12642_v30 }
 0x56b   : > { %8221 = vmatpush1.msra.mxu0 %v12635_v3 }
 0x56c   : > { %v15150_v34 = vpop.permute.xlu1 %5625  ;;  %8222 = vmatprep.subr.mxu0 %v17669_v51 }
 0x56d   : > { %10359 = vrot.lane.b32.xlu1 %v17482_v0, %s17667_s14  ;;  %8223 = vmatpush1.msra.mxu0 %v17668_v14  ;;  %v15156_v29 = vpop.permute.xlu0 %5627 }
 0x56e   : > { %6113 = vrot.lane.b32.xlu0 %v17626_v17, %s17667_s14 }
 0x570   : > { %v15160_v55 = vpop.permute.xlu1 %10299 }
 0x571   : > { %6115 = vrot.lane.b32.xlu1 %v17666_v31, %s17667_s14  ;;  %v15164_v42 = vpop.permute.xlu0 %5631 }
 0x572   : > { %6215 = vrot.lane.b32.xlu0 %v17668_v14, %s17672_s24 }
 0x574   : > { %v15168_v44 = vpop.permute.xlu1 %5633 }
 0x575   : > { %6217 = vrot.lane.b32.xlu1 %v17669_v51, %s17672_s24  ;;  %v15172_v21 = vpop.permute.xlu0 %5750 }
 0x576   : > { %10364 = vrot.lane.b32.xlu0 %v17482_v0, %s17672_s24 }
 0x578   : > { %v15176_v11 = vpop.permute.xlu1 %5752 }
 0x579   : > { %6221 = vrot.lane.b32.xlu1 %v12635_v3, %s17672_s24  ;;  %v15180_v36 = vpop.permute.xlu0 %10304 }
 0x57a   : > { %6223 = vrot.lane.b32.xlu0 %v12642_v30, %s17672_s24 }
 0x57c   : > { %v15184_v43 = vpop.permute.xlu1 %5756 }
 0x57d   : > { %6227 = vrot.lane.b32.xlu1 %v12673_v54, %s17672_s24  ;;  %v15188_v28 = vpop.permute.xlu0 %5758 }
 0x57e   : > { %6229 = vrot.lane.b32.xlu0 %v17585_v53, %s17672_s24 }
 0x580   : > { %v15192_v37 = vpop.permute.xlu1 %5762 }
 0x581   : > { %10369 = vrot.lane.b32.xlu1 %v17482_v0, %s17672_s24  ;;  %v15196_v22 = vpop.permute.xlu0 %5764 }
 0x582   : > { %6233 = vrot.lane.b32.xlu0 %v17586_v26, %s17672_s24 }
 0x584   : > { %v15200_v2 = vpop.permute.xlu1 %10309 }
 0x585   : > { %6235 = vrot.lane.b32.xlu1 %v17587_v33, %s17672_s24  ;;  %v15204_v19 = vpop.permute.xlu0 %5768 }
 0x586   : > { %6239 = vrot.lane.b32.xlu0 %v12743_v59, %s17672_s24 }
 0x588   : > { %v15208_v52 = vpop.permute.xlu1 %5770 }
 0x589   : > { %6241 = vrot.lane.b32.xlu1 %v12751_v48, %s17672_s24  ;;  %v5775_v20 = vpop.permute.xlu0 %5774 }
 0x58a   : > { %10374 = vrot.lane.b32.xlu0 %v17482_v0, %s17672_s24 }
 0x58c   : > { %v5777_v58 = vpop.permute.xlu1 %5776 }
 0x58d   : > { %6245 = vrot.lane.b32.xlu1 %v12771_v57, %s17672_s24  ;;  %v10315_v47 = vpop.permute.xlu0 %10314 }
 0x58e   : > { %6247 = vrot.lane.b32.xlu0 %v12777_v46, %s17672_s24  ;;  %v10317_v12 = vunpack.i.h.bf16 %v10315_v47 }
 0x590   : > { %v5781_v4 = vpop.permute.xlu1 %5780 }
 0x591   : > { %6251 = vrot.lane.b32.xlu1 %v12800_v40, %s17672_s24  ;;  %v5783_v6 = vpop.permute.xlu0 %5782 }
 0x592   : > { %6253 = vrot.lane.b32.xlu0 %v17625_v16, %s17672_s24 }
 0x594   : > { %v5787_v39 = vpop.permute.xlu1 %5786 }
 0x595   : > { %10379 = vrot.lane.b32.xlu1 %v17482_v0, %s17672_s24  ;;  %v5789_v50 = vpop.permute.xlu0 %5788 }
 0x596   : > { %6257 = vrot.lane.b32.xlu0 %v17626_v17, %s17672_s24 }
 0x598   : > { %v10320_v18 = vpop.permute.xlu1 %10319 }
 0x599   : > { %6259 = vrot.lane.b32.xlu1 %v17666_v31, %s17672_s24  ;;  %v5793_v1 = vpop.permute.xlu0 %5792  ;;  %v10322_v56 = vunpack.i.h.bf16 %v10320_v18  ;;  %v10321_v25 = vunpack.i.l.bf16 %v10320_v18  ;;  %v5811_v31 = vsel %vm5798_vm10, %v5787_v39, %v5789_v50  ;;  %v10312_v39 = vunpack.i.h.bf16 %v15200_v2 }
 0x59a   : > { %6375 = vrot.lane.b32.xlu0 %v17668_v14, %s10630_s29  ;;  %v10316_v14 = vunpack.i.l.bf16 %v10315_v47 }
 0x59b   : > { %v5812_v18 = vsel %vm5798_vm10, %v5789_v50, %v10321_v25  ;;  %v10311_v50 = vunpack.i.l.bf16 %v15200_v2  ;;  %v7305_v2 = vld [vmem:[#allocation5 + $0xe0] sm:$0xff]  ;;  %v10306_v25 = vunpack.i.l.bf16 %v15180_v36 }
 0x59c   : > { %v5795_v60 = vpop.permute.xlu1 %5794 }
 0x59d   : > { %v5813_v10 = vsel %vm5798_vm10, %v5793_v1, %v5795_v60  ;;  %6377 = vrot.lane.b32.xlu1 %v17669_v51, %s10630_s29  ;;  %v5814_v15 = vsel %vm5798_vm10, %v5795_v60, %v10322_v56  ;;  %v15234_v17 = vpop.permute.xlu0 %5911  ;;  %v7293_v1 = vld [vmem:[#allocation5 + $0x80] sm:$0xff]  ;;  %v5809_v60 = vsel %vm5798_vm10, %v5781_v4, %v5783_v6  ;;  %v10307_v56 = vunpack.i.h.bf16 %v15180_v36 }
 0x59e   : > { %10384 = vrot.lane.b32.xlu0 %v17482_v0, %s10630_s29  ;;  %9627 = vmatprep.subr.msk.mxu0 %vm394_vm15, %v5814_v15  ;;  %v5810_v15 = vsel %vm5798_vm10, %v5783_v6, %v10317_v12  ;;  %v5807_v12 = vsel %vm5798_vm10, %v5775_v20, %v5777_v58  ;;  %v7306_v6 = vld [vmem:[#allocation5 + $0xe8] sm:$0xff]  ;;  %v5805_v20 = vsel %vm5798_vm10, %v15204_v19, %v15208_v52 }
 0x59f   : > { %9628 = vmatpush2.msk.msra.mxu0 %vm393_vm14, %v5813_v10  ;;  %8036 = vmatprep.mubr.f32.mxu0 %v7293_v1  ;;  %v7292_v10 = vld [vmem:[#allocation5 + $0x78] sm:$0xff]  ;;  %v5803_v19 = vsel %vm5798_vm10, %v15192_v37, %v15196_v22  ;;  %v7319_v1 = vld [vmem:[#allocation5 + $0x150] sm:$0xff]  ;;  %v5802_v36 = vsel %vm5798_vm10, %v15188_v28, %v10307_v56  ;;  %v5801_v37 = vsel %vm5798_vm10, %v15184_v43, %v15188_v28  ;;  %v10296_v56 = vunpack.i.l.bf16 %v15132_v9 }
 0x5a0   : > { %v15244_v51 = vpop.permute.xlu1 %5913  ;;  %9629 = vmatprep.subr.msk.mxu0 %vm394_vm15, %v5812_v18  ;;  %8037 = vmatmul.mubr.f32.gmra.mxu0 %v7292_v10  ;;  %v5804_v18 = vsel %vm5798_vm10, %v15196_v22, %v10311_v50  ;;  %v10302_v10 = vunpack.i.h.bf16 %v15160_v55  ;;  %v5799_v43 = vsel %vm5798_vm10, %v15172_v21, %v15176_v11  ;;  %v7332_v50 = vld [vmem:[#allocation5 + $0x1b8] sm:$0xff]  ;;  %v5652_v21 = vsel %vm5637_vm12, %v15164_v42, %v15168_v44 }
 0x5a1   : > { %6381 = vrot.lane.b32.xlu1 %v12635_v3, %s10630_s29  ;;  %9630 = vmatpush2.msk.msra.mxu0 %vm393_vm14, %v5811_v31  ;;  %v15254_v47 = vpop.permute.xlu0 %10324  ;;  %v5808_v31 = vsel %vm5798_vm10, %v5777_v58, %v10316_v14  ;;  %v5806_v14 = vsel %vm5798_vm10, %v15208_v52, %v10312_v39  ;;  %v5800_v39 = vsel %vm5798_vm10, %v15176_v11, %v10306_v25  ;;  %v7344_v25 = vld [vmem:[#allocation5 + $0x218] sm:$0xff]  ;;  %vm17679_vm10 = vcmask 924672  }
 0x5a2   : > { %6383 = vrot.lane.b32.xlu0 %v12642_v30, %s10630_s29  ;;  %9631 = vmatprep.subr.msk.mxu0 %vm394_vm15, %v5810_v15  ;;  %v7318_v15 = vld [vmem:[#allocation5 + $0x148] sm:$0xff]  ;;  %v5650_v42 = vsel %vm5637_vm12, %v15150_v34, %v15156_v29  ;;  %v5648_v34 = vsel %vm5637_vm12, %v15138_v45, %v15144_v24  ;;  %v5646_v45 = vsel %vm5637_vm12, %v15120_v7, %v15126_v63 }
 0x5a3   : > { %9632 = vmatpush2.msk.msra.mxu0 %vm393_vm14, %v5809_v60  ;;  %8042 = vmatprep.mubr.f32.mxu0 %v7306_v6  ;;  %v10301_v60 = vunpack.i.l.bf16 %v15160_v55  ;;  %v10297_v55 = vunpack.i.h.bf16 %v15132_v9  ;;  %v5644_v7 = vsel %vm5637_vm12, %v15108_v41, %v15114_v32  ;;  %v5642_v41 = vsel %vm5637_vm12, %v15074_v13, %v15087_v49 }
 0x5a4   : > { %v15266_v4 = vpop.permute.xlu1 %5917  ;;  %9633 = vmatprep.subr.msk.mxu0 %vm394_vm15, %v5808_v31  ;;  %8043 = vmatmul.mubr.f32.gmra.mxu0 %v7305_v2  ;;  %v5653_v31 = vsel %vm5637_vm12, %v15168_v44, %v10302_v10  ;;  %v10286_v10 = vunpack.i.l.bf16 %v15031_v35  ;;  %v5640_v13 = vsel %vm5637_vm12, %v15046_v27, %v15060_v8  ;;  %v5638_v27 = vsel %vm5637_vm12, %v15011_v23, %v15021_v61  ;;  %v7295_v23 = vld [vmem:[#allocation5 + $0x90] sm:$0xff] }
 0x5a5   : > { %6387 = vrot.lane.b32.xlu1 %v12673_v54, %s10630_s29  ;;  %9634 = vmatpush2.msk.msra.mxu0 %vm393_vm14, %v5807_v12  ;;  %v15280_v58 = vpop.permute.xlu0 %5919  ;;  %v7331_v12 = vld [vmem:[#allocation5 + $0x1b0] sm:$0xff]  ;;  %v5651_v2 = vsel %vm5637_vm12, %v15156_v29, %v10301_v60  ;;  %v5649_v9 = vsel %vm5637_vm12, %v15144_v24, %v10297_v55  ;;  %v7284_v55 = vld [vmem:[#allocation5 + $0x38] sm:$0xff] }
 0x5a6   : > { %6389 = vrot.lane.b32.xlu0 %v17585_v53, %s10630_s29  ;;  %9635 = vmatprep.subr.msk.mxu0 %vm394_vm15, %v5806_v14 }
 0x5a7   : > { %9636 = vmatpush2.msk.msra.mxu0 %vm393_vm14, %v5805_v20  ;;  %8048 = vmatprep.mubr.f32.mxu0 %v7319_v1  ;;  %v7345_v20 = vld [vmem:[#allocation5 + $0x220] sm:$0xff]  ;;  %v5647_v1 = vsel %vm5637_vm12, %v15126_v63, %v10296_v56 }
 0x5a8   : > { %v15294_v52 = vpop.permute.xlu1 %5923  ;;  %9637 = vmatprep.subr.msk.mxu0 %vm394_vm15, %v5804_v18  ;;  %8049 = vmatmul.mubr.f32.gmra.mxu0 %v7318_v15  ;;  %v10292_v18 = vunpack.i.h.bf16 %v15100_v5  ;;  %v7297_v56 = vld [vmem:[#allocation5 + $0xa0] sm:$0xff] }
 0x5a9   : > { %10389 = vrot.lane.b32.xlu1 %v17482_v0, %s10630_s29  ;;  %9638 = vmatpush2.msk.msra.mxu0 %vm393_vm14, %v5803_v19  ;;  %v15307_v22 = vpop.permute.xlu0 %5925  ;;  %v10291_v19 = vunpack.i.l.bf16 %v15100_v5  ;;  %v10287_v5 = vunpack.i.h.bf16 %v15031_v35 }
 0x5aa   : > { %6393 = vrot.lane.b32.xlu0 %v17586_v26, %s10630_s29  ;;  %9639 = vmatprep.subr.msk.mxu0 %vm394_vm15, %v5802_v36  ;;  %v7358_v36 = vld [vmem:[#allocation5 + $0x288] sm:$0xff]  ;;  %v5645_v15 = vsel %vm5637_vm12, %v15114_v32, %v10292_v18  ;;  %v7307_v18 = vld [vmem:[#allocation5 + $0xf0] sm:$0xff] }
 0x5ab   : > { %9640 = vmatpush2.msk.msra.mxu0 %vm393_vm14, %v5801_v37  ;;  %8054 = vmatprep.mubr.f32.mxu0 %v7332_v50  ;;  %v7357_v37 = vld [vmem:[#allocation5 + $0x280] sm:$0xff]  ;;  %v5643_v60 = vsel %vm5637_vm12, %v15087_v49, %v10291_v19  ;;  %v5641_v35 = vsel %vm5637_vm12, %v15060_v8, %v10287_v5  ;;  %v5639_v50 = vsel %vm5637_vm12, %v15021_v61, %v10286_v10  ;;  %v7294_v61 = vld [vmem:[#allocation5 + $0x88] sm:$0xff]  ;;  %vm17680_vm12 = vmmov %vm17679_vm10 }
 0x5ac   : > { %v15322_v28 = vpop.permute.xlu1 %10329  ;;  %9641 = vmatprep.subr.msk.mxu0 %vm394_vm15, %v5800_v39  ;;  %8055 = vmatmul.mubr.f32.gmra.mxu0 %v7331_v12  ;;  %v7371_v39 = vld [vmem:[#allocation5 + $0x2f0] sm:$0xff]  ;;  %v7310_v19 = vld [vmem:[#allocation5 + $0x108] sm:$0xff] }
 0x5ad   : > { %6395 = vrot.lane.b32.xlu1 %v17587_v33, %s10630_s29  ;;  %9642 = vmatpush2.msk.msra.mxu0 %vm393_vm14, %v5799_v43  ;;  %v15336_v11 = vpop.permute.xlu0 %5929  ;;  %v7370_v43 = vld [vmem:[#allocation5 + $0x2e8] sm:$0xff] }
 0x5ae   : > { %6399 = vrot.lane.b32.xlu0 %v12743_v59, %s10630_s29  ;;  %9643 = vmatprep.subr.msk.mxu0 %vm420_vm11, %v5653_v31  ;;  %v7283_v31 = vld [vmem:[#allocation5 + $0x30] sm:$0xff] }
 0x5af   : > { %9644 = vmatpush2.msk.msra.mxu0 %vm419_vm13, %v5652_v21  ;;  %8060 = vmatprep.mubr.f32.mxu0 %v7345_v20  ;;  %v17675_v21 = vld [vmem:[#allocation25_spill] sm:$0xff]  ;;  %v7296_v20 = vld [vmem:[#allocation5 + $0x98] sm:$0xff] }
 0x5b0   : > { %v15350_v44 = vpop.permute.xlu1 %5931  ;;  %9645 = vmatprep.subr.msk.mxu0 %vm420_vm11, %v5651_v2  ;;  %8061 = vmatmul.mubr.f32.gmra.mxu0 %v7344_v25  ;;  %v17677_v25 = vld [vmem:[#allocation11_spill] sm:$0xff] }
 0x5b1   : > { %6401 = vrot.lane.b32.xlu1 %v12751_v48, %s10630_s29  ;;  %9646 = vmatpush2.msk.msra.mxu0 %vm419_vm13, %v5650_v42  ;;  %v15363_v29 = vpop.permute.xlu0 %5935  ;;  %v17676_v42 = vld [vmem:[#allocation16_spill] sm:$0xff] }
 0x5b2   : > { %10394 = vrot.lane.b32.xlu0 %v17482_v0, %s10630_s29  ;;  %9647 = vmatprep.subr.msk.mxu0 %vm420_vm11, %v5649_v9 }
 0x5b3   : > { %9648 = vmatpush2.msk.msra.mxu0 %vm419_vm13, %v5648_v34  ;;  %8066 = vmatprep.mubr.f32.mxu0 %v7358_v36  ;;  %v7308_v34 = vld [vmem:[#allocation5 + $0xf8] sm:$0xff]  ;;  %v7309_v36 = vld [vmem:[#allocation5 + $0x100] sm:$0xff] }
 0x5b4   : > { %v15378_v24 = vpop.permute.xlu1 %5937  ;;  %9649 = vmatprep.subr.msk.mxu0 %vm420_vm11, %v5647_v1  ;;  %8067 = vmatmul.mubr.f32.gmra.mxu0 %v7357_v37  ;;  %v7320_v37 = vld [vmem:[#allocation5 + $0x158] sm:$0xff] }
 0x5b5   : > { %6405 = vrot.lane.b32.xlu1 %v12771_v57, %s10630_s29  ;;  %9650 = vmatpush2.msk.msra.mxu0 %vm419_vm13, %v5646_v45  ;;  %v15392_v63 = vpop.permute.xlu0 %10334  ;;  %v17678_v45 = vld [vmem:[#allocation23_spill] sm:$0xff] }
 0x5b6   : > { %6407 = vrot.lane.b32.xlu0 %v12777_v46, %s10630_s29  ;;  %9651 = vmatprep.subr.msk.mxu0 %vm420_vm11, %v5645_v15  ;;  %v7321_v15 = vld [vmem:[#allocation5 + $0x160] sm:$0xff] }
 0x5b7   : > { %9652 = vmatpush2.msk.msra.mxu0 %vm419_vm13, %v5644_v7  ;;  %8072 = vmatprep.mubr.f32.mxu0 %v7371_v39  ;;  %v7323_v7 = vld [vmem:[#allocation5 + $0x170] sm:$0xff]  ;;  %v7334_v39 = vld [vmem:[#allocation5 + $0x1c8] sm:$0xff] }
 0x5b8   : > { %v15406_v32 = vpop.permute.xlu1 %5941  ;;  %9653 = vmatprep.subr.msk.mxu0 %vm420_vm11, %v5643_v60  ;;  %8073 = vmatmul.mubr.f32.gmra.mxu0 %v7370_v43  ;;  %v7322_v60 = vld [vmem:[#allocation5 + $0x168] sm:$0xff]  ;;  %v7336_v43 = vld [vmem:[#allocation5 + $0x1d8] sm:$0xff] }
 0x5b9   : > { %6411 = vrot.lane.b32.xlu1 %v12800_v40, %s10630_s29  ;;  %9654 = vmatpush2.msk.msra.mxu0 %vm419_vm13, %v5642_v41  ;;  %v15419_v49 = vpop.permute.xlu0 %5943 }
 0x5ba   : > { %6413 = vrot.lane.b32.xlu0 %v17625_v16, %s10630_s29  ;;  %9655 = vmatprep.subr.msk.mxu0 %vm420_vm11, %v5641_v35  ;;  %v7333_v35 = vld [vmem:[#allocation5 + $0x1c0] sm:$0xff] }
 0x5bb   : > { %9656 = vmatpush2.msk.msra.mxu0 %vm419_vm13, %v5640_v13  ;;  %8256 = vmatprep.mubr.f32.mxu0 %v7284_v55 }
 0x5bc   : > { %v15432_v8 = vpop.permute.xlu1 %5947  ;;  %9657 = vmatprep.subr.msk.mxu0 %vm420_vm11, %v5639_v50  ;;  %8149 = vmatprep.mubr.f32.mxu1 %v7295_v23  ;;  %v7335_v50 = vld [vmem:[#allocation5 + $0x1d0] sm:$0xff]  ;;  %v7349_v23 = vld [vmem:[#allocation5 + $0x240] sm:$0xff] }
 0x5bd   : > { %10399 = vrot.lane.b32.xlu1 %v17482_v0, %s10630_s29  ;;  %9658 = vmatpush2.msk.msra.mxu0 %vm419_vm13, %v5638_v27  ;;  %v15440_v12 = vpop.permute.xlu0 %5949  ;;  %v7347_v27 = vld [vmem:[#allocation5 + $0x230] sm:$0xff] }
 0x5be   : > { %6417 = vrot.lane.b32.xlu0 %v17675_v21, %s10630_s29  ;;  %8257 = vmatmul.mubr.f32.vlgmr.msra.gmra.mxu0 %v7283_v31  ;;  %v7346_v31 = vld [vmem:[#allocation5 + $0x228] sm:$0xff] }
 0x5bf   : > { %8150 = vmatmul.mubr.f32.gmra.mxu1 %v7294_v61  ;;  %8262 = vmatprep.mubr.f32.mxu0 %v7297_v56  ;;  %v7348_v56 = vld [vmem:[#allocation5 + $0x238] sm:$0xff] }
 0x5c0   : > { %v15444_v2 = vpop.permute.xlu1 %10339  ;;  %8155 = vmatprep.mubr.f32.mxu1 %v7308_v34  ;;  %v7360_v34 = vld [vmem:[#allocation5 + $0x298] sm:$0xff] }
 0x5c1   : > { %6419 = vrot.lane.b32.xlu1 %v17676_v42, %s10630_s29  ;;  %v15448_v9 = vpop.permute.xlu0 %5953  ;;  %s10633_s29 = smov 96  }
 0x5c2   : > { %6536 = vrot.lane.b32.xlu0 %v17677_v25, %s10631_s21  ;;  %8263 = vmatmul.mubr.f32.gmra.mxu0 %v7296_v20 }
 0x5c3   : > { %8156 = vmatmul.mubr.f32.gmra.mxu1 %v7307_v18  ;;  %8268 = vmatprep.mubr.f32.mxu0 %v7310_v19  ;;  %v7359_v18 = vld [vmem:[#allocation5 + $0x290] sm:$0xff]  ;;  %v7362_v19 = vld [vmem:[#allocation5 + $0x2a8] sm:$0xff] }
 0x5c4   : > { %v15452_v1 = vpop.permute.xlu1 %5955  ;;  %8161 = vmatprep.mubr.f32.mxu1 %v7321_v15  ;;  %v7361_v15 = vld [vmem:[#allocation5 + $0x2a0] sm:$0xff] }
 0x5c5   : > { %6538 = vrot.lane.b32.xlu1 %v17678_v45, %s10631_s21  ;;  %v15456_v5 = vpop.permute.xlu0 %6071 }
 0x5c6   : > { %10404 = vrot.lane.b32.xlu0 %v17482_v0, %s10631_s21  ;;  %8269 = vmatmul.mubr.f32.gmra.mxu0 %v7309_v36 }
 0x5c7   : > { %8162 = vmatmul.mubr.f32.gmra.mxu1 %v7320_v37  ;;  %8274 = vmatprep.mubr.f32.mxu0 %v7323_v7  ;;  %v7373_v7 = vld [vmem:[#allocation5 + $0x300] sm:$0xff] }
 0x5c8   : > { %v15460_v10 = vpop.permute.xlu1 %6073  ;;  %8167 = vmatprep.mubr.f32.mxu1 %v7334_v39  ;;  %v7375_v39 = vld [vmem:[#allocation5 + $0x310] sm:$0xff] }
 0x5c9   : > { %6542 = vrot.lane.b32.xlu1 %v12635_v3, %s10631_s21  ;;  %v15464_v41 = vpop.permute.xlu0 %10344 }
 0x5ca   : > { %6544 = vrot.lane.b32.xlu0 %v12642_v30, %s10631_s21  ;;  %8275 = vmatmul.mubr.f32.gmra.mxu0 %v7322_v60  ;;  %v7372_v60 = vld [vmem:[#allocation5 + $0x2f8] sm:$0xff] }
 0x5cb   : > { %8168 = vmatmul.mubr.f32.gmra.mxu1 %v7333_v35  ;;  %8280 = vmatprep.mubr.f32.mxu0 %v7336_v43  ;;  %v7374_v43 = vld [vmem:[#allocation5 + $0x308] sm:$0xff] }
 0x5cc   : > { %v15468_v13 = vpop.permute.xlu1 %6077  ;;  %8173 = vmatprep.mubr.f32.mxu1 %v7347_v27 }
 0x5cd   : > { %6548 = vrot.lane.b32.xlu1 %v12673_v54, %s10631_s21  ;;  %v15472_v55 = vpop.permute.xlu0 %6079 }
 0x5ce   : > { %6550 = vrot.lane.b32.xlu0 %v17585_v53, %s10631_s21  ;;  %8281 = vmatmul.mubr.f32.gmra.mxu0 %v7335_v50 }
 0x5cf   : > { %8174 = vmatmul.mubr.f32.gmra.mxu1 %v7346_v31  ;;  %8286 = vmatprep.mubr.f32.mxu0 %v7349_v23  ;;  %v7286_v23 = vld [vmem:[#allocation5 + $0x48] sm:$0xff] }
 0x5d0   : > { %v15476_v61 = vpop.permute.xlu1 %6083  ;;  %8179 = vmatprep.mubr.f32.mxu1 %v7360_v34 }
 0x5d1   : > { %10409 = vrot.lane.b32.xlu1 %v17482_v0, %s10631_s21  ;;  %v15480_v20 = vpop.permute.xlu0 %6085 }
 0x5d2   : > { %6554 = vrot.lane.b32.xlu0 %v17586_v26, %s10631_s21  ;;  %8287 = vmatmul.mubr.f32.gmra.mxu0 %v7348_v56 }
 0x5d3   : > { %8180 = vmatmul.mubr.f32.gmra.mxu1 %v7359_v18  ;;  %8292 = vmatprep.mubr.f32.mxu0 %v7362_v19 }
 0x5d4   : > { %v15484_v36 = vpop.permute.xlu1 %10349  ;;  %8185 = vmatprep.mubr.f32.mxu1 %v7373_v7 }
 0x5d5   : > { %6556 = vrot.lane.b32.xlu1 %v17587_v33, %s10631_s21  ;;  %v15488_v37 = vpop.permute.xlu0 %6089 }
 0x5d6   : > { %6560 = vrot.lane.b32.xlu0 %v12743_v59, %s10631_s21  ;;  %8293 = vmatmul.mubr.f32.gmra.mxu0 %v7361_v15 }
 0x5d7   : > { %8186 = vmatmul.mubr.f32.gmra.mxu1 %v7372_v60  ;;  %8298 = vmatprep.mubr.f32.mxu0 %v7375_v39 }
 0x5d8   : > { %v15492_v35 = vpop.permute.xlu1 %6091  ;;  %8369 = vmatprep.mubr.f32.mxu1 %v7286_v23 }
 0x5d9   : > { %6562 = vrot.lane.b32.xlu1 %v12751_v48, %s10631_s21  ;;  %v6096_v50 = vpop.permute.xlu0 %6095 }
 0x5da   : > { %10414 = vrot.lane.b32.xlu0 %v17482_v0, %s10631_s21  ;;  %8299 = vmatmul.mubr.f32.gmra.mxu0 %v7374_v43 }
 0x5dc   : > { %v6098_v27 = vpop.permute.xlu1 %6097 }
 0x5dd   : > { %6566 = vrot.lane.b32.xlu1 %v12771_v57, %s10631_s21  ;;  %v10355_v31 = vpop.permute.xlu0 %10354 }
 0x5de   : > { %6568 = vrot.lane.b32.xlu0 %v12777_v46, %s10631_s21  ;;  %v10357_v23 = vunpack.i.h.bf16 %v10355_v31  ;;  %v10356_v6 = vunpack.i.l.bf16 %v10355_v31 }
 0x5e0   : > { %v6102_v56 = vpop.permute.xlu1 %6101  ;;  %v6128_v31 = vsel %vm17393_vm9, %v6098_v27, %v10356_v6  ;;  %v6125_v6 = vsel %vm17393_vm9, %v15488_v37, %v15492_v35 }
 0x5e1   : > { %6572 = vrot.lane.b32.xlu1 %v12800_v40, %s10631_s21  ;;  %v6104_v34 = vpop.permute.xlu0 %6103 }
 0x5e2   : > { %6574 = vrot.lane.b32.xlu0 %v17625_v16, %s10631_s21 }
 0x5e4   : > { %v6108_v18 = vpop.permute.xlu1 %6107 }
 0x5e5   : > { %10419 = vrot.lane.b32.xlu1 %v17482_v0, %s10631_s21  ;;  %v6110_v19 = vpop.permute.xlu0 %6109 }
 0x5e6   : > { %6578 = vrot.lane.b32.xlu0 %v17675_v21, %s10631_s21 }
 0x5e8   : > { %v10360_v15 = vpop.permute.xlu1 %10359 }
 0x5e9   : > { %6580 = vrot.lane.b32.xlu1 %v17676_v42, %s10631_s21  ;;  %v6114_v7 = vpop.permute.xlu0 %6113  ;;  %v10362_v60 = vunpack.i.h.bf16 %v10360_v15  ;;  %v10361_v39 = vunpack.i.l.bf16 %v10360_v15  ;;  %v6131_v42 = vsel %vm17393_vm9, %v6108_v18, %v6110_v19  ;;  %s10635_s21 = smov 95  }
 0x5ea   : > { %6697 = vrot.lane.b32.xlu0 %v17677_v25, %s10632_s17 }
 0x5eb   : > { %v6132_v25 = vsel %vm17393_vm9, %v6110_v19, %v10361_v39  ;;  %v10347_v19 = vunpack.i.h.bf16 %v15464_v41  ;;  %v6123_v39 = vsel %vm17393_vm9, %v15476_v61, %v15480_v20  ;;  %v10341_v61 = vunpack.i.l.bf16 %v15444_v2 }
 0x5ec   : > { %v6116_v43 = vpop.permute.xlu1 %6115 }
 0x5ed   : > { %6699 = vrot.lane.b32.xlu1 %v17678_v45, %s10632_s17  ;;  %v6134_v62 = vsel %vm17393_vm9, %v6116_v43, %v10362_v60  ;;  %v6133_v38 = vsel %vm17393_vm9, %v6114_v7, %v6116_v43  ;;  %v15518_v14 = vpop.permute.xlu0 %6215  ;;  %v6130_v7 = vsel %vm17393_vm9, %v6104_v34, %v10357_v23  ;;  %v6122_v37 = vsel %vm17393_vm9, %v15472_v55, %v10347_v19 }
 0x5ee   : > { %10424 = vrot.lane.b32.xlu0 %v17482_v0, %s10632_s17  ;;  %8305 = vmatprep.subr.mxu1 %v6134_v62  ;;  %v10352_v62 = vunpack.i.h.bf16 %v15484_v36  ;;  %v10342_v43 = vunpack.i.h.bf16 %v15444_v2 }
 0x5ef   : > { %8306 = vmatpush1.msra.mxu1 %v6133_v38  ;;  %v6129_v38 = vsel %vm17393_vm9, %v6102_v56, %v6104_v34 }
 0x5f0   : > { %v15523_v15 = vpop.permute.xlu1 %6217  ;;  %8307 = vmatprep.subr.mxu1 %v6132_v25  ;;  %v10351_v25 = vunpack.i.l.bf16 %v15484_v36  ;;  %v6126_v56 = vsel %vm17393_vm9, %v15492_v35, %v10352_v62  ;;  %v10346_v36 = vunpack.i.l.bf16 %v15464_v41  ;;  %v6121_v41 = vsel %vm17393_vm9, %v15468_v13, %v15472_v55 }
 0x5f1   : > { %6703 = vrot.lane.b32.xlu1 %v12635_v3, %s10632_s17  ;;  %8308 = vmatpush1.msra.mxu1 %v6131_v42  ;;  %v15529_v60 = vpop.permute.xlu0 %10364  ;;  %v6127_v42 = vsel %vm17393_vm9, %v6096_v50, %v6098_v27  ;;  %v5974_v2 = vsel %vm17679_vm10, %v15452_v1, %v10342_v43  ;;  %v5973_v13 = vsel %vm17680_vm12, %v15448_v9, %v15452_v1  ;;  %v10634_v43 = vmov -3e+38  }
 0x5f2   : > { %6705 = vrot.lane.b32.xlu0 %v12642_v30, %s10632_s17  ;;  %8309 = vmatprep.subr.mxu1 %v6130_v7  ;;  %v6124_v50 = vsel %vm17393_vm9, %v15480_v20, %v10351_v25  ;;  %v6120_v20 = vsel %vm17393_vm9, %v15460_v10, %v10346_v36  ;;  %v6119_v7 = vsel %vm17393_vm9, %v15456_v5, %v15460_v10  ;;  %v10336_v5 = vunpack.i.l.bf16 %v15392_v63  ;;  %vm17683_vm9 = vmmov %vm17679_vm10 }
 0x5f3   : > { %8310 = vmatpush1.msra.mxu1 %v6129_v38  ;;  %v10337_v38 = vunpack.i.h.bf16 %v15392_v63  ;;  %v5972_v25 = vsel %vm17683_vm9, %v15440_v12, %v10341_v61  ;;  %vm17684_vm10 = vmmov %vm17683_vm9  ;;  %362 = vst [vmem:[#allocation3] sm:$0xf] %v10634_v43 }
 0x5f4   : > { %v15537_v18 = vpop.permute.xlu1 %6221  ;;  %8311 = vmatprep.subr.mxu1 %v6128_v31  ;;  %v5971_v9 = vsel %vm17684_vm10, %v15432_v8, %v15440_v12  ;;  %vm17685_vm12 = vmmov %vm17683_vm9  ;;  %v5969_v31 = vsel %vm17683_vm9, %v15406_v32, %v15419_v49  ;;  %v10332_v8 = vunpack.i.h.bf16 %v15322_v28  ;;  %v10331_v12 = vunpack.i.l.bf16 %v15322_v28  ;;  %363 = vst [vmem:[#allocation3 + $0xc] sm:$0xf] %v10634_v43 }
 0x5f5   : > { %6709 = vrot.lane.b32.xlu1 %v12673_v54, %s10632_s17  ;;  %8312 = vmatpush1.msra.mxu1 %v6127_v42  ;;  %v15545_v34 = vpop.permute.xlu0 %6223  ;;  %v5970_v63 = vsel %vm17685_vm12, %v15419_v49, %v10337_v38  ;;  %vm17686_vm10 = vmmov %vm17683_vm9 }
 0x5f6   : > { %6711 = vrot.lane.b32.xlu0 %v17585_v53, %s10632_s17  ;;  %8313 = vmatprep.subr.mxu1 %v6126_v56  ;;  %v5968_v19 = vsel %vm17686_vm10, %v15378_v24, %v10336_v5  ;;  %vm17687_vm12 = vmmov %vm17683_vm9  ;;  %v10327_v56 = vunpack.i.h.bf16 %v15254_v47  ;;  %v5966_v28 = vsel %vm17683_vm9, %v15350_v44, %v10332_v8 }
 0x5f7   : > { %8314 = vmatpush1.msra.mxu1 %v6125_v6  ;;  %v5967_v32 = vsel %vm17687_vm12, %v15363_v29, %v15378_v24  ;;  %vm17688_vm10 = vmmov %vm17683_vm9  ;;  %v10326_v6 = vunpack.i.l.bf16 %v15254_v47 }
 0x5f8   : > { %v15555_v27 = vpop.permute.xlu1 %6227  ;;  %8315 = vmatprep.subr.mxu1 %v6124_v50  ;;  %v5965_v29 = vsel %vm17688_vm10, %v15336_v11, %v15350_v44  ;;  %vm17689_vm12 = vmmov %vm17683_vm9  ;;  %v5963_v11 = vsel %vm17683_vm9, %v15294_v52, %v15307_v22 }
 0x5f9   : > { %10429 = vrot.lane.b32.xlu1 %v17482_v0, %s10632_s17  ;;  %8316 = vmatpush1.msra.mxu1 %v6123_v39  ;;  %v15564_v35 = vpop.permute.xlu0 %6229  ;;  %v5964_v36 = vsel %vm17689_vm12, %v15307_v22, %v10331_v12  ;;  %vm17690_vm10 = vmmov %vm17683_vm9  ;;  %v5960_v52 = vsel %vm17683_vm9, %v15244_v51, %v10326_v6 }
 0x5fa   : > { %6715 = vrot.lane.b32.xlu0 %v17586_v26, %s10632_s17  ;;  %8317 = vmatprep.subr.mxu1 %v6122_v37  ;;  %v5962_v47 = vsel %vm17690_vm10, %v15280_v58, %v10327_v56  ;;  %vm17691_vm12 = vmmov %vm17683_vm9 }
 0x5fb   : > { %8318 = vmatpush1.msra.mxu1 %v6121_v41  ;;  %v5961_v50 = vsel %vm17691_vm12, %v15266_v4, %v15280_v58  ;;  %vm17692_vm10 = vmmov %vm17683_vm9  ;;  %v17694_v41 = vld [vmem:[#allocation11_spill] sm:$0xff]  ;;  %vm6423_vm12 = vcmask 900096   ;;  %vm17697_vm9 = vcmask 908288  }
 0x5fc   : > { %v15575_v23 = vpop.permute.xlu1 %10369  ;;  %8319 = vmatprep.subr.mxu1 %v6120_v20  ;;  %v5959_v22 = vsel %vm17692_vm10, %v15234_v17, %v15244_v51  ;;  %v17693_v17 = vld [vmem:[#allocation16_spill] sm:$0xff]  ;;  %vm17698_vm10 = vmmov %vm17697_vm9 }
 0x5fd   : > { %6717 = vrot.lane.b32.xlu1 %v17587_v33, %s10632_s17  ;;  %8320 = vmatpush1.msra.mxu1 %v6119_v7  ;;  %v15588_v55 = vpop.permute.xlu0 %6233 }
 0x5fe   : > { %6721 = vrot.lane.b32.xlu0 %v12743_v59, %s10632_s17  ;;  %9659 = vmatprep.subr.msk.mxu1 %vm402_vm1, %v5974_v2 }
 0x5ff   : > { %9660 = vmatpush1.msk.msra.mxu1 %vm401_vm2, %v5973_v13 }
 0x600   : > { %v15602_v1 = vpop.permute.xlu1 %6235  ;;  %9661 = vmatprep.subr.msk.mxu1 %vm402_vm1, %v5972_v25 }
 0x601   : > { %6723 = vrot.lane.b32.xlu1 %v12751_v48, %s10632_s17  ;;  %9662 = vmatpush1.msk.msra.mxu1 %vm401_vm2, %v5971_v9  ;;  %v15615_v42 = vpop.permute.xlu0 %6239 }
 0x602   : > { %10434 = vrot.lane.b32.xlu0 %v17482_v0, %s10632_s17  ;;  %9663 = vmatprep.subr.msk.mxu1 %vm402_vm1, %v5970_v63 }
 0x603   : > { %9664 = vmatpush1.msk.msra.mxu1 %vm401_vm2, %v5969_v31 }
 0x604   : > { %v15630_v49 = vpop.permute.xlu1 %6241  ;;  %9665 = vmatprep.subr.msk.mxu1 %vm402_vm1, %v5968_v19 }
 0x605   : > { %6727 = vrot.lane.b32.xlu1 %v12771_v57, %s10632_s17  ;;  %9666 = vmatpush1.msk.msra.mxu1 %vm401_vm2, %v5967_v32  ;;  %v15644_v24 = vpop.permute.xlu0 %10374 }
 0x606   : > { %6729 = vrot.lane.b32.xlu0 %v12777_v46, %s10632_s17  ;;  %9667 = vmatprep.subr.msk.mxu1 %vm402_vm1, %v5966_v28 }
 0x607   : > { %9668 = vmatpush1.msk.msra.mxu1 %vm401_vm2, %v5965_v29 }
 0x608   : > { %v15658_v44 = vpop.permute.xlu1 %6245  ;;  %9669 = vmatprep.subr.msk.mxu1 %vm402_vm1, %v5964_v36 }
 0x609   : > { %6733 = vrot.lane.b32.xlu1 %v12800_v40, %s10632_s17  ;;  %9670 = vmatpush1.msk.msra.mxu1 %vm401_vm2, %v5963_v11  ;;  %v15671_v39 = vpop.permute.xlu0 %6247 }
 0x60a   : > { %6735 = vrot.lane.b32.xlu0 %v17625_v16, %s10632_s17  ;;  %9671 = vmatprep.subr.msk.mxu1 %vm402_vm1, %v5962_v47 }
 0x60b   : > { %9672 = vmatpush1.msk.msra.mxu1 %vm401_vm2, %v5961_v50 }
 0x60c   : > { %v15684_v37 = vpop.permute.xlu1 %6251  ;;  %9673 = vmatprep.subr.msk.mxu1 %vm402_vm1, %v5960_v52 }
 0x60d   : > { %10439 = vrot.lane.b32.xlu1 %v17482_v0, %s10632_s17  ;;  %9674 = vmatpush1.msk.msra.mxu1 %vm401_vm2, %v5959_v22  ;;  %v15692_v4 = vpop.permute.xlu0 %6253 }
 0x60e   : > { %6739 = vrot.lane.b32.xlu0 %v17675_v21, %s10632_s17 }
 0x610   : > { %v15696_v58 = vpop.permute.xlu1 %10379 }
 0x611   : > { %6741 = vrot.lane.b32.xlu1 %v17693_v17, %s10632_s17  ;;  %v15700_v51 = vpop.permute.xlu0 %6257  ;;  %s10636_s17 = smov 94  }
 0x612   : > { %6858 = vrot.lane.b32.xlu0 %v17694_v41, %s10633_s29 }
 0x614   : > { %v15704_v61 = vpop.permute.xlu1 %6259 }
 0x615   : > { %6860 = vrot.lane.b32.xlu1 %v17678_v45, %s10633_s29  ;;  %v15708_v20 = vpop.permute.xlu0 %6375 }
 0x616   : > { %10444 = vrot.lane.b32.xlu0 %v17482_v0, %s10633_s29 }
 0x618   : > { %v15712_v7 = vpop.permute.xlu1 %6377 }
 0x619   : > { %6864 = vrot.lane.b32.xlu1 %v12635_v3, %s10633_s29  ;;  %v15716_v38 = vpop.permute.xlu0 %10384 }
 0x61a   : > { %6866 = vrot.lane.b32.xlu0 %v12642_v30, %s10633_s29 }
 0x61c   : > { %v15720_v2 = vpop.permute.xlu1 %6381 }
 0x61d   : > { %6870 = vrot.lane.b32.xlu1 %v12673_v54, %s10633_s29  ;;  %v15724_v13 = vpop.permute.xlu0 %6383 }
 0x61e   : > { %6872 = vrot.lane.b32.xlu0 %v17585_v53, %s10633_s29 }
 0x620   : > { %v15728_v5 = vpop.permute.xlu1 %6387 }
 0x621   : > { %10449 = vrot.lane.b32.xlu1 %v17482_v0, %s10633_s29  ;;  %v15732_v25 = vpop.permute.xlu0 %6389 }
 0x622   : > { %6876 = vrot.lane.b32.xlu0 %v17586_v26, %s10633_s29 }
 0x624   : > { %v15736_v9 = vpop.permute.xlu1 %10389 }
 0x625   : > { %6878 = vrot.lane.b32.xlu1 %v17587_v33, %s10633_s29  ;;  %v6394_v63 = vpop.permute.xlu0 %6393 }
 0x626   : > { %6882 = vrot.lane.b32.xlu0 %v12743_v59, %s10633_s29 }
 0x628   : > { %v6396_v31 = vpop.permute.xlu1 %6395 }
 0x629   : > { %6884 = vrot.lane.b32.xlu1 %v12751_v48, %s10633_s29  ;;  %v6400_v8 = vpop.permute.xlu0 %6399 }
 0x62a   : > { %10454 = vrot.lane.b32.xlu0 %v17482_v0, %s10633_s29 }
 0x62c   : > { %v6402_v12 = vpop.permute.xlu1 %6401 }
 0x62d   : > { %6888 = vrot.lane.b32.xlu1 %v12771_v57, %s10633_s29  ;;  %v10395_v19 = vpop.permute.xlu0 %10394 }
 0x62e   : > { %6890 = vrot.lane.b32.xlu0 %v12777_v46, %s10633_s29  ;;  %v10397_v52 = vunpack.i.h.bf16 %v10395_v19 }
 0x630   : > { %v6406_v32 = vpop.permute.xlu1 %6405 }
 0x631   : > { %6894 = vrot.lane.b32.xlu1 %v12800_v40, %s10633_s29  ;;  %v6408_v56 = vpop.permute.xlu0 %6407 }
 0x632   : > { %6896 = vrot.lane.b32.xlu0 %v17625_v16, %s10633_s29 }
 0x634   : > { %v6412_v28 = vpop.permute.xlu1 %6411 }
 0x635   : > { %10459 = vrot.lane.b32.xlu1 %v17482_v0, %s10633_s29  ;;  %v6414_v29 = vpop.permute.xlu0 %6413 }
 0x636   : > { %6900 = vrot.lane.b32.xlu0 %v17675_v21, %s10633_s29 }
 0x638   : > { %v10400_v6 = vpop.permute.xlu1 %10399 }
 0x639   : > { %6902 = vrot.lane.b32.xlu1 %v17693_v17, %s10633_s29  ;;  %v6418_v36 = vpop.permute.xlu0 %6417  ;;  %v10402_v11 = vunpack.i.h.bf16 %v10400_v6  ;;  %v10401_v47 = vunpack.i.l.bf16 %v10400_v6  ;;  %s17719_s29 = smov 15  }
 0x63a   : > { %7003 = vrot.lane.b32.xlu0 %v17694_v41, %s10635_s21  ;;  %v10396_v41 = vunpack.i.l.bf16 %v10395_v19  ;;  %v6435_v19 = vsel %vm6423_vm12, %v6408_v56, %v10397_v52  ;;  %v6430_v52 = vsel %vm6423_vm12, %v6394_v63, %v6396_v31  ;;  %v6428_v63 = vsel %vm6423_vm12, %v15728_v5, %v15732_v25 }
 0x63b   : > { %v6437_v54 = vsel %vm6423_vm12, %v6414_v29, %v10401_v47  ;;  %v6432_v47 = vsel %vm6423_vm12, %v6400_v8, %v6402_v12  ;;  %v10386_v8 = vunpack.i.l.bf16 %v15716_v38  ;;  %v10382_v5 = vunpack.i.h.bf16 %v15696_v58 }
 0x63c   : > { %v6420_v50 = vpop.permute.xlu1 %6419 }
 0x63d   : > { %v6438_v22 = vsel %vm6423_vm12, %v6418_v36, %v6420_v50  ;;  %7005 = vrot.lane.b32.xlu1 %v17678_v45, %s10635_s21  ;;  %v6439_v43 = vsel %vm6423_vm12, %v6420_v50, %v10402_v11  ;;  %v15766_v10 = vpop.permute.xlu0 %6536  ;;  %v6436_v36 = vsel %vm6423_vm12, %v6412_v28, %v6414_v29  ;;  %v6434_v11 = vsel %vm6423_vm12, %v6406_v32, %v6408_v56 }
 0x63e   : > { %10464 = vrot.lane.b32.xlu0 %v17482_v0, %s10635_s21  ;;  %9675 = vmatprep.subr.msk.mxu1 %vm420_vm11, %v6439_v43  ;;  %v10391_v28 = vunpack.i.l.bf16 %v15736_v9  ;;  %v6433_v29 = vsel %vm6423_vm12, %v6402_v12, %v10396_v41  ;;  %v10387_v56 = vunpack.i.h.bf16 %v15716_v38 }
 0x63f   : > { %9676 = vmatpush2.msk.msra.mxu1 %vm419_vm13, %v6438_v22  ;;  %v6426_v22 = vsel %vm6423_vm12, %v15720_v2, %v15724_v13  ;;  %v6424_v2 = vsel %vm6423_vm12, %v15708_v20, %v15712_v7  ;;  %v6277_v20 = vsel %vm17698_vm10, %v15700_v51, %v15704_v61  ;;  %v6275_v51 = vsel %vm17697_vm9, %v15684_v37, %v15692_v4  ;;  %vm17702_vm10 = vmmov %vm17697_vm9 }
 0x640   : > { %v15776_v53 = vpop.permute.xlu1 %6538  ;;  %9677 = vmatprep.subr.msk.mxu1 %vm420_vm11, %v6437_v54  ;;  %v10392_v54 = vunpack.i.h.bf16 %v15736_v9  ;;  %v6429_v12 = vsel %vm6423_vm12, %v15732_v25, %v10391_v28  ;;  %v6427_v38 = vsel %vm6423_vm12, %v15724_v13, %v10387_v56  ;;  %v10381_v25 = vunpack.i.l.bf16 %v15696_v58 }
 0x641   : > { %7009 = vrot.lane.b32.xlu1 %v12635_v3, %s10635_s21  ;;  %9678 = vmatpush2.msk.msra.mxu1 %vm419_vm13, %v6436_v36  ;;  %v15786_v50 = vpop.permute.xlu0 %10404  ;;  %v6425_v36 = vsel %vm6423_vm12, %v15712_v7, %v10386_v8  ;;  %v6278_v58 = vsel %vm17697_vm9, %v15704_v61, %v10382_v5  ;;  %v10372_v37 = vunpack.i.h.bf16 %v15575_v23  ;;  %v10366_v8 = vunpack.i.l.bf16 %v15529_v60 }
 0x642   : > { %7011 = vrot.lane.b32.xlu0 %v12642_v30, %s10635_s21  ;;  %9679 = vmatprep.subr.msk.mxu1 %vm420_vm11, %v6435_v19  ;;  %v6431_v9 = vsel %vm6423_vm12, %v6396_v31, %v10392_v54  ;;  %v10377_v19 = vunpack.i.h.bf16 %v15644_v24  ;;  %v10376_v54 = vunpack.i.l.bf16 %v15644_v24  ;;  %vm17701_vm12 = vmmov %vm17697_vm9 }
 0x643   : > { %9680 = vmatpush2.msk.msra.mxu1 %vm419_vm13, %v6434_v11 }
 0x644   : > { %v15798_v32 = vpop.permute.xlu1 %6542  ;;  %9681 = vmatprep.subr.msk.mxu1 %vm420_vm11, %v6433_v29  ;;  %v6276_v29 = vsel %vm17701_vm12, %v15692_v4, %v10381_v25  ;;  %v6274_v24 = vsel %vm17702_vm10, %v15671_v39, %v10377_v19  ;;  %vm17703_vm12 = vmmov %vm17697_vm9  ;;  %v10371_v4 = vunpack.i.l.bf16 %v15575_v23  ;;  %v17710_v25 = vld [vmem:[#allocation15_spill] sm:$0xff] }
 0x645   : > { %7047 = vrot.lane.b32.xlu1 %v17693_v17, %s10635_s21  ;;  %9682 = vmatpush2.msk.msra.mxu1 %vm419_vm13, %v6432_v47  ;;  %v15809_v41 = vpop.permute.xlu0 %6544  ;;  %v6273_v47 = vsel %vm17703_vm12, %v15658_v44, %v15671_v39  ;;  %vm17704_vm10 = vmmov %vm17697_vm9 }
 0x646   : > { %10469 = vrot.lane.b32.xlu0 %v17482_v0, %s10635_s21  ;;  %9683 = vmatprep.subr.msk.mxu1 %vm420_vm11, %v6431_v9  ;;  %v6272_v9 = vsel %vm17697_vm9, %v15630_v49, %v10376_v54  ;;  %v6271_v44 = vsel %vm17704_vm10, %v15615_v42, %v15630_v49  ;;  %vm17705_vm12 = vmmov %vm17697_vm9  ;;  %v6269_v42 = vsel %vm17697_vm9, %v15588_v55, %v15602_v1  ;;  %v7325_v54 = vld [vmem:[#allocation5 + $0x180] sm:$0xff] }
 0x647   : > { %9684 = vmatpush2.msk.msra.mxu1 %vm419_vm13, %v6430_v52  ;;  %v10367_v52 = vunpack.i.h.bf16 %v15529_v60  ;;  %v6270_v23 = vsel %vm17705_vm12, %v15602_v1, %v10372_v37  ;;  %vm17706_vm10 = vmmov %vm17697_vm9  ;;  %v7337_v37 = vld [vmem:[#allocation5 + $0x1e0] sm:$0xff] }
 0x648   : > { %v15823_v31 = vpop.permute.xlu1 %6548  ;;  %9685 = vmatprep.subr.msk.mxu1 %vm420_vm11, %v6429_v12  ;;  %v6268_v12 = vsel %vm17706_vm10, %v15564_v35, %v10371_v4  ;;  %vm17707_vm12 = vmmov %vm17697_vm9 }
 0x649   : > { %7045 = vrot.lane.b32.xlu1 %v17675_v21, %s10635_s21  ;;  %9686 = vmatpush2.msk.msra.mxu1 %vm419_vm13, %v6428_v63  ;;  %v15836_v43 = vpop.permute.xlu0 %6550  ;;  %v6267_v55 = vsel %vm17707_vm12, %v15555_v27, %v15564_v35  ;;  %v6266_v60 = vsel %vm17697_vm9, %v15545_v34, %v10367_v52  ;;  %vm17708_vm10 = vmmov %vm17697_vm9  ;;  %v7285_v35 = vld [vmem:[#allocation5 + $0x40] sm:$0xff] }
 0x64a   : > { %7041 = vrot.lane.b32.xlu0 %v17625_v16, %s10635_s21  ;;  %9687 = vmatprep.subr.msk.mxu1 %vm420_vm11, %v6427_v38  ;;  %v6265_v63 = vsel %vm17708_vm10, %v15537_v18, %v15545_v34  ;;  %vm17709_vm12 = vmmov %vm17697_vm9  ;;  %v7299_v34 = vld [vmem:[#allocation5 + $0xb0] sm:$0xff]  ;;  %vm6745_vm10 = vcmask 793600  }
 0x64b   : > { %9688 = vmatpush2.msk.msra.mxu1 %vm419_vm13, %v6426_v22  ;;  %v6264_v27 = vsel %vm17709_vm12, %v15523_v15, %v10366_v8  ;;  %v6263_v22 = vsel %vm17697_vm9, %v15518_v14, %v15523_v15  ;;  %v7298_v14 = vld [vmem:[#allocation5 + $0xa8] sm:$0xff]  ;;  %v7377_v8 = vld [vmem:[#allocation5 + $0x320] sm:$0xff]  ;;  %vm6584_vm12 = vcmask 801792   ;;  %vm6906_vm9 = vcmask 785408  }
 0x64c   : > { %v15851_v13 = vpop.permute.xlu1 %10409  ;;  %9689 = vmatprep.subr.msk.mxu1 %vm420_vm11, %v6425_v36  ;;  %v7312_v36 = vld [vmem:[#allocation5 + $0x118] sm:$0xff] }
 0x64d   : > { %7039 = vrot.lane.b32.xlu1 %v12800_v40, %s10635_s21  ;;  %9690 = vmatpush2.msk.msra.mxu1 %vm419_vm13, %v6424_v2  ;;  %v15865_v7 = vpop.permute.xlu0 %6554  ;;  %v17711_v2 = vld [vmem:[#allocation36_spill] sm:$0xff] }
 0x64e   : > { %7035 = vrot.lane.b32.xlu0 %v12777_v46, %s10635_s21  ;;  %9691 = vmatprep.subr.msk.mxu1 %vm412_vm5, %v6278_v58  ;;  %v7311_v58 = vld [vmem:[#allocation5 + $0x110] sm:$0xff] }
 0x64f   : > { %9692 = vmatpush2.msk.msra.mxu1 %vm411_vm6, %v6277_v20 }
 0x650   : > { %v15879_v61 = vpop.permute.xlu1 %6556  ;;  %9693 = vmatprep.subr.msk.mxu1 %vm412_vm5, %v6276_v29 }
 0x651   : > { %10474 = vrot.lane.b32.xlu1 %v17482_v0, %s10635_s21  ;;  %9694 = vmatpush2.msk.msra.mxu1 %vm411_vm6, %v6275_v51  ;;  %v15892_v56 = vpop.permute.xlu0 %6560  ;;  %v7324_v51 = vld [vmem:[#allocation5 + $0x178] sm:$0xff] }
 0x652   : > { %7033 = vrot.lane.b32.xlu0 %v12771_v57, %s10635_s21  ;;  %9695 = vmatprep.subr.msk.mxu1 %vm412_vm5, %v6274_v24 }
 0x653   : > { %9696 = vmatpush2.msk.msra.mxu1 %vm411_vm6, %v6273_v47 }
 0x654   : > { %v15907_v39 = vpop.permute.xlu1 %6562  ;;  %9697 = vmatprep.subr.msk.mxu1 %vm412_vm5, %v6272_v9 }
 0x655   : > { %7029 = vrot.lane.b32.xlu1 %v12751_v48, %s10635_s21  ;;  %9698 = vmatpush2.msk.msra.mxu1 %vm411_vm6, %v6271_v44  ;;  %v15921_v49 = vpop.permute.xlu0 %10414 }
 0x656   : > { %7027 = vrot.lane.b32.xlu0 %v12743_v59, %s10635_s21  ;;  %9699 = vmatprep.subr.msk.mxu1 %vm412_vm5, %v6270_v23  ;;  %v7288_v23 = vld [vmem:[#allocation5 + $0x58] sm:$0xff] }
 0x657   : > { %9700 = vmatpush2.msk.msra.mxu1 %vm411_vm6, %v6269_v42  ;;  %8482 = vmatprep.mubr.f32.mxu0 %v7288_v23 }
 0x658   : > { %v15935_v1 = vpop.permute.xlu1 %6566  ;;  %9701 = vmatprep.subr.msk.mxu1 %vm412_vm5, %v6268_v12 }
 0x659   : > { %7023 = vrot.lane.b32.xlu1 %v17587_v33, %s10635_s21  ;;  %9702 = vmatpush2.msk.msra.mxu1 %vm411_vm6, %v6267_v55  ;;  %v15948_v38 = vpop.permute.xlu0 %6568 }
 0x65a   : > { %10479 = vrot.lane.b32.xlu0 %v17482_v0, %s10635_s21  ;;  %9703 = vmatprep.subr.msk.mxu1 %vm412_vm5, %v6266_v60 }
 0x65b   : > { %9704 = vmatpush2.msk.msra.mxu1 %vm411_vm6, %v6265_v63 }
 0x65c   : > { %v15961_v18 = vpop.permute.xlu1 %6572  ;;  %9705 = vmatprep.subr.msk.mxu1 %vm412_vm5, %v6264_v27 }
 0x65d   : > { %7021 = vrot.lane.b32.xlu1 %v17586_v26, %s10635_s21  ;;  %9706 = vmatpush2.msk.msra.mxu1 %vm411_vm6, %v6263_v22  ;;  %v15969_v5 = vpop.permute.xlu0 %6574 }
 0x65e   : > { %7017 = vrot.lane.b32.xlu0 %v17710_v25, %s10635_s21  ;;  %8370 = vmatmul.mubr.f32.vlgmr.msra.gmra.mxu1 %v7285_v35  ;;  %v7781_v35 = vld [vmem:[%s17188_s6] sm:$0xff] }
 0x65f   : > { %8375 = vmatprep.mubr.f32.mxu1 %v7299_v34  ;;  %v17712_v34 = vld [vmem:[#allocation11_spill] sm:$0xff] }
 0x660   : > { %v15973_v15 = vpop.permute.xlu1 %10419 }
 0x661   : > { %7015 = vrot.lane.b32.xlu1 %v17711_v2, %s10635_s21  ;;  %v15977_v19 = vpop.permute.xlu0 %6578  ;;  %s17720_s21 = smov 1  }
 0x662   : > { %7208 = vrot.lane.b32.xlu0 %v17693_v17, %s10636_s17  ;;  %8376 = vmatmul.mubr.f32.gmra.mxu1 %v7298_v14  ;;  %v7338_v17 = vld [vmem:[#allocation5 + $0x1e8] sm:$0xff] }
 0x663   : > { %8381 = vmatprep.mubr.f32.mxu1 %v7312_v36 }
 0x664   : > { %v15981_v20 = vpop.permute.xlu1 %6580 }
 0x665   : > { %10484 = vrot.lane.b32.xlu1 %v17482_v0, %s10636_s17  ;;  %v15985_v29 = vpop.permute.xlu0 %6697 }
 0x666   : > { %7206 = vrot.lane.b32.xlu0 %v17675_v21, %s10636_s17  ;;  %8382 = vmatmul.mubr.f32.gmra.mxu1 %v7311_v58  ;;  %v7351_v21 = vld [vmem:[#allocation5 + $0x250] sm:$0xff] }
 0x667   : > { %8387 = vmatprep.mubr.f32.mxu1 %v7325_v54 }
 0x668   : > { %v15989_v24 = vpop.permute.xlu1 %6699 }
 0x669   : > { %7202 = vrot.lane.b32.xlu1 %v17625_v16, %s10636_s17  ;;  %v15993_v47 = vpop.permute.xlu0 %10424  ;;  %v7350_v16 = vld [vmem:[#allocation5 + $0x248] sm:$0xff] }
 0x66a   : > { %7200 = vrot.lane.b32.xlu0 %v12800_v40, %s10636_s17  ;;  %8388 = vmatmul.mubr.f32.gmra.mxu1 %v7324_v51  ;;  %v7364_v40 = vld [vmem:[#allocation5 + $0x2b8] sm:$0xff] }
 0x66b   : > { %8393 = vmatprep.mubr.f32.mxu1 %v7338_v17 }
 0x66c   : > { %v15997_v4 = vpop.permute.xlu1 %6703 }
 0x66d   : > { %7196 = vrot.lane.b32.xlu1 %v12777_v46, %s10636_s17  ;;  %v16001_v9 = vpop.permute.xlu0 %6705  ;;  %v7363_v46 = vld [vmem:[#allocation5 + $0x2b0] sm:$0xff] }
 0x66e   : > { %10489 = vrot.lane.b32.xlu0 %v17482_v0, %s10636_s17  ;;  %8394 = vmatmul.mubr.f32.gmra.mxu1 %v7337_v37  ;;  %v7784_v37 = vld [vmem:[%s17188_s6 + $0x18] sm:$0xff] }
 0x66f   : > { %8399 = vmatprep.mubr.f32.mxu1 %v7351_v21 }
 0x670   : > { %v16005_v44 = vpop.permute.xlu1 %6709 }
 0x671   : > { %7194 = vrot.lane.b32.xlu1 %v12771_v57, %s10636_s17  ;;  %v16009_v52 = vpop.permute.xlu0 %6711  ;;  %v7376_v57 = vld [vmem:[#allocation5 + $0x318] sm:$0xff] }
 0x672   : > { %7190 = vrot.lane.b32.xlu0 %v12751_v48, %s10636_s17  ;;  %8400 = vmatmul.mubr.f32.gmra.mxu1 %v7350_v16 }
 0x673   : > { %8405 = vmatprep.mubr.f32.mxu1 %v7364_v40 }
 0x674   : > { %v16013_v42 = vpop.permute.xlu1 %10429 }
 0x675   : > { %7188 = vrot.lane.b32.xlu1 %v12743_v59, %s10636_s17  ;;  %v16017_v12 = vpop.permute.xlu0 %6715 }
 0x676   : > { %7184 = vrot.lane.b32.xlu0 %v17587_v33, %s10636_s17  ;;  %8406 = vmatmul.mubr.f32.gmra.mxu1 %v7363_v46  ;;  %v7785_v46 = vld [vmem:[%s17188_s6 + $0x20] sm:$0xff] }
 0x677   : > { %8411 = vmatprep.mubr.f32.mxu1 %v7377_v8 }
 0x678   : > { %v16021_v48 = vpop.permute.xlu1 %6717 }
 0x679   : > { %10494 = vrot.lane.b32.xlu1 %v17482_v0, %s10636_s17  ;;  %v6722_v55 = vpop.permute.xlu0 %6721 }
 0x67a   : > { %7182 = vrot.lane.b32.xlu0 %v17586_v26, %s10636_s17  ;;  %8412 = vmatmul.mubr.f32.gmra.mxu1 %v7376_v57 }
 0x67b   : > { %8595 = vmatprep.mubr.f32.mxu1 %v17482_v0 }
 0x67c   : > { %v6724_v59 = vpop.permute.xlu1 %6723 }
 0x67d   : > { %7178 = vrot.lane.b32.xlu1 %v17710_v25, %s10636_s17  ;;  %v10435_v33 = vpop.permute.xlu0 %10434  ;;  %v7782_v25 = vld [vmem:[%s17188_s6 + $0x8] sm:$0xff] }
 0x67e   : > { %7176 = vrot.lane.b32.xlu0 %v17711_v2, %s10636_s17  ;;  %v10437_v2 = vunpack.i.h.bf16 %v10435_v33  ;;  %v10436_v21 = vunpack.i.l.bf16 %v10435_v33 }
 0x680   : > { %v6728_v60 = vpop.permute.xlu1 %6727 }
 0x681   : > { %7172 = vrot.lane.b32.xlu1 %v12642_v30, %s10636_s17  ;;  %v6730_v63 = vpop.permute.xlu0 %6729 }
 0x682   : > { %10499 = vrot.lane.b32.xlu0 %v17482_v0, %s10636_s17  ;;  %v6757_v57 = vsel %vm6745_vm10, %v6730_v63, %v10437_v2  ;;  %v6756_v33 = vsel %vm6745_vm10, %v6728_v60, %v6730_v63  ;;  %v7787_v60 = vld [vmem:[%s17188_s6 + $0x30] sm:$0xff]  ;;  %v6754_v63 = vsel %vm6745_vm10, %v6722_v55, %v6724_v59  ;;  %v7788_v55 = vld [vmem:[%s17188_s6 + $0x38] sm:$0xff] }
 0x684   : > { %v6734_v26 = vpop.permute.xlu1 %6733 }
 0x685   : > { %7170 = vrot.lane.b32.xlu1 %v12635_v3, %s10636_s17  ;;  %v6736_v27 = vpop.permute.xlu0 %6735 }
 0x686   : > { %7166 = vrot.lane.b32.xlu0 %v17678_v45, %s10636_s17  ;;  %v7783_v45 = vld [vmem:[%s17188_s6 + $0x10] sm:$0xff]  ;;  %v6758_v23 = vsel %vm6745_vm10, %v6734_v26, %v6736_v27  ;;  %v7786_v26 = vld [vmem:[%s17188_s6 + $0x28] sm:$0xff] }
 0x688   : > { %v10440_v22 = vpop.permute.xlu1 %10439 }
 0x689   : > { %7164 = vrot.lane.b32.xlu1 %v17712_v34, %s10636_s17  ;;  %v6740_v30 = vpop.permute.xlu0 %6739  ;;  %v10442_v14 = vunpack.i.h.bf16 %v10440_v22  ;;  %v10441_v3 = vunpack.i.l.bf16 %v10440_v22  ;;  %v10431_v22 = vunpack.i.l.bf16 %v16013_v42  ;;  %v6755_v34 = vsel %vm6745_vm10, %v6724_v59, %v10436_v21  ;;  %v8694_v21 = vld [vmem:[#allocation3 + $0x8] sm:$0xf]  ;;  %s17718_s17 = smov 16  }
 0x68a   : > { %7791 = vperm.xlu0 %9861, %v7781_v35   ;;  %v10426_v59 = vunpack.i.l.bf16 %v15993_v47 }
 0x68b   : > { %v6759_v40 = vsel %vm6745_vm10, %v6736_v27, %v10441_v3  ;;  %v10432_v27 = vunpack.i.h.bf16 %v16013_v42 }
 0x68c   : > { %v6742_v36 = vpop.permute.xlu1 %6741 }
 0x68d   : > { %v6760_v58 = vsel %vm6745_vm10, %v6740_v30, %v6742_v36  ;;  %7796 = vperm.xlu1 %10022, %v7782_v25   ;;  %v6761_v54 = vsel %vm6745_vm10, %v6742_v36, %v10442_v14  ;;  %v16053_v51 = vpop.permute.xlu0 %6858  ;;  %v10427_v25 = vunpack.i.h.bf16 %v15993_v47  ;;  %v6753_v42 = vsel %vm6745_vm10, %v16021_v48, %v10432_v27  ;;  %v16115_v36 = vld [vmem:[#allocation3] sm:$0xff] }
 0x68e   : > { %7801 = vperm.xlu0 %9861, %v7783_v45   ;;  %9707 = vmatprep.subr.msk.mxu0 %vm402_vm1, %v6761_v54  ;;  %v6752_v14 = vsel %vm6745_vm10, %v16017_v12, %v16021_v48  ;;  %v6751_v45 = vsel %vm6745_vm10, %v16009_v52, %v10431_v22  ;;  %v6750_v12 = vsel %vm6745_vm10, %v16005_v44, %v16009_v52  ;;  %v10421_v54 = vunpack.i.l.bf16 %v15973_v15 }
 0x68f   : > { %9708 = vmatpush1.msk.msra.mxu0 %vm401_vm2, %v6760_v58  ;;  %v6749_v47 = vsel %vm6745_vm10, %v16001_v9, %v10427_v25  ;;  %v16130_v2 = vcombine.high %v16115_v36, %v16115_v36  ;;  %v6748_v44 = vsel %vm6745_vm10, %v15997_v4, %v16001_v9  ;;  %v10422_v58 = vunpack.i.h.bf16 %v15973_v15 }
 0x690   : > { %v16067_v8 = vpop.permute.xlu1 %6860  ;;  %9709 = vmatprep.subr.msk.mxu0 %vm402_vm1, %v6759_v40  ;;  %v6746_v4 = vsel %vm6745_vm10, %v15985_v29, %v15989_v24  ;;  %v10417_v40 = vunpack.i.h.bf16 %v15921_v49  ;;  %v6599_v29 = vsel %vm6584_vm12, %v15977_v19, %v15981_v20  ;;  %v6587_v25 = vsel %vm6584_vm12, %v15798_v32, %v15809_v41 }
 0x691   : > { %7806 = vperm.xlu1 %10022, %v7784_v37   ;;  %9710 = vmatpush1.msk.msra.mxu0 %vm401_vm2, %v6758_v23  ;;  %v16075_v35 = vpop.permute.xlu0 %10444  ;;  %v6747_v37 = vsel %vm6745_vm10, %v15989_v24, %v10426_v59  ;;  %v6600_v15 = vsel %vm6584_vm12, %v15981_v20, %v10422_v58  ;;  %v10416_v23 = vunpack.i.l.bf16 %v15921_v49  ;;  %v6595_v20 = vsel %vm6584_vm12, %v15935_v1, %v15948_v38 }
 0x692   : > { %7811 = vperm.xlu0 %9861, %v7785_v46   ;;  %9711 = vmatprep.subr.msk.mxu0 %vm402_vm1, %v6757_v57  ;;  %v6596_v49 = vsel %vm6584_vm12, %v15948_v38, %v10417_v40  ;;  %v6593_v1 = vsel %vm6584_vm12, %v15892_v56, %v15907_v39  ;;  %v6591_v56 = vsel %vm6584_vm12, %v15865_v7, %v15879_v61 }
 0x693   : > { %9712 = vmatpush1.msk.msra.mxu0 %vm401_vm2, %v6756_v33  ;;  %v6598_v33 = vsel %vm6584_vm12, %v15969_v5, %v10421_v54  ;;  %v6594_v22 = vsel %vm6584_vm12, %v15907_v39, %v10416_v23  ;;  %v6589_v7 = vsel %vm6584_vm12, %v15823_v31, %v15836_v43  ;;  %v16308_v23 = vld [vmem:[%s17189_s7 + $0x8] sm:$0xff] }
 0x694   : > { %v16091_v30 = vpop.permute.xlu1 %6864  ;;  %9713 = vmatprep.subr.msk.mxu0 %vm402_vm1, %v6755_v34  ;;  %v10407_v34 = vunpack.i.h.bf16 %v15786_v50 }
 0x695   : > { %7816 = vperm.xlu1 %10022, %v7786_v26   ;;  %9714 = vmatpush1.msk.msra.mxu0 %vm401_vm2, %v6754_v63  ;;  %v16103_v3 = vpop.permute.xlu0 %6866  ;;  %v6597_v26 = vsel %vm6584_vm12, %v15961_v18, %v15969_v5  ;;  %v10412_v18 = vunpack.i.h.bf16 %v15851_v13  ;;  %v10411_v5 = vunpack.i.l.bf16 %v15851_v13 }
 0x696   : > { %7821 = vperm.xlu0 %9861, %v7787_v60   ;;  %9715 = vmatprep.subr.msk.mxu0 %vm402_vm1, %v6753_v42  ;;  %v10406_v60 = vunpack.i.l.bf16 %v15786_v50  ;;  %v6588_v50 = vsel %vm6584_vm12, %v15809_v41, %v10407_v34 }
 0x697   : > { %9716 = vmatpush1.msk.msra.mxu0 %vm401_vm2, %v6752_v14  ;;  %v6592_v13 = vsel %vm6584_vm12, %v15879_v61, %v10412_v18  ;;  %v6590_v63 = vsel %vm6584_vm12, %v15836_v43, %v10411_v5  ;;  %v8760_v43 = vld [vmem:[#allocation3 + $0x4] sm:$0xff]  ;;  %v6585_v14 = vsel %vm6584_vm12, %v15766_v10, %v15776_v53  ;;  %v8761_v10 = vld [vmem:[#allocation3 + $0xc] sm:$0xf]  ;;  %v16328_v18 = vld [vmem:[%s17189_s7 + $0x18] sm:$0xff] }
 0x698   : > { %v16120_v48 = vpop.permute.xlu1 %6870  ;;  %9717 = vmatprep.subr.msk.mxu0 %vm402_vm1, %v6751_v45  ;;  %v6586_v31 = vsel %vm6584_vm12, %v15776_v53, %v10406_v60  ;;  %v16333_v5 = vld [vmem:[%s17189_s7 + $0x20] sm:$0xff] }
 0x699   : > { %7826 = vperm.xlu1 %10022, %v7788_v55   ;;  %9718 = vmatpush1.msk.msra.mxu0 %vm401_vm2, %v6750_v12  ;;  %v16135_v52 = vpop.permute.xlu0 %6872  ;;  %v8764_v55 = vcombine.high %v8760_v43, %v8760_v43 }
 0x69a   : > { %8698 = vrot.lane.b32.xlu0 %v16115_v36, %s17715_s26  ;;  %9719 = vmatprep.subr.msk.mxu0 %vm402_vm1, %v6749_v47 }
 0x69b   : > { %9720 = vmatpush1.msk.msra.mxu0 %vm401_vm2, %v6748_v44 }
 0x69c   : > { %v16150_v9 = vpop.permute.xlu1 %10449  ;;  %9721 = vmatprep.subr.msk.mxu0 %vm402_vm1, %v6747_v37 }
 0x69d   : > { %9722 = vmatpush1.msk.msra.mxu0 %vm401_vm2, %v6746_v4  ;;  %8700 = vrot.lane.b32.xlu1 %v16130_v2, %s17715_s26  ;;  %v16164_v24 = vpop.permute.xlu0 %6876  ;;  %v16297_v4 = vld [vmem:[%s17189_s7] sm:$0xff] }
 0x69e   : > { %8702 = vrot.lane.b32.xlu0 %v8694_v21, %s17715_s26  ;;  %9723 = vmatprep.subr.msk.mxu0 %vm394_vm15, %v6600_v15  ;;  %s17836_s26 = sand.u32 1, %s10594_s10  }
 0x69f   : > { %9724 = vmatpush1.msk.msra.mxu0 %vm393_vm14, %v6599_v29 }
 0x6a0   : > { %v16177_v19 = vpop.permute.xlu1 %6878  ;;  %9725 = vmatprep.subr.msk.mxu0 %vm394_vm15, %v6598_v33  ;;  %v16316_v33 = vld [vmem:[%s17189_s7 + $0x10] sm:$0xff] }
 0x6a1   : > { %9726 = vmatpush1.msk.msra.mxu0 %vm393_vm14, %v6597_v26  ;;  %8715 = vrot.lane.b32.xlu1 %v16115_v36, %s17718_s17  ;;  %v16190_v27 = vpop.permute.xlu0 %6882 }
 0x6a2   : > { %8717 = vrot.lane.b32.xlu0 %v8694_v21, %s17718_s17  ;;  %9727 = vmatprep.subr.msk.mxu0 %vm394_vm15, %v6596_v49 }
 0x6a3   : > { %9728 = vmatpush1.msk.msra.mxu0 %vm393_vm14, %v6595_v20 }
 0x6a4   : > { %v16204_v38 = vpop.permute.xlu1 %6884  ;;  %9729 = vmatprep.subr.msk.mxu0 %vm394_vm15, %v6594_v22 }
 0x6a5   : > { %9730 = vmatpush1.msk.msra.mxu0 %vm393_vm14, %v6593_v1  ;;  %8726 = vrot.lane.b32.xlu1 %v16115_v36, %s17719_s29  ;;  %v16218_v39 = vpop.permute.xlu0 %10454 }
 0x6a6   : > { %8728 = vrot.lane.b32.xlu0 %v16130_v2, %s17719_s29  ;;  %9731 = vmatprep.subr.msk.mxu0 %vm394_vm15, %v6592_v13  ;;  %v16340_v13 = vld [vmem:[%s17189_s7 + $0x28] sm:$0xff] }
 0x6a7   : > { %9732 = vmatpush1.msk.msra.mxu0 %vm393_vm14, %v6591_v56 }
 0x6a8   : > { %v16232_v61 = vpop.permute.xlu1 %6888  ;;  %9733 = vmatprep.subr.msk.mxu0 %vm394_vm15, %v6590_v63  ;;  %v16346_v63 = vld [vmem:[%s17189_s7 + $0x30] sm:$0xff] }
 0x6a9   : > { %9734 = vmatpush1.msk.msra.mxu0 %vm393_vm14, %v6589_v7  ;;  %8730 = vrot.lane.b32.xlu1 %v8694_v21, %s17719_s29  ;;  %v16244_v42 = vpop.permute.xlu0 %6890 }
 0x6aa   : > { %8743 = vrot.lane.b32.xlu0 %v16115_v36, %s17720_s21  ;;  %9735 = vmatprep.subr.msk.mxu0 %vm394_vm15, %v6588_v50 }
 0x6ab   : > { %9736 = vmatpush1.msk.msra.mxu0 %vm393_vm14, %v6587_v25 }
 0x6ac   : > { %v16257_v32 = vpop.permute.xlu1 %6894  ;;  %9737 = vmatprep.subr.msk.mxu0 %vm394_vm15, %v6586_v31  ;;  %vm7212_vm15 = vcmask 769024  }
 0x6ad   : > { %9738 = vmatpush1.msk.msra.mxu0 %vm393_vm14, %v6585_v14  ;;  %8745 = vrot.lane.b32.xlu1 %v16130_v2, %s17720_s21  ;;  %v16265_v41 = vpop.permute.xlu0 %6896  ;;  %vm7051_vm14 = vcmask 777216  }
 0x6ae   : > { %8747 = vrot.lane.b32.xlu0 %v8694_v21, %s17720_s21  ;;  %s10637_s21 = smov [#allocation8]  }
 0x6b0   : > { %v16268_v59 = vpop.permute.xlu1 %10459 }
 0x6b1   : > { %8765 = vrot.lane.b32.xlu1 %v8760_v43, %s17652_s23  ;;  %v16271_v53 = vpop.permute.xlu0 %6900 }
 0x6b2   : > { %8767 = vrot.lane.b32.xlu0 %v8764_v55, %s17652_s23 }
 0x6b4   : > { %v16274_v45 = vpop.permute.xlu1 %6902 }
 0x6b5   : > { %8769 = vrot.lane.b32.xlu1 %v8761_v10, %s17652_s23  ;;  %v16277_v36 = vpop.permute.xlu0 %7003  ;;  %s10542_s23 = sshll.u32 %s10637_s21, 4  ;;  %s10543_s23 = int_to_ptr.vmem [resolvable:$false] %s10542_s23 }
 0x6b6   : > { %8782 = vrot.lane.b32.xlu0 %v8760_v43, %s17661_s16  ;;  %s10544_s27 = scalar_lea.vmem %s10543_s23, 16384 }
 0x6b8   : > { %v16280_v12 = vpop.permute.xlu1 %7005 }
 0x6b9   : > { %8784 = vrot.lane.b32.xlu1 %v8764_v55, %s17661_s16  ;;  %v16283_v47 = vpop.permute.xlu0 %10464 }
 0x6ba   : > { %8786 = vrot.lane.b32.xlu0 %v8761_v10, %s17661_s16  ;;  %s9354_s16 = sshll.u32 %s10710_s13, 13  ;;  %s17141_s13 = scalar_lea.sflag [#allocation7], %s17836_s26 }
 0x6bc   : > { %v16286_v2 = vpop.permute.xlu1 %7009 }
 0x6bd   : > { %8799 = vrot.lane.b32.xlu1 %v8760_v43, %s17667_s14  ;;  %v16289_v44 = vpop.permute.xlu0 %7011 }
 0x6be   : > { %8801 = vrot.lane.b32.xlu0 %v8761_v10, %s17667_s14  ;;  %s9249_s14 = sshll.u32 %s11326_s25, 4  ;;  %s17136_s14 = int_to_ptr.vmem [resolvable:$true] %s9249_s14 }
 0x6bf   : > { %s10538_s29 = scalar_lea.vmem %s17136_s14, 8192  ;;  %p10545_p11 = scmp.lt.s32.totalorder %s17136_s14, %s10543_s23 }
 0x6c0   : > { %v7048_v58 = vpop.permute.xlu1 %7047  ;;  %p10539_p8 = scmp.ne.s32.totalorder %s17136_s14, %s10538_s29  ;;  %p10546_p12 = scmp.lt.s32.totalorder %s10544_s27, %s10538_s29 }
 0x6c1   : > { %8809 = vrot.lane.b32.xlu1 %v8760_v43, %s17672_s24  ;;  %v10470_v54 = vpop.permute.xlu0 %10469  ;;  %v16361_v43 = vld [vmem:[%s17189_s7 + $0x38] sm:$0xff] }
 0x6c2   : > { %8811 = vrot.lane.b32.xlu0 %v8764_v55, %s17672_s24  ;;  %v10472_v37 = vunpack.i.h.bf16 %v10470_v54  ;;  %v10471_v21 = vunpack.i.l.bf16 %v10470_v54  ;;  %v8684_v55 = vld [vmem:[%s17190_s8] sm:$0xff]  ;;  %v8685_v54 = vld [vmem:[%s17190_s8 + $0x8] sm:$0xff]  ;;  %p10540_p9 = pnand %p10539_p8, %p10727_p5  ;;  %p10547_p13 = por %p10546_p12, %p10545_p11 }
 0x6c4   : > { %v7046_v40 = vpop.permute.xlu1 %7045  ;;  %v7067_v29 = vsel %vm7051_vm14, %v7048_v58, %v10471_v21  ;;  %p10541_p10 = pneg %p10540_p9 }
 0x6c5   : > { %v7066_v15 = vsel %vm7051_vm14, %v7046_v40, %v7048_v58  ;;  %8813 = vrot.lane.b32.xlu1 %v8761_v10, %s17672_s24  ;;  %v7042_v46 = vpop.permute.xlu0 %7041  ;;  %9739 = vmatprep.subr.msk.mxu0 %vm412_vm5, %v7067_v29  ;;  %v8686_v40 = vld [vmem:[%s17190_s8 + $0x10] sm:$0xff]  ;;  %s17133_s24 = scalar_lea.hbm %s17191_s9, %s9354_s16 }
 0x6c6   : > { %8828 = vperm.xlu0 %9861, %v16297_v4   ;;  %9740 = vmatpush2.msk.msra.mxu0 %vm411_vm6, %v7066_v15  ;;  %v7065_v57 = vsel %vm7051_vm14, %v7042_v46, %v10472_v37  ;;  %p10548_p0 = pnand %p10547_p13, %p10541_p10 }
 0x6c7   : > { %9741 = vmatprep.subr.msk.mxu0 %vm412_vm5, %v7065_v57  ;;  %v10467_v57 = vunpack.i.h.bf16 %v16283_v47 }
 0x6c8   : > { %v7040_v26 = vpop.permute.xlu1 %7039 }
 0x6c9   : > { %v7064_v49 = vsel %vm7051_vm14, %v7040_v26, %v7042_v46  ;;  %8833 = vperm.xlu1 %10022, %v16308_v23   ;;  %v7036_v20 = vpop.permute.xlu0 %7035 }
 0x6ca   : > { %8838 = vperm.xlu0 %9861, %v16316_v33   ;;  %9742 = vmatpush2.msk.msra.mxu0 %vm411_vm6, %v7064_v49  ;;  %v8687_v49 = vld [vmem:[%s17190_s8 + $0x18] sm:$0xff] }
 0x6cc   : > { %v10475_v22 = vpop.permute.xlu1 %10474 }
 0x6cd   : > { %v10476_v1 = vunpack.i.l.bf16 %v10475_v22  ;;  %8843 = vperm.xlu1 %10022, %v16328_v18   ;;  %v7034_v34 = vpop.permute.xlu0 %7033  ;;  %v10477_v56 = vunpack.i.h.bf16 %v10475_v22  ;;  %v8688_v22 = vld [vmem:[%s17190_s8 + $0x20] sm:$0xff] }
 0x6ce   : > { %8848 = vperm.xlu0 %9861, %v16333_v5   ;;  %v7062_v7 = vsel %vm7051_vm14, %v7034_v34, %v7036_v20 }
 0x6cf   : > { %v7063_v60 = vsel %vm7051_vm14, %v7036_v20, %v10476_v1  ;;  %v10466_v1 = vunpack.i.l.bf16 %v16283_v47  ;;  %v7054_v47 = vsel %vm7051_vm14, %v16286_v2, %v16289_v44  ;;  %v7052_v2 = vsel %vm7051_vm14, %v16277_v36, %v16280_v12 }
 0x6d0   : > { %v7030_v50 = vpop.permute.xlu1 %7029  ;;  %9743 = vmatprep.subr.msk.mxu0 %vm412_vm5, %v7063_v60  ;;  %v6921_v36 = vsel %vm6906_vm9, %v16271_v53, %v16274_v45 }
 0x6d1   : > { %9744 = vmatpush2.msk.msra.mxu0 %vm411_vm6, %v7062_v7  ;;  %8853 = vperm.xlu1 %10022, %v16340_v13   ;;  %v7061_v25 = vsel %vm7051_vm14, %v7030_v50, %v10477_v56  ;;  %v7028_v31 = vpop.permute.xlu0 %7027  ;;  %v7055_v7 = vsel %vm7051_vm14, %v16289_v44, %v10467_v57  ;;  %v17721_v57 = vmov 1  }
 0x6d2   : > { %8858 = vperm.xlu0 %9861, %v16346_v63   ;;  %9745 = vmatprep.subr.msk.mxu0 %vm412_vm5, %v7061_v25  ;;  %v7060_v14 = vsel %vm7051_vm14, %v7028_v31, %v7030_v50  ;;  %v8689_v50 = vld [vmem:[%s17190_s8 + $0x28] sm:$0xff]  ;;  %v8690_v25 = vld [vmem:[%s17190_s8 + $0x30] sm:$0xff]  ;;  %v10462_v31 = vunpack.i.h.bf16 %v16268_v59 }
 0x6d3   : > { %9746 = vmatpush2.msk.msra.mxu0 %vm411_vm6, %v7060_v14  ;;  %v10461_v14 = vunpack.i.l.bf16 %v16268_v59 }
 0x6d4   : > { %v7024_v10 = vpop.permute.xlu1 %7023  ;;  %v6922_v59 = vsel %vm6906_vm9, %v16274_v45, %v10462_v31 }
 0x6d5   : > { %8863 = vperm.xlu1 %10022, %v16361_v43   ;;  %v10480_v58 = vpop.permute.xlu0 %10479 }
 0x6d6   : > { %8903 = vperm.xlu0 %9861, %v8684_v55   ;;  %v10482_v37 = vunpack.i.h.bf16 %v10480_v58  ;;  %v10481_v21 = vunpack.i.l.bf16 %v10480_v58 }
 0x6d8   : > { %v7022_v15 = vpop.permute.xlu1 %7021  ;;  %v7059_v46 = vsel %vm7051_vm14, %v7024_v10, %v10481_v21  ;;  %v8691_v21 = vld [vmem:[%s17190_s8 + $0x38] sm:$0xff] }
 0x6d9   : > { %v7058_v29 = vsel %vm7051_vm14, %v7022_v15, %v7024_v10  ;;  %8908 = vperm.xlu1 %10022, %v8685_v54   ;;  %v7018_v26 = vpop.permute.xlu0 %7017  ;;  %9747 = vmatprep.subr.msk.mxu0 %vm412_vm5, %v7059_v46  ;;  %v7053_v10 = vsel %vm7051_vm14, %v16280_v12, %v10466_v1  ;;  %v10457_v54 = vunpack.i.h.bf16 %v16218_v39  ;;  %v10456_v46 = vunpack.i.l.bf16 %v16218_v39 }
 0x6da   : > { %8913 = vperm.xlu0 %9861, %v8686_v40   ;;  %v7057_v20 = vsel %vm7051_vm14, %v7018_v26, %v10482_v37  ;;  %9748 = vmatpush2.msk.msra.mxu0 %vm411_vm6, %v7058_v29  ;;  %v6920_v29 = vsel %vm6906_vm9, %v16265_v41, %v10461_v14  ;;  %v10452_v1 = vunpack.i.h.bf16 %v16150_v9  ;;  %v6911_v14 = vsel %vm6906_vm9, %v16120_v48, %v16135_v52 }
 0x6db   : > { %9749 = vmatprep.subr.msk.mxu0 %vm412_vm5, %v7057_v20  ;;  %v6918_v39 = vsel %vm6906_vm9, %v16244_v42, %v10457_v54  ;;  %v7300_v54 = vld [vmem:[#allocation5 + $0xb8] sm:$0xff] }
 0x6dc   : > { %v7016_v34 = vpop.permute.xlu1 %7015 }
 0x6dd   : > { %v7056_v56 = vsel %vm7051_vm14, %v7016_v34, %v7018_v26  ;;  %8918 = vperm.xlu1 %10022, %v8687_v49   ;;  %v7209_v60 = vpop.permute.xlu0 %7208  ;;  %v6919_v26 = vsel %vm6906_vm9, %v16257_v32, %v16265_v41  ;;  %v10451_v32 = vunpack.i.l.bf16 %v16150_v9  ;;  %v6916_v41 = vsel %vm6906_vm9, %v16204_v38, %v10456_v46 }
 0x6de   : > { %8923 = vperm.xlu0 %9861, %v8688_v22   ;;  %9750 = vmatpush2.msk.msra.mxu0 %vm411_vm6, %v7056_v56  ;;  %v6917_v22 = vsel %vm6906_vm9, %v16232_v61, %v16244_v42  ;;  %v6915_v56 = vsel %vm6906_vm9, %v16190_v27, %v16204_v38  ;;  %v6914_v9 = vsel %vm6906_vm9, %v16177_v19, %v10452_v1 }
 0x6df   : > { %9751 = vmatprep.subr.msk.mxu0 %vm412_vm5, %v7055_v7 }
 0x6e0   : > { %v10485_v55 = vpop.permute.xlu1 %10484  ;;  %9752 = vmatpush2.msk.msra.mxu0 %vm411_vm6, %v7054_v47  ;;  %v6912_v47 = vsel %vm6906_vm9, %v16135_v52, %v10451_v32  ;;  %v6909_v52 = vsel %vm6906_vm9, %v16091_v30, %v16103_v3 }
 0x6e1   : > { %v10486_v44 = vunpack.i.l.bf16 %v10485_v55  ;;  %9753 = vmatprep.subr.msk.mxu0 %vm412_vm5, %v7053_v10  ;;  %8928 = vperm.xlu1 %10022, %v8689_v50   ;;  %v7207_v58 = vpop.permute.xlu0 %7206  ;;  %v10487_v37 = vunpack.i.h.bf16 %v10485_v55  ;;  %v6913_v50 = vsel %vm6906_vm9, %v16164_v24, %v16177_v19 }
 0x6e2   : > { %8933 = vperm.xlu0 %9861, %v8690_v25   ;;  %9754 = vmatpush2.msk.msra.mxu0 %vm411_vm6, %v7052_v2  ;;  %v7227_v40 = vsel %vm7212_vm15, %v7207_v58, %v7209_v60  ;;  %v10446_v25 = vunpack.i.l.bf16 %v16075_v35  ;;  %v7287_v2 = vld [vmem:[#allocation5 + $0x50] sm:$0xff]  ;;  %v7301_v58 = vld [vmem:[#allocation5 + $0xc0] sm:$0xff] }
 0x6e3   : > { %8466 = vmatprep.subr.mxu0 %v6922_v59  ;;  %v7228_v12 = vsel %vm7212_vm15, %v7209_v60, %v10486_v44  ;;  %v10447_v60 = vunpack.i.h.bf16 %v16075_v35  ;;  %v6907_v44 = vsel %vm6906_vm9, %v16053_v51, %v16067_v8  ;;  %v7314_v51 = vld [vmem:[#allocation5 + $0x128] sm:$0xff] }
 0x6e4   : > { %v7203_v15 = vpop.permute.xlu1 %7202  ;;  %8467 = vmatpush2.msra.mxu0 %v6921_v36  ;;  %9755 = vmatprep.subr.msk.mxu1 %vm420_vm11, %v7228_v12  ;;  %v6908_v10 = vsel %vm6906_vm9, %v16067_v8, %v10446_v25  ;;  %v17722_v12 = vmov 2   ;;  %v7365_v25 = vld [vmem:[#allocation5 + $0x2c0] sm:$0xff] }
 0x6e5   : > { %v7226_v53 = vsel %vm7212_vm15, %v7203_v15, %v10487_v37  ;;  %8468 = vmatprep.subr.mxu0 %v6920_v29  ;;  %9756 = vmatpush1.msk.msra.mxu1 %vm419_vm13, %v7227_v40  ;;  %v7201_v45 = vpop.permute.xlu0 %7200  ;;  %v6910_v35 = vsel %vm6906_vm9, %v16103_v3, %v10447_v60  ;;  %v7313_v29 = vld [vmem:[#allocation5 + $0x120] sm:$0xff]  ;;  %v17723_v60 = vmov 3   ;;  %vm8721_vm9 = vcmask 1043456  }
 0x6e6   : > { %10503 = vset.pattern.permute.xlu0 %v17721_v57  ;;  %8938 = vperm.xlu1 %10022, %v8691_v21   ;;  %v7225_v49 = vsel %vm7212_vm15, %v7201_v45, %v7203_v15  ;;  %v7327_v45 = vld [vmem:[#allocation5 + $0x190] sm:$0xff] }
 0x6e7   : > { %8469 = vmatpush2.msra.mxu0 %v6919_v26  ;;  %9757 = vmatprep.subr.msk.mxu1 %vm420_vm11, %v7226_v53  ;;  %v7326_v26 = vld [vmem:[#allocation5 + $0x188] sm:$0xff] }
 0x6e8   : > { %8958 = vperm.xlu0 %10503, %v16297_v4   ;;  %8470 = vmatprep.subr.mxu0 %v6918_v39  ;;  %v7197_v20 = vpop.permute.xlu1 %7196 }
 0x6e9   : > { %9758 = vmatpush1.msk.msra.mxu1 %vm419_vm13, %v7225_v49  ;;  %8471 = vmatpush2.msra.mxu0 %v6917_v22  ;;  %v10490_v34 = vpop.permute.xlu0 %10489  ;;  %v7340_v22 = vld [vmem:[#allocation5 + $0x1f8] sm:$0xff] }
 0x6ea   : > { %8472 = vmatprep.subr.mxu0 %v6916_v41  ;;  %10504 = vset.pattern.permute.xlu1 %v17721_v57  ;;  %v10492_v61 = vunpack.i.h.bf16 %v10490_v34  ;;  %v10491_v42 = vunpack.i.l.bf16 %v10490_v34  ;;  %v7339_v34 = vld [vmem:[#allocation5 + $0x1f0] sm:$0xff] }
 0x6eb   : > { %8473 = vmatpush2.msra.mxu0 %v6915_v56  ;;  %8962 = vperm.xlu1 %10504, %v16308_v23  }
 0x6ec   : > { %8970 = vperm.xlu0 %10503, %v16328_v18   ;;  %8474 = vmatprep.subr.mxu0 %v6914_v9  ;;  %v7195_v7 = vpop.permute.xlu1 %7194  ;;  %v7224_v38 = vsel %vm7212_vm15, %v7197_v20, %v10491_v42  ;;  %v7353_v42 = vld [vmem:[#allocation5 + $0x260] sm:$0xff] }
 0x6ed   : > { %v7223_v27 = vsel %vm7212_vm15, %v7195_v7, %v7197_v20  ;;  %8475 = vmatpush2.msra.mxu0 %v6913_v50  ;;  %v7191_v31 = vpop.permute.xlu0 %7190  ;;  %9759 = vmatprep.subr.msk.mxu1 %vm420_vm11, %v7224_v38  ;;  %v7352_v50 = vld [vmem:[#allocation5 + $0x258] sm:$0xff]  ;;  %v7366_v38 = vld [vmem:[#allocation5 + $0x2c8] sm:$0xff] }
 0x6ee   : > { %8476 = vmatprep.subr.mxu0 %v6912_v47  ;;  %v7222_v24 = vsel %vm7212_vm15, %v7191_v31, %v10492_v61  ;;  %9760 = vmatpush1.msk.msra.mxu1 %vm419_vm13, %v7223_v27  ;;  %v7289_v27 = vld [vmem:[#allocation5 + $0x60] sm:$0xff] }
 0x6ef   : > { %8477 = vmatpush2.msra.mxu0 %v6911_v14  ;;  %8966 = vperm.xlu1 %10504, %v16316_v33   ;;  %v16549_v14 = vpop.f32.mrf.mxu1 }
 0x6f0   : > { %8978 = vperm.xlu0 %10503, %v16340_v13   ;;  %v7189_v19 = vpop.permute.xlu1 %7188  ;;  %8478 = vmatprep.subr.mxu0 %v6910_v35  ;;  %v7378_v35 = vld [vmem:[#allocation5 + $0x328] sm:$0xff] }
 0x6f1   : > { %9761 = vmatprep.subr.msk.mxu1 %vm420_vm11, %v7222_v24  ;;  %v7221_v48 = vsel %vm7212_vm15, %v7189_v19, %v7191_v31  ;;  %v7185_v55 = vpop.permute.xlu0 %7184  ;;  %8479 = vmatpush2.msra.mxu0 %v6909_v52  ;;  %v7302_v31 = vld [vmem:[#allocation5 + $0xc8] sm:$0xff]  ;;  %v7315_v19 = vld [vmem:[#allocation5 + $0x130] sm:$0xff] }
 0x6f2   : > { %9762 = vmatpush1.msk.msra.mxu1 %vm419_vm13, %v7221_v48  ;;  %8480 = vmatprep.subr.mxu0 %v6908_v10 }
 0x6f3   : > { %8481 = vmatpush2.msra.mxu0 %v6907_v44  ;;  %8974 = vperm.xlu1 %10504, %v16333_v5   ;;  %v7341_v44 = vld [vmem:[#allocation5 + $0x200] sm:$0xff] }
 0x6f4   : > { %8986 = vperm.xlu0 %10503, %v16361_v43   ;;  %v10495_v59 = vpop.permute.xlu1 %10494  ;;  %8483 = vmatmul.mubr.f32.vlgmr.msra.gmra.mxu0 %v7287_v2 }
 0x6f5   : > { %v10496_v30 = vunpack.i.l.bf16 %v10495_v59  ;;  %v7183_v3 = vpop.permute.xlu0 %7182  ;;  %8488 = vmatprep.mubr.f32.mxu0 %v7301_v58  ;;  %v10497_v37 = vunpack.i.h.bf16 %v10495_v59 }
 0x6f6   : > { %v7219_v8 = vsel %vm7212_vm15, %v7183_v3, %v7185_v55  ;;  %v7354_v3 = vld [vmem:[#allocation5 + $0x268] sm:$0xff] }
 0x6f7   : > { %v7220_v36 = vsel %vm7212_vm15, %v7185_v55, %v10496_v30  ;;  %8982 = vperm.xlu1 %10504, %v16346_v63   ;;  %v7328_v55 = vld [vmem:[#allocation5 + $0x198] sm:$0xff] }
 0x6f8   : > { %10506 = vset.pattern.permute.xlu0 %v17722_v12  ;;  %v7179_v21 = vpop.permute.xlu1 %7178  ;;  %9763 = vmatprep.subr.msk.mxu1 %vm420_vm11, %v7220_v36 }
 0x6f9   : > { %8489 = vmatmul.mubr.f32.gmra.mxu0 %v7300_v54  ;;  %v7218_v40 = vsel %vm7212_vm15, %v7179_v21, %v10497_v37  ;;  %9044 = vperm.xlu0 %10506, %v16308_v23   ;;  %v7177_v15 = vpop.permute.xlu0 %7176 }
 0x6fa   : > { %9764 = vmatpush1.msk.msra.mxu1 %vm419_vm13, %v7219_v8  ;;  %v7217_v46 = vsel %vm7212_vm15, %v7177_v15, %v7179_v21  ;;  %8494 = vmatprep.mubr.f32.mxu0 %v7314_v51  ;;  %v7367_v8 = vld [vmem:[#allocation5 + $0x2d0] sm:$0xff] }
 0x6fb   : > { %9765 = vmatprep.subr.msk.mxu1 %vm420_vm11, %v7218_v40  ;;  %10505 = vset.pattern.permute.xlu1 %v17722_v12  ;;  %v10511_v15 = vld [vmem:[#allocation3 + $0x4] sm:$0xff] }
 0x6fc   : > { %9766 = vmatpush1.msk.msra.mxu1 %vm419_vm13, %v7217_v46  ;;  %v7173_v53 = vpop.permute.xlu1 %7172  ;;  %9040 = vperm.xlu1 %10505, %v16297_v4  }
 0x6fd   : > { %8495 = vmatmul.mubr.f32.gmra.mxu0 %v7313_v29  ;;  %9056 = vperm.xlu0 %10506, %v16333_v5   ;;  %v10500_v57 = vpop.permute.xlu0 %10499 }
 0x6fe   : > { %v10502_v49 = vunpack.i.h.bf16 %v10500_v57  ;;  %v10501_v39 = vunpack.i.l.bf16 %v10500_v57  ;;  %8500 = vmatprep.mubr.f32.mxu0 %v7327_v45 }
 0x700   : > { %v7171_v20 = vpop.permute.xlu1 %7170  ;;  %v7216_v32 = vsel %vm7212_vm15, %v7173_v53, %v10501_v39  ;;  %9048 = vperm.xlu1 %10505, %v16316_v33  }
 0x701   : > { %8501 = vmatmul.mubr.f32.gmra.mxu0 %v7326_v26  ;;  %v7215_v1 = vsel %vm7212_vm15, %v7171_v20, %v7173_v53  ;;  %9064 = vperm.xlu0 %10506, %v16346_v63   ;;  %v7167_v41 = vpop.permute.xlu0 %7166  ;;  %v7380_v26 = vld [vmem:[#allocation5 + $0x338] sm:$0xff] }
 0x702   : > { %v7214_v56 = vsel %vm7212_vm15, %v7167_v41, %v10502_v49  ;;  %9767 = vmatprep.subr.msk.mxu1 %vm420_vm11, %v7216_v32  ;;  %8506 = vmatprep.mubr.f32.mxu0 %v7340_v22 }
 0x703   : > { %9768 = vmatpush1.msk.msra.mxu1 %vm419_vm13, %v7215_v1 }
 0x704   : > { %v7165_v61 = vpop.permute.xlu1 %7164  ;;  %9769 = vmatprep.subr.msk.mxu1 %vm420_vm11, %v7214_v56  ;;  %9052 = vperm.xlu1 %10505, %v16328_v18   ;;  %vm17724_vm11 = vcmask 523264  }
 0x705   : > { %8507 = vmatmul.mubr.f32.gmra.mxu0 %v7339_v34  ;;  %v7213_v9 = vsel %vm7212_vm15, %v7165_v61, %v7167_v41  ;;  %10507 = vset.pattern.permute.xlu0 %v17723_v60  ;;  %v16536_v7 = vpop.permute.xlu0 %7791  ;;  %vm17729_vm10 = vmmov %vm17724_vm11 }
 0x706   : > { %9122 = vperm.xlu0 %10507, %v16297_v4   ;;  %8512 = vmatprep.mubr.f32.mxu0 %v7353_v42  ;;  %v7379_v4 = vld [vmem:[#allocation5 + $0x330] sm:$0xff]  ;;  %vm17732_vm12 = vmmov %vm17729_vm10 }
 0x707   : > { %9770 = vmatpush1.msk.msra.mxu1 %vm419_vm13, %v7213_v9  ;;  %vm17726_vm13 = vmmov %vm17724_vm11 }
 0x708   : > { %v16541_v47 = vpop.permute.xlu1 %7796  ;;  %9340 = vmatmul.mubr.msk.f32.vlgmr.msra.gmra.mxu1 %vm17724_vm11, %v7289_v27  ;;  %9060 = vperm.xlu1 %10505, %v16340_v13   ;;  %vm17733_vm14 = vmmov %vm17729_vm10 }
 0x709   : > { %8513 = vmatmul.mubr.f32.gmra.mxu0 %v7352_v50  ;;  %v16545_v62 = vpop.permute.xlu0 %7801  ;;  %8601 = vmatprep.mubr.f32.mxu1 %v17482_v0  ;;  %vm17734_vm15 = vmmov %vm17729_vm10 }
 0x70a   : > { %8518 = vmatprep.mubr.f32.mxu0 %v7366_v38  ;;  %9134 = vperm.xlu0 %10507, %v16328_v18   ;;  %v16559_v18 = vpop.f32.mrf.mxu1 }
 0x70c   : > { %v16551_v6 = vpop.permute.xlu1 %7806  ;;  %9341 = vmatmul.mubr.msk.f32.gmra.mxu1 %vm17726_vm13, %v7302_v31  ;;  %9068 = vperm.xlu1 %10505, %v16361_v43   ;;  %v16569_v10 = vpop.f32.mrf.mxu1 }
 0x70d   : > { %17725 = vst [vmem:[#allocation43_spill] sm:$0xff] %v16551_v6  ;;  %8519 = vmatmul.mubr.f32.gmra.mxu0 %v7365_v25  ;;  %v16555_v24 = vpop.permute.xlu0 %7811  ;;  %8607 = vmatprep.mubr.f32.mxu1 %v17482_v0 }
 0x70e   : > { %17727 = vst [vmem:[#allocation19_spill] sm:$0xff] %v16555_v24  ;;  %8524 = vmatprep.mubr.f32.mxu0 %v7379_v4  ;;  %9142 = vperm.xlu0 %10507, %v16340_v13   ;;  %v16576_v58 = vpop.f32.mrf.mxu1 }
 0x710   : > { %v16561_v48 = vpop.permute.xlu1 %7816  ;;  %9342 = vmatmul.mubr.msk.f32.gmra.mxu1 %vm17729_vm10, %v7315_v19  ;;  %10508 = vset.pattern.permute.xlu1 %v17723_v60  ;;  %v16585_v37 = vpop.f32.mrf.mxu1 }
 0x711   : > { %17728 = vst [vmem:[#allocation47_spill] sm:$0xff] %v16561_v48  ;;  %8525 = vmatmul.mubr.f32.gmra.mxu0 %v7378_v35  ;;  %v16565_v52 = vpop.permute.xlu0 %7821  ;;  %8613 = vmatprep.mubr.f32.mxu1 %v17482_v0 }
 0x712   : > { %17730 = vst [vmem:[#allocation20_spill] sm:$0xff] %v16565_v52  ;;  %9150 = vperm.xlu0 %10507, %v16361_v43   ;;  %9126 = vperm.xlu1 %10508, %v16308_v23   ;;  %v16592_v46 = vpop.f32.mrf.mxu1 }
 0x714   : > { %v16572_v13 = vpop.permute.xlu1 %7826  ;;  %9343 = vmatmul.mubr.msk.f32.gmra.mxu1 %vm17732_vm12, %v7328_v55  ;;  %v16600_v20 = vpop.f32.mrf.mxu1 }
 0x715   : > { %17731 = vst [vmem:[#allocation33_spill] sm:$0xff] %v16572_v13  ;;  %v8699_v2 = vpop.permute.xlu0 %8698  ;;  %8619 = vmatprep.mubr.f32.mxu1 %v17482_v0  ;;  %17736 = vst [vmem:[#allocation32_spill] sm:$0xff] %v16600_v20 }
 0x716   : > { %9130 = vperm.xlu1 %10508, %v16316_v33  }
 0x718   : > { %v8701_v59 = vpop.permute.xlu1 %8700  ;;  %9344 = vmatmul.mubr.msk.f32.gmra.mxu1 %vm17733_vm14, %v7341_v44 }
 0x719   : > { %v8704_v43 = vsel %vm1605_vm3, %v8699_v2, %v8701_v59  ;;  %v8703_v30 = vpop.permute.xlu0 %8702  ;;  %8625 = vmatprep.mubr.f32.mxu1 %v17482_v0 }
 0x71a   : > { %v8708_v23 = vsel %vm401_vm2, %v8704_v43, -3e+38  ;;  %v8705_v54 = vsel %vm1605_vm3, %v8701_v59, %v8703_v30  ;;  %9138 = vperm.xlu1 %10508, %v16333_v5   ;;  %vm17735_vm3 = vmmov %vm17729_vm10 }
 0x71b   : > { %v8709_v33 = vsel %vm402_vm1, %v8705_v54, -3e+38  ;;  %vm17737_vm11 = vmmov %vm17735_vm3 }
 0x71c   : > { %v8716_v36 = vpop.permute.xlu1 %8715  ;;  %v8712_v12 = vcombine.low %v8708_v23, %v8709_v33  ;;  %9345 = vmatmul.mubr.msk.f32.gmra.mxu1 %vm17734_vm15, %v7354_v3 }
 0x71d   : > { %v8719_v21 = vrot.slane %v8716_v36, 4  ;;  %v8718_v51 = vpop.permute.xlu0 %8717  ;;  %8631 = vmatprep.mubr.f32.mxu1 %v17482_v0 }
 0x71e   : > { %v8720_v40 = vrot.slane %v8718_v51, 4  ;;  %v8714_v29 = vmax.f32 %v10511_v15, %v8712_v12  ;;  %9146 = vperm.xlu1 %10508, %v16346_v63  }
 0x720   : > { %v8727_v5 = vpop.permute.xlu1 %8726  ;;  %v8722_v53 = vsel %vm8721_vm9, %v8719_v21, %v8720_v40  ;;  %9346 = vmatmul.mubr.msk.f32.gmra.mxu1 %vm17735_vm3, %v7367_v8 }
 0x721   : > { %v8723_v45 = vsel %vm1766_vm0, %v8716_v36, %v8722_v53  ;;  %v8729_v57 = vpop.permute.xlu0 %8728  ;;  %8637 = vmatprep.mubr.f32.mxu1 %v17482_v0  ;;  %v16608_v0 = vpop.f32.mrf.mxu1  ;;  %vm17742_vm0 = vcmask 924672  }
 0x722   : > { %v8725_v49 = vmax.f32 %v8714_v29, %v8723_v45  ;;  %v8732_v39 = vsel %vm1915_vm7, %v8727_v5, %v8729_v57  ;;  %17738 = vst [vmem:[#allocation70_spill] sm:$0xff] %v16608_v0  ;;  %v16629_v36 = vpop.f32.mrf.mxu0 }
 0x723   : > { %v8736_v22 = vsel %vm411_vm6, %v8732_v39, -3e+38  ;;  %v16614_v27 = vpop.f32.mrf.mxu1 }
 0x724   : > { %v8731_v63 = vpop.permute.xlu1 %8730  ;;  %9347 = vmatmul.mubr.msk.f32.gmra.mxu1 %vm17737_vm11, %v7380_v26  ;;  %17739 = vst [vmem:[#allocation24_spill] sm:$0xff] %v16614_v27  ;;  %v16638_v45 = vpop.f32.mrf.mxu0 }
 0x725   : > { %v8733_v1 = vsel %vm1915_vm7, %v8729_v57, %v8731_v63  ;;  %v8744_v32 = vpop.permute.xlu0 %8743  ;;  %v16619_v55 = vpop.f32.mrf.mxu1 }
 0x726   : > { %v8737_v41 = vsel %vm412_vm5, %v8733_v1, -3e+38  ;;  %17740 = vst [vmem:[#allocation69_spill] sm:$0xff] %v16619_v55  ;;  %v16643_v63 = vpop.f32.mrf.mxu0 }
 0x727   : > { %v8740_v34 = vcombine.low %v8736_v22, %v8737_v41  ;;  %v16626_v23 = vpop.f32.mrf.mxu1 }
 0x728   : > { %v8746_v56 = vpop.permute.xlu1 %8745  ;;  %17741 = vst [vmem:[#allocation27_spill] sm:$0xff] %v16626_v23 }
 0x729   : > { %v8742_v61 = vmax.f32 %v8725_v49, %v8740_v34  ;;  %v8749_v42 = vsel %vm2076_vm4, %v8744_v32, %v8746_v56  ;;  %v8748_v9 = vpop.permute.xlu0 %8747  ;;  %v16634_v8 = vpop.f32.mrf.mxu1 }
 0x72a   : > { %v8753_v60 = vsel %vm401_vm2, %v8749_v42, -3e+38  ;;  %v8750_v50 = vsel %vm2076_vm4, %v8746_v56, %v8748_v9  ;;  %vm17743_vm4 = vmmov %vm17742_vm0  ;;  %17744 = vst [vmem:[#allocation21_spill] sm:$0xff] %v16634_v8  ;;  %v16652_v9 = vpop.f32.mrf.mxu0 }
 0x72b   : > { %v8754_v38 = vsel %vm402_vm1, %v8750_v50, -3e+38  ;;  %v16640_v49 = vpop.f32.mrf.mxu1 }
 0x72c   : > { %v8766_v25 = vpop.permute.xlu1 %8765  ;;  %v8757_v31 = vcombine.low %v8753_v60, %v8754_v38  ;;  %17745 = vst [vmem:[#allocation51_spill] sm:$0xff] %v16640_v49  ;;  %v16664_v28 = vpop.f32.mrf.mxu0  ;;  %v17770_v49 = vld [vmem:[#allocation50_spill] sm:$0xff] }
 0x72d   : > { %v8768_v4 = vpop.permute.xlu0 %8767  ;;  %v16647_v41 = vpop.f32.mrf.mxu1  ;;  %17751 = vst [vmem:[#allocation22_spill] sm:$0xff] %v16664_v28 }
 0x72e   : > { %v8759_v35 = vmax.f32 %v8742_v61, %v8757_v31  ;;  %v8771_v19 = vsel %vm2269_vm8, %v8766_v25, %v8768_v4  ;;  %17748 = vst [vmem:[#allocation45_spill] sm:$0xff] %v16647_v41 }
 0x72f   : > { %v8775_v59 = vsel %vm411_vm6, %v8771_v19, -3e+38  ;;  %v16658_v25 = vpop.f32.mrf.mxu1  ;;  %v17752_v19 = vld [vmem:[#allocation49_spill] sm:$0xff] }
 0x730   : > { %v8770_v2 = vpop.permute.xlu1 %8769  ;;  %17750 = vst [vmem:[#allocation35_spill] sm:$0xff] %v16658_v25 }
 0x731   : > { %v8772_v44 = vsel %vm2269_vm8, %v8768_v4, %v8770_v2  ;;  %v8783_v43 = vpop.permute.xlu0 %8782 }
 0x732   : > { %v8776_v30 = vsel %vm412_vm5, %v8772_v44, -3e+38  ;;  %v17753_v44 = vld [vmem:[#allocation46_spill] sm:$0xff] }
 0x733   : > { %v8779_v54 = vcombine.low %v8775_v59, %v8776_v30  ;;  %v17754_v59 = vsub.s32 4, %v17753_v44  ;;  %v16671_v30 = vpop.f32.mrf.mxu1  ;;  %v17771_v8 = vsub.s32 5, %v17753_v44 }
 0x734   : > { %v8785_v3 = vpop.permute.xlu1 %8784  ;;  %17755 = vst [vmem:[#allocation34_spill] sm:$0xff] %v16671_v30 }
 0x735   : > { %v8788_v33 = vsel %vm17742_vm0, %v8783_v43, %v8785_v3  ;;  %v8787_v12 = vpop.permute.xlu0 %8786  ;;  %v8781_v29 = vmax.f32 %v8759_v35, %v8779_v54 }
 0x736   : > { %v8792_v21 = vsel %vm401_vm2, %v8788_v33, -3e+38  ;;  %v8789_v51 = vsel %vm17743_vm4, %v8785_v3, %v8787_v12  ;;  %vm17746_vm2 = vcmask 916480   ;;  %v16681_v33 = vpop.f32.mrf.mxu0 }
 0x737   : > { %v8793_v40 = vsel %vm402_vm1, %v8789_v51, -3e+38  ;;  %vm17747_vm1 = vcmask 908288   ;;  %17756 = vst [vmem:[#allocation71_spill] sm:$0xff] %v16681_v33 }
 0x738   : > { %v8800_v15 = vpop.permute.xlu1 %8799  ;;  %v8796_v5 = vcombine.low %v8792_v21, %v8793_v40  ;;  %vm17749_vm7 = vmmov %vm17747_vm1  ;;  %v16685_v40 = vpop.f32.mrf.mxu1 }
 0x739   : > { %v8803_v53 = vrot.slane %v8800_v15, 4  ;;  %v8802_v57 = vpop.permute.xlu0 %8801 }
 0x73a   : > { %v8804_v26 = vrot.slane %v8802_v57, 4  ;;  %v8798_v16 = vmax.f32 %v8781_v29, %v8796_v5 }
 0x73c   : > { %v8810_v39 = vpop.permute.xlu1 %8809  ;;  %v8805_v22 = vsel %vm8721_vm9, %v8803_v53, %v8804_v26  ;;  %v16691_v53 = vpop.f32.mrf.mxu0 }
 0x73d   : > { %v8806_v1 = vsel %vm17746_vm2, %v8800_v15, %v8805_v22  ;;  %v8812_v17 = vpop.permute.xlu0 %8811  ;;  %17757 = vst [vmem:[#allocation13_spill] sm:$0xff] %v16691_v53 }
 0x73e   : > { %v8815_v32 = vsel %vm17747_vm1, %v8810_v39, %v8812_v17  ;;  %v8808_v61 = vmax.f32 %v8798_v16, %v8806_v1  ;;  %v16695_v16 = vpop.f32.mrf.mxu1  ;;  %v16699_v1 = vpop.f32.mrf.mxu0 }
 0x73f   : > { %v8819_v34 = vsel %vm411_vm6, %v8815_v32, -3e+38  ;;  %17758 = vst [vmem:[#allocation48_spill] sm:$0xff] %v16695_v16  ;;  %17759 = vst [vmem:[#allocation37_spill] sm:$0xff] %v16699_v1 }
 0x740   : > { %v8814_v56 = vpop.permute.xlu1 %8813  ;;  %v16703_v32 = vpop.f32.mrf.mxu1 }
 0x741   : > { %v8816_v42 = vsel %vm17749_vm7, %v8812_v17, %v8814_v56  ;;  %v16654_v60 = vpop.permute.xlu0 %8828  ;;  %17760 = vst [vmem:[#allocation54_spill] sm:$0xff] %v16703_v32  ;;  %v16707_v56 = vpop.f32.mrf.mxu0 }
 0x742   : > { %v8820_v50 = vsel %vm412_vm5, %v8816_v42, -3e+38  ;;  %17761 = vst [vmem:[#allocation63_spill] sm:$0xff] %v16707_v56  ;;  %v16709_v42 = vpop.f32.mrf.mxu1 }
 0x743   : > { %v8823_v38 = vcombine.low %v8819_v34, %v8820_v50  ;;  %17762 = vst [vmem:[#allocation56_spill] sm:$0xff] %v16709_v42 }
 0x744   : > { %v16660_v31 = vpop.permute.xlu1 %8833 }
 0x745   : > { %v16662_v4 = vmax.f32 %v8808_v61, %v8823_v38  ;;  %v8839_v35 = vpop.permute.xlu0 %8838  ;;  %v16713_v38 = vpop.f32.mrf.mxu0 }
 0x746   : > { %17763 = vst [vmem:[#allocation57_spill] sm:$0xff] %v16713_v38 }
 0x747   : > { %v8870_v2 = vrot.slane %v16662_v4, %v17752_v19  ;;  %v8874_v43 = vrot.slane %v16662_v4, %v17754_v59  ;;  %v16719_v59 = vpop.f32.mrf.mxu0  ;;  %v8992_v52 = vrot.slane %v16662_v4, %v17770_v49 }
 0x748   : > { %v16673_v11 = vpop.permute.xlu1 %8843  ;;  %17765 = vst [vmem:[#allocation38_spill] sm:$0xff] %v16719_v59  ;;  %v8996_v59 = vrot.slane %v16662_v4, %v17771_v8 }
 0x749   : > { %v16676_v3 = vrot.slane %v8870_v2, %v17752_v19  ;;  %v16679_v54 = vrot.slane %v8874_v43, %v17752_v19  ;;  %v8849_v12 = vpop.permute.xlu0 %8848  ;;  %v16715_v19 = vpop.f32.mrf.mxu1  ;;  %v16747_v56 = vrot.slane %v8992_v52, %v17770_v49 }
 0x74a   : > { %17764 = vst [vmem:[#allocation28_spill] sm:$0xff] %v16715_v19  ;;  %v16725_v30 = vpop.f32.mrf.mxu0 }
 0x74b   : > { %v8889_v21 = vmul.f32 %v16676_v3, %v8839_v35  ;;  %v8890_v51 = vmul.f32 %v16679_v54, %v8839_v35  ;;  %v8893_v15 = vmul.f32 %v16676_v3, %v8849_v12  ;;  %v8894_v29 = vmul.f32 %v16679_v54, %v8849_v12  ;;  %v16721_v12 = vpop.f32.mrf.mxu1  ;;  %17767 = vst [vmem:[#allocation62_spill] sm:$0xff] %v16725_v30 }
 0x74c   : > { %v16689_v5 = vpop.permute.xlu1 %8853  ;;  %17766 = vst [vmem:[#allocation42_spill] sm:$0xff] %v16721_v12  ;;  %v16731_v41 = vpop.f32.mrf.mxu0 }
 0x74d   : > { %v8859_v57 = vpop.permute.xlu0 %8858  ;;  %v16729_v13 = vpop.f32.mrf.mxu1  ;;  %17769 = vst [vmem:[#allocation60_spill] sm:$0xff] %v16731_v41  ;;  %v16750_v41 = vrot.slane %v8996_v59, %v17770_v49 }
 0x74e   : > { %v8897_v26 = vmul.f32 %v16676_v3, %v8859_v57  ;;  %v8898_v39 = vmul.f32 %v16679_v54, %v8859_v57  ;;  %17768 = vst [vmem:[#allocation65_spill] sm:$0xff] %v16729_v13  ;;  %v16744_v30 = vpop.f32.mrf.mxu0 }
 0x74f   : > { %v16742_v48 = vpop.f32.mrf.mxu1  ;;  %17773 = vst [vmem:[#allocation55_spill] sm:$0xff] %v16744_v30 }
 0x750   : > { %v16697_v22 = vpop.permute.xlu1 %8863  ;;  %17772 = vst [vmem:[#allocation44_spill] sm:$0xff] %v16742_v48  ;;  %v16758_v48 = vpop.f32.mrf.mxu0 }
 0x751   : > { %v16701_v17 = vpop.permute.xlu0 %8903  ;;  %v16754_v55 = vpop.f32.mrf.mxu1  ;;  %17775 = vst [vmem:[#allocation41_spill] sm:$0xff] %v16758_v48 }
 0x752   : > { %17774 = vst [vmem:[#allocation58_spill] sm:$0xff] %v16754_v55 }
 0x753   : > { %v16766_v49 = vpop.f32.mrf.mxu1 }
 0x754   : > { %v16705_v34 = vpop.permute.xlu1 %8908  ;;  %17776 = vst [vmem:[#allocation31_spill] sm:$0xff] %v16766_v49 }
 0x755   : > { %v8914_v61 = vpop.permute.xlu0 %8913  ;;  %v16772_v48 = vpop.f32.mrf.mxu1 }
 0x756   : > { %v8945_v8 = vadd.f32 %v8914_v61, %v8889_v21  ;;  %v8946_v1 = vadd.f32 %v8914_v61, %v8890_v51  ;;  %v16770_v61 = vpop.f32.mrf.mxu0  ;;  %17778 = vst [vmem:[#allocation18_spill] sm:$0xff] %v16772_v48 }
 0x757   : > { %17777 = vst [vmem:[#allocation29_spill] sm:$0xff] %v16770_v61 }
 0x758   : > { %v16711_v50 = vpop.permute.xlu1 %8918  ;;  %v16788_v48 = vpop.f32.mrf.mxu0 }
 0x759   : > { %v8924_v35 = vpop.permute.xlu0 %8923  ;;  %17783 = vst [vmem:[#allocation30_spill] sm:$0xff] %v16788_v48 }
 0x75a   : > { %v8949_v53 = vadd.f32 %v8924_v35, %v8893_v15  ;;  %v8950_v42 = vadd.f32 %v8924_v35, %v8894_v29  ;;  %v17781_v15 = vld [vmem:[#allocation53_spill] sm:$0xff]  ;;  %v17782_v35 = vsub.s32 7, %v17753_v44 }
 0x75b   : > { %v9156_v29 = vrot.slane %v16662_v4, %v17781_v15 }
 0x75c   : > { %v16717_v2 = vpop.permute.xlu1 %8928 }
 0x75d   : > { %v8934_v43 = vpop.permute.xlu0 %8933 }
 0x75e   : > { %v8953_v61 = vadd.f32 %v8934_v43, %v8897_v26 }
 0x761   : > { %v16723_v57 = vpop.permute.xlu1 %8938 }
 0x763   : > { %v16727_v25 = vpop.permute.xlu0 %8958 }
 0x766   : > { %v16738_v38 = vpop.permute.xlu1 %8962 }
 0x767   : > { %v16740_v23 = vpop.permute.xlu0 %8970 }
 0x76a   : > { %v8967_v12 = vpop.permute.xlu1 %8966 }
 0x76b   : > { %v16752_v13 = vpop.permute.xlu0 %8978  ;;  %v9011_v19 = vmul.f32 %v16747_v56, %v8967_v12  ;;  %v9012_v27 = vmul.f32 %v16750_v41, %v8967_v12 }
 0x76d   : > { %v16760_v30 = vadd.f32 %v9011_v19, %v8945_v8  ;;  %v16762_v52 = vadd.f32 %v9012_v27, %v8946_v1  ;;  %v17779_v27 = vld [vmem:[#allocation52_spill] sm:$0xff]  ;;  %v17780_v8 = vsub.s32 6, %v17753_v44 }
 0x76e   : > { %v8975_v59 = vpop.permute.xlu1 %8974  ;;  %v9074_v1 = vrot.slane %v16662_v4, %v17779_v27 }
 0x76f   : > { %v16764_v24 = vpop.permute.xlu0 %8986  ;;  %v9015_v21 = vmul.f32 %v16747_v56, %v8975_v59  ;;  %v9016_v51 = vmul.f32 %v16750_v41, %v8975_v59  ;;  %v9078_v49 = vrot.slane %v16662_v4, %v17780_v8  ;;  %v9160_v59 = vrot.slane %v16662_v4, %v17782_v35  ;;  %v16790_v8 = vpop.f32.mrf.mxu1 }
 0x770   : > { %17784 = vst [vmem:[#allocation72_spill] sm:$0xff] %v16790_v8  ;;  %v16793_v32 = vrot.slane %v9074_v1, %v17779_v27  ;;  %v16799_v4 = vrot.slane %v9156_v29, %v17781_v15  ;;  %v16812_v1 = vpop.f32.mrf.mxu0  ;;  %v8886_v29 = vmul.f32 %v16679_v54, %v16654_v60 }
 0x771   : > { %v9031_v12 = vadd.f32 %v9015_v21, %v8949_v53  ;;  %v9032_v55 = vadd.f32 %v9016_v51, %v8950_v42  ;;  %v8954_v53 = vadd.f32 %v8934_v43, %v8898_v39  ;;  %v16796_v44 = vrot.slane %v9078_v49, %v17779_v27  ;;  %17785 = vst [vmem:[#allocation59_spill] sm:$0xff] %v16812_v1 }
 0x772   : > { %v8983_v19 = vpop.permute.xlu1 %8982  ;;  %v16802_v26 = vrot.slane %v9160_v59, %v17781_v15  ;;  %v8887_v39 = vmul.f32 %v16676_v3, %v16660_v31  ;;  %v8888_v43 = vmul.f32 %v16679_v54, %v16660_v31  ;;  %v8885_v15 = vmul.f32 %v16676_v3, %v16654_v60 }
 0x773   : > { %v9019_v42 = vmul.f32 %v16747_v56, %v8983_v19  ;;  %v9020_v21 = vmul.f32 %v16750_v41, %v8983_v19  ;;  %v8892_v19 = vmul.f32 %v16679_v54, %v16673_v11  ;;  %v8895_v59 = vmul.f32 %v16676_v3, %v16689_v5 }
 0x774   : > { %v16786_v51 = vpop.permute.xlu0 %9044  ;;  %v8941_v60 = vadd.f32 %v16701_v17, %v8885_v15  ;;  %v8942_v8 = vadd.f32 %v16701_v17, %v8886_v29  ;;  %v16837_v48 = vadd.f32 %v16705_v34, %v8887_v39 }
 0x775   : > { %v9035_v0 = vadd.f32 %v9019_v42, %v8953_v61  ;;  %v9036_v33 = vadd.f32 %v9020_v21, %v8954_v53  ;;  %v8891_v61 = vmul.f32 %v16676_v3, %v16673_v11  ;;  %v8896_v11 = vmul.f32 %v16679_v54, %v16689_v5  ;;  %v16828_v21 = vpop.f32.mrf.mxu1 }
 0x776   : > { %v8899_v53 = vmul.f32 %v16676_v3, %v16697_v22  ;;  %v8900_v42 = vmul.f32 %v16679_v54, %v16697_v22  ;;  %17786 = vst [vmem:[#allocation66_spill] sm:$0xff] %v16828_v21  ;;  %v16840_v5 = vadd.f32 %v16705_v34, %v8888_v43  ;;  %v9007_v3 = vmul.f32 %v16747_v56, %v16727_v25  ;;  %v16846_v21 = vpop.f32.mrf.mxu0 }
 0x777   : > { %v9041_v27 = vpop.permute.xlu1 %9040  ;;  %v9008_v54 = vmul.f32 %v16750_v41, %v16727_v25  ;;  %17787 = vst [vmem:[#allocation26_spill] sm:$0xff] %v16846_v21  ;;  %v9013_v34 = vmul.f32 %v16747_v56, %v16740_v23  ;;  %v9014_v43 = vmul.f32 %v16750_v41, %v16740_v23  ;;  %v8947_v20 = vadd.f32 %v16711_v50, %v8891_v61 }
 0x778   : > { %v9057_v49 = vpop.permute.xlu0 %9056  ;;  %v9089_v25 = vmul.f32 %v16793_v32, %v9041_v27  ;;  %v9090_v29 = vmul.f32 %v16796_v44, %v9041_v27  ;;  %v8948_v23 = vadd.f32 %v16711_v50, %v8892_v19  ;;  %v9023_v6 = vadd.f32 %v9007_v3, %v8941_v60  ;;  %v16872_v27 = vpop.f32.mrf.mxu0 }
 0x779   : > { %v9097_v35 = vmul.f32 %v16793_v32, %v9057_v49  ;;  %v9098_v31 = vmul.f32 %v16796_v44, %v9057_v49  ;;  %v9024_v28 = vadd.f32 %v9008_v54, %v8942_v8  ;;  %v9029_v19 = vadd.f32 %v9013_v34, %v8947_v20 }
 0x77a   : > { %v9030_v8 = vadd.f32 %v9014_v43, %v8948_v23  ;;  %v9017_v60 = vmul.f32 %v16747_v56, %v16752_v13  ;;  %v16888_v54 = vpop.f32.mrf.mxu0 }
 0x77b   : > { %v16832_v1 = vadd.f32 %v9097_v35, %v9031_v12  ;;  %v16834_v49 = vadd.f32 %v9098_v31, %v9032_v55  ;;  %v9049_v15 = vpop.permute.xlu1 %9048 }
 0x77c   : > { %v9065_v22 = vpop.permute.xlu0 %9064  ;;  %v9093_v12 = vmul.f32 %v16793_v32, %v9049_v15  ;;  %v9094_v39 = vmul.f32 %v16796_v44, %v9049_v15  ;;  %v16868_v15 = vpop.f32.mrf.mxu1 }
 0x77d   : > { %v9101_v17 = vmul.f32 %v16793_v32, %v9065_v22  ;;  %v9102_v55 = vmul.f32 %v16796_v44, %v9065_v22 }
 0x77e   : > { %v16863_v22 = vadd.f32 %v9093_v12, %v16760_v30  ;;  %v16866_v21 = vadd.f32 %v9094_v39, %v16762_v52  ;;  %v9106_v12 = vadd.f32 %v9090_v29, %v9024_v28 }
 0x77f   : > { %v16858_v35 = vadd.f32 %v9101_v17, %v9035_v0  ;;  %v16860_v31 = vadd.f32 %v9102_v55, %v9036_v33  ;;  %v9053_v16 = vpop.permute.xlu1 %9052  ;;  %v8951_v0 = vadd.f32 %v16717_v2, %v8895_v59  ;;  %v8952_v33 = vadd.f32 %v16717_v2, %v8896_v11  ;;  %v16884_v2 = vpop.f32.mrf.mxu1 }
 0x780   : > { %v9095_v30 = vmul.f32 %v16793_v32, %v9053_v16  ;;  %v9096_v52 = vmul.f32 %v16796_v44, %v9053_v16  ;;  %v9105_v55 = vadd.f32 %v9089_v25, %v9023_v6  ;;  %v9018_v59 = vmul.f32 %v16750_v41, %v16752_v13 }
 0x781   : > { %v9123_v17 = vpop.permute.xlu0 %9122  ;;  %v8955_v11 = vadd.f32 %v16723_v57, %v8899_v53  ;;  %v8956_v16 = vadd.f32 %v16723_v57, %v8900_v42  ;;  %v9033_v42 = vadd.f32 %v9017_v60, %v8951_v0 }
 0x782   : > { %v9171_v61 = vmul.f32 %v16799_v4, %v9123_v17  ;;  %v9172_v50 = vmul.f32 %v16802_v26, %v9123_v17  ;;  %v9111_v39 = vadd.f32 %v9095_v30, %v9029_v19  ;;  %v9112_v20 = vadd.f32 %v9096_v52, %v9030_v8  ;;  %v16898_v52 = vpop.f32.mrf.mxu1 }
 0x783   : > { %v9061_v3 = vpop.permute.xlu1 %9060  ;;  %v9034_v23 = vadd.f32 %v9018_v59, %v8952_v33  ;;  %v9021_v17 = vmul.f32 %v16747_v56, %v16764_v24  ;;  %v9022_v30 = vmul.f32 %v16750_v41, %v16764_v24  ;;  %v16906_v33 = vpop.f32.mrf.mxu0 }
 0x784   : > { %v9187_v6 = vadd.f32 %v9171_v61, %v9105_v55  ;;  %v9188_v28 = vadd.f32 %v9172_v50, %v9106_v12  ;;  %v9099_v34 = vmul.f32 %v16793_v32, %v9061_v3  ;;  %v9100_v43 = vmul.f32 %v16796_v44, %v9061_v3 }
 0x785   : > { %v9135_v13 = vpop.permute.xlu0 %9134  ;;  %v9009_v55 = vmul.f32 %v16747_v56, %v16738_v38  ;;  %v9010_v12 = vmul.f32 %v16750_v41, %v16738_v38  ;;  %v16910_v56 = vpop.f32.mrf.mxu1  ;;  %v9037_v3 = vadd.f32 %v9021_v17, %v8955_v11 }
 0x786   : > { %v9203_v25 = vmax.f32 %v9187_v6, 0.0  ;;  %v9204_v29 = vmax.f32 %v9188_v28, 0.0  ;;  %v9177_v53 = vmul.f32 %v16799_v4, %v9135_v13  ;;  %v9178_v57 = vmul.f32 %v16802_v26, %v9135_v13 }
 0x787   : > { %v9069_v0 = vpop.permute.xlu1 %9068  ;;  %v9115_v19 = vadd.f32 %v9099_v34, %v9033_v42  ;;  %v9116_v8 = vadd.f32 %v9100_v43, %v9034_v23  ;;  %v9092_v34 = vmul.f32 %v16796_v44, %v16786_v51  ;;  %v16924_v42 = vpop.f32.mrf.mxu1 }
 0x788   : > { %9219 = vst [vmem:[%s11326_s25 + $0x180] sm:$0xff] %v9203_v25  ;;  %9220 = vst [vmem:[%s11326_s25 + $0x188] sm:$0xff] %v9204_v29  ;;  %v9193_v61 = vadd.f32 %v9177_v53, %v9111_v39  ;;  %v9194_v50 = vadd.f32 %v9178_v57, %v9112_v20  ;;  %v9103_v24 = vmul.f32 %v16793_v32, %v9069_v0  ;;  %v16920_v25 = vpop.f32.mrf.mxu0 }
 0x789   : > { %v9104_v60 = vmul.f32 %v16796_v44, %v9069_v0  ;;  %v9143_v59 = vpop.permute.xlu0 %9142  ;;  %v9038_v39 = vadd.f32 %v9022_v30, %v8956_v16  ;;  %v9091_v20 = vmul.f32 %v16793_v32, %v16786_v51  ;;  %v9025_v29 = vadd.f32 %v9009_v55, %v16837_v48 }
 0x78a   : > { %v9209_v6 = vmax.f32 %v9193_v61, 0.0  ;;  %v9210_v41 = vmax.f32 %v9194_v50, 0.0  ;;  %v9181_v38 = vmul.f32 %v16799_v4, %v9143_v59  ;;  %v9182_v28 = vmul.f32 %v16802_v26, %v9143_v59 }
 0x78b   : > { %v9026_v53 = vadd.f32 %v9010_v12, %v16840_v5  ;;  %v9119_v11 = vadd.f32 %v9103_v24, %v9037_v3  ;;  %v9120_v16 = vadd.f32 %v9104_v60, %v9038_v39  ;;  %v9107_v30 = vadd.f32 %v9091_v20, %v9025_v29  ;;  %v16932_v12 = vpop.f32.mrf.mxu0 }
 0x78c   : > { %9225 = vst [vmem:[%s11326_s25 + $0x1b0] sm:$0xff] %v9209_v6  ;;  %9226 = vst [vmem:[%s11326_s25 + $0x1b8] sm:$0xff] %v9210_v41  ;;  %v9197_v43 = vadd.f32 %v9181_v38, %v9115_v19  ;;  %v9198_v13 = vadd.f32 %v9182_v28, %v9116_v8  ;;  %v16934_v8 = vpop.f32.mrf.mxu1 }
 0x78d   : > { %v9151_v57 = vpop.permute.xlu0 %9150  ;;  %v9127_v17 = vpop.permute.xlu1 %9126  ;;  %v9108_v61 = vadd.f32 %v9092_v34, %v9026_v53 }
 0x78e   : > { %v9213_v32 = vmax.f32 %v9197_v43, 0.0  ;;  %v9214_v23 = vmax.f32 %v9198_v13, 0.0  ;;  %v9185_v51 = vmul.f32 %v16799_v4, %v9151_v57  ;;  %v9186_v44 = vmul.f32 %v16802_v26, %v9151_v57  ;;  %v16940_v3 = vpop.f32.mrf.mxu0  ;;  %v16946_v34 = vpop.f32.mrf.mxu1 }
 0x78f   : > { %v9173_v50 = vmul.f32 %v16799_v4, %v9127_v17  ;;  %v9174_v48 = vmul.f32 %v16802_v26, %v9127_v17 }
 0x790   : > { %9229 = vst [vmem:[%s11326_s25 + $0x1d0] sm:$0xff] %v9213_v32  ;;  %9230 = vst [vmem:[%s11326_s25 + $0x1d8] sm:$0xff] %v9214_v23  ;;  %v9201_v5 = vadd.f32 %v9185_v51, %v9119_v11  ;;  %v9202_v55 = vadd.f32 %v9186_v44, %v9120_v16  ;;  %v16950_v16 = vpop.f32.mrf.mxu0 }
 0x791   : > { %v9189_v0 = vadd.f32 %v9173_v50, %v9107_v30  ;;  %v9190_v19 = vadd.f32 %v9174_v48, %v9108_v61  ;;  %v9131_v59 = vpop.permute.xlu1 %9130 }
 0x792   : > { %v9217_v24 = vmax.f32 %v9201_v5, 0.0  ;;  %v9218_v60 = vmax.f32 %v9202_v55, 0.0  ;;  %v9175_v38 = vmul.f32 %v16799_v4, %v9131_v59  ;;  %v9176_v28 = vmul.f32 %v16802_v26, %v9131_v59 }
 0x793   : > { %v9205_v6 = vmax.f32 %v9189_v0, 0.0  ;;  %v9206_v41 = vmax.f32 %v9190_v19, 0.0 }
 0x794   : > { %9233 = vst [vmem:[%s11326_s25 + $0x1f0] sm:$0xff] %v9217_v24  ;;  %9234 = vst [vmem:[%s11326_s25 + $0x1f8] sm:$0xff] %v9218_v60  ;;  %v9191_v39 = vadd.f32 %v9175_v38, %v16863_v22  ;;  %v9192_v20 = vadd.f32 %v9176_v28, %v16866_v21  ;;  %v16956_v22 = vpop.f32.mrf.mxu1  ;;  %v7920_v38 = vadd.f32 %v16549_v14, %v16536_v7 }
 0x795   : > { %9221 = vst [vmem:[%s11326_s25 + $0x190] sm:$0xff] %v9205_v6  ;;  %9222 = vst [vmem:[%s11326_s25 + $0x198] sm:$0xff] %v9206_v41  ;;  %v9139_v43 = vpop.permute.xlu1 %9138  ;;  %v7932_v14 = vadd.f32 %v16585_v37, %v16545_v62  ;;  %v17791_v37 = vld [vmem:[#allocation43_spill] sm:$0xff] }
 0x796   : > { %v9207_v13 = vmax.f32 %v9191_v39, 0.0  ;;  %v9208_v29 = vmax.f32 %v9192_v20, 0.0  ;;  %v9179_v53 = vmul.f32 %v16799_v4, %v9139_v43  ;;  %v9180_v11 = vmul.f32 %v16802_v26, %v9139_v43  ;;  %v16966_v50 = vpop.f32.mrf.mxu1 }
 0x797   : > { %v7922_v39 = vadd.f32 %v16559_v18, %v16536_v7 }
 0x798   : > { %9223 = vst [vmem:[%s11326_s25 + $0x1a0] sm:$0xff] %v9207_v13  ;;  %9224 = vst [vmem:[%s11326_s25 + $0x1a8] sm:$0xff] %v9208_v29  ;;  %v9195_v57 = vadd.f32 %v9179_v53, %v16832_v1  ;;  %v9196_v21 = vadd.f32 %v9180_v11, %v16834_v49  ;;  %v16964_v1 = vpop.f32.mrf.mxu0  ;;  %v16972_v55 = vpop.f32.mrf.mxu1  ;;  %v8033_v13 = vadd.f32 %v16629_v36, %v7920_v38  ;;  %v17797_v38 = vld [vmem:[#allocation70_spill] sm:$0xff] }
 0x799   : > { %v9147_v32 = vpop.permute.xlu1 %9146  ;;  %v7926_v29 = vadd.f32 %v16569_v10, %v16541_v47  ;;  %v8035_v11 = vadd.f32 %v16638_v45, %v7922_v39  ;;  %v7934_v10 = vadd.f32 %v16592_v46, %v16545_v62  ;;  %v17796_v62 = vld [vmem:[#allocation71_spill] sm:$0xff] }
 0x79a   : > { %v9211_v23 = vmax.f32 %v9195_v57, 0.0  ;;  %v9212_v51 = vmax.f32 %v9196_v21, 0.0  ;;  %v9183_v44 = vmul.f32 %v16799_v4, %v9147_v32  ;;  %v9184_v17 = vmul.f32 %v16802_v26, %v9147_v32  ;;  %v16970_v5 = vpop.f32.mrf.mxu0  ;;  %v16976_v26 = vpop.f32.mrf.mxu1 }
 0x79b   : > { %v7928_v57 = vadd.f32 %v16576_v58, %v16541_v47  ;;  %v8039_v18 = vadd.f32 %v16643_v63, %v7926_v29  ;;  %v8146_v36 = vadd.f32 %v16685_v40, %v8033_v13  ;;  %v17790_v58 = vld [vmem:[#allocation22_spill] sm:$0xff]  ;;  %v8047_v46 = vadd.f32 %v17796_v62, %v7934_v10  ;;  %v17798_v13 = vld [vmem:[#allocation59_spill] sm:$0xff] }
 0x79c   : > { %9227 = vst [vmem:[%s11326_s25 + $0x1c0] sm:$0xff] %v9211_v23  ;;  %9228 = vst [vmem:[%s11326_s25 + $0x1c8] sm:$0xff] %v9212_v51  ;;  %v9199_v30 = vadd.f32 %v9183_v44, %v16858_v35  ;;  %v9200_v61 = vadd.f32 %v9184_v17, %v16860_v31  ;;  %v16974_v4 = vpop.f32.mrf.mxu0  ;;  %v16980_v35 = vpop.f32.mrf.mxu1  ;;  %v17789_v23 = vld [vmem:[#allocation48_spill] sm:$0xff]  ;;  %v8045_v51 = vadd.f32 %v17790_v58, %v7932_v14  ;;  %v17794_v63 = vld [vmem:[#allocation30_spill] sm:$0xff] }
 0x79d   : > { %v8041_v45 = vadd.f32 %v16652_v9, %v7928_v57  ;;  %v8148_v47 = vadd.f32 %v17789_v23, %v8035_v11  ;;  %v17792_v44 = vld [vmem:[#allocation32_spill] sm:$0xff]  ;;  %v8259_v40 = vadd.f32 %v17794_v63, %v8146_v36  ;;  %v7940_v9 = vadd.f32 %v17797_v38, %v17791_v37  ;;  %v17800_v14 = vld [vmem:[#allocation13_spill] sm:$0xff]  ;;  %v17801_v58 = vld [vmem:[#allocation19_spill] sm:$0xff] }
 0x79e   : > { %v9215_v49 = vmax.f32 %v9199_v30, 0.0  ;;  %v9216_v48 = vmax.f32 %v9200_v61, 0.0  ;;  %v16978_v0 = vpop.f32.mrf.mxu0  ;;  %v16984_v19 = vpop.f32.mrf.mxu1  ;;  %v7938_v17 = vadd.f32 %v17792_v44, %v17791_v37  ;;  %v17799_v11 = vld [vmem:[#allocation56_spill] sm:$0xff]  ;;  %v17805_v37 = vld [vmem:[#allocation26_spill] sm:$0xff] }
 0x79f   : > { %v8372_v39 = vadd.f32 %v16910_v56, %v8259_v40  ;;  %v8261_v29 = vadd.f32 %v17798_v13, %v8148_v47  ;;  %v8154_v57 = vadd.f32 %v17799_v11, %v8041_v45  ;;  %v17802_v44 = vld [vmem:[#allocation24_spill] sm:$0xff]  ;;  %v17806_v40 = vld [vmem:[#allocation37_spill] sm:$0xff] }
 0x7a0   : > { %9231 = vst [vmem:[%s11326_s25 + $0x1e0] sm:$0xff] %v9215_v49  ;;  %9232 = vst [vmem:[%s11326_s25 + $0x1e8] sm:$0xff] %v9216_v48  ;;  %v16982_v31 = vpop.f32.mrf.mxu0  ;;  %v16988_v60 = vpop.f32.mrf.mxu1  ;;  %v17795_v49 = vld [vmem:[#allocation54_spill] sm:$0xff]  ;;  %v8051_v23 = vadd.f32 %v17800_v14, %v7938_v17  ;;  %v8053_v47 = vadd.f32 %v17806_v40, %v7940_v9  ;;  %v17807_v45 = vld [vmem:[#allocation69_spill] sm:$0xff] }
 0x7a1   : > { %v8152_v48 = vadd.f32 %v17795_v49, %v8039_v18  ;;  %v8374_v10 = vadd.f32 %v16924_v42, %v8261_v29  ;;  %v7946_v62 = vadd.f32 %v17807_v45, %v17801_v58  ;;  %v17808_v17 = vld [vmem:[#allocation42_spill] sm:$0xff]  ;;  %v17810_v42 = vld [vmem:[#allocation47_spill] sm:$0xff]  ;;  %v17812_v9 = vld [vmem:[#allocation65_spill] sm:$0xff] }
 0x7a2   : > { %v16986_v24 = vpop.f32.mrf.mxu0  ;;  %v16990_v6 = vpop.f32.mrf.mxu1  ;;  %v8160_v38 = vadd.f32 %v17808_v17, %v8047_v46  ;;  %v17811_v29 = vld [vmem:[#allocation27_spill] sm:$0xff]  ;;  %v17815_v40 = vld [vmem:[#allocation44_spill] sm:$0xff] }
 0x7a3   : > { %17788 = vst [vmem:[#allocation14_spill] sm:$0xff] %v16986_v24  ;;  %v17803_v24 = vld [vmem:[#allocation28_spill] sm:$0xff]  ;;  %v8265_v49 = vadd.f32 %v17805_v37, %v8152_v48  ;;  %v7950_v48 = vadd.f32 %v17811_v29, %v17810_v42  ;;  %v17820_v29 = vld [vmem:[#allocation31_spill] sm:$0xff] }
 0x7a4   : > { %v16996_v20 = vpop.f32.mrf.mxu1  ;;  %v8158_v36 = vadd.f32 %v17803_v24, %v8045_v51  ;;  %v8267_v24 = vadd.f32 %v16872_v27, %v8154_v57 }
 0x7a5   : > { %v8378_v11 = vadd.f32 %v16934_v8, %v8265_v49 }
 0x7a6   : > { %v17008_v21 = vpop.f32.mrf.mxu1  ;;  %v8380_v37 = vadd.f32 %v16946_v34, %v8267_v24 }
 0x7a8   : > { %v17023_v30 = vpop.f32.mrf.mxu1 }
 0x7a9   : > { %17793 = vst [vmem:[#allocation68_spill] sm:$0xff] %v17023_v30  ;;  %v7944_v30 = vadd.f32 %v17802_v44, %v17801_v58  ;;  %v17809_v44 = vld [vmem:[#allocation63_spill] sm:$0xff] }
 0x7aa   : > { %v17039_v63 = vpop.f32.mrf.mxu1 }
 0x7ab   : > { %17804 = vst [vmem:[#allocation40_spill] sm:$0xff] %v17039_v63  ;;  %v8057_v63 = vadd.f32 %v17809_v44, %v7944_v30  ;;  %v17814_v30 = vld [vmem:[#allocation21_spill] sm:$0xff] }
 0x7b4   : > { %v8484_v59 = vpop.f32.mrf.mxu0 }
 0x7b5   : > { %v8485_v56 = vadd.f32 %v8484_v59, %v8372_v39  ;;  %v8271_v59 = vadd.f32 %v16888_v54, %v8158_v36  ;;  %v8164_v39 = vadd.f32 %v17812_v9, %v8051_v23  ;;  %v8166_v54 = vadd.f32 %v17815_v40, %v8053_v47  ;;  %v17822_v9 = vld [vmem:[#allocation62_spill] sm:$0xff]  ;;  %v17826_v40 = vld [vmem:[#allocation35_spill] sm:$0xff] }
 0x7b6   : > { %v8486_v41 = vpop.f32.mrf.mxu0 }
 0x7b7   : > { %v8487_v51 = vadd.f32 %v8486_v41, %v8374_v10  ;;  %v17813_v41 = vld [vmem:[#allocation57_spill] sm:$0xff]  ;;  %v7952_v10 = vadd.f32 %v17814_v30, %v17810_v42  ;;  %v8384_v23 = vadd.f32 %v16956_v22, %v8271_v59 }
 0x7b8   : > { %v8059_v57 = vadd.f32 %v17813_v41, %v7946_v62  ;;  %v17818_v62 = vld [vmem:[#allocation20_spill] sm:$0xff] }
 0x7b9   : > { %v8490_v28 = vpop.f32.mrf.mxu0 }
 0x7ba   : > { %v8491_v8 = vadd.f32 %v8490_v28, %v8378_v11  ;;  %v17816_v28 = vld [vmem:[#allocation58_spill] sm:$0xff]  ;;  %v8172_v59 = vadd.f32 %v17820_v29, %v8059_v57  ;;  %v17824_v57 = vld [vmem:[#allocation60_spill] sm:$0xff] }
 0x7bb   : > { %v8492_v43 = vpop.f32.mrf.mxu0  ;;  %v17817_v11 = vld [vmem:[#allocation38_spill] sm:$0xff] }
 0x7bc   : > { %v8493_v45 = vadd.f32 %v8492_v43, %v8380_v37  ;;  %v8063_v24 = vadd.f32 %v17817_v11, %v7950_v48  ;;  %v8279_v37 = vadd.f32 %v16932_v12, %v8166_v54 }
 0x7bd   : > { %v17001_v53 = vpop.f32.mrf.mxu0 }
 0x7be   : > { %v8497_v22 = vadd.f32 %v17001_v53, %v8384_v23  ;;  %v8392_v54 = vadd.f32 %v16976_v26, %v8279_v37 }
 0x7bf   : > { %v17010_v7 = vpop.f32.mrf.mxu0 }
 0x7c1   : > { %v17016_v32 = vpop.f32.mrf.mxu0 }
 0x7c3   : > { %v17025_v61 = vpop.f32.mrf.mxu0 }
 0x7c4   : > { %v8505_v26 = vadd.f32 %v17025_v61, %v8392_v54 }
 0x7c5   : > { %v17041_v18 = vpop.f32.mrf.mxu0 }
 0x7c7   : > { %v17056_v58 = vpop.f32.mrf.mxu0 }
 0x7c8   : > { %v8597_v13 = vpop.f32.mrf.mxu1 }
 0x7c9   : > { %v8598_v14 = vadd.f32 %v8597_v13, %v8485_v56  ;;  %v8273_v56 = vadd.f32 %v16906_v33, %v8160_v38  ;;  %v8170_v13 = vadd.f32 %v17816_v28, %v8057_v63  ;;  %v8277_v33 = vadd.f32 %v16920_v25, %v8164_v39  ;;  %v8514_v38 = vpop.f32.mrf.mxu0  ;;  %v17821_v63 = vld [vmem:[#allocation45_spill] sm:$0xff] }
 0x7ca   : > { %v8599_v46 = vpop.f32.mrf.mxu1  ;;  %v7958_v48 = vadd.f32 %v17821_v63, %v17818_v62 }
 0x7cb   : > { %v8644_v49 = vmax.f32 %v8598_v14, 0.0  ;;  %v8600_v27 = vadd.f32 %v8599_v46, %v8487_v51  ;;  %v17819_v51 = vld [vmem:[#allocation51_spill] sm:$0xff]  ;;  %v8386_v47 = vadd.f32 %v16966_v50, %v8273_v56  ;;  %v8065_v46 = vadd.f32 %v17822_v9, %v7952_v10  ;;  %v17825_v56 = vld [vmem:[#allocation33_spill] sm:$0xff] }
 0x7cc   : > { %v8603_v36 = vpop.f32.mrf.mxu1  ;;  %v7956_v14 = vadd.f32 %v17819_v51, %v17818_v62  ;;  %v8390_v39 = vadd.f32 %v16972_v55, %v8277_v33  ;;  %v7962_v10 = vadd.f32 %v17826_v40, %v17825_v56  ;;  %v17830_v33 = vld [vmem:[#allocation66_spill] sm:$0xff] }
 0x7cd   : > { %8660 = vst [vmem:[%s11326_s25 + $0x100] sm:$0xff] %v8644_v49  ;;  %v8645_v17 = vmax.f32 %v8600_v27, 0.0  ;;  %v8604_v34 = vadd.f32 %v8603_v36, %v8491_v8  ;;  %v8499_v50 = vadd.f32 %v17010_v7, %v8386_v47  ;;  %v8283_v49 = vadd.f32 %v16940_v3, %v8170_v13  ;;  %v17823_v27 = vld [vmem:[#allocation18_spill] sm:$0xff]  ;;  %v8516_v36 = vpop.f32.mrf.mxu0  ;;  %v17827_v3 = vld [vmem:[#allocation72_spill] sm:$0xff]  ;;  %v17829_v13 = vld [vmem:[#allocation55_spill] sm:$0xff] }
 0x7ce   : > { %v8605_v44 = vpop.f32.mrf.mxu1  ;;  %v8176_v41 = vadd.f32 %v17823_v27, %v8063_v24  ;;  %v8069_v30 = vadd.f32 %v17824_v57, %v7956_v14  ;;  %v8503_v55 = vadd.f32 %v17016_v32, %v8390_v39  ;;  %v8071_v11 = vadd.f32 %v17829_v13, %v7958_v48 }
 0x7cf   : > { %8661 = vst [vmem:[%s11326_s25 + $0x108] sm:$0xff] %v8645_v17  ;;  %v8646_v43 = vmax.f32 %v8604_v34, 0.0  ;;  %v8606_v42 = vadd.f32 %v8605_v44, %v8493_v45  ;;  %v8285_v45 = vadd.f32 %v16950_v16, %v8172_v59  ;;  %v8178_v17 = vadd.f32 %v17827_v3, %v8065_v46  ;;  %v17828_v34 = vld [vmem:[#allocation34_spill] sm:$0xff]  ;;  %v17831_v44 = vld [vmem:[#allocation41_spill] sm:$0xff] }
 0x7d0   : > { %v8609_v25 = vpop.f32.mrf.mxu1  ;;  %v7964_v28 = vadd.f32 %v17828_v34, %v17825_v56  ;;  %v8396_v62 = vadd.f32 %v16980_v35, %v8283_v49  ;;  %v8289_v14 = vadd.f32 %v16964_v1, %v8176_v41  ;;  %v8182_v16 = vadd.f32 %v17830_v33, %v8069_v30  ;;  %v17832_v1 = vld [vmem:[#allocation29_spill] sm:$0xff] }
 0x7d1   : > { %8662 = vst [vmem:[%s11326_s25 + $0x110] sm:$0xff] %v8646_v43  ;;  %v8647_v53 = vmax.f32 %v8606_v42, 0.0  ;;  %v8610_v8 = vadd.f32 %v8609_v25, %v8497_v22  ;;  %v8075_v47 = vadd.f32 %v17831_v44, %v7962_v10  ;;  %v8520_v22 = vpop.f32.mrf.mxu0  ;;  %v8398_v42 = vadd.f32 %v16984_v19, %v8285_v45  ;;  %v17835_v45 = vld [vmem:[#allocation40_spill] sm:$0xff] }
 0x7d2   : > { %v8611_v12 = vpop.f32.mrf.mxu1  ;;  %v8509_v29 = vadd.f32 %v17041_v18, %v8396_v62  ;;  %v8291_v61 = vadd.f32 %v16970_v5, %v8178_v17  ;;  %v8184_v63 = vadd.f32 %v16868_v15, %v8071_v11  ;;  %v8077_v48 = vadd.f32 %v17832_v1, %v7964_v28 }
 0x7d3   : > { %8663 = vst [vmem:[%s11326_s25 + $0x118] sm:$0xff] %v8647_v53  ;;  %v8648_v7 = vmax.f32 %v8610_v8, 0.0  ;;  %v8612_v23 = vadd.f32 %v8611_v12, %v8499_v50  ;;  %v8402_v46 = vadd.f32 %v16988_v60, %v8289_v14  ;;  %v8511_v37 = vadd.f32 %v17056_v58, %v8398_v42  ;;  %v8522_v50 = vpop.f32.mrf.mxu0 }
 0x7d4   : > { %v8615_v24 = vpop.f32.mrf.mxu1  ;;  %v8295_v18 = vadd.f32 %v16974_v4, %v8182_v16  ;;  %v8188_v39 = vadd.f32 %v16884_v2, %v8075_v47  ;;  %v8404_v5 = vadd.f32 %v16990_v6, %v8291_v61  ;;  %v8297_v60 = vadd.f32 %v16978_v0, %v8184_v63 }
 0x7d5   : > { %8664 = vst [vmem:[%s11326_s25 + $0x120] sm:$0xff] %v8648_v7  ;;  %v8649_v32 = vmax.f32 %v8612_v23, 0.0  ;;  %v8616_v51 = vadd.f32 %v8615_v24, %v8503_v55  ;;  %v8515_v15 = vadd.f32 %v8514_v38, %v8402_v46  ;;  %v8190_v58 = vadd.f32 %v16898_v52, %v8077_v48  ;;  %v8526_v6 = vpop.f32.mrf.mxu0  ;;  %v17833_v52 = vld [vmem:[#allocation14_spill] sm:$0xff] }
 0x7d6   : > { %v8617_v43 = vpop.f32.mrf.mxu1  ;;  %v8408_v41 = vadd.f32 %v16996_v20, %v8295_v18  ;;  %v8517_v57 = vadd.f32 %v8516_v36, %v8404_v5  ;;  %v8301_v30 = vadd.f32 %v16982_v31, %v8188_v39  ;;  %v8410_v56 = vadd.f32 %v17008_v21, %v8297_v60  ;;  %v17834_v36 = vld [vmem:[#allocation68_spill] sm:$0xff] }
 0x7d7   : > { %8665 = vst [vmem:[%s11326_s25 + $0x128] sm:$0xff] %v8649_v32  ;;  %v8650_v35 = vmax.f32 %v8616_v51, 0.0  ;;  %v8618_v59 = vadd.f32 %v8617_v43, %v8505_v26  ;;  %v8303_v12 = vadd.f32 %v17833_v52, %v8190_v58  ;;  %v8528_v23 = vpop.f32.mrf.mxu0 }
 0x7d8   : > { %v8621_v9 = vpop.f32.mrf.mxu1  ;;  %v8521_v40 = vadd.f32 %v8520_v22, %v8408_v41  ;;  %v8414_v54 = vadd.f32 %v17834_v36, %v8301_v30  ;;  %v8523_v55 = vadd.f32 %v8522_v50, %v8410_v56 }
 0x7d9   : > { %8666 = vst [vmem:[%s11326_s25 + $0x130] sm:$0xff] %v8650_v35  ;;  %v8651_v25 = vmax.f32 %v8618_v59, 0.0  ;;  %v8622_v19 = vadd.f32 %v8621_v9, %v8509_v29  ;;  %v8416_v3 = vadd.f32 %v17835_v45, %v8303_v12 }
 0x7da   : > { %v8623_v53 = vpop.f32.mrf.mxu1  ;;  %v8527_v17 = vadd.f32 %v8526_v6, %v8414_v54 }
 0x7db   : > { %8667 = vst [vmem:[%s11326_s25 + $0x138] sm:$0xff] %v8651_v25  ;;  %v8652_v8 = vmax.f32 %v8622_v19, 0.0  ;;  %v8624_v49 = vadd.f32 %v8623_v53, %v8511_v37  ;;  %v8529_v11 = vadd.f32 %v8528_v23, %v8416_v3 }
 0x7dc   : > { %v8627_v27 = vpop.f32.mrf.mxu1 }
 0x7dd   : > { %8668 = vst [vmem:[%s11326_s25 + $0x140] sm:$0xff] %v8652_v8  ;;  %v8653_v2 = vmax.f32 %v8624_v49, 0.0  ;;  %v8628_v4 = vadd.f32 %v8627_v27, %v8515_v15 }
 0x7de   : > { %v8629_v38 = vpop.f32.mrf.mxu1 }
 0x7df   : > { %8669 = vst [vmem:[%s11326_s25 + $0x148] sm:$0xff] %v8653_v2  ;;  %v8654_v0 = vmax.f32 %v8628_v4, 0.0  ;;  %v8630_v10 = vadd.f32 %v8629_v38, %v8517_v57 }
 0x7e0   : > { %v8633_v20 = vpop.f32.mrf.mxu1 }
 0x7e1   : > { %8670 = vst [vmem:[%s11326_s25 + $0x150] sm:$0xff] %v8654_v0  ;;  %v8655_v7 = vmax.f32 %v8630_v10, 0.0  ;;  %v8634_v31 = vadd.f32 %v8633_v20, %v8521_v40 }
 0x7e2   : > { %v8635_v21 = vpop.f32.mrf.mxu1 }
 0x7e3   : > { %8671 = vst [vmem:[%s11326_s25 + $0x158] sm:$0xff] %v8655_v7  ;;  %v8656_v34 = vmax.f32 %v8634_v31, 0.0  ;;  %v8636_v28 = vadd.f32 %v8635_v21, %v8523_v55 }
 0x7e4   : > { %v8639_v13 = vpop.f32.mrf.mxu1 }
 0x7e5   : > { %8672 = vst [vmem:[%s11326_s25 + $0x160] sm:$0xff] %v8656_v34  ;;  %v8657_v24 = vmax.f32 %v8636_v28, 0.0  ;;  %v8640_v62 = vadd.f32 %v8639_v13, %v8527_v17 }
 0x7e6   : > { %v8641_v26 = vpop.f32.mrf.mxu1 }
 0x7e7   : > { %8673 = vst [vmem:[%s11326_s25 + $0x168] sm:$0xff] %v8657_v24  ;;  %v8658_v32 = vmax.f32 %v8640_v62, 0.0  ;;  %v8642_v51 = vadd.f32 %v8641_v26, %v8529_v11 }
 0x7e9   : > { %8674 = vst [vmem:[%s11326_s25 + $0x170] sm:$0xff] %v8658_v32  ;;  %v8659_v14 = vmax.f32 %v8642_v51, 0.0 }
 0x7eb   : > { %8675 = vst [vmem:[%s11326_s25 + $0x178] sm:$0xff] %v8659_v14 }
 0x7ec   : > { %10551 = shalt.err (!%p10548_p0)
}
 0x7ed   : > { %s10552_s25 = scalar_lea.hbm %s17133_s24, 8192  ;;  %s10556_s22 = scalar_lea.hbm %s17191_s9, 16384 }
 0x7ee   : > { %p10553_p1 = scmp.ne.s32.totalorder %s17133_s24, %s10552_s25  ;;  %p10557_p4 = scmp.lt.s32.totalorder %s17133_s24, %s17191_s9 }
 0x7ef   : > { %p10558_p7 = scmp.lt.s32.totalorder %s10556_s22, %s10552_s25 }
 0x7f0   : > { %p10554_p2 = pnand %p10553_p1, %p10727_p5 }
 0x7f1   : > { %p10559_p6 = por %p10558_p7, %p10557_p4 }
 0x7f2   : > { %p10555_p3 = pneg %p10554_p2 }
 0x7f4   : > { %p10560_p8 = pnand %p10559_p6, %p10555_p3 }
 0x7f6   : > { %10563 = shalt.err (!%p10560_p8)
}
 0x7f7   : > { %s10638_s29 = smov 256  }
 0x7f8   : > { %9775 = dma.vmem_to_hbm [thread:$0]  (%p10727_p5), %s17136_s14, 8192, %s17133_s24, %s17141_s13, %s10638_s29, %s10638_s29, %s17718_s17  }
 0x7f9 PF: > { %p9787_p9 = scmp.ge.s32.totalorder %s10602_s12, 2  ;;  %s9264_s23 = sand.u32 1, %s10590_s30  }
 0x7fa   : > { %p17837_p10 = scmp.ne.s32.totalorder %s17414_s20, 0  ;;  %s9265_s27 = scalar_lea.sflag [#allocation7], %s9264_s23 }
 0x7fc   : > { %p9782_p11 = pnand %p9787_p9, %p17837_p10 }
 0x7fe   : > { %p9783_p12 = pneg %p9782_p11 }
 0x800   : > { %10585 = dma.done.wait (%p9783_p12), %s9265_s27, 8192  }
 0x801   : > { %10587 = vsyncadd (%p9783_p12), %s9265_s27, 4294959104  ;;  %p20_p13 = scmp.ge.s32.totalorder %s10714_s15, 4   ;;  %s17838_s30 = smov %s10594_s10 }
 0x802   : > { %s17839_s10 = smov %s10598_s11  ;;  %s17840_s11 = smov %s10725_s18 }
 0x803   : > { %s17841_s12 = smov %s10714_s15  ;;  %22 = sbr.rel (!%p20_p13) target bundleno = 4 (0x4), region = 96 }
 0x808   :  { %9270 = vsyncpa [#allocation6], 1 }
 0x809   :  { %9272 = vsyncpa [#allocation6 + $0x1], 1 }
 0x80a   :  { %9273 = vsyncpa [#allocation7], 1 }
 0x80b   :  { %9275 = vsyncpa [#allocation7 + $0x1], 1 }

</bundles_post_ra>
